<compile_context>
chip_gen: v7x
topology: tpu7x:2x2x1
jax: 0.10.0
libtpu: 0.0.40
codegen_flags: <defaults>
</compile_context>

<pallas_src>
import jax
import jax.numpy as jnp
from jax.experimental import pallas as pl
from jax.experimental.pallas import tpu as pltpu

P_H = 8
P_W = 8
NEG_INF = -1e30
COL0 = 8  # sublane-aligned column offset of the image inside the halo scratch


def _residual_block_kernel(scal_ref, x_ref, w1_ref, b1_ref, w2_ref, b2_ref,
                           wqkv_l_ref, bqkv_l_ref, wqkv_s_ref, bqkv_s_ref,
                           bias_l_ref, bias_s_ref, out_ref, xp_ref):
    H, W, C = x_ref.shape[1], x_ref.shape[2], x_ref.shape[3]
    L = H * W

    x = x_ref[0]                      # (H, W, C) f32
    x_flat = x.reshape(L, C)

    alpha = scal_ref[0, 0]            # single shared PReLU slope (nn.PReLU())
    gamma_l = scal_ref[0, 1]
    gamma_s = scal_ref[0, 2]

    # ---------------- fused 3x3 conv + bias + PReLU (im2col matmul) --------
    xp_ref[...] = jnp.zeros(xp_ref.shape, xp_ref.dtype)   # zero incl. halo

    def conv3x3_prelu(w_ref, b_ref):
        xpv = xp_ref[...]                                  # (H+2, W+16, C) f32
        taps = []
        for dy in (-1, 0, 1):
            for dx in (-1, 0, 1):
                taps.append(
                    xpv[1 + dy:1 + dy + H, COL0 + dx:COL0 + dx + W, :]
                    .reshape(L, C))
        patches = jnp.concatenate(taps, axis=-1)           # (L, 9*C) f32
        acc = jnp.dot(patches.astype(jnp.bfloat16), w_ref[...],
                      preferred_element_type=jnp.float32)  # (L, C) f32 acc
        acc = acc + b_ref[...]
        return jnp.where(acc >= 0.0, acc, alpha * acc)     # PReLU

    xp_ref[1:H + 1, COL0:COL0 + W, :] = x
    s1 = x_flat + conv3x3_prelu(w1_ref, b1_ref)            # x + x1
    xp_ref[1:H + 1, COL0:COL0 + W, :] = s1.reshape(H, W, C)
    s2 = s1 + conv3x3_prelu(w2_ref, b2_ref)                # x + x1 + x2

    # ------------- interlaced sparse self-attention (dense + group mask) ---
    def sagan_attention(xin, wqkv_ref, bqkv_ref, gamma, bias):
        dqk = (wqkv_ref.shape[-1] - C) // 2
        xb = xin.astype(jnp.bfloat16)
        qkv = jnp.dot(xb, wqkv_ref[...],
                      preferred_element_type=jnp.float32) + bqkv_ref[...]
        q = qkv[:, :dqk]
        k = qkv[:, dqk:2 * dqk]
        v = qkv[:, 2 * dqk:]
        e = jnp.einsum('qd,kd->qk', q.astype(jnp.bfloat16),
                       k.astype(jnp.bfloat16),
                       preferred_element_type=jnp.float32)   # (L, L)
        e = e + bias                                         # -inf off-group
        e = e - jnp.max(e, axis=-1, keepdims=True)
        p = jnp.exp(e)
        attn = p * pl.reciprocal(jnp.sum(p, axis=-1, keepdims=True),
                                 approx=True)
        o = jnp.dot(attn.astype(jnp.bfloat16), v.astype(jnp.bfloat16),
                    preferred_element_type=jnp.float32)
        return gamma * o + xin

    y = sagan_attention(s2, wqkv_l_ref, bqkv_l_ref, gamma_l, bias_l_ref[...])
    y = sagan_attention(y, wqkv_s_ref, bqkv_s_ref, gamma_s, bias_s_ref[...])

    out = x_flat + 0.5 * y                                   # x + 0.5 * x3
    out_ref[0] = out.reshape(H, W, C).astype(out_ref.dtype)


def residual_block(x_nchw, params, P_h=P_H, P_w=P_W):
    N, C, H, W = x_nchw.shape
    assert H % P_h == 0 and W % P_w == 0
    L = H * W
    dqk = params['wq_l'].shape[-1]
    qkv_w = C + 2 * dqk

    x_nhwc = jnp.transpose(x_nchw, (0, 2, 3, 1))             # NCHW -> NHWC once

    # ISA group masks as additive softmax biases (computed once, in XLA).
    t = jnp.arange(L, dtype=jnp.int32)
    h, w = t // W, t % W
    same_long = ((h % P_h)[:, None] == (h % P_h)[None, :]) & \
                ((w % P_w)[:, None] == (w % P_w)[None, :])
    same_short = ((h // P_h)[:, None] == (h // P_h)[None, :]) & \
                 ((w // P_w)[:, None] == (w // P_w)[None, :])
    bias_l = jnp.where(same_long, 0.0, NEG_INF).astype(jnp.float32)
    bias_s = jnp.where(same_short, 0.0, NEG_INF).astype(jnp.float32)

    # im2col weight layout + bf16 matmul operands (accumulation stays f32).
    w1 = params['w1'].reshape(9 * C, C).astype(jnp.bfloat16)
    w2 = params['w2'].reshape(9 * C, C).astype(jnp.bfloat16)
    b1 = params['b1'].reshape(1, C)
    b2 = params['b2'].reshape(1, C)

    def fuse_qkv(wq, wk, wv, bq, bk, bv):
        wqkv = jnp.concatenate([wq, wk, wv], axis=1).astype(jnp.bfloat16)
        bqkv = jnp.concatenate([bq, bk, bv], axis=1).astype(jnp.float32)
        return wqkv, bqkv

    wqkv_l, bqkv_l = fuse_qkv(params['wq_l'], params['wk_l'], params['wv_l'],
                              params['bq_l'], params['bk_l'], params['bv_l'])
    wqkv_s, bqkv_s = fuse_qkv(params['wq_s'], params['wk_s'], params['wv_s'],
                              params['bq_s'], params['bk_s'], params['bv_s'])

    scalars = jnp.stack([params['alpha'], params['gamma_l'],
                         params['gamma_s']]).reshape(1, 3).astype(jnp.float32)

    const = lambda n: (0, 0)
    y_nhwc = pl.pallas_call(
        _residual_block_kernel,
        out_shape=jax.ShapeDtypeStruct((N, H, W, C), x_nchw.dtype),
        grid=(N,),
        in_specs=[
            pl.BlockSpec(memory_space=pltpu.MemorySpace.SMEM),     # scalars
            pl.BlockSpec((1, H, W, C), lambda n: (n, 0, 0, 0)),    # x (NHWC)
            pl.BlockSpec((9 * C, C), const),                       # w1 (im2col)
            pl.BlockSpec((1, C), const),                           # b1
            pl.BlockSpec((9 * C, C), const),                       # w2
            pl.BlockSpec((1, C), const),                           # b2
            pl.BlockSpec((C, qkv_w), const),                       # wqkv long
            pl.BlockSpec((1, qkv_w), const),                       # bqkv long
            pl.BlockSpec((C, qkv_w), const),                       # wqkv short
            pl.BlockSpec((1, qkv_w), const),                       # bqkv short
            pl.BlockSpec((L, L), const),                           # long mask
            pl.BlockSpec((L, L), const),                           # short mask
        ],
        out_specs=pl.BlockSpec((1, H, W, C), lambda n: (n, 0, 0, 0)),
        scratch_shapes=[pltpu.VMEM((H + 2, W + 16, C), jnp.float32)],
        compiler_params=pltpu.CompilerParams(
            dimension_semantics=("parallel",)),   # batch images -> 2 TCs on v7x
    )(scalars, x_nhwc, w1, b1, w2, b2,
      wqkv_l, bqkv_l, wqkv_s, bqkv_s, bias_l, bias_s)

    return jnp.transpose(y_nhwc, (0, 3, 1, 2))               # NHWC -> NCHW once


def init_params(key, channels, dim=64, scale=0.05):
    assert channels == dim, "attention is hardwired to dim=64 in the module"
    dqk = dim // 8
    ks = jax.random.split(key, 18)

    def conv_w(k):
        # (3, 3, Cin, Cout): tap-major layout that flattens to the im2col matrix
        return scale * jax.random.normal(k, (3, 3, channels, channels),
                                         jnp.float32)

    def attn_params(k0, k1, k2, k3, k4, k5):
        return {
            'wq': scale * jax.random.normal(k0, (dim, dqk), jnp.float32),
            'bq': scale * jax.random.normal(k1, (1, dqk), jnp.float32),
            'wk': scale * jax.random.normal(k2, (dim, dqk), jnp.float32),
            'bk': scale * jax.random.normal(k3, (1, dqk), jnp.float32),
            'wv': scale * jax.random.normal(k4, (dim, dim), jnp.float32),
            'bv': scale * jax.random.normal(k5, (1, dim), jnp.float32),
        }

    long_p = attn_params(*ks[4:10])
    short_p = attn_params(*ks[10:16])
    return {
        'w1': conv_w(ks[0]),
        'b1': scale * jax.random.normal(ks[1], (1, channels), jnp.float32),
        'w2': conv_w(ks[2]),
        'b2': scale * jax.random.normal(ks[3], (1, channels), jnp.float32),
        'alpha': jnp.float32(0.25),          # nn.PReLU() default init, shared
        'wq_l': long_p['wq'], 'bq_l': long_p['bq'],
        'wk_l': long_p['wk'], 'bk_l': long_p['bk'],
        'wv_l': long_p['wv'], 'bv_l': long_p['bv'],
        'wq_s': short_p['wq'], 'bq_s': short_p['bq'],
        'wk_s': short_p['wk'], 'bk_s': short_p['bk'],
        'wv_s': short_p['wv'], 'bv_s': short_p['bv'],
        # torch initializes gamma to 0 (attention would be an identity); small
        # nonzero values are used so the attention path is actually exercised.
        'gamma_l': jnp.float32(0.1),
        'gamma_s': jnp.float32(0.1),
    }


if __name__ == "__main__":
    key = jax.random.PRNGKey(0)
    kx, kp = jax.random.split(key)
    N, C, H, W = 2, 64, 16, 16          # C must be 64 (attention dim); H,W % 8 == 0
    x = jax.random.normal(kx, (N, C, H, W), jnp.float32)
    params = init_params(kp, C)
    out = jax.jit(residual_block)(x, params)
    jax.block_until_ready(out)
    assert out.shape == (N, C, H, W) and out.dtype == jnp.float32
    assert bool(jnp.all(jnp.isfinite(out)))
    print("KERNEL_OK")
</pallas_src>

<mosaic_0001>
module attributes {stable_mosaic.version = 11 : i64} {
  func.func @_residual_block_kernel(%arg0: i32, %arg1: memref<1x3xf32, #tpu.memory_space<smem>>, %arg2: memref<1x16x16x64xf32, #tpu.memory_space<vmem>>, %arg3: memref<576x64xbf16, #tpu.memory_space<vmem>>, %arg4: memref<1x64xf32, #tpu.memory_space<vmem>>, %arg5: memref<576x64xbf16, #tpu.memory_space<vmem>>, %arg6: memref<1x64xf32, #tpu.memory_space<vmem>>, %arg7: memref<64x80xbf16, #tpu.memory_space<vmem>>, %arg8: memref<1x80xf32, #tpu.memory_space<vmem>>, %arg9: memref<64x80xbf16, #tpu.memory_space<vmem>>, %arg10: memref<1x80xf32, #tpu.memory_space<vmem>>, %arg11: memref<256x256xf32, #tpu.memory_space<vmem>>, %arg12: memref<256x256xf32, #tpu.memory_space<vmem>>, %arg13: memref<1x16x16x64xf32, #tpu.memory_space<vmem>>, %arg14: memref<18x32x64xf32, #tpu.memory_space<vmem>>) attributes {dimension_semantics = [#tpu.dimension_semantics<parallel>], iteration_bounds = array<i64: 2>, scalar_prefetch = 0 : i64, scratch_operands = 1 : i64, tpu.core_type = #tpu.core_type<tc>, window_params = [{transform_indices = @transform_0, window_bounds = array<i64: 1, 3>}, {transform_indices = @transform_1, window_bounds = array<i64: 1, 16, 16, 64>}, {pipeline_mode = #tpu.pipeline_mode<synchronous>, transform_indices = @transform_2, window_bounds = array<i64: 576, 64>}, {pipeline_mode = #tpu.pipeline_mode<synchronous>, transform_indices = @transform_3, window_bounds = array<i64: 1, 64>}, {pipeline_mode = #tpu.pipeline_mode<synchronous>, transform_indices = @transform_4, window_bounds = array<i64: 576, 64>}, {pipeline_mode = #tpu.pipeline_mode<synchronous>, transform_indices = @transform_5, window_bounds = array<i64: 1, 64>}, {pipeline_mode = #tpu.pipeline_mode<synchronous>, transform_indices = @transform_6, window_bounds = array<i64: 64, 80>}, {pipeline_mode = #tpu.pipeline_mode<synchronous>, transform_indices = @transform_7, window_bounds = array<i64: 1, 80>}, {pipeline_mode = #tpu.pipeline_mode<synchronous>, transform_indices = @transform_8, window_bounds = array<i64: 64, 80>}, {pipeline_mode = #tpu.pipeline_mode<synchronous>, transform_indices = @transform_9, window_bounds = array<i64: 1, 80>}, {pipeline_mode = #tpu.pipeline_mode<synchronous>, transform_indices = @transform_10, window_bounds = array<i64: 256, 256>}, {pipeline_mode = #tpu.pipeline_mode<synchronous>, transform_indices = @transform_11, window_bounds = array<i64: 256, 256>}, {transform_indices = @transform_12, window_bounds = array<i64: 1, 16, 16, 64>}]} {
    %c0 = arith.constant 0 : index
    %c0_0 = arith.constant 0 : index
    %c0_1 = arith.constant 0 : index
    %c0_2 = arith.constant 0 : index
    %0 = vector.load %arg2[%c0, %c0_0, %c0_1, %c0_2] : memref<1x16x16x64xf32, #tpu.memory_space<vmem>>, vector<1x16x16x64xf32>
    %1 = vector.shape_cast %0 : vector<1x16x16x64xf32> to vector<16x16x64xf32>
    %2 = vector.shape_cast %1 : vector<16x16x64xf32> to vector<256x64xf32>
    %c0_3 = arith.constant 0 : index
    %c0_4 = arith.constant 0 : index
    %3 = memref.load %arg1[%c0_3, %c0_4] : memref<1x3xf32, #tpu.memory_space<smem>>
    %c0_5 = arith.constant 0 : index
    %c1 = arith.constant 1 : index
    %4 = memref.load %arg1[%c0_5, %c1] : memref<1x3xf32, #tpu.memory_space<smem>>
    %c0_6 = arith.constant 0 : index
    %c2 = arith.constant 2 : index
    %5 = memref.load %arg1[%c0_6, %c2] : memref<1x3xf32, #tpu.memory_space<smem>>
    %cst = arith.constant 0.000000e+00 : f32
    %6 = vector.broadcast %cst : f32 to vector<18x32x64xf32>
    %c0_7 = arith.constant 0 : index
    %c0_8 = arith.constant 0 : index
    %c0_9 = arith.constant 0 : index
    %7 = vector.load %arg14[%c0_7, %c0_8, %c0_9] : memref<18x32x64xf32, #tpu.memory_space<vmem>>, vector<18x32x64xf32>
    tpu.vector_store %arg14[%c0_7, %c0_8, %c0_9], %6 {strides = array<i32>} : memref<18x32x64xf32, #tpu.memory_space<vmem>>, vector<18x32x64xf32>,
    %c1_10 = arith.constant 1 : index
    %c8 = arith.constant 8 : index
    %c0_11 = arith.constant 0 : index
    %8 = vector.load %arg14[%c1_10, %c8, %c0_11] : memref<18x32x64xf32, #tpu.memory_space<vmem>>, vector<16x16x64xf32>
    tpu.vector_store %arg14[%c1_10, %c8, %c0_11], %1 {strides = array<i32>} : memref<18x32x64xf32, #tpu.memory_space<vmem>>, vector<16x16x64xf32>,
    %c0_12 = arith.constant 0 : index
    %c0_13 = arith.constant 0 : index
    %c0_14 = arith.constant 0 : index
    %9 = vector.load %arg14[%c0_12, %c0_13, %c0_14] : memref<18x32x64xf32, #tpu.memory_space<vmem>>, vector<18x32x64xf32>
    %10 = vector.extract_strided_slice %9 {offsets = [0, 7, 0], sizes = [16, 16, 64], strides = [1, 1, 1]} : vector<18x32x64xf32> to vector<16x16x64xf32>
    %11 = vector.shape_cast %10 : vector<16x16x64xf32> to vector<256x64xf32>
    %12 = vector.extract_strided_slice %9 {offsets = [0, 8, 0], sizes = [16, 16, 64], strides = [1, 1, 1]} : vector<18x32x64xf32> to vector<16x16x64xf32>
    %13 = vector.shape_cast %12 : vector<16x16x64xf32> to vector<256x64xf32>
    %14 = vector.extract_strided_slice %9 {offsets = [0, 9, 0], sizes = [16, 16, 64], strides = [1, 1, 1]} : vector<18x32x64xf32> to vector<16x16x64xf32>
    %15 = vector.shape_cast %14 : vector<16x16x64xf32> to vector<256x64xf32>
    %16 = vector.extract_strided_slice %9 {offsets = [1, 7, 0], sizes = [16, 16, 64], strides = [1, 1, 1]} : vector<18x32x64xf32> to vector<16x16x64xf32>
    %17 = vector.shape_cast %16 : vector<16x16x64xf32> to vector<256x64xf32>
    %18 = vector.extract_strided_slice %9 {offsets = [1, 8, 0], sizes = [16, 16, 64], strides = [1, 1, 1]} : vector<18x32x64xf32> to vector<16x16x64xf32>
    %19 = vector.shape_cast %18 : vector<16x16x64xf32> to vector<256x64xf32>
    %20 = vector.extract_strided_slice %9 {offsets = [1, 9, 0], sizes = [16, 16, 64], strides = [1, 1, 1]} : vector<18x32x64xf32> to vector<16x16x64xf32>
    %21 = vector.shape_cast %20 : vector<16x16x64xf32> to vector<256x64xf32>
    %22 = vector.extract_strided_slice %9 {offsets = [2, 7, 0], sizes = [16, 16, 64], strides = [1, 1, 1]} : vector<18x32x64xf32> to vector<16x16x64xf32>
    %23 = vector.shape_cast %22 : vector<16x16x64xf32> to vector<256x64xf32>
    %24 = vector.extract_strided_slice %9 {offsets = [2, 8, 0], sizes = [16, 16, 64], strides = [1, 1, 1]} : vector<18x32x64xf32> to vector<16x16x64xf32>
    %25 = vector.shape_cast %24 : vector<16x16x64xf32> to vector<256x64xf32>
    %26 = vector.extract_strided_slice %9 {offsets = [2, 9, 0], sizes = [16, 16, 64], strides = [1, 1, 1]} : vector<18x32x64xf32> to vector<16x16x64xf32>
    %27 = vector.shape_cast %26 : vector<16x16x64xf32> to vector<256x64xf32>
    %28 = tpu.concatenate %11, %13, %15, %17, %19, %21, %23, %25, %27 in 1 : vector<256x64xf32>, vector<256x64xf32>, vector<256x64xf32>, vector<256x64xf32>, vector<256x64xf32>, vector<256x64xf32>, vector<256x64xf32>, vector<256x64xf32>, vector<256x64xf32> -> vector<256x576xf32>
    %29 = arith.truncf %28 : vector<256x576xf32> to vector<256x576xbf16>
    %c0_15 = arith.constant 0 : index
    %c0_16 = arith.constant 0 : index
    %30 = vector.load %arg3[%c0_15, %c0_16] : memref<576x64xbf16, #tpu.memory_space<vmem>>, vector<576x64xbf16>
    %cst_17 = arith.constant dense<0.000000e+00> : vector<256x64xf32>
    %31 = tpu.matmul %29, %30, %cst_17 {dimension_numbers = #tpu.dot_dimension_numbers<[1], [0], [0], [1], [0, 0, 1, 1], [], []>} : vector<256x576xbf16>, vector<576x64xbf16>, vector<256x64xf32> -> vector<256x64xf32>
    %c0_18 = arith.constant 0 : index
    %c0_19 = arith.constant 0 : index
    %32 = vector.load %arg4[%c0_18, %c0_19] : memref<1x64xf32, #tpu.memory_space<vmem>>, vector<1x64xf32>
    %33 = vector.broadcast %32 : vector<1x64xf32> to vector<256x64xf32>
    %34 = arith.addf %31, %33 : vector<256x64xf32>
    %cst_20 = arith.constant 0.000000e+00 : f32
    %35 = vector.broadcast %cst_20 : f32 to vector<256x64xf32>
    %36 = arith.cmpf oge, %34, %35 : vector<256x64xf32>
    %37 = vector.broadcast %3 : f32 to vector<256x64xf32>
    %38 = arith.mulf %37, %34 : vector<256x64xf32>
    %39 = arith.select %36, %34, %38 : vector<256x64xi1>, vector<256x64xf32>
    %40 = arith.addf %2, %39 : vector<256x64xf32>
    %41 = vector.shape_cast %40 : vector<256x64xf32> to vector<16x16x64xf32>
    %c1_21 = arith.constant 1 : index
    %c8_22 = arith.constant 8 : index
    %c0_23 = arith.constant 0 : index
    %42 = vector.load %arg14[%c1_21, %c8_22, %c0_23] : memref<18x32x64xf32, #tpu.memory_space<vmem>>, vector<16x16x64xf32>
    tpu.vector_store %arg14[%c1_21, %c8_22, %c0_23], %41 {strides = array<i32>} : memref<18x32x64xf32, #tpu.memory_space<vmem>>, vector<16x16x64xf32>,
    %c0_24 = arith.constant 0 : index
    %c0_25 = arith.constant 0 : index
    %c0_26 = arith.constant 0 : index
    %43 = vector.load %arg14[%c0_24, %c0_25, %c0_26] : memref<18x32x64xf32, #tpu.memory_space<vmem>>, vector<18x32x64xf32>
    %44 = vector.extract_strided_slice %43 {offsets = [0, 7, 0], sizes = [16, 16, 64], strides = [1, 1, 1]} : vector<18x32x64xf32> to vector<16x16x64xf32>
    %45 = vector.shape_cast %44 : vector<16x16x64xf32> to vector<256x64xf32>
    %46 = vector.extract_strided_slice %43 {offsets = [0, 8, 0], sizes = [16, 16, 64], strides = [1, 1, 1]} : vector<18x32x64xf32> to vector<16x16x64xf32>
    %47 = vector.shape_cast %46 : vector<16x16x64xf32> to vector<256x64xf32>
    %48 = vector.extract_strided_slice %43 {offsets = [0, 9, 0], sizes = [16, 16, 64], strides = [1, 1, 1]} : vector<18x32x64xf32> to vector<16x16x64xf32>
    %49 = vector.shape_cast %48 : vector<16x16x64xf32> to vector<256x64xf32>
    %50 = vector.extract_strided_slice %43 {offsets = [1, 7, 0], sizes = [16, 16, 64], strides = [1, 1, 1]} : vector<18x32x64xf32> to vector<16x16x64xf32>
    %51 = vector.shape_cast %50 : vector<16x16x64xf32> to vector<256x64xf32>
    %52 = vector.extract_strided_slice %43 {offsets = [1, 8, 0], sizes = [16, 16, 64], strides = [1, 1, 1]} : vector<18x32x64xf32> to vector<16x16x64xf32>
    %53 = vector.shape_cast %52 : vector<16x16x64xf32> to vector<256x64xf32>
    %54 = vector.extract_strided_slice %43 {offsets = [1, 9, 0], sizes = [16, 16, 64], strides = [1, 1, 1]} : vector<18x32x64xf32> to vector<16x16x64xf32>
    %55 = vector.shape_cast %54 : vector<16x16x64xf32> to vector<256x64xf32>
    %56 = vector.extract_strided_slice %43 {offsets = [2, 7, 0], sizes = [16, 16, 64], strides = [1, 1, 1]} : vector<18x32x64xf32> to vector<16x16x64xf32>
    %57 = vector.shape_cast %56 : vector<16x16x64xf32> to vector<256x64xf32>
    %58 = vector.extract_strided_slice %43 {offsets = [2, 8, 0], sizes = [16, 16, 64], strides = [1, 1, 1]} : vector<18x32x64xf32> to vector<16x16x64xf32>
    %59 = vector.shape_cast %58 : vector<16x16x64xf32> to vector<256x64xf32>
    %60 = vector.extract_strided_slice %43 {offsets = [2, 9, 0], sizes = [16, 16, 64], strides = [1, 1, 1]} : vector<18x32x64xf32> to vector<16x16x64xf32>
    %61 = vector.shape_cast %60 : vector<16x16x64xf32> to vector<256x64xf32>
    %62 = tpu.concatenate %45, %47, %49, %51, %53, %55, %57, %59, %61 in 1 : vector<256x64xf32>, vector<256x64xf32>, vector<256x64xf32>, vector<256x64xf32>, vector<256x64xf32>, vector<256x64xf32>, vector<256x64xf32>, vector<256x64xf32>, vector<256x64xf32> -> vector<256x576xf32>
    %63 = arith.truncf %62 : vector<256x576xf32> to vector<256x576xbf16>
    %c0_27 = arith.constant 0 : index
    %c0_28 = arith.constant 0 : index
    %64 = vector.load %arg5[%c0_27, %c0_28] : memref<576x64xbf16, #tpu.memory_space<vmem>>, vector<576x64xbf16>
    %cst_29 = arith.constant dense<0.000000e+00> : vector<256x64xf32>
    %65 = tpu.matmul %63, %64, %cst_29 {dimension_numbers = #tpu.dot_dimension_numbers<[1], [0], [0], [1], [0, 0, 1, 1], [], []>} : vector<256x576xbf16>, vector<576x64xbf16>, vector<256x64xf32> -> vector<256x64xf32>
    %c0_30 = arith.constant 0 : index
    %c0_31 = arith.constant 0 : index
    %66 = vector.load %arg6[%c0_30, %c0_31] : memref<1x64xf32, #tpu.memory_space<vmem>>, vector<1x64xf32>
    %67 = vector.broadcast %66 : vector<1x64xf32> to vector<256x64xf32>
    %68 = arith.addf %65, %67 : vector<256x64xf32>
    %cst_32 = arith.constant 0.000000e+00 : f32
    %69 = vector.broadcast %cst_32 : f32 to vector<256x64xf32>
    %70 = arith.cmpf oge, %68, %69 : vector<256x64xf32>
    %71 = vector.broadcast %3 : f32 to vector<256x64xf32>
    %72 = arith.mulf %71, %68 : vector<256x64xf32>
    %73 = arith.select %70, %68, %72 : vector<256x64xi1>, vector<256x64xf32>
    %74 = arith.addf %40, %73 : vector<256x64xf32>
    %c0_33 = arith.constant 0 : index
    %c0_34 = arith.constant 0 : index
    %75 = vector.load %arg11[%c0_33, %c0_34] : memref<256x256xf32, #tpu.memory_space<vmem>>, vector<256x256xf32>
    %76 = arith.truncf %74 : vector<256x64xf32> to vector<256x64xbf16>
    %c0_35 = arith.constant 0 : index
    %c0_36 = arith.constant 0 : index
    %77 = vector.load %arg7[%c0_35, %c0_36] : memref<64x80xbf16, #tpu.memory_space<vmem>>, vector<64x80xbf16>
    %cst_37 = arith.constant dense<0.000000e+00> : vector<256x80xf32>
    %78 = tpu.matmul %76, %77, %cst_37 {dimension_numbers = #tpu.dot_dimension_numbers<[1], [0], [0], [1], [0, 0, 1, 1], [], []>} : vector<256x64xbf16>, vector<64x80xbf16>, vector<256x80xf32> -> vector<256x80xf32>
    %c0_38 = arith.constant 0 : index
    %c0_39 = arith.constant 0 : index
    %79 = vector.load %arg8[%c0_38, %c0_39] : memref<1x80xf32, #tpu.memory_space<vmem>>, vector<1x80xf32>
    %80 = vector.broadcast %79 : vector<1x80xf32> to vector<256x80xf32>
    %81 = arith.addf %78, %80 : vector<256x80xf32>
    %82 = vector.extract_strided_slice %81 {offsets = [0, 0], sizes = [256, 8], strides = [1, 1]} : vector<256x80xf32> to vector<256x8xf32>
    %83 = vector.extract_strided_slice %81 {offsets = [0, 8], sizes = [256, 8], strides = [1, 1]} : vector<256x80xf32> to vector<256x8xf32>
    %84 = vector.extract_strided_slice %81 {offsets = [0, 16], sizes = [256, 64], strides = [1, 1]} : vector<256x80xf32> to vector<256x64xf32>
    %85 = arith.truncf %82 : vector<256x8xf32> to vector<256x8xbf16>
    %86 = arith.truncf %83 : vector<256x8xf32> to vector<256x8xbf16>
    "tpu.trace_start"() <{level = 10 : i32, message = "qd,kd->qk"}> : () -> ()
    %cst_40 = arith.constant dense<0.000000e+00> : vector<256x256xf32>
    %87 = tpu.matmul %85, %86, %cst_40 {dimension_numbers = #tpu.dot_dimension_numbers<[1], [1], [0], [0], [0, 0, 1, 0], [], []>} : vector<256x8xbf16>, vector<256x8xbf16>, vector<256x256xf32> -> vector<256x256xf32>
    "tpu.trace_stop"() : () -> ()
    %88 = arith.addf %87, %75 : vector<256x256xf32>
    %cst_41 = arith.constant dense<0xFF800000> : vector<256xf32>
    %89 = vector.multi_reduction <maximumf>, %88, %cst_41 [1] : vector<256x256xf32> to vector<256xf32>
    %90 = vector.shape_cast %89 : vector<256xf32> to vector<256x1xf32>
    %91 = vector.broadcast %90 : vector<256x1xf32> to vector<256x256xf32>
    %92 = arith.subf %88, %91 : vector<256x256xf32>
    %93 = math.exp %92 : vector<256x256xf32>
    %cst_42 = arith.constant dense<0.000000e+00> : vector<256xf32>
    %94 = vector.multi_reduction <add>, %93, %cst_42 [1] : vector<256x256xf32> to vector<256xf32>
    %95 = vector.shape_cast %94 : vector<256xf32> to vector<256x1xf32>
    %96 = tpu.reciprocal %95 {approx = true} : vector<256x1xf32> -> vector<256x1xf32>
    %97 = vector.broadcast %96 : vector<256x1xf32> to vector<256x256xf32>
    %98 = arith.mulf %93, %97 : vector<256x256xf32>
    %99 = arith.truncf %98 : vector<256x256xf32> to vector<256x256xbf16>
    %100 = arith.truncf %84 : vector<256x64xf32> to vector<256x64xbf16>
    %cst_43 = arith.constant dense<0.000000e+00> : vector<256x64xf32>
    %101 = tpu.matmul %99, %100, %cst_43 {dimension_numbers = #tpu.dot_dimension_numbers<[1], [0], [0], [1], [0, 0, 1, 1], [], []>} : vector<256x256xbf16>, vector<256x64xbf16>, vector<256x64xf32> -> vector<256x64xf32>
    %102 = vector.broadcast %4 : f32 to vector<256x64xf32>
    %103 = arith.mulf %102, %101 : vector<256x64xf32>
    %104 = arith.addf %103, %74 : vector<256x64xf32>
    %c0_44 = arith.constant 0 : index
    %c0_45 = arith.constant 0 : index
    %105 = vector.load %arg12[%c0_44, %c0_45] : memref<256x256xf32, #tpu.memory_space<vmem>>, vector<256x256xf32>
    %106 = arith.truncf %104 : vector<256x64xf32> to vector<256x64xbf16>
    %c0_46 = arith.constant 0 : index
    %c0_47 = arith.constant 0 : index
    %107 = vector.load %arg9[%c0_46, %c0_47] : memref<64x80xbf16, #tpu.memory_space<vmem>>, vector<64x80xbf16>
    %cst_48 = arith.constant dense<0.000000e+00> : vector<256x80xf32>
    %108 = tpu.matmul %106, %107, %cst_48 {dimension_numbers = #tpu.dot_dimension_numbers<[1], [0], [0], [1], [0, 0, 1, 1], [], []>} : vector<256x64xbf16>, vector<64x80xbf16>, vector<256x80xf32> -> vector<256x80xf32>
    %c0_49 = arith.constant 0 : index
    %c0_50 = arith.constant 0 : index
    %109 = vector.load %arg10[%c0_49, %c0_50] : memref<1x80xf32, #tpu.memory_space<vmem>>, vector<1x80xf32>
    %110 = vector.broadcast %109 : vector<1x80xf32> to vector<256x80xf32>
    %111 = arith.addf %108, %110 : vector<256x80xf32>
    %112 = vector.extract_strided_slice %111 {offsets = [0, 0], sizes = [256, 8], strides = [1, 1]} : vector<256x80xf32> to vector<256x8xf32>
    %113 = vector.extract_strided_slice %111 {offsets = [0, 8], sizes = [256, 8], strides = [1, 1]} : vector<256x80xf32> to vector<256x8xf32>
    %114 = vector.extract_strided_slice %111 {offsets = [0, 16], sizes = [256, 64], strides = [1, 1]} : vector<256x80xf32> to vector<256x64xf32>
    %115 = arith.truncf %112 : vector<256x8xf32> to vector<256x8xbf16>
    %116 = arith.truncf %113 : vector<256x8xf32> to vector<256x8xbf16>
    "tpu.trace_start"() <{level = 10 : i32, message = "qd,kd->qk"}> : () -> ()
    %cst_51 = arith.constant dense<0.000000e+00> : vector<256x256xf32>
    %117 = tpu.matmul %115, %116, %cst_51 {dimension_numbers = #tpu.dot_dimension_numbers<[1], [1], [0], [0], [0, 0, 1, 0], [], []>} : vector<256x8xbf16>, vector<256x8xbf16>, vector<256x256xf32> -> vector<256x256xf32>
    "tpu.trace_stop"() : () -> ()
    %118 = arith.addf %117, %105 : vector<256x256xf32>
    %cst_52 = arith.constant dense<0xFF800000> : vector<256xf32>
    %119 = vector.multi_reduction <maximumf>, %118, %cst_52 [1] : vector<256x256xf32> to vector<256xf32>
    %120 = vector.shape_cast %119 : vector<256xf32> to vector<256x1xf32>
    %121 = vector.broadcast %120 : vector<256x1xf32> to vector<256x256xf32>
    %122 = arith.subf %118, %121 : vector<256x256xf32>
    %123 = math.exp %122 : vector<256x256xf32>
    %cst_53 = arith.constant dense<0.000000e+00> : vector<256xf32>
    %124 = vector.multi_reduction <add>, %123, %cst_53 [1] : vector<256x256xf32> to vector<256xf32>
    %125 = vector.shape_cast %124 : vector<256xf32> to vector<256x1xf32>
    %126 = tpu.reciprocal %125 {approx = true} : vector<256x1xf32> -> vector<256x1xf32>
    %127 = vector.broadcast %126 : vector<256x1xf32> to vector<256x256xf32>
    %128 = arith.mulf %123, %127 : vector<256x256xf32>
    %129 = arith.truncf %128 : vector<256x256xf32> to vector<256x256xbf16>
    %130 = arith.truncf %114 : vector<256x64xf32> to vector<256x64xbf16>
    %cst_54 = arith.constant dense<0.000000e+00> : vector<256x64xf32>
    %131 = tpu.matmul %129, %130, %cst_54 {dimension_numbers = #tpu.dot_dimension_numbers<[1], [0], [0], [1], [0, 0, 1, 1], [], []>} : vector<256x256xbf16>, vector<256x64xbf16>, vector<256x64xf32> -> vector<256x64xf32>
    %132 = vector.broadcast %5 : f32 to vector<256x64xf32>
    %133 = arith.mulf %132, %131 : vector<256x64xf32>
    %134 = arith.addf %133, %104 : vector<256x64xf32>
    %cst_55 = arith.constant 5.000000e-01 : f32
    %135 = vector.broadcast %cst_55 : f32 to vector<256x64xf32>
    %136 = arith.mulf %135, %134 : vector<256x64xf32>
    %137 = arith.addf %2, %136 : vector<256x64xf32>
    %138 = vector.shape_cast %137 : vector<256x64xf32> to vector<16x16x64xf32>
    %c0_56 = arith.constant 0 : index
    %c0_57 = arith.constant 0 : index
    %c0_58 = arith.constant 0 : index
    %c0_59 = arith.constant 0 : index
    %139 = vector.load %arg13[%c0_56, %c0_57, %c0_58, %c0_59] : memref<1x16x16x64xf32, #tpu.memory_space<vmem>>, vector<1x16x16x64xf32>
    %140 = vector.shape_cast %139 : vector<1x16x16x64xf32> to vector<16x16x64xf32>
    %141 = vector.shape_cast %138 : vector<16x16x64xf32> to vector<1x16x16x64xf32>
    tpu.vector_store %arg13[%c0_56, %c0_57, %c0_58, %c0_59], %141 {strides = array<i32>} : memref<1x16x16x64xf32, #tpu.memory_space<vmem>>, vector<1x16x16x64xf32>,
    return
  }
  func.func @transform_0(%arg0: i32) -> (i32, i32) {
    %c0_i32 = arith.constant 0 : i32
    %c0_i32_0 = arith.constant 0 : i32
    %c0_i32_1 = arith.constant 0 : i32
    return %c0_i32, %c0_i32_0 : i32, i32
  }
  func.func @transform_1(%arg0: i32) -> (i32, i32, i32, i32) {
    %c0_i32 = arith.constant 0 : i32
    %c0_i32_0 = arith.constant 0 : i32
    %c0_i32_1 = arith.constant 0 : i32
    %c0_i32_2 = arith.constant 0 : i32
    return %arg0, %c0_i32, %c0_i32_0, %c0_i32_1 : i32, i32, i32, i32
  }
  func.func @transform_2(%arg0: i32) -> (i32, i32) {
    %c0_i32 = arith.constant 0 : i32
    %c0_i32_0 = arith.constant 0 : i32
    %c0_i32_1 = arith.constant 0 : i32
    return %c0_i32, %c0_i32_0 : i32, i32
  }
  func.func @transform_3(%arg0: i32) -> (i32, i32) {
    %c0_i32 = arith.constant 0 : i32
    %c0_i32_0 = arith.constant 0 : i32
    %c0_i32_1 = arith.constant 0 : i32
    return %c0_i32, %c0_i32_0 : i32, i32
  }
  func.func @transform_4(%arg0: i32) -> (i32, i32) {
    %c0_i32 = arith.constant 0 : i32
    %c0_i32_0 = arith.constant 0 : i32
    %c0_i32_1 = arith.constant 0 : i32
    return %c0_i32, %c0_i32_0 : i32, i32
  }
  func.func @transform_5(%arg0: i32) -> (i32, i32) {
    %c0_i32 = arith.constant 0 : i32
    %c0_i32_0 = arith.constant 0 : i32
    %c0_i32_1 = arith.constant 0 : i32
    return %c0_i32, %c0_i32_0 : i32, i32
  }
  func.func @transform_6(%arg0: i32) -> (i32, i32) {
    %c0_i32 = arith.constant 0 : i32
    %c0_i32_0 = arith.constant 0 : i32
    %c0_i32_1 = arith.constant 0 : i32
    return %c0_i32, %c0_i32_0 : i32, i32
  }
  func.func @transform_7(%arg0: i32) -> (i32, i32) {
    %c0_i32 = arith.constant 0 : i32
    %c0_i32_0 = arith.constant 0 : i32
    %c0_i32_1 = arith.constant 0 : i32
    return %c0_i32, %c0_i32_0 : i32, i32
  }
  func.func @transform_8(%arg0: i32) -> (i32, i32) {
    %c0_i32 = arith.constant 0 : i32
    %c0_i32_0 = arith.constant 0 : i32
    %c0_i32_1 = arith.constant 0 : i32
    return %c0_i32, %c0_i32_0 : i32, i32
  }
  func.func @transform_9(%arg0: i32) -> (i32, i32) {
    %c0_i32 = arith.constant 0 : i32
    %c0_i32_0 = arith.constant 0 : i32
    %c0_i32_1 = arith.constant 0 : i32
    return %c0_i32, %c0_i32_0 : i32, i32
  }
  func.func @transform_10(%arg0: i32) -> (i32, i32) {
    %c0_i32 = arith.constant 0 : i32
    %c0_i32_0 = arith.constant 0 : i32
    %c0_i32_1 = arith.constant 0 : i32
    return %c0_i32, %c0_i32_0 : i32, i32
  }
  func.func @transform_11(%arg0: i32) -> (i32, i32) {
    %c0_i32 = arith.constant 0 : i32
    %c0_i32_0 = arith.constant 0 : i32
    %c0_i32_1 = arith.constant 0 : i32
    return %c0_i32, %c0_i32_0 : i32, i32
  }
  func.func @transform_12(%arg0: i32) -> (i32, i32, i32, i32) {
    %c0_i32 = arith.constant 0 : i32
    %c0_i32_0 = arith.constant 0 : i32
    %c0_i32_1 = arith.constant 0 : i32
    %c0_i32_2 = arith.constant 0 : i32
    return %arg0, %c0_i32, %c0_i32_0, %c0_i32_1 : i32, i32, i32, i32
  }
}

</mosaic_0001>

<bundles_post_ra>
// kernel: residual_block.1
= control target key start
LH: loop header
LB: loop body
LE: loop exit
PB: predicated region body
PF: predicated region fallthrough
CT: control target
= control target key end

     0   :  { %s15594_s0 = inlined_call_operand.vmem [shape: f32[1,3], index: 0, kind: input, shape index: {}]   ;;  %s15595_s1 = inlined_call_operand.vmem [shape: f32[2,16,16,64], index: 1, kind: input, shape index: {}]   ;;  %s15596_s2 = inlined_call_operand.vmem [shape: bf16[576,64], index: 2, kind: input, shape index: {}]   ;;  %s15597_s3 = inlined_call_operand.vmem [shape: f32[1,64], index: 3, kind: input, shape index: {}]   ;;  %s15598_s4 = inlined_call_operand.vmem [shape: bf16[576,64], index: 4, kind: input, shape index: {}]   ;;  %s15599_s5 = inlined_call_operand.vmem [shape: f32[1,64], index: 5, kind: input, shape index: {}]   ;;  %s15600_s6 = inlined_call_operand.vmem [shape: bf16[64,80], index: 6, kind: input, shape index: {}]   ;;  %s15601_s7 = inlined_call_operand.vmem [shape: f32[1,80], index: 7, kind: input, shape index: {}]   ;;  %s15602_s8 = inlined_call_operand.vmem [shape: bf16[64,80], index: 8, kind: input, shape index: {}]   ;;  %s15603_s9 = inlined_call_operand.vmem [shape: f32[1,80], index: 9, kind: input, shape index: {}]   ;;  %s15604_s10 = inlined_call_operand.vmem [shape: f32[256,256], index: 10, kind: input, shape index: {}]   ;;  %s15605_s11 = inlined_call_operand.vmem [shape: f32[256,256], index: 11, kind: input, shape index: {}]   ;;  %s15606_s12 = inlined_call_operand.hbm [shape: f32[2,16,16,64], index: 12, kind: output, shape index: {}]  }
   0x1   :  { %15905 = sst [smem:[#allocation101_spill]] %s15594_s0 }
   0x2   :  { %17 = vsyncpa [#allocation5], 0 }
   0x3   :  { %18 = vsyncpa [#allocation4], 0 }
   0x4   :  { %20 = vsyncpa [#allocation4 + $0x1], 0  ;;  %s9818_s21 = smov 0   ;;  %s9820_s22 = smov 0  }
   0x5   :  { %s9822_s23 = smov 0   ;;  %s9824_s24 = smov 0  }
   0x6 LB: > { %s9839_s25 = sadd.s32 4294967295, %s9743_s24   ;;  %s7354_s26 = sadd.s32 4294967294, %s9743_s24   ;;  %s9743_s24 = sphi %s9824_s24, %s16576_s24   ;;  %s9739_s23 = sphi %s9822_s23, %s16575_s23   ;;  %s9735_s22 = sphi %s9820_s22, %s16574_s22   ;;  %s9731_s21 = sphi %s9818_s21, %s16573_s21  }
   0x7   : > { %s9843_s27 = sadd.s32 1, %s9743_s24   ;;  %s290_s28 = sadd.s32 1, %s9739_s23 }
   0x8   : > { %s287_s29 = ssub.s32 %s9743_s24, %s9843_s27  ;;  %p300_p0 = scmp.ne.s32.totalorder %s9739_s23, %s9735_s22 }
   0x9   : > { %p288_p1 = scmp.eq.s32.totalorder %s287_s29, 0  ;;  %p301_p2 = scmp.eq.s32.totalorder %s9839_s25, 1 }
   0xa   : > { %p306_p3 = scmp.ne.s32.totalorder %s9735_s22, %s9731_s21  ;;  %p307_p4 = scmp.eq.s32.totalorder %s7354_s26, 1 }
   0xb   : > { %s9854_s30 = scalar_select %p288_p1, %s9739_s23, %s290_s28  }
   0xc   : > { %p9856_p5 = por %p301_p2, %p300_p0  ;;  %p9860_p6 = por %p307_p4, %p306_p3 }
   0xd   : > { %15906 = sst [smem:[#allocation9_spill]] %s9854_s30  ;;  %p7355_p7 = scmp.ge.s32.totalorder %s9743_s24, 1 }
   0xe   : > { %p314_p8 = scmp.lt.s32.totalorder %s9743_s24, 3  ;;  %p8590_p9 = scmp.eq.s32.totalorder %s9839_s25, 0 }
   0xf   : > { %s15910_s0 = sld [smem:[#allocation101_spill]] }
  0x10   : > { %p9867_p10 = pnand %p7355_p7, %p314_p8 }
  0x12   : > { %p8582_p11 = pneg %p9867_p10 }
  0x14   : > { %p8583_p12 = pnand %p8590_p9, %p8582_p11 }
  0x15   : > { %s327_s18 = sshll.u32 %s15910_s0, 4  ;;  %s328_s18 = int_to_ptr.vmem [resolvable:$true] %s327_s18 }
  0x16   : > { %s9662_s19 = scalar_lea.vmem %s328_s18, 16  ;;  %p9664_p0 = pneg %p8583_p12 }
  0x17   : > { %p9663_p13 = scmp.ne.s32.totalorder %s328_s18, %s9662_s19  ;;  %p9670_p3 = scmp.lt.s32.totalorder %s328_s18, %s328_s18 }
  0x18   : > { %p9671_p4 = scmp.lt.s32.totalorder %s9662_s19, %s9662_s19 }
  0x19   : > { %p9665_p1 = pnand %p9664_p0, %p9663_p13 }
  0x1a   : > { %p9672_p7 = por %p9671_p4, %p9670_p3 }
  0x1b   : > { %p9666_p2 = pneg %p9665_p1 }
  0x1d   : > { %p9673_p8 = pnand %p9672_p7, %p9666_p2 }
  0x1f   : > { %9676 = shalt.err (!%p9673_p8)
}
  0x20   : > { %s9745_s20 = smov [#allocation3]   ;;  %378 = sbr.rel (%p9867_p10) target bundleno = 3939 (0xf63), region = 68 }
  0x21   : > { %8585 = dma.vmem_to_smem (!%p8583_p12), %s328_s18, 16, %s9745_s20, [#allocation5]  }
  0x27   : > { %9722 = dma.done.wait (%p8590_p9), [#allocation5], 16  }
  0x28   : > { %9724 = vsyncadd (%p8590_p9), [#allocation5], 4294967280 }
  0x29   : > { %384 = sfence }
  0x2a   : > { %p421_p11 = scmp.lt.s32.totalorder %s9839_s25, 1  ;;  %vm462_vm0 = vcmask 523264   ;;  %v9746_v0 = vmov 0.0   ;;  %v9132_v1 = vld [vmem:[%s15596_s2 + $0x40] sm:$0xff]   ;;  %v9134_v3 = vld [vmem:[%s15596_s2 + $0x48] sm:$0xff]   ;;  %v9136_v5 = vld [vmem:[%s15596_s2 + $0x50] sm:$0xff]  }
  0x2b   : > { %467 = vst.msk [vmem:[#allocation2 + $0x20] sm:$0xff] %vm462_vm0, %v9746_v0  ;;  %468 = vst.msk [vmem:[#allocation2 + $0x28] sm:$0xff] %vm462_vm0, %v9746_v0  ;;  %v9133_v2 = vld [vmem:[%s15596_s2] sm:$0xff]   ;;  %7552 = vmatprep.subr.bf16.mxu0 %v9132_v1  ;;  %v9135_v4 = vld [vmem:[%s15596_s2 + $0x8] sm:$0xff]   ;;  %vm688_vm1 = vcmask 1040384   ;;  %vm817_vm2 = vcmask 1046528  }
  0x2c   : > { %469 = vst.msk [vmem:[#allocation2 + $0x30] sm:$0xff] %vm462_vm0, %v9746_v0  ;;  %463 = vst.msk [vmem:[#allocation2] sm:$0xff] %vm462_vm0, %v9746_v0  ;;  %s422_s29 = scalar_select %p421_p11, %s9839_s25, 1  ;;  %7553 = vmatpush3.bf16.msra.mxu0 %v9133_v2 }
  0x2d   : > { %464 = vst.msk [vmem:[#allocation2 + $0x8] sm:$0xff] %vm462_vm0, %v9746_v0  ;;  %465 = vst.msk [vmem:[#allocation2 + $0x10] sm:$0xff] %vm462_vm0, %v9746_v0  ;;  %7554 = vmatprep.subr.bf16.mxu0 %v9134_v3  ;;  %s9747_s0 = smov 64   ;;  %s9749_s15 = smov 112  }
  0x2e   : > { %466 = vst.msk [vmem:[#allocation2 + $0x18] sm:$0xff] %vm462_vm0, %v9746_v0  ;;  %470 = vst.msk [vmem:[#allocation2 + $0x38] sm:$0xff] %vm462_vm0, %v9746_v0  ;;  %s7550_s19 = sshll.u32 %s422_s29, 8  ;;  %s7363_s30 = sld [smem:[#allocation3 + $0x1]] }
  0x2f   : > { %471 = vst.msk [vmem:[#allocation2 + $0x40] sm:$0xff] %vm462_vm0, %v9746_v0  ;;  %472 = vst.msk [vmem:[#allocation2 + $0x48] sm:$0xff] %vm462_vm0, %v9746_v0  ;;  %s10047_s28 = scalar_lea.vmem %s15595_s1, %s7550_s19  ;;  %s459_s19 = sld [smem:[#allocation3]] }
  0x30   : > { %473 = vst.msk [vmem:[#allocation2 + $0x50] sm:$0xff] %vm462_vm0, %v9746_v0  ;;  %474 = vst.msk [vmem:[#allocation2 + $0x58] sm:$0xff] %vm462_vm0, %v9746_v0  ;;  %v10053_v6 = vld [vmem:[%s10047_s28] sm:$0xff]  ;;  %v10056_v7 = vld [vmem:[%s10047_s28 + $0x8] sm:$0xff]  ;;  %7555 = vmatpush3.bf16.msra.mxu0 %v9135_v4  ;;  %s7551_s17 = sshll.u32 %s9839_s25, 12  ;;  %s9750_s16 = smov [#allocation6]  }
  0x31   : > { %475 = vst.msk [vmem:[#allocation2 + $0x60] sm:$0xff] %vm462_vm0, %v9746_v0  ;;  %476 = vst.msk [vmem:[#allocation2 + $0x68] sm:$0xff] %vm462_vm0, %v9746_v0  ;;  %v10059_v8 = vld [vmem:[%s10047_s28 + $0x10] sm:$0xff]  ;;  %v10066_v9 = vld [vmem:[%s10047_s28 + $0x18] sm:$0xff]  ;;  %7556 = vmatprep.subr.bf16.mxu0 %v9136_v5  ;;  %s15542_s20 = scalar_lea.hbm %s15606_s12, %s7551_s17 }
  0x32   : > { %477 = vst.msk [vmem:[#allocation2 + $0x70] sm:$0xff] %vm462_vm0, %v9746_v0  ;;  %478 = vst.msk [vmem:[#allocation2 + $0x78] sm:$0xff] %vm462_vm0, %v9746_v0  ;;  %v10071_v10 = vld [vmem:[%s10047_s28 + $0x20] sm:$0xff]  ;;  %v10074_v11 = vld [vmem:[%s10047_s28 + $0x28] sm:$0xff] }
  0x33   : > { %479 = vst.msk [vmem:[#allocation2 + $0x80] sm:$0xff] %vm462_vm0, %v9746_v0  ;;  %480 = vst.msk [vmem:[#allocation2 + $0x88] sm:$0xff] %vm462_vm0, %v9746_v0  ;;  %v572_v14 = vld [vmem:[#allocation2 + $0x20] sm:$0xff]  ;;  %v10089_v17 = vld [vmem:[%s10047_s28 + $0x30] sm:$0xff] }
  0x34   : > { %481 = vst.msk [vmem:[#allocation2 + $0x90] sm:$0xff] %vm462_vm0, %v9746_v0  ;;  %482 = vst.msk [vmem:[#allocation2 + $0x98] sm:$0xff] %vm462_vm0, %v9746_v0  ;;  %v10076_v12 = vld [vmem:[#allocation2 + $0x8] sm:$0xff]  ;;  %v10078_v13 = vld [vmem:[#allocation2 + $0x10] sm:$0xff]  ;;  %v694_v28 = vrot.slane %v572_v14, 7 }
  0x35   : > { %483 = vst.msk [vmem:[#allocation2 + $0xa0] sm:$0xff] %vm462_vm0, %v9746_v0  ;;  %484 = vst.msk [vmem:[#allocation2 + $0xa8] sm:$0xff] %vm462_vm0, %v9746_v0  ;;  %v692_v15 = vrot.slane %v10078_v13, 7  ;;  %v15607_v16 = vrot.slane %v10076_v12, 7  ;;  %v10092_v19 = vld [vmem:[%s10047_s28 + $0x38] sm:$0xff]  ;;  %v10097_v20 = vld [vmem:[%s10047_s28 + $0x40] sm:$0xff]  ;;  %v8637_v61 = vpack.i.bf16 %v10078_v13, %v10076_v12 }
  0x36   : > { %485 = vst.msk [vmem:[#allocation2 + $0xb0] sm:$0xff] %vm462_vm0, %v9746_v0  ;;  %486 = vst.msk [vmem:[#allocation2 + $0xb8] sm:$0xff] %vm462_vm0, %v9746_v0  ;;  %v576_v18 = vld [vmem:[#allocation2 + $0x40] sm:$0xff]  ;;  %v818_v21 = vrot.slane %v10076_v12, 1  ;;  %v10103_v22 = vld [vmem:[%s10047_s28 + $0x48] sm:$0xff]  ;;  %v15608_v24 = vrot.slane %v10078_v13, 1 }
  0x37   : > { %487 = vst.msk [vmem:[#allocation2 + $0xc0] sm:$0xff] %vm462_vm0, %v9746_v0  ;;  %488 = vst.msk [vmem:[#allocation2 + $0xc8] sm:$0xff] %vm462_vm0, %v9746_v0  ;;  %v10108_v23 = vld [vmem:[%s10047_s28 + $0x50] sm:$0xff]  ;;  %v10114_v25 = vld [vmem:[%s10047_s28 + $0x58] sm:$0xff]  ;;  %v10124_v27 = vsel %vm688_vm1, %v15607_v16, %v692_v15  ;;  %v699_v29 = vrot.slane %v576_v18, 7 }
  0x38   : > { %489 = vst.msk [vmem:[#allocation2 + $0xd0] sm:$0xff] %vm462_vm0, %v9746_v0  ;;  %490 = vst.msk [vmem:[#allocation2 + $0xd8] sm:$0xff] %vm462_vm0, %v9746_v0  ;;  %v10119_v26 = vld [vmem:[%s10047_s28 + $0x60] sm:$0xff]  ;;  %v10129_v31 = vld [vmem:[%s10047_s28 + $0x68] sm:$0xff]  ;;  %v10139_v33 = vsel %vm817_vm2, %v818_v21, %v15608_v24 }
  0x39   : > { %491 = vst.msk [vmem:[#allocation2 + $0xe0] sm:$0xff] %vm462_vm0, %v9746_v0  ;;  %492 = vst.msk [vmem:[#allocation2 + $0xe8] sm:$0xff] %vm462_vm0, %v9746_v0  ;;  %v580_v30 = vld [vmem:[#allocation2 + $0x60] sm:$0xff]  ;;  %v10134_v32 = vld [vmem:[%s10047_s28 + $0x70] sm:$0xff] }
  0x3a   : > { %493 = vst.msk [vmem:[#allocation2 + $0xf0] sm:$0xff] %vm462_vm0, %v9746_v0  ;;  %494 = vst.msk [vmem:[#allocation2 + $0xf8] sm:$0xff] %vm462_vm0, %v9746_v0  ;;  %v704_v44 = vrot.slane %v580_v30, 7  ;;  %v10163_v46 = vld [vmem:[%s10047_s28 + $0x78] sm:$0xff]  ;;  %v10166_v47 = vld [vmem:[%s10047_s28 + $0x80] sm:$0xff] }
  0x3b   : > { %495 = vst.msk [vmem:[#allocation2 + $0x100] sm:$0xff] %vm462_vm0, %v9746_v0  ;;  %496 = vst.msk [vmem:[#allocation2 + $0x108] sm:$0xff] %vm462_vm0, %v9746_v0  ;;  %v584_v52 = vld [vmem:[#allocation2 + $0x80] sm:$0xff]  ;;  %v10181_v53 = vld [vmem:[%s10047_s28 + $0x88] sm:$0xff] }
  0x3c   : > { %497 = vst.msk [vmem:[#allocation2 + $0x110] sm:$0xff] %vm462_vm0, %v9746_v0  ;;  %498 = vst.msk [vmem:[#allocation2 + $0x118] sm:$0xff] %vm462_vm0, %v9746_v0  ;;  %v10197_v58 = vld [vmem:[%s10047_s28 + $0x90] sm:$0xff]  ;;  %v10202_v60 = vld [vmem:[%s10047_s28 + $0x98] sm:$0xff]  ;;  %v709_v63 = vrot.slane %v584_v52, 7 }
  0x3d   : > { %499 = vst.msk [vmem:[#allocation2 + $0x120] sm:$0xff] %vm462_vm0, %v9746_v0  ;;  %500 = vst.msk [vmem:[#allocation2 + $0x128] sm:$0xff] %vm462_vm0, %v9746_v0  ;;  %v588_v4 = vld [vmem:[#allocation2 + $0xa0] sm:$0xff]  ;;  %v10230_v18 = vld [vmem:[%s10047_s28 + $0xa8] sm:$0xff] }
  0x3e   : > { %501 = vst.msk [vmem:[#allocation2 + $0x130] sm:$0xff] %vm462_vm0, %v9746_v0  ;;  %502 = vst.msk [vmem:[#allocation2 + $0x138] sm:$0xff] %vm462_vm0, %v9746_v0  ;;  %v10225_v14 = vld [vmem:[%s10047_s28 + $0xa0] sm:$0xff]  ;;  %v10235_v21 = vld [vmem:[%s10047_s28 + $0xb0] sm:$0xff] }
  0x3f   : > { %503 = vst.msk [vmem:[#allocation2 + $0x140] sm:$0xff] %vm462_vm0, %v9746_v0  ;;  %504 = vst.msk [vmem:[#allocation2 + $0x148] sm:$0xff] %vm462_vm0, %v9746_v0  ;;  %v592_v52 = vld [vmem:[#allocation2 + $0xc0] sm:$0xff]  ;;  %v10300_v24 = vld [vmem:[%s10047_s28 + $0xf0] sm:$0xff] }
  0x40   : > { %505 = vst.msk [vmem:[#allocation2 + $0x150] sm:$0xff] %vm462_vm0, %v9746_v0  ;;  %506 = vst.msk [vmem:[#allocation2 + $0x158] sm:$0xff] %vm462_vm0, %v9746_v0  ;;  %v719_v16 = vrot.slane %v592_v52, 7 }
  0x41   : > { %507 = vst.msk [vmem:[#allocation2 + $0x160] sm:$0xff] %vm462_vm0, %v9746_v0  ;;  %508 = vst.msk [vmem:[#allocation2 + $0x168] sm:$0xff] %vm462_vm0, %v9746_v0 }
  0x42   : > { %509 = vst.msk [vmem:[#allocation2 + $0x170] sm:$0xff] %vm462_vm0, %v9746_v0  ;;  %510 = vst.msk [vmem:[#allocation2 + $0x178] sm:$0xff] %vm462_vm0, %v9746_v0 }
  0x43   : > { %511 = vst.msk [vmem:[#allocation2 + $0x180] sm:$0xff] %vm462_vm0, %v9746_v0  ;;  %512 = vst.msk [vmem:[#allocation2 + $0x188] sm:$0xff] %vm462_vm0, %v9746_v0 }
  0x44   : > { %513 = vst.msk [vmem:[#allocation2 + $0x190] sm:$0xff] %vm462_vm0, %v9746_v0  ;;  %514 = vst.msk [vmem:[#allocation2 + $0x198] sm:$0xff] %vm462_vm0, %v9746_v0 }
  0x45   : > { %515 = vst.msk [vmem:[#allocation2 + $0x1a0] sm:$0xff] %vm462_vm0, %v9746_v0  ;;  %516 = vst.msk [vmem:[#allocation2 + $0x1a8] sm:$0xff] %vm462_vm0, %v9746_v0 }
  0x46   : > { %517 = vst.msk [vmem:[#allocation2 + $0x1b0] sm:$0xff] %vm462_vm0, %v9746_v0  ;;  %518 = vst.msk [vmem:[#allocation2 + $0x1b8] sm:$0xff] %vm462_vm0, %v9746_v0 }
  0x47   : > { %519 = vst.msk [vmem:[#allocation2 + $0x1c0] sm:$0xff] %vm462_vm0, %v9746_v0  ;;  %520 = vst.msk [vmem:[#allocation2 + $0x1c8] sm:$0xff] %vm462_vm0, %v9746_v0 }
  0x48   : > { %521 = vst.msk [vmem:[#allocation2 + $0x1d0] sm:$0xff] %vm462_vm0, %v9746_v0  ;;  %522 = vst.msk [vmem:[#allocation2 + $0x1d8] sm:$0xff] %vm462_vm0, %v9746_v0 }
  0x49   : > { %523 = vst.msk [vmem:[#allocation2 + $0x1e0] sm:$0xff] %vm462_vm0, %v9746_v0  ;;  %524 = vst.msk [vmem:[#allocation2 + $0x1e8] sm:$0xff] %vm462_vm0, %v9746_v0 }
  0x4a   : > { %525 = vst.msk [vmem:[#allocation2 + $0x1f0] sm:$0xff] %vm462_vm0, %v9746_v0  ;;  %526 = vst.msk [vmem:[#allocation2 + $0x1f8] sm:$0xff] %vm462_vm0, %v9746_v0 }
  0x4b   : > { %527 = vst.msk [vmem:[#allocation2 + $0x200] sm:$0xff] %vm462_vm0, %v9746_v0  ;;  %528 = vst.msk [vmem:[#allocation2 + $0x208] sm:$0xff] %vm462_vm0, %v9746_v0 }
  0x4c   : > { %529 = vst.msk [vmem:[#allocation2 + $0x210] sm:$0xff] %vm462_vm0, %v9746_v0  ;;  %530 = vst.msk [vmem:[#allocation2 + $0x218] sm:$0xff] %vm462_vm0, %v9746_v0 }
  0x4d   : > { %531 = vst.msk [vmem:[#allocation2 + $0x220] sm:$0xff] %vm462_vm0, %v9746_v0  ;;  %532 = vst.msk [vmem:[#allocation2 + $0x228] sm:$0xff] %vm462_vm0, %v9746_v0 }
  0x4e   : > { %533 = vst.msk [vmem:[#allocation2 + $0x230] sm:$0xff] %vm462_vm0, %v9746_v0  ;;  %534 = vst.msk [vmem:[#allocation2 + $0x238] sm:$0xff] %vm462_vm0, %v9746_v0 }
  0x4f   : > { %15911 = vst [vmem:[#allocation10_spill] sm:$0xff] %v10053_v6  ;;  %15912 = vst [vmem:[#allocation11_spill] sm:$0xff] %v10056_v7 }
  0x50   : > { %15913 = vst [vmem:[#allocation12_spill] sm:$0xff] %v10059_v8  ;;  %536 = vst.msk [vmem:[#allocation2 + $0x28] sm:$0xff] %vm462_vm0, %v10053_v6 }
  0x51   : > { %537 = vst.msk [vmem:[#allocation2 + $0x30] sm:$0xff] %vm462_vm0, %v10056_v7  ;;  %15914 = vst [vmem:[#allocation13_spill] sm:$0xff] %v10066_v9 }
  0x52   : > { %538 = vst.msk [vmem:[#allocation2 + $0x48] sm:$0xff] %vm462_vm0, %v10059_v8  ;;  %15915 = vst [vmem:[#allocation14_spill] sm:$0xff] %v10071_v10  ;;  %v9141_v8 = vld [vmem:[%s15596_s2 + $0x20] sm:$0xff]  }
  0x53   : > { %15916 = vst [vmem:[#allocation15_spill] sm:$0xff] %v10074_v11  ;;  %15917 = vst [vmem:[#allocation16_spill] sm:$0xff] %v10076_v12  ;;  %v9162_v12 = vld [vmem:[%s15596_s2 + $0xf0] sm:$0xff]  }
  0x54   : > { %15918 = vst [vmem:[#allocation17_spill] sm:$0xff] %v10078_v13  ;;  %539 = vst.msk [vmem:[#allocation2 + $0x50] sm:$0xff] %vm462_vm0, %v10066_v9 }
  0x55   : > { %540 = vst.msk [vmem:[#allocation2 + $0x68] sm:$0xff] %vm462_vm0, %v10071_v10  ;;  %541 = vst.msk [vmem:[#allocation2 + $0x70] sm:$0xff] %vm462_vm0, %v10074_v11 }
  0x56   : > { %15919 = vst [vmem:[#allocation18_spill] sm:$0xff] %v10089_v17  ;;  %15920 = vst [vmem:[#allocation19_spill] sm:$0xff] %v10092_v19 }
  0x57   : > { %542 = vst.msk [vmem:[#allocation2 + $0x88] sm:$0xff] %vm462_vm0, %v10089_v17  ;;  %15921 = vst [vmem:[#allocation20_spill] sm:$0xff] %v10097_v20  ;;  %v10141_v34 = vld [vmem:[#allocation2 + $0x28] sm:$0xff]  ;;  %v10393_v17 = vld [vmem:[#allocation2 + $0x1a0] sm:$0xff] }
  0x58   : > { %543 = vst.msk [vmem:[#allocation2 + $0x90] sm:$0xff] %vm462_vm0, %v10092_v19  ;;  %15922 = vst [vmem:[#allocation21_spill] sm:$0xff] %v10103_v22  ;;  %v10143_v35 = vld [vmem:[#allocation2 + $0x30] sm:$0xff]  ;;  %v695_v37 = vrot.slane %v10141_v34, 7 }
  0x59   : > { %544 = vst.msk [vmem:[#allocation2 + $0xa8] sm:$0xff] %vm462_vm0, %v10097_v20  ;;  %15923 = vst [vmem:[#allocation22_spill] sm:$0xff] %v10108_v23  ;;  %v10145_v36 = vld [vmem:[#allocation2 + $0x48] sm:$0xff]  ;;  %v697_v38 = vrot.slane %v10143_v35, 7  ;;  %v8647_v62 = vpack.i.bf16 %v10143_v35, %v10141_v34 }
  0x5a   : > { %545 = vst.msk [vmem:[#allocation2 + $0xb0] sm:$0xff] %vm462_vm0, %v10103_v22  ;;  %15924 = vst [vmem:[#allocation23_spill] sm:$0xff] %v10114_v25  ;;  %v700_v40 = vrot.slane %v10145_v36, 7  ;;  %v10169_v48 = vsel %vm688_vm1, %v694_v28, %v695_v37  ;;  %v10240_v28 = vld [vmem:[%s10047_s28 + $0xb8] sm:$0xff] }
  0x5b   : > { %546 = vst.msk [vmem:[#allocation2 + $0xc8] sm:$0xff] %vm462_vm0, %v10108_v23  ;;  %15925 = vst [vmem:[#allocation24_spill] sm:$0xff] %v10119_v26  ;;  %v10153_v39 = vld [vmem:[#allocation2 + $0x50] sm:$0xff]  ;;  %v10172_v49 = vsel %vm688_vm1, %v695_v37, %v697_v38  ;;  %v714_v38 = vrot.slane %v588_v4, 7 }
  0x5c   : > { %15926 = vst [vmem:[#allocation25_spill] sm:$0xff] %v10124_v27  ;;  %547 = vst.msk [vmem:[#allocation2 + $0xd0] sm:$0xff] %vm462_vm0, %v10114_v25  ;;  %v10156_v41 = vld [vmem:[#allocation2 + $0x68] sm:$0xff]  ;;  %v10158_v42 = vld [vmem:[#allocation2 + $0x70] sm:$0xff]  ;;  %v702_v43 = vrot.slane %v10153_v39, 7  ;;  %v10175_v50 = vsel %vm688_vm1, %v699_v29, %v700_v40  ;;  %v8632_v54 = vpack.i.bf16 %v10172_v49, %v10169_v48  ;;  %v8657_v37 = vpack.i.bf16 %v10153_v39, %v10145_v36 }
  0x5d   : > { %15927 = vst [vmem:[#allocation26_spill] sm:$0xff] %v10129_v31  ;;  %548 = vst.msk [vmem:[#allocation2 + $0xe8] sm:$0xff] %vm462_vm0, %v10119_v26  ;;  %v705_v45 = vrot.slane %v10156_v41, 7  ;;  %v707_v51 = vrot.slane %v10158_v42, 7  ;;  %v10245_v29 = vld [vmem:[%s10047_s28 + $0xc0] sm:$0xff]  ;;  %v8667_v4 = vpack.i.bf16 %v10158_v42, %v10156_v41  ;;  %v9138_v25 = vld [vmem:[%s15596_s2 + $0x58] sm:$0xff]  }
  0x5e   : > { %15928 = vst [vmem:[#allocation27_spill] sm:$0xff] %v10134_v32  ;;  %15929 = vst [vmem:[#allocation28_spill] sm:$0xff] %v10139_v33  ;;  %v10188_v55 = vsel %vm688_vm1, %v700_v40, %v702_v43  ;;  %v10190_v56 = vld [vmem:[#allocation2 + $0x88] sm:$0xff]  ;;  %8633 = vrot.lane.b32.xlu0 %v8632_v54, %s9747_s0  ;;  %v10271_v54 = vld [vmem:[%s10047_s28 + $0xd0] sm:$0xff] }
  0x5f   : > { %549 = vst.msk [vmem:[#allocation2 + $0xf0] sm:$0xff] %vm462_vm0, %v10129_v31  ;;  %550 = vst.msk [vmem:[#allocation2 + $0x108] sm:$0xff] %vm462_vm0, %v10134_v32  ;;  %v10192_v57 = vld [vmem:[#allocation2 + $0x90] sm:$0xff]  ;;  %v8642_v59 = vpack.i.bf16 %v10188_v55, %v10175_v50  ;;  %v10215_v0 = vsel %vm688_vm1, %v704_v44, %v705_v45  ;;  %v10218_v1 = vsel %vm688_vm1, %v705_v45, %v707_v51  ;;  %v710_v2 = vrot.slane %v10190_v56, 7  ;;  %v10255_v40 = vld [vmem:[%s10047_s28 + $0xc8] sm:$0xff] }
  0x60   : > { %15930 = vst [vmem:[#allocation29_spill] sm:$0xff] %v10163_v46  ;;  %15931 = vst [vmem:[#allocation30_spill] sm:$0xff] %v10166_v47  ;;  %v712_v3 = vrot.slane %v10192_v57, 7  ;;  %v10222_v5 = vld [vmem:[#allocation2 + $0xa8] sm:$0xff]  ;;  %v8652_v30 = vpack.i.bf16 %v10218_v1, %v10215_v0  ;;  %v10626_v27 = vld [vmem:[#allocation2 + $0x178] sm:$0xff] }
  0x61   : > { %15932 = vst [vmem:[#allocation31_spill] sm:$0xff] %v10169_v48  ;;  %15933 = vst [vmem:[#allocation32_spill] sm:$0xff] %v10172_v49  ;;  %8643 = vrot.lane.b32.xlu1 %v8642_v59, %s9747_s0  ;;  %v10227_v15 = vld [vmem:[#allocation2 + $0xb0] sm:$0xff]  ;;  %v10261_v43 = vsel %vm688_vm1, %v709_v63, %v710_v2  ;;  %v715_v45 = vrot.slane %v10222_v5, 7  ;;  %v10285_v63 = vld [vmem:[%s10047_s28 + $0xe0] sm:$0xff] }
  0x62   : > { %15934 = vst [vmem:[#allocation33_spill] sm:$0xff] %v10175_v50  ;;  %551 = vst.msk [vmem:[#allocation2 + $0x110] sm:$0xff] %vm462_vm0, %v10163_v46  ;;  %8638 = vrot.lane.b32.xlu0 %v8637_v61, %s9747_s0  ;;  %v10264_v44 = vsel %vm688_vm1, %v710_v2, %v712_v3  ;;  %v717_v51 = vrot.slane %v10227_v15, 7  ;;  %v10273_v59 = vld [vmem:[#allocation2 + $0xc8] sm:$0xff]  ;;  %v8687_v20 = vpack.i.bf16 %v10227_v15, %v10222_v5  ;;  %v10546_v50 = vld [vmem:[#allocation2 + $0xf8] sm:$0xff] }
  0x63   : > { %15935 = vst [vmem:[#allocation34_spill] sm:$0xff] %v10181_v53  ;;  %552 = vst.msk [vmem:[#allocation2 + $0x128] sm:$0xff] %vm462_vm0, %v10166_v47  ;;  %v10275_v61 = vld [vmem:[#allocation2 + $0xd0] sm:$0xff]  ;;  %v10288_v2 = vld [vmem:[%s10047_s28 + $0xe8] sm:$0xff]  ;;  %v8662_v3 = vpack.i.bf16 %v10264_v44, %v10261_v43  ;;  %v720_v52 = vrot.slane %v10273_v59, 7 }
  0x64   : > { %15936 = vst [vmem:[#allocation35_spill] sm:$0xff] %v10188_v55  ;;  %553 = vst.msk [vmem:[#allocation2 + $0x130] sm:$0xff] %vm462_vm0, %v10181_v53  ;;  %v10342_v53 = vld [vmem:[#allocation2 + $0x140] sm:$0xff] }
  0x65   : > { %15937 = vst [vmem:[#allocation36_spill] sm:$0xff] %v10197_v58  ;;  %15938 = vst [vmem:[#allocation37_spill] sm:$0xff] %v10202_v60  ;;  %8648 = vrot.lane.b32.xlu1 %v8647_v62, %s9747_s0  ;;  %v10278_v62 = vld [vmem:[%s10047_s28 + $0xd8] sm:$0xff] }
  0x66   : > { %554 = vst.msk [vmem:[#allocation2 + $0x148] sm:$0xff] %vm462_vm0, %v10197_v58  ;;  %555 = vst.msk [vmem:[#allocation2 + $0x150] sm:$0xff] %vm462_vm0, %v10202_v60  ;;  %8653 = vrot.lane.b32.xlu0 %v8652_v30, %s9747_s0  ;;  %v10307_v30 = vsel %vm688_vm1, %v714_v38, %v715_v45  ;;  %v600_v38 = vld [vmem:[#allocation2 + $0x100] sm:$0xff] }
  0x67   : > { %15939 = vst [vmem:[#allocation38_spill] sm:$0xff] %v10215_v0  ;;  %15940 = vst [vmem:[#allocation39_spill] sm:$0xff] %v10218_v1  ;;  %v10471_v1 = vld [vmem:[#allocation2 + $0x58] sm:$0xff] }
  0x68   : > { %15941 = vst [vmem:[#allocation40_spill] sm:$0xff] %v10225_v14  ;;  %15942 = vst [vmem:[#allocation41_spill] sm:$0xff] %v10230_v18  ;;  %v9147_v0 = vld [vmem:[%s15596_s2 + $0x38] sm:$0xff]  }
  0x69   : > { %556 = vst.msk [vmem:[#allocation2 + $0x168] sm:$0xff] %vm462_vm0, %v10225_v14  ;;  %15943 = vst [vmem:[#allocation42_spill] sm:$0xff] %v10235_v21  ;;  %8658 = vrot.lane.b32.xlu1 %v8657_v37, %s9747_s0  ;;  %v10320_v37 = vld [vmem:[#allocation2 + $0xf0] sm:$0xff]  ;;  %v604_v14 = vld [vmem:[#allocation2 + $0x120] sm:$0xff] }
  0x6a   : > { %557 = vst.msk [vmem:[#allocation2 + $0x170] sm:$0xff] %vm462_vm0, %v10230_v18  ;;  %15944 = vst [vmem:[#allocation43_spill] sm:$0xff] %v10240_v28  ;;  %8663 = vrot.lane.b32.xlu0 %v8662_v3, %s9747_s0  ;;  %v10326_v18 = vld [vmem:[#allocation2 + $0x108] sm:$0xff]  ;;  %v8677_v3 = vpack.i.bf16 %v10192_v57, %v10190_v56  ;;  %v734_v46 = vrot.slane %v604_v14, 7 }
  0x6b   : > { %558 = vst.msk [vmem:[#allocation2 + $0x188] sm:$0xff] %vm462_vm0, %v10235_v21  ;;  %15945 = vst [vmem:[#allocation44_spill] sm:$0xff] %v10245_v29  ;;  %v10340_v21 = vld [vmem:[#allocation2 + $0x128] sm:$0xff]  ;;  %v10344_v60 = vld [vmem:[#allocation2 + $0x130] sm:$0xff]  ;;  %v730_v47 = vrot.slane %v10326_v18, 7 }
  0x6c   : > { %559 = vst.msk [vmem:[#allocation2 + $0x190] sm:$0xff] %vm462_vm0, %v10240_v28  ;;  %15946 = vst [vmem:[#allocation45_spill] sm:$0xff] %v10255_v40  ;;  %v10328_v28 = vld [vmem:[#allocation2 + $0x110] sm:$0xff]  ;;  %v735_v26 = vrot.slane %v10340_v21, 7  ;;  %v737_v23 = vrot.slane %v10344_v60, 7 }
  0x6d   : > { %560 = vst.msk [vmem:[#allocation2 + $0x1a8] sm:$0xff] %vm462_vm0, %v10245_v29  ;;  %15947 = vst [vmem:[#allocation46_spill] sm:$0xff] %v10261_v43  ;;  %v722_v29 = vrot.slane %v10275_v61, 7  ;;  %8668 = vrot.lane.b32.xlu1 %v8667_v4, %s9747_s0  ;;  %v9137_v4 = vld [vmem:[%s15596_s2 + $0x10] sm:$0xff]   ;;  %v732_v31 = vrot.slane %v10328_v28, 7  ;;  %v10446_v43 = vld [vmem:[#allocation2 + $0x200] sm:$0xff] }
  0x6e   : > { %15948 = vst [vmem:[#allocation47_spill] sm:$0xff] %v10264_v44  ;;  %561 = vst.msk [vmem:[#allocation2 + $0x1b0] sm:$0xff] %vm462_vm0, %v10255_v40  ;;  %v10303_v40 = vld [vmem:[%s10047_s28 + $0xf8] sm:$0xff]  ;;  %v10359_v32 = vld [vmem:[#allocation2 + $0x150] sm:$0xff]  ;;  %7557 = vmatpush3.bf16.msra.mxu0 %v9137_v4  ;;  %v739_v4 = vrot.slane %v10342_v53, 7  ;;  %v10433_v9 = vsel %vm688_vm1, %v735_v26, %v737_v23  ;;  %s9748_s28 = smov 120  }
  0x6f   : > { %15949 = vst [vmem:[#allocation48_spill] sm:$0xff] %v10271_v54  ;;  %15950 = vst [vmem:[#allocation49_spill] sm:$0xff] %v10278_v62  ;;  %7558 = vmatprep.subr.bf16.mxu0 %v9138_v25  ;;  %v8697_v25 = vpack.i.bf16 %v10275_v61, %v10273_v59  ;;  %v9144_v44 = vld [vmem:[%s15596_s2 + $0x70] sm:$0xff]  }
  0x70   : > { %562 = vst.msk [vmem:[#allocation2 + $0x1c8] sm:$0xff] %vm462_vm0, %v10271_v54  ;;  %563 = vst.msk [vmem:[#allocation2 + $0x1d0] sm:$0xff] %vm462_vm0, %v10278_v62  ;;  %v10310_v62 = vsel %vm688_vm1, %v715_v45, %v717_v51  ;;  %v10314_v54 = vld [vmem:[#allocation2 + $0xe8] sm:$0xff] }
  0x71   : > { %15951 = vst [vmem:[#allocation50_spill] sm:$0xff] %v10285_v63  ;;  %15952 = vst [vmem:[#allocation51_spill] sm:$0xff] %v10288_v2  ;;  %v8672_v45 = vpack.i.bf16 %v10310_v62, %v10307_v30  ;;  %v10361_v22 = vld [vmem:[#allocation2 + $0x168] sm:$0xff]  ;;  %8678 = vrot.lane.b32.xlu1 %v8677_v3, %s9747_s0  ;;  %v10378_v11 = vld [vmem:[#allocation2 + $0x170] sm:$0xff] }
  0x72   : > { %564 = vst.msk [vmem:[#allocation2 + $0x1e8] sm:$0xff] %vm462_vm0, %v10285_v63  ;;  %565 = vst.msk [vmem:[#allocation2 + $0x1f0] sm:$0xff] %vm462_vm0, %v10288_v2  ;;  %v596_v63 = vld [vmem:[#allocation2 + $0xe0] sm:$0xff]  ;;  %v725_v2 = vrot.slane %v10314_v54, 7  ;;  %v10382_v10 = vld [vmem:[#allocation2 + $0x188] sm:$0xff] }
  0x73   : > { %15953 = vst [vmem:[#allocation52_spill] sm:$0xff] %v10300_v24  ;;  %15954 = vst [vmem:[#allocation53_spill] sm:$0xff] %v10303_v40  ;;  %v724_v51 = vrot.slane %v596_v63, 7  ;;  %v727_v63 = vrot.slane %v10320_v37, 7  ;;  %8673 = vrot.lane.b32.xlu0 %v8672_v45, %s9747_s0  ;;  %v10384_v3 = vld [vmem:[#allocation2 + $0x190] sm:$0xff] }
  0x74   : > { %15955 = vst [vmem:[#allocation54_spill] sm:$0xff] %v10307_v30  ;;  %15956 = vst [vmem:[#allocation55_spill] sm:$0xff] %v10310_v62  ;;  %v10395_v53 = vld [vmem:[#allocation2 + $0x1a8] sm:$0xff] }
  0x75   : > { %566 = vst.msk [vmem:[#allocation2 + $0x208] sm:$0xff] %vm462_vm0, %v10300_v24  ;;  %567 = vst.msk [vmem:[#allocation2 + $0x210] sm:$0xff] %vm462_vm0, %v10303_v40  ;;  %v10332_v40 = vsel %vm688_vm1, %v719_v16, %v720_v52  ;;  %v10335_v24 = vsel %vm688_vm1, %v720_v52, %v722_v29  ;;  %v729_v16 = vrot.slane %v600_v38, 7  ;;  %v10350_v29 = vld [vmem:[#allocation2 + $0x148] sm:$0xff]  ;;  %v10352_v52 = vld [vmem:[#allocation2 + $0x160] sm:$0xff]  ;;  %v10370_v45 = vsel %vm688_vm1, %v724_v51, %v725_v2 }
  0x76   : > { %15957 = vst [vmem:[#allocation56_spill] sm:$0xff] %v10332_v40  ;;  %15958 = vst [vmem:[#allocation57_spill] sm:$0xff] %v10335_v24  ;;  %v8682_v58 = vpack.i.bf16 %v10335_v24, %v10332_v40  ;;  %v10363_v38 = vld [vmem:[#allocation2 + $0x180] sm:$0xff]  ;;  %v10373_v14 = vsel %vm688_vm1, %v725_v2, %v727_v63  ;;  %v740_v19 = vrot.slane %v10350_v29, 7  ;;  %v9139_v2 = vld [vmem:[%s15596_s2 + $0x18] sm:$0xff]   ;;  %v742_v63 = vrot.slane %v10359_v32, 7  ;;  %8688 = vrot.lane.b32.xlu1 %v8687_v20, %s9747_s0 }
  0x77   : > { %15959 = vst [vmem:[#allocation58_spill] sm:$0xff] %v10370_v45  ;;  %15960 = vst [vmem:[#allocation59_spill] sm:$0xff] %v10373_v14  ;;  %v9140_v51 = vld [vmem:[%s15596_s2 + $0x60] sm:$0xff]   ;;  %v8692_v7 = vpack.i.bf16 %v10373_v14, %v10370_v45  ;;  %v10402_v6 = vld [vmem:[#allocation2 + $0x1b0] sm:$0xff]  ;;  %7559 = vmatpush3.bf16.msra.mxu0 %v9139_v2  ;;  %v10409_v24 = vsel %vm688_vm1, %v729_v16, %v730_v47  ;;  %v15975_v49 = vrot.slane %v10363_v38, 7 }
  0x78   : > { %8683 = vrot.lane.b32.xlu0 %v8682_v58, %s9747_s0  ;;  %15961 = vst [vmem:[#allocation60_spill] sm:$0xff] %v10409_v24  ;;  %v10412_v58 = vsel %vm688_vm1, %v730_v47, %v732_v31  ;;  %v10417_v14 = vld [vmem:[#allocation2 + $0x1c0] sm:$0xff]  ;;  %7560 = vmatprep.subr.bf16.mxu0 %v9140_v51  ;;  %v9142_v2 = vld [vmem:[%s15596_s2 + $0x68] sm:$0xff]   ;;  %v10425_v16 = vld [vmem:[#allocation2 + $0x1d0] sm:$0xff]  ;;  %v10430_v47 = vsel %vm688_vm1, %v734_v46, %v735_v26 }
  0x79   : > { %15962 = vst [vmem:[#allocation61_spill] sm:$0xff] %v10412_v58  ;;  %v10423_v45 = vld [vmem:[#allocation2 + $0x1c8] sm:$0xff]  ;;  %v10427_v31 = vld [vmem:[#allocation2 + $0x1e0] sm:$0xff]  ;;  %15963 = vst [vmem:[#allocation62_spill] sm:$0xff] %v10430_v47  ;;  %v8702_v20 = vpack.i.bf16 %v10412_v58, %v10409_v24  ;;  %v8712_v46 = vpack.i.bf16 %v10433_v9, %v10430_v47  ;;  %v8717_v58 = vpack.i.bf16 %v10328_v28, %v10326_v18 }
  0x7a   : > { %15964 = vst [vmem:[#allocation63_spill] sm:$0xff] %v10433_v9  ;;  %v10437_v62 = vld [vmem:[#allocation2 + $0x1e8] sm:$0xff]  ;;  %v10439_v30 = vld [vmem:[#allocation2 + $0x1f0] sm:$0xff]  ;;  %8698 = vrot.lane.b32.xlu1 %v8697_v25, %s9747_s0  ;;  %v10475_v9 = vsel %vm688_vm1, %v739_v4, %v740_v19  ;;  %v10500_v4 = vld [vmem:[#allocation2 + $0x98] sm:$0xff]  ;;  %v15969_v25 = vrot.slane %v10352_v52, 7 }
  0x7b   : > { %7561 = vmatpush3.bf16.msra.mxu0 %v9141_v8  ;;  %v9143_v26 = vld [vmem:[%s15596_s2 + $0x28] sm:$0xff]   ;;  %15965 = vst [vmem:[#allocation64_spill] sm:$0xff] %v10475_v9  ;;  %v10478_v8 = vsel %vm688_vm1, %v740_v19, %v742_v63  ;;  %v9145_v24 = vld [vmem:[%s15596_s2 + $0x30] sm:$0xff]   ;;  %v10491_v63 = vld [vmem:[#allocation2 + $0x78] sm:$0xff]  ;;  %v15968_v19 = vrot.slane %v10361_v22, 7 }
  0x7c   : > { %8693 = vrot.lane.b32.xlu0 %v8692_v7, %s9747_s0  ;;  %v10448_v23 = vld [vmem:[#allocation2 + $0x208] sm:$0xff]  ;;  %v8707_v7 = vpack.i.bf16 %v10320_v37, %v10314_v54  ;;  %7562 = vmatprep.subr.bf16.mxu0 %v9142_v2  ;;  %v10463_v51 = vld [vmem:[#allocation2 + $0x210] sm:$0xff]  ;;  %v10469_v2 = vld [vmem:[#allocation2 + $0x38] sm:$0xff]  ;;  %15966 = vst [vmem:[#allocation65_spill] sm:$0xff] %v10478_v8 }
  0x7d   : > { %v10502_v40 = vld [vmem:[#allocation2 + $0xb8] sm:$0xff]  ;;  %v9149_v47 = vld [vmem:[%s15596_s2 + $0xc0] sm:$0xff]   ;;  %v10527_v55 = vsel %vm688_vm1, %v15969_v25, %v15968_v19  ;;  %v9152_v25 = vld [vmem:[%s15596_s2 + $0x88] sm:$0xff]  }
  0x7e   : > { %8708 = vrot.lane.b32.xlu1 %v8707_v7, %s9747_s0  ;;  %v8722_v7 = vpack.i.bf16 %v10478_v8, %v10475_v9  ;;  %15970 = vst [vmem:[#allocation67_spill] sm:$0xff] %v10527_v55  ;;  %v15972_v8 = vmov %v15968_v19  ;;  %v9150_v52 = vld [vmem:[%s15596_s2 + $0x80] sm:$0xff]   ;;  %7664 = vmatprep.subr.bf16.mxu1 %v9149_v47  ;;  %v15977_v19 = vrot.slane %v10384_v3, 7  ;;  %v9153_v38 = vld [vmem:[%s15596_s2 + $0xd0] sm:$0xff]  }
  0x7f   : > { %7563 = vmatpush3.bf16.msra.mxu0 %v9143_v26  ;;  %v9146_v26 = vld [vmem:[%s15596_s2 + $0x78] sm:$0xff]   ;;  %7665 = vmatpush3.bf16.msra.mxu1 %v9150_v52  ;;  %v15974_v52 = vrot.slane %v10382_v10, 7 }
  0x80   : > { %8703 = vrot.lane.b32.xlu0 %v8702_v20, %s9747_s0  ;;  %7564 = vmatprep.subr.bf16.mxu0 %v9144_v44  ;;  %v10519_v44 = vld [vmem:[%s15596_s2 + $0x100] sm:$0xff]   ;;  %v8727_v20 = vpack.i.bf16 %v10344_v60, %v10340_v21 }
  0x81   : > { %15967 = vst [vmem:[#allocation66_spill] sm:$0xff] %v10519_v44  ;;  %v10570_v9 = vsel %vm688_vm1, %v15975_v49, %v15974_v52 }
  0x82   : > { %8718 = vrot.lane.b32.xlu1 %v8717_v58, %s9747_s0  ;;  %v10539_v58 = vld [vmem:[#allocation2 + $0xd8] sm:$0xff]  ;;  %15976 = vst [vmem:[#allocation69_spill] sm:$0xff] %v10570_v9 }
  0x83   : > { %7565 = vmatpush3.bf16.msra.mxu0 %v9145_v24 }
  0x84   : > { %8713 = vrot.lane.b32.xlu0 %v8712_v46, %s9747_s0  ;;  %v15971_v46 = vrot.slane %v10378_v11, 7  ;;  %7566 = vmatprep.subr.bf16.mxu0 %v9146_v26  ;;  %v9151_v26 = vld [vmem:[%s15596_s2 + $0xc8] sm:$0xff]  }
  0x85   : > { %7666 = vmatprep.subr.bf16.mxu1 %v9151_v26 }
  0x86   : > { %v10534_v24 = vsel %vm688_vm1, %v15972_v8, %v15971_v46  ;;  %v10562_v8 = vld [vmem:[#allocation2 + $0x118] sm:$0xff]  ;;  %8728 = vrot.lane.b32.xlu1 %v8727_v20, %s9747_s0  ;;  %v8737_v46 = vpack.i.bf16 %v10359_v32, %v10350_v29  ;;  %7667 = vmatpush3.bf16.msra.mxu1 %v9152_v25  ;;  %v8747_v20 = vpack.i.bf16 %v10378_v11, %v10361_v22 }
  0x87   : > { %15973 = vst [vmem:[#allocation68_spill] sm:$0xff] %v10534_v24  ;;  %v8732_v47 = vpack.i.bf16 %v10534_v24, %v10527_v55  ;;  %7567 = vmatpush3.bf16.msra.mxu0 %v9147_v0  ;;  %v9154_v0 = vld [vmem:[%s15596_s2 + $0x90] sm:$0xff]   ;;  %7668 = vmatprep.subr.bf16.mxu1 %v9153_v38  ;;  %v9155_v25 = vld [vmem:[%s15596_s2 + $0xd8] sm:$0xff]  }
  0x88   : > { %8723 = vrot.lane.b32.xlu0 %v8722_v7, %s9747_s0  ;;  %v15978_v7 = vmov %v15974_v52  ;;  %8400 = vmatprep.subr.bf16.mxu0 %v10519_v44  ;;  %v10601_v52 = vld [vmem:[#allocation2 + $0x158] sm:$0xff]  ;;  %v15989_v44 = vrot.slane %v10425_v16, 7 }
  0x89   : > { %v10577_v24 = vsel %vm688_vm1, %v15978_v7, %v15977_v19  ;;  %v10590_v7 = vld [vmem:[#allocation2 + $0x138] sm:$0xff]  ;;  %v15980_v19 = vrot.slane %v10395_v53, 7 }
  0x8a   : > { %15979 = vst [vmem:[#allocation70_spill] sm:$0xff] %v10577_v24  ;;  %v8742_v55 = vpack.i.bf16 %v10577_v24, %v10570_v9  ;;  %8738 = vrot.lane.b32.xlu1 %v8737_v46, %s9747_s0  ;;  %v15983_v24 = vrot.slane %v10402_v6, 7  ;;  %7669 = vmatpush3.bf16.msra.mxu1 %v9154_v0  ;;  %v9157_v0 = vld [vmem:[%s15596_s2 + $0xe0] sm:$0xff]  }
  0x8b   : > { %v15984_v26 = vmov %v15980_v19  ;;  %7670 = vmatprep.subr.bf16.mxu1 %v9155_v25  ;;  %v15998_v25 = vrot.slane %v10448_v23, 7 }
  0x8c   : > { %8733 = vrot.lane.b32.xlu0 %v8732_v47, %s9747_s0  ;;  %v15981_v47 = vrot.slane %v10393_v17, 7  ;;  %v10619_v9 = vsel %vm688_vm1, %v15984_v26, %v15983_v24  ;;  %v9156_v24 = vld [vmem:[%s15596_s2 + $0x98] sm:$0xff]  }
  0x8d   : > { %15985 = vst [vmem:[#allocation72_spill] sm:$0xff] %v10619_v9  ;;  %v10638_v17 = vld [vmem:[#allocation2 + $0x198] sm:$0xff]  ;;  %v16002_v13 = vmov %v15998_v25 }
  0x8e   : > { %v10612_v49 = vsel %vm688_vm1, %v15981_v47, %v15980_v19  ;;  %v8757_v47 = vpack.i.bf16 %v10384_v3, %v10382_v10  ;;  %8748 = vrot.lane.b32.xlu1 %v8747_v20, %s9747_s0  ;;  %v15986_v19 = vrot.slane %v10423_v45, 7  ;;  %7671 = vmatpush3.bf16.msra.mxu1 %v9156_v24  ;;  %v635_v20 = vld [vmem:[#allocation2 + $0x218] sm:$0xff] }
  0x8f   : > { %15982 = vst [vmem:[#allocation71_spill] sm:$0xff] %v10612_v49  ;;  %v8752_v26 = vpack.i.bf16 %v10619_v9, %v10612_v49  ;;  %v15995_v49 = vrot.slane %v10439_v30, 7  ;;  %7672 = vmatprep.subr.bf16.mxu1 %v9157_v0  ;;  %v942_v33 = vrot.slane %v635_v20, 1  ;;  %v16006_v20 = vrot.slane %v10143_v35, 1 }
  0x90   : > { %8743 = vrot.lane.b32.xlu0 %v8742_v55, %s9747_s0  ;;  %v15987_v55 = vrot.slane %v10417_v14, 7  ;;  %v15990_v46 = vmov %v15986_v19 }
  0x91   : > { %v10656_v38 = vsel %vm688_vm1, %v15990_v46, %v15989_v44  ;;  %v15992_v46 = vrot.slane %v10437_v62, 7 }
  0x92   : > { %v10649_v48 = vsel %vm688_vm1, %v15987_v55, %v15986_v19  ;;  %15991 = vst [vmem:[#allocation74_spill] sm:$0xff] %v10656_v38  ;;  %v9158_v19 = vld [vmem:[%s15596_s2 + $0xa0] sm:$0xff]   ;;  %v15993_v55 = vrot.slane %v10427_v31, 7  ;;  %8758 = vrot.lane.b32.xlu1 %v8757_v47, %s9747_s0  ;;  %v8767_v31 = vpack.i.bf16 %v10402_v6, %v10395_v53  ;;  %v9161_v47 = vld [vmem:[%s15596_s2 + $0xa8] sm:$0xff]  }
  0x93   : > { %15988 = vst [vmem:[#allocation73_spill] sm:$0xff] %v10649_v48  ;;  %v8762_v44 = vpack.i.bf16 %v10656_v38, %v10649_v48  ;;  %v15996_v24 = vmov %v15992_v46  ;;  %7673 = vmatpush3.bf16.msra.mxu1 %v9158_v19  ;;  %v940_v38 = vrot.slane %v10463_v51, 1  ;;  %v15999_v48 = vrot.slane %v10446_v43, 7 }
  0x94   : > { %8753 = vrot.lane.b32.xlu0 %v8752_v26, %s9747_s0  ;;  %v10674_v9 = vsel %vm688_vm1, %v15993_v55, %v15992_v46  ;;  %v10681_v14 = vsel %vm688_vm1, %v15996_v24, %v15995_v49  ;;  %v9159_v26 = vld [vmem:[%s15596_s2 + $0xe8] sm:$0xff]   ;;  %v10691_v55 = vld [vmem:[#allocation2 + $0x1b8] sm:$0xff]  ;;  %v8777_v24 = vpack.i.bf16 %v10425_v16, %v10423_v45  ;;  %v939_v46 = vrot.slane %v10448_v23, 1 }
  0x95   : > { %15994 = vst [vmem:[#allocation75_spill] sm:$0xff] %v10674_v9  ;;  %15997 = vst [vmem:[#allocation76_spill] sm:$0xff] %v10681_v14  ;;  %v10694_v49 = vld [vmem:[#allocation2 + $0x1d8] sm:$0xff]  ;;  %v8772_v0 = vpack.i.bf16 %v10681_v14, %v10674_v9  ;;  %v10711_v14 = vsel %vm688_vm1, %v15999_v48, %v15998_v25  ;;  %7674 = vmatprep.subr.bf16.mxu1 %v9159_v26  ;;  %v889_v25 = vrot.slane %v10425_v16, 1  ;;  %v9163_v9 = vld [vmem:[%s15596_s2 + $0xb0] sm:$0xff]  }
  0x96   : > { %16000 = vst [vmem:[#allocation77_spill] sm:$0xff] %v10711_v14  ;;  %8768 = vrot.lane.b32.xlu1 %v8767_v31, %s9747_s0  ;;  %v9164_v31 = vld [vmem:[%s15596_s2 + $0xf8] sm:$0xff]   ;;  %v10737_v19 = vsel %vm817_vm2, %v939_v46, %v940_v38  ;;  %v16007_v46 = vrot.slane %v10141_v34, 1  ;;  %v16011_v34 = vrot.slane %v10145_v36, 1 }
  0x97   : > { %16004 = vst [vmem:[#allocation79_spill] sm:$0xff] %v10737_v19  ;;  %7675 = vmatpush3.bf16.msra.mxu1 %v9161_v47 }
  0x98   : > { %8763 = vrot.lane.b32.xlu0 %v8762_v44, %s9747_s0  ;;  %v16001_v44 = vrot.slane %v10463_v51, 7  ;;  %7676 = vmatprep.subr.bf16.mxu1 %v9162_v12  ;;  %v10753_v48 = vsel %vm817_vm2, %v16007_v46, %v16006_v20  ;;  %v9165_v12 = vld [vmem:[%s15596_s2 + $0xb8] sm:$0xff]  }
  0x9a   : > { %v10724_v43 = vsel %vm688_vm1, %v16002_v13, %v16001_v44  ;;  %v10740_v13 = vsel %vm817_vm2, %v940_v38, %v942_v33  ;;  %8778 = vrot.lane.b32.xlu1 %v8777_v24, %s9747_s0  ;;  %v16008_v33 = vrot.slane %v10469_v2, 1  ;;  %v16009_v38 = vmov %v16006_v20 }
  0x9b   : > { %16003 = vst [vmem:[#allocation78_spill] sm:$0xff] %v10724_v43  ;;  %16005 = vst [vmem:[#allocation80_spill] sm:$0xff] %v10740_v13  ;;  %v8782_v26 = vpack.i.bf16 %v10724_v43, %v10711_v14  ;;  %v16010_v24 = vrot.slane %v10153_v39, 1  ;;  %v16012_v2 = vrot.slane %v10471_v1, 1  ;;  %7677 = vmatpush3.bf16.msra.mxu1 %v9163_v9  ;;  %v16015_v1 = vrot.slane %v10156_v41, 1  ;;  %v639_v14 = vld [vmem:[#allocation2 + $0x238] sm:$0xff] }
  0x9c   : > { %8773 = vrot.lane.b32.xlu0 %v8772_v0, %s9747_s0  ;;  %v10760_v47 = vsel %vm817_vm2, %v16009_v38, %v16008_v33  ;;  %v8787_v0 = vpack.i.bf16 %v10439_v30, %v10437_v62  ;;  %7678 = vmatprep.subr.bf16.mxu1 %v9164_v31  ;;  %v16014_v38 = vrot.slane %v10158_v42, 1  ;;  %v16016_v9 = vrot.slane %v10491_v63, 1 }
  0x9d   : > { %v10772_v20 = vsel %vm817_vm2, %v16011_v34, %v16010_v24  ;;  %v16013_v35 = vmov %v16010_v24  ;;  %v8792_v33 = vpack.i.bf16 %v10760_v47, %v10753_v48  ;;  %v16018_v31 = vrot.slane %v10192_v57, 1 }
  0x9e   : > { %v10779_v46 = vsel %vm817_vm2, %v16013_v35, %v16012_v2  ;;  %8788 = vrot.lane.b32.xlu1 %v8787_v0, %s9747_s0  ;;  %v10792_v39 = vsel %vm817_vm2, %v16015_v1, %v16014_v38  ;;  %v16019_v0 = vrot.slane %v10190_v56, 1  ;;  %v16020_v2 = vrot.slane %v10500_v4, 1 }
  0x9f   : > { %v8797_v36 = vpack.i.bf16 %v10779_v46, %v10772_v20  ;;  %v16021_v41 = vmov %v16018_v31  ;;  %7679 = vmatpush3.bf16.msra.mxu1 %v9165_v12  ;;  %v16022_v63 = vrot.slane %v10227_v15, 1  ;;  %v16023_v4 = vrot.slane %v10222_v5, 1 }
  0xa0   : > { %8783 = vrot.lane.b32.xlu0 %v8782_v26, %s9747_s0  ;;  %v16017_v26 = vmov %v16014_v38  ;;  %v10806_v34 = vsel %vm817_vm2, %v16019_v0, %v16018_v31  ;;  %v10813_v35 = vsel %vm817_vm2, %v16021_v41, %v16020_v2  ;;  %v16024_v38 = vrot.slane %v10502_v40, 1 }
  0xa1   : > { %v10799_v24 = vsel %vm817_vm2, %v16017_v26, %v16016_v9  ;;  %v8807_v56 = vpack.i.bf16 %v10813_v35, %v10806_v34  ;;  %v10826_v57 = vsel %vm817_vm2, %v16023_v4, %v16022_v63  ;;  %v16025_v12 = vmov %v16022_v63 }
  0xa2   : > { %v8802_v42 = vpack.i.bf16 %v10799_v24, %v10792_v39  ;;  %8798 = vrot.lane.b32.xlu1 %v8797_v36, %s9747_s0  ;;  %v16026_v1 = vrot.slane %v10275_v61, 1  ;;  %v16027_v36 = vrot.slane %v10273_v59, 1  ;;  %v16029_v26 = vrot.slane %v10539_v58, 1 }
  0xa3   : > { %v16032_v59 = vrot.slane %v10320_v37, 1  ;;  %v16033_v0 = vrot.slane %v10314_v54, 1  ;;  %v16035_v61 = vrot.slane %v10546_v50, 1  ;;  %v16041_v4 = vrot.slane %v10562_v8, 1  ;;  %v631_v50 = vld [vmem:[#allocation2 + $0x1f8] sm:$0xff] }
  0xa4   : > { %8793 = vrot.lane.b32.xlu0 %v8792_v33, %s9747_s0  ;;  %v10833_v33 = vsel %vm817_vm2, %v16025_v12, %v16024_v38  ;;  %v10840_v9 = vsel %vm817_vm2, %v16027_v36, %v16026_v1  ;;  %v16030_v5 = vmov %v16026_v1  ;;  %v16044_v12 = vrot.slane %v10344_v60, 1 }
  0xa5   : > { %16028 = vst [vmem:[#allocation81_spill] sm:$0xff] %v10840_v9  ;;  %v10847_v31 = vsel %vm817_vm2, %v16030_v5, %v16029_v26  ;;  %v8812_v15 = vpack.i.bf16 %v10833_v33, %v10826_v57  ;;  %v10860_v58 = vsel %vm817_vm2, %v16033_v0, %v16032_v59  ;;  %v16036_v2 = vmov %v16032_v59 }
  0xa6   : > { %16031 = vst [vmem:[#allocation82_spill] sm:$0xff] %v10847_v31  ;;  %8808 = vrot.lane.b32.xlu1 %v8807_v56, %s9747_s0  ;;  %v8817_v40 = vpack.i.bf16 %v10847_v31, %v10840_v9  ;;  %16034 = vst [vmem:[#allocation83_spill] sm:$0xff] %v10860_v58  ;;  %v10867_v41 = vsel %vm817_vm2, %v16036_v2, %v16035_v61  ;;  %v16039_v56 = vrot.slane %v10326_v18, 1  ;;  %v16045_v8 = vrot.slane %v10340_v21, 1 }
  0xa7   : > { %16037 = vst [vmem:[#allocation84_spill] sm:$0xff] %v10867_v41  ;;  %v8822_v37 = vpack.i.bf16 %v10867_v41, %v10860_v58  ;;  %v16046_v1 = vrot.slane %v10590_v7, 1  ;;  %v16047_v36 = vmov %v16044_v12  ;;  %v16048_v5 = vrot.slane %v10359_v32, 1 }
  0xa8   : > { %8803 = vrot.lane.b32.xlu0 %v8802_v42, %s9747_s0  ;;  %v16038_v42 = vrot.slane %v10328_v28, 1  ;;  %v10894_v28 = vsel %vm817_vm2, %v16045_v8, %v16044_v12  ;;  %v16050_v59 = vrot.slane %v10601_v52, 1  ;;  %v894_v7 = vrot.slane %v10439_v30, 1 }
  0xa9   : > { %v10901_v26 = vsel %vm817_vm2, %v16047_v36, %v16046_v1  ;;  %v16051_v21 = vmov %v16048_v5  ;;  %v896_v61 = vrot.slane %v631_v50, 1  ;;  %v16052_v52 = vrot.slane %v10378_v11, 1 }
  0xaa   : > { %v10874_v63 = vsel %vm817_vm2, %v16039_v56, %v16038_v42  ;;  %v16042_v54 = vmov %v16038_v42  ;;  %8818 = vrot.lane.b32.xlu1 %v8817_v40, %s9747_s0  ;;  %v10915_v0 = vsel %vm817_vm2, %v16051_v21, %v16050_v59  ;;  %v8832_v60 = vpack.i.bf16 %v10901_v26, %v10894_v28  ;;  %v11006_v21 = vld [vmem:[#allocation2 + $0x228] sm:$0xff] }
  0xab   : > { %16040 = vst [vmem:[#allocation85_spill] sm:$0xff] %v10874_v63  ;;  %v10881_v38 = vsel %vm817_vm2, %v16042_v54, %v16041_v4  ;;  %v16053_v32 = vrot.slane %v10361_v22, 1  ;;  %v16054_v42 = vrot.slane %v10626_v27, 1  ;;  %v16055_v56 = vmov %v16052_v52 }
  0xac   : > { %16043 = vst [vmem:[#allocation86_spill] sm:$0xff] %v10881_v38  ;;  %8813 = vrot.lane.b32.xlu0 %v8812_v15, %s9747_s0  ;;  %v8827_v18 = vpack.i.bf16 %v10881_v38, %v10874_v63  ;;  %v16049_v15 = vrot.slane %v10350_v29, 1  ;;  %v16056_v30 = vrot.slane %v10384_v3, 1  ;;  %v16057_v54 = vrot.slane %v10382_v10, 1 }
  0xad   : > { %v10929_v2 = vsel %vm817_vm2, %v16053_v32, %v16052_v52  ;;  %v10936_v4 = vsel %vm817_vm2, %v16055_v56, %v16054_v42  ;;  %v16060_v27 = vrot.slane %v10402_v6, 1  ;;  %v16061_v12 = vrot.slane %v10395_v53, 1  ;;  %v16067_v52 = vld [vmem:[#allocation17_spill] sm:$0xff] }
  0xae   : > { %v10908_v40 = vsel %vm817_vm2, %v16049_v15, %v16048_v5  ;;  %8828 = vrot.lane.b32.xlu1 %v8827_v18, %s9747_s0  ;;  %v10943_v50 = vsel %vm817_vm2, %v16057_v54, %v16056_v30  ;;  %v16059_v22 = vmov %v16056_v30  ;;  %v8842_v11 = vpack.i.bf16 %v10936_v4, %v10929_v2 }
  0xaf   : > { %v8837_v29 = vpack.i.bf16 %v10915_v0, %v10908_v40  ;;  %v16062_v3 = vrot.slane %v10691_v55, 1  ;;  %v16063_v8 = vmov %v16060_v27  ;;  %v16064_v36 = vrot.slane %v10423_v45, 1 }
  0xb0   : > { %8823 = vrot.lane.b32.xlu0 %v8822_v37, %s9747_s0  ;;  %v16058_v37 = vrot.slane %v10638_v17, 1  ;;  %v10963_v17 = vsel %vm817_vm2, %v16061_v12, %v16060_v27  ;;  %v16065_v15 = vrot.slane %v10694_v49, 1  ;;  %v16066_v55 = vrot.slane %v10437_v62, 1 }
  0xb1   : > { %v10970_v1 = vsel %vm817_vm2, %v16063_v8, %v16062_v3  ;;  %v10977_v5 = vsel %vm817_vm2, %v16064_v36, %v889_v25  ;;  %v10998_v16 = vsel %vm817_vm2, %v894_v7, %v896_v61  ;;  %v8862_v49 = vpack.i.bf16 %v10463_v51, %v10448_v23  ;;  %v571_v51 = vld [vmem:[#allocation2 + $0x18] sm:$0xff]  ;;  %v568_v61 = vld [vmem:[#allocation2] sm:$0xff]  ;;  %v16070_v36 = vld [vmem:[#allocation16_spill] sm:$0xff] }
  0xb2   : > { %v10950_v18 = vsel %vm817_vm2, %v16059_v22, %v16058_v37  ;;  %8838 = vrot.lane.b32.xlu1 %v8837_v29, %s9747_s0  ;;  %v10984_v53 = vsel %vm817_vm2, %v889_v25, %v16065_v15  ;;  %v8852_v6 = vpack.i.bf16 %v10970_v1, %v10963_v17  ;;  %v10995_v59 = vsel %vm817_vm2, %v16066_v55, %v894_v7 }
  0xb3   : > { %v8847_v10 = vpack.i.bf16 %v10950_v18, %v10943_v50  ;;  %v8857_v45 = vpack.i.bf16 %v10984_v53, %v10977_v5  ;;  %v8867_v25 = vpack.i.bf16 %v10998_v16, %v10995_v59  ;;  %v8877_v7 = vpack.i.bf16 %v10740_v13, %v10737_v19 }
  0xb4   : > { %8833 = vrot.lane.b32.xlu0 %v8832_v60, %s9747_s0  ;;  %v11008_v60 = vld [vmem:[#allocation2 + $0x230] sm:$0xff]  ;;  %v821_v23 = vrot.slane %v571_v51, 1  ;;  %v16068_v32 = vrot.slane %v16067_v52, 1  ;;  %v689_v56 = vrot.slane %v568_v61, 7  ;;  %v16071_v15 = vrot.slane %v16070_v36, 7 }
  0xb5   : > { %v8872_v62 = vpack.i.bf16 %v11008_v60, %v11006_v21 }
  0xb6   : > { %8848 = vrot.lane.b32.xlu1 %v8847_v10, %s9747_s0  ;;  %v822_v42 = vsel %vm817_vm2, %v16068_v32, %v821_v23  ;;  %v16069_v10 = vld [vmem:[#allocation28_spill] sm:$0xff]  ;;  %v16072_v23 = vld [vmem:[#allocation25_spill] sm:$0xff] }
  0xb8   : > { %8843 = vrot.lane.b32.xlu0 %v8842_v11, %s9747_s0 }
  0xba   : > { %8858 = vrot.lane.b32.xlu1 %v8857_v45, %s9747_s0 }
  0xbc   : > { %8853 = vrot.lane.b32.xlu0 %v8852_v6, %s9747_s0  ;;  %v691_v6 = vsel %vm688_vm1, %v689_v56, %v16071_v15  ;;  %v16076_v15 = vld [vmem:[#allocation33_spill] sm:$0xff] }
  0xbe   : > { %8868 = vrot.lane.b32.xlu1 %v8867_v25, %s9747_s0 }
  0xc0   : > { %8863 = vrot.lane.b32.xlu0 %v8862_v49, %s9747_s0 }
  0xc2   : > { %8878 = vrot.lane.b32.xlu1 %v8877_v7, %s9747_s0 }
  0xc4   : > { %8873 = vrot.lane.b32.xlu0 %v8872_v62, %s9747_s0 }
  0xd0   : > { %v8634_v29 = vpop.permute.xlu0 %8633 }
  0xd1   : > { %v8636_v30 = vunpack.i.h.bf16 %v8634_v29  ;;  %v8635_v54 = vunpack.i.l.bf16 %v8634_v29 }
  0xd3   : > { %v8644_v37 = vpop.permute.xlu1 %8643  ;;  %v1298_v27 = vsel %vm462_vm0, %v16069_v10, %v8635_v54  ;;  %v1299_v12 = vsel %vm462_vm0, %v822_v42, %v8636_v30  ;;  %v16074_v10 = vld [vmem:[#allocation32_spill] sm:$0xff] }
  0xd4   : > { %v8646_v22 = vunpack.i.h.bf16 %v8644_v37  ;;  %v8645_v11 = vunpack.i.l.bf16 %v8644_v37  ;;  %v8639_v3 = vpop.permute.xlu0 %8638  ;;  %v1367_v8 = vpack.c.bf16 %v1299_v12, %v1298_v27  ;;  %v16075_v12 = vld [vmem:[#allocation66_spill] sm:$0xff] }
  0xd5   : > { %v8641_v49 = vunpack.i.h.bf16 %v8639_v3  ;;  %v8640_v25 = vunpack.i.l.bf16 %v8639_v3 }
  0xd6   : > { %v1300_v45 = vsel %vm462_vm0, %v10753_v48, %v8645_v11  ;;  %v1301_v55 = vsel %vm462_vm0, %v10760_v47, %v8646_v22  ;;  %1807 = vmatprep.mubr.bf16.mxu0 %v1367_v8  ;;  %v9160_v48 = vld [vmem:[%s15596_s2 + $0x108] sm:$0xff]  }
  0xd7   : > { %v8649_v62 = vpop.permute.xlu1 %8648  ;;  %v1372_v7 = vpack.c.bf16 %v1301_v55, %v1300_v45  ;;  %v1266_v51 = vsel %vm462_vm0, %v691_v6, %v8640_v25  ;;  %v1267_v61 = vsel %vm462_vm0, %v16072_v23, %v8641_v49  ;;  %v16073_v22 = vld [vmem:[#allocation31_spill] sm:$0xff]  ;;  %v9166_v49 = vld [vmem:[%s15596_s2 + $0x110] sm:$0xff]  }
  0xd8   : > { %v8651_v29 = vunpack.i.h.bf16 %v8649_v62  ;;  %v8650_v52 = vunpack.i.l.bf16 %v8649_v62  ;;  %v8654_v32 = vpop.permute.xlu0 %8653  ;;  %v1366_v42 = vpack.c.bf16 %v1267_v61, %v1266_v51  ;;  %v16077_v45 = vld [vmem:[#allocation35_spill] sm:$0xff] }
  0xd9   : > { %v8656_v56 = vunpack.i.h.bf16 %v8654_v32  ;;  %v8655_v47 = vunpack.i.l.bf16 %v8654_v32 }
  0xda   : > { %1808 = vmatmul.mubr.bf16.vlgmr.msra.gmra.mrb[0].mxu0 %v1366_v42  ;;  %v1268_v11 = vsel %vm462_vm0, %v16073_v22, %v8650_v52  ;;  %v1269_v27 = vsel %vm462_vm0, %v16074_v10, %v8651_v29  ;;  %v9167_v52 = vld [vmem:[%s15596_s2 + $0x118] sm:$0xff]  }
  0xdb   : > { %v8659_v30 = vpop.permute.xlu1 %8658  ;;  %1815 = vmatprep.mubr.bf16.mxu0 %v1372_v7  ;;  %8401 = vmatpush3.bf16.msra.mxu0 %v16075_v12  ;;  %v1302_v8 = vsel %vm462_vm0, %v10772_v20, %v8655_v47  ;;  %v1303_v36 = vsel %vm462_vm0, %v10779_v46, %v8656_v56  ;;  %v1371_v7 = vpack.c.bf16 %v1269_v27, %v1268_v11  ;;  %v16078_v12 = vld [vmem:[#allocation38_spill] sm:$0xff] }
  0xdc   : > { %v8661_v54 = vunpack.i.h.bf16 %v8659_v30  ;;  %v8660_v37 = vunpack.i.l.bf16 %v8659_v30  ;;  %v8664_v3 = vpop.permute.xlu0 %8663  ;;  %8402 = vmatprep.subr.bf16.mxu0 %v9160_v48  ;;  %v1376_v51 = vpack.c.bf16 %v1303_v36, %v1302_v8  ;;  %v16079_v8 = vld [vmem:[#allocation39_spill] sm:$0xff] }
  0xdd   : > { %v8666_v23 = vunpack.i.h.bf16 %v8664_v3  ;;  %v8665_v61 = vunpack.i.l.bf16 %v8664_v3 }
  0xde   : > { %v1270_v6 = vsel %vm462_vm0, %v16076_v15, %v8660_v37  ;;  %v1271_v55 = vsel %vm462_vm0, %v16077_v45, %v8661_v54 }
  0xdf   : > { %v8669_v25 = vpop.permute.xlu1 %8668  ;;  %v1369_v62 = vpack.c.bf16 %v1271_v55, %v1270_v6  ;;  %8403 = vmatpush3.bf16.msra.mxu0 %v9160_v48  ;;  %v1304_v56 = vsel %vm462_vm0, %v10792_v39, %v8665_v61  ;;  %v1305_v47 = vsel %vm462_vm0, %v10799_v24, %v8666_v23 }
  0xe0   : > { %8404 = vmatprep.subr.bf16.mxu0 %v9166_v49  ;;  %v8671_v30 = vunpack.i.h.bf16 %v8669_v25  ;;  %v8670_v54 = vunpack.i.l.bf16 %v8669_v25  ;;  %v1380_v37 = vpack.c.bf16 %v1305_v47, %v1304_v56  ;;  %v16081_v47 = vld [vmem:[#allocation47_spill] sm:$0xff] }
  0xe1   : > { %1968 = vmatprep.mubr.bf16.mxu1 %v1369_v62 }
  0xe2   : > { %1816 = vmatmul.mubr.bf16.gmra.mrb[4].mxu0 %v1371_v7  ;;  %v1272_v3 = vsel %vm462_vm0, %v16078_v12, %v8670_v54  ;;  %v1273_v36 = vsel %vm462_vm0, %v16079_v8, %v8671_v30 }
  0xe3   : > { %v8679_v32 = vpop.permute.xlu1 %8678  ;;  %1823 = vmatprep.mubr.bf16.mxu0 %v1376_v51  ;;  %8405 = vmatpush3.bf16.msra.mxu0 %v9166_v49  ;;  %v11070_v49 = vpack.c.bf16 %v1273_v36, %v1272_v3 }
  0xe4   : > { %8406 = vmatprep.subr.bf16.mxu0 %v9167_v52  ;;  %v8681_v25 = vunpack.i.h.bf16 %v8679_v32 }
  0xe5   : > { %v8674_v29 = vpop.permute.xlu0 %8673 }
  0xe6   : > { %v8676_v22 = vunpack.i.h.bf16 %v8674_v29  ;;  %v8675_v11 = vunpack.i.l.bf16 %v8674_v29  ;;  %v1275_v30 = vsel %vm462_vm0, %v16081_v47, %v8681_v25  ;;  %v16082_v25 = vld [vmem:[#allocation54_spill] sm:$0xff] }
  0xe7   : > { %8407 = vmatpush3.bf16.msra.mxu0 %v9167_v52  ;;  %v16080_v52 = vld [vmem:[#allocation46_spill] sm:$0xff] }
  0xe8   : > { %v8689_v48 = vpop.permute.xlu1 %8688  ;;  %v1306_v6 = vsel %vm462_vm0, %v10806_v34, %v8675_v11  ;;  %v1307_v45 = vsel %vm462_vm0, %v10813_v35, %v8676_v22 }
  0xe9   : > { %v1384_v7 = vpack.c.bf16 %v1307_v45, %v1306_v6  ;;  %v8691_v11 = vunpack.i.h.bf16 %v8689_v48  ;;  %v8690_v12 = vunpack.i.l.bf16 %v8689_v48 }
  0xea   : > { %v8684_v42 = vpop.permute.xlu0 %8683  ;;  %1824 = vmatmul.mubr.bf16.gmra.mrb[8].mxu0 %v1369_v62  ;;  %v8680_v62 = vunpack.i.l.bf16 %v8679_v32 }
  0xeb   : > { %1831 = vmatprep.mubr.bf16.mxu0 %v1380_v37  ;;  %v8686_v51 = vunpack.i.h.bf16 %v8684_v42  ;;  %v8685_v23 = vunpack.i.l.bf16 %v8684_v42 }
  0xec   : > { %v8699_v27 = vpop.permute.xlu1 %8698  ;;  %v1274_v56 = vsel %vm462_vm0, %v16080_v52, %v8680_v62  ;;  %v1276_v62 = vsel %vm462_vm0, %v16082_v25, %v8690_v12 }
  0xed   : > { %v1308_v32 = vsel %vm462_vm0, %v10826_v57, %v8685_v23  ;;  %v1309_v42 = vsel %vm462_vm0, %v10833_v33, %v8686_v51  ;;  %v11089_v22 = vpack.c.bf16 %v1275_v30, %v1274_v56  ;;  %v8701_v47 = vunpack.i.h.bf16 %v8699_v27 }
  0xee   : > { %v8694_v10 = vpop.permute.xlu0 %8693  ;;  %v1388_v3 = vpack.c.bf16 %v1309_v42, %v1308_v32  ;;  %v8700_v30 = vunpack.i.l.bf16 %v8699_v27 }
  0xef   : > { %v8696_v8 = vunpack.i.h.bf16 %v8694_v10  ;;  %v8695_v36 = vunpack.i.l.bf16 %v8694_v10 }
  0xf0   : > { %v11068_v55 = vpop.permute.xlu1 %8708 }
  0xf1   : > { %v1310_v48 = vsel %vm462_vm0, %v10840_v9, %v8695_v36  ;;  %v1311_v10 = vsel %vm462_vm0, %v10847_v31, %v8696_v8  ;;  %v16084_v36 = vld [vmem:[#allocation56_spill] sm:$0xff]  ;;  %v16085_v8 = vld [vmem:[#allocation57_spill] sm:$0xff] }
  0xf2   : > { %v8704_v15 = vpop.permute.xlu0 %8703  ;;  %1832 = vmatmul.mubr.bf16.gmra.mrb[12].mxu0 %v11070_v49  ;;  %v1392_v32 = vpack.c.bf16 %v1311_v10, %v1310_v48  ;;  %v1278_v25 = vsel %vm462_vm0, %v16084_v36, %v8700_v30  ;;  %v950_v10 = vrot.slane %v11008_v60, 7  ;;  %v8711_v30 = vunpack.i.h.bf16 %v11068_v55 }
  0xf3   : > { %1839 = vmatprep.mubr.bf16.mxu0 %v1384_v7  ;;  %v16083_v7 = vld [vmem:[#allocation55_spill] sm:$0xff]  ;;  %v8706_v42 = vunpack.i.h.bf16 %v8704_v15  ;;  %v8705_v12 = vunpack.i.l.bf16 %v8704_v15 }
  0xf4   : > { %v11074_v29 = vpop.permute.xlu1 %8718  ;;  %v1277_v51 = vsel %vm462_vm0, %v16083_v7, %v8691_v11  ;;  %v1279_v7 = vsel %vm462_vm0, %v16085_v8, %v8701_v47  ;;  %v8710_v47 = vunpack.i.l.bf16 %v11068_v55  ;;  %v16086_v55 = vld [vmem:[#allocation58_spill] sm:$0xff] }
  0xf5   : > { %v11108_v56 = vpack.c.bf16 %v1277_v51, %v1276_v62  ;;  %v1312_v27 = vsel %vm462_vm0, %v10860_v58, %v8705_v12  ;;  %v1313_v15 = vsel %vm462_vm0, %v10867_v41, %v8706_v42  ;;  %v11127_v48 = vpack.c.bf16 %v1279_v7, %v1278_v25 }
  0xf6   : > { %v11072_v61 = vpop.permute.xlu0 %8713  ;;  %v1396_v36 = vpack.c.bf16 %v1313_v15, %v1312_v27  ;;  %v958_v25 = vrot.slane %v11008_v60, 1  ;;  %v957_v7 = vrot.slane %v11006_v21, 1  ;;  %v1280_v27 = vsel %vm462_vm0, %v16086_v55, %v8710_v47 }
  0xf7   : > { %v8716_v8 = vunpack.i.h.bf16 %v11072_v61  ;;  %v8715_v12 = vunpack.i.l.bf16 %v11072_v61  ;;  %v16087_v61 = vld [vmem:[#allocation59_spill] sm:$0xff] }
  0xf8   : > { %v11087_v37 = vpop.permute.xlu1 %8728  ;;  %v1281_v15 = vsel %vm462_vm0, %v16087_v61, %v8711_v30  ;;  %v11164_v30 = vsel %vm817_vm2, %v957_v7, %v958_v25 }
  0xf9   : > { %v1314_v43 = vsel %vm462_vm0, %v10874_v63, %v8715_v12  ;;  %v1315_v60 = vsel %vm462_vm0, %v10881_v38, %v8716_v8  ;;  %v11161_v47 = vpack.c.bf16 %v1281_v15, %v1280_v27  ;;  %16088 = vst [vmem:[#allocation17_spill] sm:$0xff] %v11164_v30  ;;  %v16089_v27 = vld [vmem:[#allocation60_spill] sm:$0xff]  ;;  %v9596_v15 = vld [vmem:[#allocation2 + $0x28] sm:$0xff] }
  0xfa   : > { %v11081_v54 = vpop.permute.xlu0 %8723  ;;  %1840 = vmatmul.mubr.bf16.gmra.mrb[16].mxu0 %v11089_v22  ;;  %v1400_v55 = vpack.c.bf16 %v1315_v60, %v1314_v43  ;;  %v16090_v43 = vld [vmem:[#allocation61_spill] sm:$0xff] }
  0xfb   : > { %1847 = vmatprep.mubr.bf16.mxu0 %v1388_v3  ;;  %v8726_v12 = vunpack.i.h.bf16 %v11081_v54  ;;  %v8725_v8 = vunpack.i.l.bf16 %v11081_v54 }
  0xfc   : > { %v11093_v45 = vpop.permute.xlu1 %8738 }
  0xfd   : > { %v1316_v30 = vsel %vm462_vm0, %v10894_v28, %v8725_v8 }
  0xfe   : > { %v11091_v6 = vpop.permute.xlu0 %8733 }
  0xff   : > { %v8736_v8 = vunpack.i.h.bf16 %v11091_v6 }
 0x100   : > { %v11106_v52 = vpop.permute.xlu1 %8748 }
 0x102   : > { %v11100_v23 = vpop.permute.xlu0 %8743  ;;  %1848 = vmatmul.mubr.bf16.gmra.mrb[20].mxu0 %v11108_v56 }
 0x103   : > { %1855 = vmatprep.mubr.bf16.mxu0 %v1392_v32  ;;  %v15711_v32 = vrot.slane %v11006_v21, 7 }
 0x104   : > { %v11112_v11 = vpop.permute.xlu1 %8758 }
 0x105   : > { %v11145_v19 = vsel %vm688_vm1, %v15711_v32, %v950_v10  ;;  %v960_v10 = vrot.slane %v639_v14, 1  ;;  %v8720_v32 = vunpack.i.l.bf16 %v11074_v29 }
 0x106   : > { %v11110_v3 = vpop.permute.xlu0 %8753 }
 0x107   : > { %v11167_v61 = vsel %vm817_vm2, %v958_v25, %v960_v10  ;;  %v1282_v7 = vsel %vm462_vm0, %v16089_v27, %v8720_v32  ;;  %v9597_v10 = vld [vmem:[#allocation2 + $0x30] sm:$0xff]  ;;  %v1317_v32 = vsel %vm462_vm0, %v10901_v26, %v8726_v12  ;;  %v8731_v27 = vunpack.i.h.bf16 %v11087_v37 }
 0x108   : > { %v11125_v51 = vpop.permute.xlu1 %8768  ;;  %v8735_v12 = vunpack.i.l.bf16 %v11091_v6  ;;  %v1319_v6 = vsel %vm462_vm0, %v10915_v0, %v8736_v8 }
 0x10a   : > { %v11119_v62 = vpop.permute.xlu0 %8763  ;;  %1856 = vmatmul.mubr.bf16.gmra.mrb[24].mxu0 %v11127_v48 }
 0x10b   : > { %1863 = vmatprep.mubr.bf16.mxu0 %v1396_v36  ;;  %v8721_v36 = vunpack.i.h.bf16 %v11074_v29 }
 0x10c   : > { %v11137_v42 = vpop.permute.xlu1 %8778 }
 0x10d   : > { %v1283_v25 = vsel %vm462_vm0, %v16090_v43, %v8721_v36 }
 0x10e   : > { %v11135_v44 = vpop.permute.xlu0 %8773  ;;  %v11185_v36 = vpack.c.bf16 %v1283_v25, %v1282_v7 }
 0x110   : > { %v11157_v41 = vpop.permute.xlu1 %8788 }
 0x112   : > { %v11151_v13 = vpop.permute.xlu0 %8783  ;;  %1864 = vmatmul.mubr.bf16.gmra.mrb[28].mxu0 %v11161_v47 }
 0x113   : > { %1871 = vmatprep.mubr.bf16.mxu0 %v1400_v55 }
 0x114   : > { %v8799_v29 = vpop.permute.xlu1 %8798 }
 0x115   : > { %v8801_v31 = vunpack.i.h.bf16 %v8799_v29  ;;  %v8800_v9 = vunpack.i.l.bf16 %v8799_v29  ;;  %v9599_v29 = vld [vmem:[#allocation2 + $0x50] sm:$0xff] }
 0x116   : > { %v8794_v38 = vpop.permute.xlu0 %8793 }
 0x117   : > { %v8796_v63 = vunpack.i.h.bf16 %v8794_v38  ;;  %v8795_v58 = vunpack.i.l.bf16 %v8794_v38  ;;  %v1333_v43 = vsel %vm462_vm0, %v9599_v29, %v8801_v31  ;;  %v1318_v31 = vsel %vm462_vm0, %v10908_v40, %v8735_v12 }
 0x118   : > { %v1408_v29 = vpack.c.bf16 %v1319_v6, %v1318_v31  ;;  %v8809_v8 = vpop.permute.xlu1 %8808  ;;  %v8751_v31 = vunpack.i.h.bf16 %v11106_v52 }
 0x119   : > { %v1330_v60 = vsel %vm462_vm0, %v9596_v15, %v8795_v58  ;;  %v1331_v54 = vsel %vm462_vm0, %v9597_v10, %v8796_v63  ;;  %v8730_v58 = vunpack.i.l.bf16 %v11087_v37  ;;  %v9598_v63 = vld [vmem:[#allocation2 + $0x48] sm:$0xff]  ;;  %v1404_v15 = vpack.c.bf16 %v1317_v32, %v1316_v30 }
 0x11a   : > { %v1368_v14 = vpack.c.bf16 %v1331_v54, %v1330_v60  ;;  %v8804_v38 = vpop.permute.xlu0 %8803  ;;  %v1332_v55 = vsel %vm462_vm0, %v9598_v63, %v8800_v9  ;;  %1872 = vmatmul.mubr.bf16.gmra.mrb[32].mxu0 %v11185_v36  ;;  %v16092_v9 = vld [vmem:[#allocation63_spill] sm:$0xff]  ;;  %v8741_v54 = vunpack.i.h.bf16 %v11093_v45  ;;  %v9601_v63 = vld [vmem:[#allocation2 + $0x70] sm:$0xff] }
 0x11b   : > { %v8806_v7 = vunpack.i.h.bf16 %v8804_v38  ;;  %v8805_v37 = vunpack.i.l.bf16 %v8804_v38  ;;  %1879 = vmatprep.mubr.bf16.mxu0 %v1404_v15  ;;  %v1285_v10 = vsel %vm462_vm0, %v16092_v9, %v8731_v27  ;;  %v8740_v38 = vunpack.i.l.bf16 %v11093_v45 }
 0x11c   : > { %1969 = vmatmul.mubr.bf16.vlgmr.msra.gmra.mrb[0].mxu1 %v1368_v14  ;;  %v1373_v14 = vpack.c.bf16 %v1333_v43, %v1332_v55  ;;  %v8746_v43 = vunpack.i.h.bf16 %v11100_v23  ;;  %v8745_v15 = vunpack.i.l.bf16 %v11100_v23  ;;  %v8811_v45 = vunpack.i.h.bf16 %v8809_v8 }
 0x11d   : > { %1976 = vmatprep.mubr.bf16.mxu1 %v11070_v49  ;;  %v16091_v49 = vld [vmem:[#allocation62_spill] sm:$0xff]  ;;  %v1335_v55 = vsel %vm462_vm0, %v9601_v63, %v8806_v7 }
 0x11e   : > { %v11193_v60 = vpop.permute.xlu0 %8813  ;;  %v1284_v25 = vsel %vm462_vm0, %v16091_v49, %v8730_v58  ;;  %v9600_v58 = vld [vmem:[#allocation2 + $0x68] sm:$0xff]  ;;  %v8810_v49 = vunpack.i.l.bf16 %v8809_v8  ;;  %v1320_v9 = vsel %vm462_vm0, %v10929_v2, %v8745_v15  ;;  %v1321_v23 = vsel %vm462_vm0, %v10936_v4, %v8746_v43  ;;  %v636_v8 = vld [vmem:[#allocation2 + $0x220] sm:$0xff] }
 0x11f   : > { %v11207_v32 = vpack.c.bf16 %v1285_v10, %v1284_v25  ;;  %v1334_v27 = vsel %vm462_vm0, %v9600_v58, %v8805_v37  ;;  %v16094_v25 = vld [vmem:[#allocation65_spill] sm:$0xff]  ;;  %v8750_v58 = vunpack.i.l.bf16 %v11106_v52  ;;  %v8755_v43 = vunpack.i.l.bf16 %v11110_v3 }
 0x120   : > { %v1287_v7 = vsel %vm462_vm0, %v16094_v25, %v8741_v54  ;;  %v8816_v52 = vunpack.i.h.bf16 %v11193_v60 }
 0x122   : > { %v11204_v30 = vpop.permute.xlu0 %8823  ;;  %1880 = vmatmul.mubr.bf16.gmra.mrb[36].mxu0 %v11207_v32 }
 0x123   : > { %1887 = vmatprep.mubr.bf16.mxu0 %v1408_v29  ;;  %v8756_v29 = vunpack.i.h.bf16 %v11110_v3  ;;  %v1322_v3 = vsel %vm462_vm0, %v10943_v50, %v8755_v43  ;;  %v8819_v43 = vpop.permute.xlu1 %8818 }
 0x124   : > { %1977 = vmatmul.mubr.bf16.gmra.mrb[4].mxu1 %v1373_v14  ;;  %v1377_v14 = vpack.c.bf16 %v1335_v55, %v1334_v27  ;;  %v9603_v27 = vld [vmem:[#allocation2 + $0x90] sm:$0xff]  ;;  %v1412_v55 = vpack.c.bf16 %v1321_v23, %v1320_v9  ;;  %v947_v9 = vrot.slane %v636_v8, 7  ;;  %v8761_v23 = vunpack.i.h.bf16 %v11112_v11 }
 0x125   : > { %1984 = vmatprep.mubr.bf16.mxu1 %v11089_v22  ;;  %v16093_v22 = vld [vmem:[#allocation64_spill] sm:$0xff]  ;;  %v1337_v63 = vsel %vm462_vm0, %v9603_v27, %v8811_v45  ;;  %v1323_v25 = vsel %vm462_vm0, %v10950_v18, %v8756_v29  ;;  %v8765_v29 = vunpack.i.l.bf16 %v11119_v62 }
 0x126   : > { %v11215_v12 = vpop.permute.xlu0 %8833  ;;  %v1286_v37 = vsel %vm462_vm0, %v16093_v22, %v8740_v38  ;;  %v9602_v38 = vld [vmem:[#allocation2 + $0x88] sm:$0xff]  ;;  %v16096_v45 = vld [vmem:[#allocation68_spill] sm:$0xff] }
 0x127   : > { %v11229_v6 = vpack.c.bf16 %v1287_v7, %v1286_v37  ;;  %v1336_v54 = vsel %vm462_vm0, %v9602_v38, %v8810_v49  ;;  %v16095_v49 = vld [vmem:[#allocation67_spill] sm:$0xff]  ;;  %v1289_v37 = vsel %vm462_vm0, %v16096_v45, %v8751_v31 }
 0x128   : > { %v1288_v22 = vsel %vm462_vm0, %v16095_v49, %v8750_v58  ;;  %v9604_v58 = vld [vmem:[#allocation2 + $0xa8] sm:$0xff] }
 0x129   : > { %v11254_v38 = vpack.c.bf16 %v1289_v37, %v1288_v22 }
 0x12a   : > { %v11226_v10 = vpop.permute.xlu0 %8843  ;;  %1888 = vmatmul.mubr.bf16.gmra.mrb[40].mxu0 %v11229_v6 }
 0x12b   : > { %1895 = vmatprep.mubr.bf16.mxu0 %v1412_v55  ;;  %v8766_v55 = vunpack.i.h.bf16 %v11119_v62 }
 0x12c   : > { %1985 = vmatmul.mubr.bf16.gmra.mrb[8].mxu1 %v1377_v14  ;;  %v1381_v14 = vpack.c.bf16 %v1337_v63, %v1336_v54  ;;  %v9605_v54 = vld [vmem:[#allocation2 + $0xb0] sm:$0xff]  ;;  %v1416_v63 = vpack.c.bf16 %v1323_v25, %v1322_v3  ;;  %v8821_v3 = vunpack.i.h.bf16 %v8819_v43  ;;  %v8820_v25 = vunpack.i.l.bf16 %v8819_v43 }
 0x12d   : > { %1992 = vmatprep.mubr.bf16.mxu1 %v11108_v56  ;;  %v8815_v56 = vunpack.i.l.bf16 %v11193_v60  ;;  %v8760_v60 = vunpack.i.l.bf16 %v11112_v11  ;;  %v1339_v27 = vsel %vm462_vm0, %v9605_v54, %v8816_v52  ;;  %v16097_v11 = vrot.slane %v11006_v21, 7  ;;  %v16099_v52 = vld [vmem:[#allocation70_spill] sm:$0xff] }
 0x12e   : > { %v11237_v15 = vpop.permute.xlu0 %8853  ;;  %v1291_v37 = vsel %vm462_vm0, %v16099_v52, %v8761_v23  ;;  %v8771_v23 = vunpack.i.h.bf16 %v11125_v51  ;;  %v8770_v54 = vunpack.i.l.bf16 %v11125_v51  ;;  %v8825_v51 = vunpack.i.l.bf16 %v11204_v30 }
 0x12f   : > { %v1338_v31 = vsel %vm462_vm0, %v9604_v58, %v8815_v56  ;;  %v16098_v56 = vld [vmem:[#allocation69_spill] sm:$0xff]  ;;  %v1325_v58 = vsel %vm462_vm0, %v10970_v1, %v8766_v55  ;;  %v8776_v55 = vunpack.i.h.bf16 %v11135_v44 }
 0x130   : > { %v1290_v45 = vsel %vm462_vm0, %v16098_v56, %v8760_v60 }
 0x132   : > { %v11250_v7 = vpop.permute.xlu0 %8863  ;;  %1896 = vmatmul.mubr.bf16.gmra.mrb[44].mxu0 %v11254_v38 }
 0x133   : > { %1903 = vmatprep.mubr.bf16.mxu0 %v1416_v63  ;;  %v9607_v63 = vld [vmem:[#allocation2 + $0xd0] sm:$0xff] }
 0x134   : > { %1993 = vmatmul.mubr.bf16.gmra.mrb[12].mxu1 %v1381_v14  ;;  %v949_v14 = vsel %vm688_vm1, %v947_v9, %v16097_v11  ;;  %v1324_v9 = vsel %vm462_vm0, %v10963_v17, %v8765_v29  ;;  %v1341_v29 = vsel %vm462_vm0, %v9607_v63, %v8821_v3 }
 0x135   : > { %2000 = vmatprep.mubr.bf16.mxu1 %v11127_v48  ;;  %v1385_v48 = vpack.c.bf16 %v1339_v27, %v1338_v31  ;;  %v11283_v31 = vpack.c.bf16 %v1291_v37, %v1290_v45  ;;  %v1420_v43 = vpack.c.bf16 %v1325_v58, %v1324_v9  ;;  %v8781_v45 = vunpack.i.h.bf16 %v11137_v42  ;;  %v9608_v37 = vld [vmem:[#allocation2 + $0xe8] sm:$0xff] }
 0x136   : > { %v8874_v8 = vpop.permute.xlu0 %8873  ;;  %v1342_v3 = vsel %vm462_vm0, %v9608_v37, %v8825_v51  ;;  %v8790_v51 = vunpack.i.l.bf16 %v11157_v41  ;;  %v16104_v37 = vld [vmem:[#allocation75_spill] sm:$0xff] }
 0x137   : > { %v8876_v49 = vunpack.i.h.bf16 %v8874_v8  ;;  %v8875_v22 = vunpack.i.l.bf16 %v8874_v8  ;;  %v8775_v8 = vunpack.i.l.bf16 %v11135_v44  ;;  %v1327_v44 = vsel %vm462_vm0, %v10984_v53, %v8776_v55 }
 0x139   : > { %v11270_v62 = vsel %vm462_vm0, %v949_v14, %v8875_v22  ;;  %v11274_v21 = vsel %vm462_vm0, %v11145_v19, %v8876_v49  ;;  %v9606_v19 = vld [vmem:[#allocation2 + $0xc8] sm:$0xff]  ;;  %v8826_v14 = vunpack.i.h.bf16 %v11204_v30  ;;  %v16101_v22 = vld [vmem:[#allocation72_spill] sm:$0xff]  ;;  %v1326_v56 = vsel %vm462_vm0, %v10977_v5, %v8775_v8 }
 0x13a   : > { %v1430_v60 = vpack.c.bf16 %v11274_v21, %v11270_v62  ;;  %v1340_v27 = vsel %vm462_vm0, %v9606_v19, %v8820_v25  ;;  %1904 = vmatmul.mubr.bf16.gmra.mrb[48].mxu0 %v11283_v31  ;;  %v8780_v30 = vunpack.i.l.bf16 %v11137_v42  ;;  %v9609_v25 = vld [vmem:[#allocation2 + $0xf0] sm:$0xff]  ;;  %v1424_v58 = vpack.c.bf16 %v1327_v44, %v1326_v56  ;;  %v8829_v19 = vpop.permute.xlu1 %8828  ;;  %v16102_v42 = vld [vmem:[#allocation73_spill] sm:$0xff] }
 0x13b   : > { %v1389_v11 = vpack.c.bf16 %v1341_v29, %v1340_v27  ;;  %1911 = vmatprep.mubr.bf16.mxu0 %v1420_v43  ;;  %v1343_v9 = vsel %vm462_vm0, %v9609_v25, %v8826_v14  ;;  %v8831_v63 = vunpack.i.h.bf16 %v8829_v19  ;;  %v8830_v29 = vunpack.i.l.bf16 %v8829_v19  ;;  %v16103_v43 = vld [vmem:[#allocation74_spill] sm:$0xff] }
 0x13c   : > { %2001 = vmatmul.mubr.bf16.gmra.mrb[16].mxu1 %v1385_v48  ;;  %v1293_v48 = vsel %vm462_vm0, %v16101_v22, %v8771_v23  ;;  %v8786_v23 = vunpack.i.h.bf16 %v11151_v13  ;;  %v1393_v27 = vpack.c.bf16 %v1343_v9, %v1342_v3  ;;  %v1295_v55 = vsel %vm462_vm0, %v16103_v43, %v8781_v45  ;;  %v9611_v22 = vld [vmem:[#allocation2 + $0x110] sm:$0xff]  ;;  %v9612_v9 = vld [vmem:[#allocation2 + $0x128] sm:$0xff] }
 0x13d   : > { %2008 = vmatprep.mubr.bf16.mxu1 %v11161_v47  ;;  %v16100_v47 = vld [vmem:[#allocation71_spill] sm:$0xff]  ;;  %v8836_v45 = vunpack.i.h.bf16 %v11215_v12  ;;  %v16105_v3 = vld [vmem:[#allocation76_spill] sm:$0xff] }
 0x13e   : > { %v1292_v49 = vsel %vm462_vm0, %v16100_v47, %v8770_v54  ;;  %v8785_v54 = vunpack.i.l.bf16 %v11151_v13  ;;  %v8791_v13 = vunpack.i.h.bf16 %v11157_v41  ;;  %v9610_v47 = vld [vmem:[#allocation2 + $0x108] sm:$0xff]  ;;  %v1296_v41 = vsel %vm462_vm0, %v16104_v37, %v8790_v51  ;;  %v8839_v19 = vpop.permute.xlu1 %8838  ;;  %v9615_v43 = vld [vmem:[#allocation2 + $0x150] sm:$0xff]  ;;  %v16107_v51 = vld [vmem:[#allocation82_spill] sm:$0xff] }
 0x13f   : > { %v11303_v52 = vpack.c.bf16 %v1293_v48, %v1292_v49  ;;  %v1344_v49 = vsel %vm462_vm0, %v9610_v47, %v8830_v29  ;;  %v1345_v48 = vsel %vm462_vm0, %v9611_v22, %v8831_v63  ;;  %v8841_v63 = vunpack.i.h.bf16 %v8839_v19  ;;  %v16110_v37 = vld [vmem:[#allocation85_spill] sm:$0xff] }
 0x140   : > { %v1328_v8 = vsel %vm462_vm0, %v10995_v59, %v8785_v54  ;;  %v1397_v44 = vpack.c.bf16 %v1345_v48, %v1344_v49  ;;  %v8840_v29 = vunpack.i.l.bf16 %v8839_v19 }
 0x142   : > { %1912 = vmatmul.mubr.bf16.gmra.mrb[52].mxu0 %v11303_v52  ;;  %v8849_v49 = vpop.permute.xlu1 %8848 }
 0x143   : > { %1919 = vmatprep.mubr.bf16.mxu0 %v1424_v58  ;;  %v8851_v22 = vunpack.i.h.bf16 %v8849_v49  ;;  %v8850_v48 = vunpack.i.l.bf16 %v8849_v49 }
 0x144   : > { %2009 = vmatmul.mubr.bf16.gmra.mrb[20].mxu1 %v1389_v11  ;;  %v1329_v11 = vsel %vm462_vm0, %v10998_v16, %v8786_v23  ;;  %v9613_v23 = vld [vmem:[#allocation2 + $0x130] sm:$0xff] }
 0x145   : > { %2016 = vmatprep.mubr.bf16.mxu1 %v11185_v36  ;;  %v1294_v36 = vsel %vm462_vm0, %v16102_v42, %v8780_v30  ;;  %v1428_v56 = vpack.c.bf16 %v1329_v11, %v1328_v8  ;;  %v8835_v30 = vunpack.i.l.bf16 %v11215_v12  ;;  %v1347_v54 = vsel %vm462_vm0, %v9613_v23, %v8836_v45  ;;  %v9614_v42 = vld [vmem:[#allocation2 + $0x148] sm:$0xff]  ;;  %v9619_v45 = vld [vmem:[#allocation2 + $0x190] sm:$0xff] }
 0x146   : > { %v11321_v14 = vpack.c.bf16 %v1295_v55, %v1294_v36  ;;  %v1370_v12 = vpack.c.bf16 %v10779_v46, %v10772_v20  ;;  %v1348_v36 = vsel %vm462_vm0, %v9614_v42, %v8840_v29  ;;  %v1349_v20 = vsel %vm462_vm0, %v9615_v43, %v8841_v63  ;;  %v9620_v23 = vld [vmem:[#allocation2 + $0x1a8] sm:$0xff]  ;;  %v8859_v63 = vpop.permute.xlu1 %8858 }
 0x147   : > { %v1346_v58 = vsel %vm462_vm0, %v9612_v9, %v8835_v30  ;;  %v1379_v46 = vpack.c.bf16 %v10813_v35, %v10806_v34  ;;  %v1405_v55 = vpack.c.bf16 %v1349_v20, %v1348_v36  ;;  %v8846_v8 = vunpack.i.h.bf16 %v11226_v10  ;;  %v16106_v35 = vld [vmem:[#allocation81_spill] sm:$0xff]  ;;  %v9622_v42 = vld [vmem:[#allocation2 + $0x1c8] sm:$0xff] }
 0x148   : > { %v8845_v11 = vunpack.i.l.bf16 %v11226_v10  ;;  %v1387_v47 = vpack.c.bf16 %v16107_v51, %v16106_v35  ;;  %v1353_v30 = vsel %vm462_vm0, %v9619_v45, %v8851_v22  ;;  %v8856_v9 = vunpack.i.h.bf16 %v11237_v15  ;;  %v16114_v22 = vld [vmem:[#allocation80_spill] sm:$0xff] }
 0x149   : > { %v8861_v29 = vunpack.i.h.bf16 %v8859_v63  ;;  %v1411_v43 = vpack.c.bf16 %v10950_v18, %v10943_v50  ;;  %v9624_v50 = vld [vmem:[#allocation2 + $0x1e8] sm:$0xff] }
 0x14a   : > { %1920 = vmatmul.mubr.bf16.gmra.mrb[56].mxu0 %v11321_v14  ;;  %v8869_v20 = vpop.permute.xlu1 %8868 }
 0x14b   : > { %1927 = vmatprep.mubr.bf16.mxu0 %v1428_v56  ;;  %v9618_v56 = vld [vmem:[#allocation2 + $0x188] sm:$0xff] }
 0x14c   : > { %2017 = vmatmul.mubr.bf16.gmra.mrb[24].mxu1 %v1393_v27  ;;  %v1401_v27 = vpack.c.bf16 %v1347_v54, %v1346_v58  ;;  %v8855_v58 = vunpack.i.l.bf16 %v11237_v15 }
 0x14d   : > { %2024 = vmatprep.mubr.bf16.mxu1 %v11207_v32  ;;  %v1297_v32 = vsel %vm462_vm0, %v16105_v3, %v8791_v13  ;;  %v9617_v13 = vld [vmem:[#allocation2 + $0x170] sm:$0xff] }
 0x14e   : > { %v11334_v25 = vpack.c.bf16 %v1297_v32, %v1296_v41  ;;  %v1351_v34 = vsel %vm462_vm0, %v9617_v13, %v8846_v8  ;;  %v16111_v41 = vld [vmem:[#allocation86_spill] sm:$0xff]  ;;  %v1354_v54 = vsel %vm462_vm0, %v9620_v23, %v8855_v58  ;;  %v1419_v13 = vpack.c.bf16 %v10984_v53, %v10977_v5  ;;  %v9627_v5 = vld [vmem:[#allocation2 + $0x210] sm:$0xff] }
 0x14f   : > { %v1395_v3 = vpack.c.bf16 %v16111_v41, %v16110_v37 }
 0x152   : > { %1928 = vmatmul.mubr.bf16.gmra.mrb[60].mxu0 %v11334_v25 }
 0x153   : > { %8408 = vmatprep.mubr.msk.bf16.mxu0 %vm462_vm0, %v1370_v12  ;;  %v9621_v12 = vld [vmem:[#allocation2 + $0x1b0] sm:$0xff] }
 0x154   : > { %2025 = vmatmul.mubr.bf16.gmra.mrb[28].mxu1 %v1397_v44  ;;  %v1352_v44 = vsel %vm462_vm0, %v9618_v56, %v8850_v48  ;;  %v1355_v19 = vsel %vm462_vm0, %v9621_v12, %v8856_v9  ;;  %v16115_v48 = vld [vmem:[#allocation79_spill] sm:$0xff] }
 0x155   : > { %2032 = vmatprep.mubr.bf16.mxu1 %v11229_v6  ;;  %v1375_v6 = vpack.c.bf16 %v10799_v24, %v10792_v39  ;;  %v1383_v39 = vpack.c.bf16 %v10833_v33, %v10826_v57  ;;  %v9616_v24 = vld [vmem:[#allocation2 + $0x168] sm:$0xff]  ;;  %v16109_v33 = vld [vmem:[#allocation84_spill] sm:$0xff]  ;;  %v1413_v32 = vpack.c.bf16 %v1353_v30, %v1352_v44  ;;  %v1417_v15 = vpack.c.bf16 %v1355_v19, %v1354_v54 }
 0x156   : > { %v16108_v57 = vld [vmem:[#allocation83_spill] sm:$0xff] }
 0x15a   : > { %8409 = vmatmul.mubr.msk.bf16.vlgmr.msra.gmra.mrb[64].mxu0 %vm462_vm0, %v1375_v6  ;;  %v8860_v6 = vunpack.i.l.bf16 %v8859_v63 }
 0x15b   : > { %8412 = vmatprep.mubr.msk.bf16.mxu0 %vm462_vm0, %v1379_v46  ;;  %v16112_v46 = vld [vmem:[#allocation77_spill] sm:$0xff] }
 0x15c   : > { %2033 = vmatmul.mubr.bf16.gmra.mrb[32].mxu1 %v1401_v27  ;;  %v1403_v27 = vpack.c.bf16 %v10915_v0, %v10908_v40  ;;  %v1356_v40 = vsel %vm462_vm0, %v9622_v42, %v8860_v6  ;;  %v9623_v0 = vld [vmem:[#allocation2 + $0x1d0] sm:$0xff] }
 0x15d   : > { %2040 = vmatprep.mubr.bf16.mxu1 %v11254_v38  ;;  %v1350_v38 = vsel %vm462_vm0, %v9616_v24, %v8845_v11  ;;  %v1357_v36 = vsel %vm462_vm0, %v9623_v0, %v8861_v29  ;;  %v9625_v24 = vld [vmem:[#allocation2 + $0x1f0] sm:$0xff] }
 0x15e   : > { %v1409_v10 = vpack.c.bf16 %v1351_v34, %v1350_v38  ;;  %v8879_v34 = vpop.permute.xlu1 %8878 }
 0x15f   : > { %v8881_v51 = vunpack.i.h.bf16 %v8879_v34 }
 0x161   : > { %v1361_v53 = vsel %vm462_vm0, %v9627_v5, %v8881_v51 }
 0x162   : > { %8413 = vmatmul.mubr.msk.bf16.gmra.mrb[68].mxu0 %vm462_vm0, %v1383_v39  ;;  %v1415_v39 = vpack.c.bf16 %v10970_v1, %v10963_v17  ;;  %v1423_v17 = vpack.c.bf16 %v10998_v16, %v10995_v59  ;;  %v9626_v1 = vld [vmem:[#allocation2 + $0x208] sm:$0xff]  ;;  %v16117_v59 = vld [vmem:[#allocation17_spill] sm:$0xff] }
 0x163   : > { %8416 = vmatprep.mubr.msk.bf16.mxu0 %vm462_vm0, %v1387_v47  ;;  %v8880_v47 = vunpack.i.l.bf16 %v8879_v34  ;;  %v16118_v16 = vpack.c.bf16 %v11167_v61, %v16117_v59  ;;  %v11430_v61 = vld [vmem:[#allocation2 + $0x10] sm:$0xff] }
 0x164   : > { %2041 = vmatmul.mubr.bf16.gmra.mrb[36].mxu1 %v1405_v55 }
 0x165   : > { %2048 = vmatprep.mubr.bf16.mxu1 %v11283_v31  ;;  %v1391_v31 = vpack.c.bf16 %v16109_v33, %v16108_v57  ;;  %v1360_v49 = vsel %vm462_vm0, %v9626_v1, %v8880_v47  ;;  %v16116_v57 = vpack.c.bf16 %v16114_v22, %v16115_v48  ;;  %v11466_v47 = vld [vmem:[%s15597_s3] ss:$0 sm:$0xff]  ;;  %v9171_v1 = vld [vmem:[%s15598_s4 + $0x8] sm:$0xff]  }
 0x16a   : > { %8417 = vmatmul.mubr.msk.bf16.gmra.mrb[72].mxu0 %vm462_vm0, %v1391_v31 }
 0x16b   : > { %8420 = vmatprep.mubr.msk.bf16.mxu0 %vm462_vm0, %v1395_v3 }
 0x16c   : > { %2049 = vmatmul.mubr.bf16.gmra.mrb[40].mxu1 %v1409_v10  ;;  %v1429_v10 = vpack.c.bf16 %v1361_v53, %v1360_v49 }
 0x16d   : > { %2056 = vmatprep.mubr.bf16.mxu1 %v11303_v52  ;;  %v1399_v52 = vpack.c.bf16 %v10901_v26, %v10894_v28  ;;  %v8866_v28 = vunpack.i.h.bf16 %v11250_v7  ;;  %v8865_v26 = vunpack.i.l.bf16 %v11250_v7  ;;  %v16113_v7 = vld [vmem:[#allocation78_spill] sm:$0xff] }
 0x16f   : > { %v1362_v55 = vsel %vm462_vm0, %v16112_v46, %v8865_v26  ;;  %v1363_v8 = vsel %vm462_vm0, %v16113_v7, %v8866_v28  ;;  %v9168_v46 = vld [vmem:[%s15598_s4 + $0x40] sm:$0xff]  }
 0x170   : > { %v1426_v11 = vpack.c.bf16 %v1363_v8, %v1362_v55  ;;  %v9169_v8 = vld [vmem:[%s15598_s4] sm:$0xff]   ;;  %7796 = vmatprep.subr.bf16.mxu1 %v9168_v46 }
 0x171   : > { %7797 = vmatpush3.bf16.msra.mxu1 %v9169_v8 }
 0x172   : > { %8421 = vmatmul.mubr.msk.bf16.gmra.mrb[76].mxu0 %vm462_vm0, %v1399_v52 }
 0x173   : > { %8424 = vmatprep.mubr.msk.bf16.mxu0 %vm462_vm0, %v1403_v27 }
 0x174   : > { %2057 = vmatmul.mubr.bf16.gmra.mrb[44].mxu1 %v1413_v32  ;;  %v11428_v32 = vld [vmem:[#allocation2 + $0x8] sm:$0xff] }
 0x175   : > { %2064 = vmatprep.mubr.bf16.mxu1 %v11321_v14  ;;  %v1407_v14 = vpack.c.bf16 %v10936_v4, %v10929_v2  ;;  %v1421_v2 = vpack.c.bf16 %v1357_v36, %v1356_v40  ;;  %v8871_v4 = vunpack.i.h.bf16 %v8869_v20  ;;  %v8887_v58 = vpack.i.bf16 %v11430_v61, %v11428_v32 }
 0x177   : > { %v1359_v38 = vsel %vm462_vm0, %v9625_v24, %v8871_v4  ;;  %8888 = vrot.lane.b32.xlu1 %v8887_v58, %s9747_s0 }
 0x17a   : > { %8425 = vmatmul.mubr.msk.bf16.gmra.mrb[80].mxu0 %vm462_vm0, %v1407_v14 }
 0x17b   : > { %8428 = vmatprep.mubr.msk.bf16.mxu0 %vm462_vm0, %v1411_v43 }
 0x17c   : > { %2065 = vmatmul.mubr.bf16.gmra.mrb[48].mxu1 %v1417_v15 }
 0x17d   : > { %2072 = vmatprep.mubr.bf16.mxu1 %v11334_v25  ;;  %v8870_v25 = vunpack.i.l.bf16 %v8869_v20 }
 0x17f   : > { %v1358_v18 = vsel %vm462_vm0, %v9624_v50, %v8870_v25 }
 0x180   : > { %v1425_v35 = vpack.c.bf16 %v1359_v38, %v1358_v18 }
 0x182   : > { %8429 = vmatmul.mubr.msk.bf16.gmra.mrb[84].mxu0 %vm462_vm0, %v1415_v39 }
 0x183   : > { %8432 = vmatprep.mubr.msk.bf16.mxu0 %vm462_vm0, %v1419_v13 }
 0x184   : > { %2073 = vmatmul.mubr.bf16.gmra.mrb[52].mxu1 %v1421_v2 }
 0x185   : > { %2080 = vmatprep.mubr.bf16.mxu1 %v1426_v11 }
 0x18a   : > { %8433 = vmatmul.mubr.msk.bf16.gmra.mrb[88].mxu0 %vm462_vm0, %v1423_v17  ;;  %v9170_v17 = vld [vmem:[%s15598_s4 + $0x48] sm:$0xff]  }
 0x18b   : > { %8436 = vmatprep.mubr.msk.bf16.mxu0 %vm462_vm0, %v16116_v57  ;;  %7798 = vmatprep.subr.bf16.mxu1 %v9170_v17 }
 0x18c   : > { %2081 = vmatmul.mubr.bf16.gmra.mrb[56].mxu1 %v1425_v35 }
 0x18d   : > { %2088 = vmatprep.mubr.bf16.mxu1 %v1430_v60  ;;  %7799 = vmatpush3.bf16.msra.mxu1 %v9171_v1 }
 0x192   : > { %8437 = vmatmul.mubr.msk.bf16.gmra.mrb[92].mxu0 %vm462_vm0, %v16118_v16 }
 0x194   : > { %2089 = vmatmul.mubr.bf16.gmra.mrb[60].mxu1 %v1429_v10 }
 0x1ad   : > { %v7568_v62 = vpop.f32.mrb[0].mxu0 }
 0x1ae   : > { %v7569_v21 = vpop.f32.mrb[1].mxu0 }
 0x1af   : > { %v7570_v60 = vadd.f32 %v7569_v21, %v7568_v62  ;;  %v7571_v33 = vpop.f32.mrb[2].mxu0 }
 0x1b0   : > { %v7572_v31 = vpop.f32.mrb[3].mxu0 }
 0x1b1   : > { %v11422_v56 = vadd.f32 %v7572_v31, %v7571_v33  ;;  %v1810_v48 = vadd.f32 %v7570_v60, %v11466_v47 }
 0x1b3   : > { %v1813_v21 = vadd.f32 %v11422_v56, %v11466_v47 }
 0x1b5   : > { %v7574_v44 = vpop.f32.mrb[4].mxu0 }
 0x1b6   : > { %v7575_v45 = vpop.f32.mrb[5].mxu0 }
 0x1b7   : > { %v11424_v30 = vadd.f32 %v7575_v45, %v7574_v44  ;;  %v7577_v37 = vpop.f32.mrb[6].mxu0 }
 0x1b8   : > { %v7578_v41 = vpop.f32.mrb[7].mxu0 }
 0x1b9   : > { %v11426_v3 = vadd.f32 %v7578_v41, %v7577_v37 }
 0x1bd   : > { %v7580_v9 = vpop.f32.mrb[8].mxu0 }
 0x1be   : > { %v7581_v52 = vpop.f32.mrb[9].mxu0 }
 0x1bf   : > { %v11434_v23 = vadd.f32 %v7581_v52, %v7580_v9  ;;  %v7583_v54 = vpop.f32.mrb[10].mxu0 }
 0x1c0   : > { %v7584_v12 = vpop.f32.mrb[11].mxu0 }
 0x1c1   : > { %v11437_v19 = vadd.f32 %v7584_v12, %v7583_v54  ;;  %v1818_v54 = vadd.f32 %v11424_v30, %v11466_v47 }
 0x1c5   : > { %v7586_v27 = vpop.f32.mrb[12].mxu0 }
 0x1c6   : > { %v7587_v63 = vpop.f32.mrb[13].mxu0 }
 0x1c7   : > { %v11439_v15 = vadd.f32 %v7587_v63, %v7586_v27  ;;  %v7589_v29 = vpop.f32.mrb[14].mxu0 }
 0x1c8   : > { %v7590_v6 = vpop.f32.mrb[15].mxu0 }
 0x1c9   : > { %v11441_v28 = vadd.f32 %v7590_v6, %v7589_v29  ;;  %v1821_v29 = vadd.f32 %v11426_v3, %v11466_v47 }
 0x1cd   : > { %v7592_v26 = vpop.f32.mrb[16].mxu0 }
 0x1ce   : > { %v7593_v14 = vpop.f32.mrb[17].mxu0 }
 0x1cf   : > { %v11443_v42 = vadd.f32 %v7593_v14, %v7592_v26  ;;  %v7595_v40 = vpop.f32.mrb[18].mxu0  ;;  %v9172_v26 = vld [vmem:[%s15598_s4 + $0x50] sm:$0xff]  }
 0x1d0   : > { %v7596_v0 = vpop.f32.mrb[19].mxu0  ;;  %v9173_v14 = vld [vmem:[%s15598_s4 + $0x10] sm:$0xff]   ;;  %7800 = vmatprep.subr.bf16.mxu1 %v9172_v26 }
 0x1d1   : > { %v11445_v36 = vadd.f32 %v7596_v0, %v7595_v40  ;;  %7801 = vmatpush3.bf16.msra.mxu1 %v9173_v14 }
 0x1d5   : > { %v7598_v43 = vpop.f32.mrb[20].mxu0 }
 0x1d6   : > { %v7599_v20 = vpop.f32.mrb[21].mxu0 }
 0x1d7   : > { %v11450_v55 = vadd.f32 %v7599_v20, %v7598_v43  ;;  %v7601_v7 = vpop.f32.mrb[22].mxu0 }
 0x1d8   : > { %v7602_v2 = vpop.f32.mrb[23].mxu0 }
 0x1d9   : > { %v11455_v4 = vadd.f32 %v7602_v2, %v7601_v7  ;;  %v1826_v2 = vadd.f32 %v11434_v23, %v11466_v47 }
 0x1dd   : > { %v7604_v25 = vpop.f32.mrb[24].mxu0 }
 0x1de   : > { %v7605_v11 = vpop.f32.mrb[25].mxu0 }
 0x1df   : > { %v11457_v39 = vadd.f32 %v7605_v11, %v7604_v25  ;;  %v7607_v50 = vpop.f32.mrb[26].mxu0 }
 0x1e0   : > { %v7608_v18 = vpop.f32.mrb[27].mxu0 }
 0x1e1   : > { %v11459_v24 = vadd.f32 %v7608_v18, %v7607_v50 }
 0x1e5   : > { %v7610_v38 = vpop.f32.mrb[28].mxu0 }
 0x1e6   : > { %v7611_v13 = vpop.f32.mrb[29].mxu0 }
 0x1e7   : > { %v11461_v34 = vadd.f32 %v7611_v13, %v7610_v38  ;;  %v7613_v35 = vpop.f32.mrb[30].mxu0  ;;  %v1829_v38 = vadd.f32 %v11437_v19, %v11466_v47 }
 0x1e8   : > { %v7614_v51 = vpop.f32.mrb[31].mxu0 }
 0x1e9   : > { %v11474_v49 = vadd.f32 %v7614_v51, %v7613_v35 }
 0x1ed   : > { %v7616_v16 = vpop.f32.mrb[32].mxu0 }
 0x1ee   : > { %v7617_v33 = vpop.f32.mrb[33].mxu0 }
 0x1ef   : > { %v7680_v5 = vpop.f32.mrb[0].mxu1  ;;  %v11481_v31 = vadd.f32 %v7617_v33, %v7616_v16  ;;  %v7619_v44 = vpop.f32.mrb[34].mxu0 }
 0x1f0   : > { %v7681_v53 = vpop.f32.mrb[1].mxu1  ;;  %v7620_v37 = vpop.f32.mrb[35].mxu0 }
 0x1f1   : > { %v7682_v10 = vadd.f32 %v7681_v53, %v7680_v5  ;;  %v7683_v22 = vpop.f32.mrb[2].mxu1  ;;  %v11485_v41 = vadd.f32 %v7620_v37, %v7619_v44  ;;  %v9174_v44 = vld [vmem:[%s15598_s4 + $0x58] sm:$0xff]  }
 0x1f2   : > { %v7684_v57 = vpop.f32.mrb[3].mxu1  ;;  %v9175_v37 = vld [vmem:[%s15598_s4 + $0x18] sm:$0xff]   ;;  %7802 = vmatprep.subr.bf16.mxu1 %v9174_v44 }
 0x1f3   : > { %v7685_v59 = vadd.f32 %v7684_v57, %v7683_v22  ;;  %v11477_v62 = vadd.f32 %v7682_v10, %v1810_v48  ;;  %v1834_v48 = vadd.f32 %v11439_v15, %v11466_v47  ;;  %7803 = vmatpush3.bf16.msra.mxu1 %v9175_v37  ;;  %v1858_v37 = vadd.f32 %v11457_v39, %v11466_v47 }
 0x1f5   : > { %v11483_v45 = vadd.f32 %v7685_v59, %v1813_v21  ;;  %v7622_v63 = vpop.f32.mrb[36].mxu0  ;;  %v1837_v21 = vadd.f32 %v11441_v28, %v11466_v47 }
 0x1f6   : > { %v7623_v6 = vpop.f32.mrb[37].mxu0 }
 0x1f7   : > { %v7686_v9 = vpop.f32.mrb[4].mxu1  ;;  %v11499_v40 = vadd.f32 %v7623_v6, %v7622_v63  ;;  %v7625_v30 = vpop.f32.mrb[38].mxu0  ;;  %v1842_v63 = vadd.f32 %v11443_v42, %v11466_v47 }
 0x1f8   : > { %v7687_v60 = vpop.f32.mrb[5].mxu1  ;;  %v7626_v43 = vpop.f32.mrb[39].mxu0 }
 0x1f9   : > { %v7688_v58 = vadd.f32 %v7687_v60, %v7686_v9  ;;  %v7689_v52 = vpop.f32.mrb[6].mxu1  ;;  %v11503_v20 = vadd.f32 %v7626_v43, %v7625_v30  ;;  %v1845_v30 = vadd.f32 %v11445_v36, %v11466_v47 }
 0x1fa   : > { %v7690_v12 = vpop.f32.mrb[7].mxu1 }
 0x1fb   : > { %v7691_v27 = vadd.f32 %v7690_v12, %v7689_v52  ;;  %v11489_v56 = vadd.f32 %v7688_v58, %v1818_v54 }
 0x1fd   : > { %v11501_v0 = vadd.f32 %v7691_v27, %v1821_v29  ;;  %v7628_v50 = vpop.f32.mrb[40].mxu0 }
 0x1fe   : > { %v7629_v13 = vpop.f32.mrb[41].mxu0 }
 0x1ff   : > { %v7692_v46 = vpop.f32.mrb[8].mxu1  ;;  %v11511_v35 = vadd.f32 %v7629_v13, %v7628_v50  ;;  %v7631_v51 = vpop.f32.mrb[42].mxu0 }
 0x200   : > { %v7693_v3 = vpop.f32.mrb[9].mxu1  ;;  %v7632_v1 = vpop.f32.mrb[43].mxu0 }
 0x201   : > { %v7694_v7 = vadd.f32 %v7693_v3, %v7692_v46  ;;  %v7695_v8 = vpop.f32.mrb[10].mxu1  ;;  %v11515_v5 = vadd.f32 %v7632_v1, %v7631_v51 }
 0x202   : > { %v7696_v25 = vpop.f32.mrb[11].mxu1 }
 0x203   : > { %v7697_v11 = vadd.f32 %v7696_v25, %v7695_v8  ;;  %v11507_v18 = vadd.f32 %v7694_v7, %v1826_v2 }
 0x205   : > { %v11513_v17 = vadd.f32 %v7697_v11, %v1829_v38  ;;  %v7634_v16 = vpop.f32.mrb[44].mxu0  ;;  %v1850_v38 = vadd.f32 %v11450_v55, %v11466_v47 }
 0x206   : > { %v7635_v33 = vpop.f32.mrb[45].mxu0 }
 0x207   : > { %v7698_v53 = vpop.f32.mrb[12].mxu1  ;;  %v11529_v9 = vadd.f32 %v7635_v33, %v7634_v16  ;;  %v7637_v15 = vpop.f32.mrb[46].mxu0 }
 0x208   : > { %v7699_v10 = vpop.f32.mrb[13].mxu1  ;;  %v7638_v58 = vpop.f32.mrb[47].mxu0 }
 0x209   : > { %v7700_v23 = vadd.f32 %v7699_v10, %v7698_v53  ;;  %v7701_v22 = vpop.f32.mrb[14].mxu1  ;;  %v11533_v52 = vadd.f32 %v7638_v58, %v7637_v15  ;;  %v1853_v53 = vadd.f32 %v11455_v4, %v11466_v47 }
 0x20a   : > { %v7702_v57 = vpop.f32.mrb[15].mxu1 }
 0x20b   : > { %v7703_v59 = vadd.f32 %v7702_v57, %v7701_v22  ;;  %v11519_v19 = vadd.f32 %v7700_v23, %v1834_v48  ;;  %v9176_v23 = vld [vmem:[%s15598_s4 + $0x60] sm:$0xff]  }
 0x20c   : > { %v9177_v22 = vld [vmem:[%s15598_s4 + $0x20] sm:$0xff]   ;;  %7804 = vmatprep.subr.bf16.mxu1 %v9176_v23 }
 0x20d   : > { %v11531_v60 = vadd.f32 %v7703_v59, %v1837_v21  ;;  %v7640_v26 = vpop.f32.mrb[48].mxu0  ;;  %7805 = vmatpush3.bf16.msra.mxu1 %v9177_v22  ;;  %v15718_v22 = vrot.slane %v11428_v32, 7 }
 0x20e   : > { %v7641_v43 = vpop.f32.mrb[49].mxu0 }
 0x20f   : > { %v7704_v54 = vpop.f32.mrb[16].mxu1  ;;  %v11541_v46 = vadd.f32 %v7641_v43, %v7640_v26  ;;  %v7643_v3 = vpop.f32.mrb[50].mxu0 }
 0x210   : > { %v7705_v28 = vpop.f32.mrb[17].mxu1  ;;  %v7644_v8 = vpop.f32.mrb[51].mxu0 }
 0x211   : > { %v7706_v12 = vadd.f32 %v7705_v28, %v7704_v54  ;;  %v7707_v27 = vpop.f32.mrb[18].mxu1  ;;  %v11545_v2 = vadd.f32 %v7644_v8, %v7643_v3 }
 0x212   : > { %v7708_v29 = vpop.f32.mrb[19].mxu1 }
 0x213   : > { %v7709_v6 = vadd.f32 %v7708_v29, %v7707_v27  ;;  %v11537_v14 = vadd.f32 %v7706_v12, %v1842_v63  ;;  %v1861_v12 = vadd.f32 %v11459_v24, %v11466_v47  ;;  %v11581_v24 = vld [vmem:[#allocation2 + $0x40] sm:$0xff] }
 0x215   : > { %v11543_v7 = vadd.f32 %v7709_v6, %v1845_v30  ;;  %v7646_v1 = vpop.f32.mrb[52].mxu0 }
 0x216   : > { %v7647_v10 = vpop.f32.mrb[53].mxu0 }
 0x217   : > { %v7710_v25 = vpop.f32.mrb[20].mxu1  ;;  %v11559_v48 = vadd.f32 %v7647_v10, %v7646_v1  ;;  %v7649_v55 = vpop.f32.mrb[54].mxu0  ;;  %v11587_v1 = vld [vmem:[#allocation2 + $0x60] sm:$0xff] }
 0x218   : > { %v7711_v11 = vpop.f32.mrb[21].mxu1  ;;  %v7650_v59 = vpop.f32.mrb[55].mxu0  ;;  %v11591_v10 = vld [vmem:[#allocation2 + $0xa0] sm:$0xff] }
 0x219   : > { %v7712_v42 = vadd.f32 %v7711_v11, %v7710_v25  ;;  %v7713_v50 = vpop.f32.mrb[22].mxu1  ;;  %v11563_v16 = vadd.f32 %v7650_v59, %v7649_v55  ;;  %v1866_v25 = vadd.f32 %v11461_v34, %v11466_v47  ;;  %v2542_v34 = vrot.slane %v11430_v61, 7  ;;  %v11595_v55 = vld [vmem:[#allocation2 + $0xc0] sm:$0xff]  ;;  %v9178_v59 = vld [vmem:[%s15598_s4 + $0x68] sm:$0xff]  }
 0x21a   : > { %v7714_v13 = vpop.f32.mrb[23].mxu1  ;;  %v11609_v61 = vld [vmem:[#allocation2 + $0x100] sm:$0xff]  ;;  %7806 = vmatprep.subr.bf16.mxu1 %v9178_v59  ;;  %v9180_v59 = vld [vmem:[%s15598_s4 + $0x70] sm:$0xff]  }
 0x21b   : > { %v7715_v51 = vadd.f32 %v7714_v13, %v7713_v50  ;;  %v11549_v36 = vadd.f32 %v7712_v42, %v1850_v38  ;;  %v11579_v42 = vld [vmem:[#allocation2 + $0x20] sm:$0xff] }
 0x21d   : > { %v11561_v57 = vadd.f32 %v7715_v51, %v1853_v53  ;;  %v7652_v54 = vpop.f32.mrb[56].mxu0  ;;  %v1869_v51 = vadd.f32 %v11474_v49, %v11466_v47  ;;  %v11589_v53 = vld [vmem:[#allocation2 + $0x80] sm:$0xff]  ;;  %v9179_v49 = vld [vmem:[%s15598_s4 + $0x28] sm:$0xff]  }
 0x21e   : > { %v7653_v27 = vpop.f32.mrb[57].mxu0  ;;  %7807 = vmatpush3.bf16.msra.mxu1 %v9179_v49  ;;  %v2543_v49 = vsel %vm688_vm1, %v15718_v22, %v2542_v34  ;;  %v16124_v34 = vld [vmem:[#allocation12_spill] sm:$0xff] }
 0x21f   : > { %v7716_v21 = vpop.f32.mrb[24].mxu1  ;;  %v11571_v63 = vadd.f32 %v7653_v27, %v7652_v54  ;;  %v7655_v29 = vpop.f32.mrb[58].mxu0  ;;  %v11616_v27 = vld [vmem:[#allocation2 + $0x120] sm:$0xff]  ;;  %7808 = vmatprep.subr.bf16.mxu1 %v9180_v59  ;;  %v11665_v59 = vadd.f32 %v11533_v52, %v11466_v47 }
 0x220   : > { %v7717_v4 = vpop.f32.mrb[25].mxu1  ;;  %v7656_v26 = vpop.f32.mrb[59].mxu0 }
 0x221   : > { %v7718_v33 = vadd.f32 %v7717_v4, %v7716_v21  ;;  %v7719_v44 = vpop.f32.mrb[26].mxu1  ;;  %v11575_v30 = vadd.f32 %v7656_v26, %v7655_v29  ;;  %v11618_v29 = vld [vmem:[#allocation2 + $0x140] sm:$0xff] }
 0x222   : > { %v7720_v15 = vpop.f32.mrb[27].mxu1  ;;  %16120 = vst [vmem:[#allocation16_spill] sm:$0xff] %v11618_v29 }
 0x223   : > { %v7721_v58 = vadd.f32 %v7720_v15, %v7719_v44  ;;  %v11567_v28 = vadd.f32 %v7718_v33, %v1858_v37  ;;  %v11607_v44 = vld [vmem:[#allocation2 + $0xe0] sm:$0xff]  ;;  %v11611_v15 = vstv %s459_s19 }
 0x224   : > { %16119 = vst [vmem:[#allocation28_spill] sm:$0xff] %v11611_v15 }
 0x225   : > { %v11573_v6 = vadd.f32 %v7721_v58, %v1861_v12  ;;  %v7658_v38 = vpop.f32.mrb[60].mxu0  ;;  %v1885_v58 = vadd.f32 %v11503_v20, %v11466_v47  ;;  %v11661_v20 = vadd.f32 %v11529_v9, %v11466_v47  ;;  %v11680_v9 = vadd.f32 %v11545_v2, %v11466_v47 }
 0x226   : > { %v7659_v23 = vpop.f32.mrb[61].mxu0 }
 0x227   : > { %v7722_v43 = vpop.f32.mrb[28].mxu1  ;;  %v11603_v21 = vadd.f32 %v7659_v23, %v7658_v38  ;;  %v7661_v4 = vpop.f32.mrb[62].mxu0  ;;  %v1874_v38 = vadd.f32 %v11481_v31, %v11466_v47  ;;  %v1877_v31 = vadd.f32 %v11485_v41, %v11466_v47  ;;  %v11656_v41 = vadd.f32 %v11511_v35, %v11466_v47 }
 0x228   : > { %v7723_v39 = vpop.f32.mrb[29].mxu1  ;;  %v7662_v37 = vpop.f32.mrb[63].mxu0 }
 0x229   : > { %v7724_v3 = vadd.f32 %v7723_v39, %v7722_v43  ;;  %v7725_v8 = vpop.f32.mrb[30].mxu1  ;;  %v11620_v26 = vadd.f32 %v7662_v37, %v7661_v4  ;;  %v9181_v4 = vld [vmem:[%s15598_s4 + $0x30] sm:$0xff]   ;;  %v2419_v37 = vld [vmem:[#allocation2] sm:$0xff]  ;;  %v1882_v39 = vadd.f32 %v11499_v40, %v11466_v47 }
 0x22a   : > { %v7726_v11 = vpop.f32.mrb[31].mxu1  ;;  %7809 = vmatpush3.bf16.msra.mxu1 %v9181_v4 }
 0x22b   : > { %v7727_v50 = vadd.f32 %v7726_v11, %v7725_v8  ;;  %v11583_v13 = vadd.f32 %v7724_v3, %v1866_v25  ;;  %v11625_v25 = vld [vmem:[#allocation2 + $0x180] sm:$0xff] }
 0x22c   : > { %16121 = vst [vmem:[#allocation25_spill] sm:$0xff] %v11625_v25  ;;  %v11627_v11 = vld [vmem:[#allocation2 + $0x160] sm:$0xff] }
 0x22d   : > { %v11605_v33 = vadd.f32 %v7727_v50, %v1869_v51  ;;  %16122 = vst [vmem:[#allocation31_spill] sm:$0xff] %v11627_v11  ;;  %v2539_v51 = vrot.slane %v2419_v37, 7  ;;  %v16123_v37 = vrot.slane %v11428_v32, 7 }
 0x22f   : > { %v7728_v43 = vpop.f32.mrb[32].mxu1  ;;  %v2541_v2 = vsel %vm688_vm1, %v2539_v51, %v16123_v37 }
 0x230   : > { %v7729_v50 = vpop.f32.mrb[33].mxu1 }
 0x231   : > { %v7730_v8 = vadd.f32 %v7729_v50, %v7728_v43  ;;  %v7731_v3 = vpop.f32.mrb[34].mxu1  ;;  %v8410_v50 = vpop.f32.mrb[64].mxu0 }
 0x232   : > { %v7732_v12 = vpop.f32.mrb[35].mxu1  ;;  %v2140_v40 = vadd.f32 %v8410_v50, %v11489_v56  ;;  %v2131_v23 = vpop.f32.mrb[65].mxu0  ;;  %v11676_v56 = vadd.f32 %v11541_v46, %v11466_v47 }
 0x233   : > { %v7733_v43 = vadd.f32 %v7732_v12, %v7731_v3  ;;  %v11652_v22 = vadd.f32 %v7730_v8, %v1874_v38  ;;  %v11669_v12 = vadd.f32 %v11515_v5, %v11466_v47  ;;  %v2132_v35 = vadd.f32 %v2131_v23, %v11477_v62  ;;  %v8411_v3 = vpop.f32.mrb[66].mxu0 }
 0x234   : > { %vm2260_vm3 = vcmp.ge.f32.partialorder %v2140_v40, 0.0  ;;  %v2293_v52 = vmul.f32 %v11611_v15, %v2140_v40  ;;  %v2143_v38 = vadd.f32 %v8411_v3, %v11501_v0  ;;  %v2134_v5 = vpop.f32.mrb[67].mxu0  ;;  %v11686_v62 = vadd.f32 %v11559_v48, %v11466_v47 }
 0x235   : > { %v11672_v8 = vadd.f32 %v7733_v43, %v1877_v31  ;;  %vm2258_vm4 = vcmp.ge.f32.partialorder %v2132_v35, 0.0  ;;  %v2291_v23 = vmul.f32 %v11611_v15, %v2132_v35  ;;  %v2135_v46 = vadd.f32 %v2134_v5, %v11483_v45  ;;  %v8889_v31 = vpop.permute.xlu1 %8888  ;;  %v16126_v5 = vld [vmem:[#allocation10_spill] sm:$0xff] }
 0x236   : > { %v2325_v43 = vsel %vm2260_vm3, %v2140_v40, %v2293_v52  ;;  %vm2261_vm5 = vcmp.ge.f32.partialorder %v2143_v38, 0.0  ;;  %v2294_v0 = vmul.f32 %v11611_v15, %v2143_v38  ;;  %v8891_v3 = vunpack.i.h.bf16 %v8889_v31  ;;  %v16128_v52 = vld [vmem:[#allocation13_spill] sm:$0xff] }
 0x237   : > { %v7734_v4 = vpop.f32.mrb[36].mxu1  ;;  %v11695_v48 = vadd.f32 %v2325_v43, %v16124_v34  ;;  %v2323_v54 = vsel %vm2258_vm4, %v2132_v35, %v2291_v23  ;;  %vm2259_vm6 = vcmp.ge.f32.partialorder %v2135_v46, 0.0  ;;  %v2292_v11 = vmul.f32 %v11611_v15, %v2135_v46  ;;  %v8414_v34 = vpop.f32.mrb[68].mxu0 }
 0x238   : > { %v7735_v50 = vpop.f32.mrb[37].mxu1  ;;  %v11699_v25 = vadd.f32 %v2323_v54, %v16126_v5  ;;  %v2326_v32 = vsel %vm2261_vm5, %v2143_v38, %v2294_v0  ;;  %v11702_v40 = vsel %vm462_vm0, %v2543_v49, %v8891_v3  ;;  %v8890_v29 = vunpack.i.l.bf16 %v8889_v31  ;;  %v16130_v54 = vld [vmem:[#allocation11_spill] sm:$0xff]  ;;  %v2147_v49 = vpop.f32.mrb[69].mxu0 }
 0x239   : > { %16125 = vst [vmem:[#allocation32_spill] sm:$0xff] %v11695_v48  ;;  %v7737_v45 = vpop.f32.mrb[38].mxu1  ;;  %v7736_v51 = vadd.f32 %v7735_v50, %v7734_v4  ;;  %2389 = vst.msk [vmem:[#allocation2 + $0x48] sm:$0xff] %vm462_vm0, %v11695_v48  ;;  %v11707_v43 = vadd.f32 %v2326_v32, %v16128_v52  ;;  %v2324_v35 = vsel %vm2259_vm6, %v2135_v46, %v2292_v11  ;;  %v8415_v46 = vpop.f32.mrb[70].mxu0 }
 0x23a   : > { %16127 = vst [vmem:[#allocation66_spill] sm:$0xff] %v11699_v25  ;;  %v7738_v37 = vpop.f32.mrb[39].mxu1  ;;  %2387 = vst.msk [vmem:[#allocation2 + $0x28] sm:$0xff] %vm462_vm0, %v11699_v25  ;;  %v11712_v38 = vadd.f32 %v2324_v35, %v16130_v54  ;;  %v2156_v4 = vadd.f32 %v8414_v34, %v11519_v19  ;;  %v11719_v50 = vadd.f32 %v11563_v16, %v11466_v47  ;;  %v2150_v34 = vpop.f32.mrb[71].mxu0  ;;  %v16132_v35 = vld [vmem:[#allocation18_spill] sm:$0xff] }
 0x23b   : > { %16129 = vst [vmem:[#allocation33_spill] sm:$0xff] %v11707_v43  ;;  %v7739_v23 = vadd.f32 %v7738_v37, %v7737_v45  ;;  %v11715_v0 = vadd.f32 %v7736_v51, %v1882_v39  ;;  %2390 = vst.msk [vmem:[#allocation2 + $0x50] sm:$0xff] %vm462_vm0, %v11707_v43  ;;  %v2148_v11 = vadd.f32 %v2147_v49, %v11507_v18  ;;  %v9182_v37 = vld [vmem:[%s15598_s4 + $0x78] sm:$0xff]  }
 0x23c   : > { %16131 = vst [vmem:[#allocation35_spill] sm:$0xff] %v11712_v38  ;;  %v11728_v3 = vadd.f32 %v11571_v63, %v11466_v47  ;;  %v11731_v19 = vsel %vm462_vm0, %v2541_v2, %v8890_v29  ;;  %2388 = vst.msk [vmem:[#allocation2 + $0x30] sm:$0xff] %vm462_vm0, %v11712_v38  ;;  %vm2264_vm7 = vcmp.ge.f32.partialorder %v2156_v4, 0.0  ;;  %v2297_v16 = vmul.f32 %v11611_v15, %v2156_v4 }
 0x23d   : > { %v11724_v31 = vadd.f32 %v7739_v23, %v1885_v58  ;;  %v2159_v39 = vadd.f32 %v8415_v46, %v11531_v60  ;;  %vm2262_vm8 = vcmp.ge.f32.partialorder %v2148_v11, 0.0  ;;  %v2295_v58 = vmul.f32 %v11611_v15, %v2148_v11  ;;  %v16134_v46 = vld [vmem:[#allocation14_spill] sm:$0xff]  ;;  %7810 = vmatprep.subr.bf16.mxu1 %v9182_v37 }
 0x23e   : > { %v2151_v63 = vadd.f32 %v2150_v34, %v11513_v17  ;;  %v11743_v29 = vadd.f32 %v11575_v30, %v11466_v47  ;;  %v2329_v2 = vsel %vm2264_vm7, %v2156_v4, %v2297_v16  ;;  %v11748_v60 = vadd.f32 %v11603_v21, %v11466_v47  ;;  %v9183_v17 = vld [vmem:[%s15598_s4 + $0x38] sm:$0xff]  }
 0x23f   : > { %v7740_v45 = vpop.f32.mrb[40].mxu1  ;;  %vm2265_vm9 = vcmp.ge.f32.partialorder %v2159_v39, 0.0  ;;  %v2298_v32 = vmul.f32 %v11611_v15, %v2159_v39  ;;  %v11757_v30 = vadd.f32 %v2329_v2, %v16132_v35  ;;  %v2327_v23 = vsel %vm2262_vm8, %v2148_v11, %v2295_v58  ;;  %v16136_v11 = vld [vmem:[#allocation19_spill] sm:$0xff]  ;;  %7811 = vmatpush3.bf16.msra.mxu1 %v9183_v17 }
 0x240   : > { %v7741_v51 = vpop.f32.mrb[41].mxu1  ;;  %vm2263_vm10 = vcmp.ge.f32.partialorder %v2151_v63, 0.0  ;;  %v2296_v4 = vmul.f32 %v11611_v15, %v2151_v63  ;;  %v11761_v16 = vadd.f32 %v2327_v23, %v16134_v46  ;;  %v11763_v52 = vld [vmem:[#allocation2 + $0x48] sm:$0xff]  ;;  %v11767_v54 = vadd.f32 %v11620_v26, %v11466_v47  ;;  %v8418_v23 = vpop.f32.mrb[72].mxu0 }
 0x241   : > { %16133 = vst [vmem:[#allocation38_spill] sm:$0xff] %v11757_v30  ;;  %v7743_v49 = vpop.f32.mrb[42].mxu1  ;;  %v2330_v21 = vsel %vm2265_vm9, %v2159_v39, %v2298_v32  ;;  %v7742_v34 = vadd.f32 %v7741_v51, %v7740_v45  ;;  %2393 = vst.msk [vmem:[#allocation2 + $0x88] sm:$0xff] %vm462_vm0, %v11757_v30  ;;  %v11776_v39 = vld [vmem:[#allocation2 + $0x28] sm:$0xff]  ;;  %v2550_v45 = vrot.slane %v11763_v52, 7  ;;  %v2172_v32 = vadd.f32 %v8418_v23, %v11549_v36  ;;  %v2163_v51 = vpop.f32.mrb[73].mxu0 }
 0x242   : > { %16135 = vst [vmem:[#allocation39_spill] sm:$0xff] %v11761_v16  ;;  %v7744_v18 = vpop.f32.mrb[43].mxu1  ;;  %v11772_v58 = vadd.f32 %v2330_v21, %v16136_v11  ;;  %v2328_v2 = vsel %vm2263_vm10, %v2151_v63, %v2296_v4  ;;  %2391 = vst.msk [vmem:[#allocation2 + $0x68] sm:$0xff] %vm462_vm0, %v11761_v16  ;;  %v16138_v47 = vld [vmem:[#allocation15_spill] sm:$0xff]  ;;  %v2545_v37 = vrot.slane %v11776_v39, 7  ;;  %v11786_v63 = vld [vmem:[#allocation2 + $0x50] sm:$0xff]  ;;  %v2164_v17 = vadd.f32 %v2163_v51, %v11537_v14 }
 0x243   : > { %v11774_v35 = vadd.f32 %v7744_v18, %v7743_v49  ;;  %v11782_v26 = vadd.f32 %v2328_v2, %v16138_v47  ;;  %v11789_v18 = vadd.f32 %v7742_v34, %v11656_v41  ;;  %v8419_v4 = vpop.f32.mrb[74].mxu0  ;;  %v11794_v49 = vld [vmem:[#allocation2 + $0x30] sm:$0xff]  ;;  %v8907_v21 = vpack.i.bf16 %v11786_v63, %v11763_v52  ;;  %v16143_v30 = vld [vmem:[#allocation22_spill] sm:$0xff] }
 0x244   : > { %16137 = vst [vmem:[#allocation46_spill] sm:$0xff] %v11772_v58  ;;  %2394 = vst.msk [vmem:[#allocation2 + $0x90] sm:$0xff] %vm462_vm0, %v11772_v58  ;;  %v16140_v36 = vrot.slane %v11581_v24, 7  ;;  %v2552_v23 = vrot.slane %v11786_v63, 7  ;;  %vm2268_vm11 = vcmp.ge.f32.partialorder %v2172_v32, 0.0  ;;  %v2301_v41 = vmul.f32 %v11611_v15, %v2172_v32  ;;  %v2166_v34 = vpop.f32.mrb[75].mxu0 }
 0x245   : > { %16139 = vst [vmem:[#allocation47_spill] sm:$0xff] %v11782_v26  ;;  %2392 = vst.msk [vmem:[#allocation2 + $0x70] sm:$0xff] %vm462_vm0, %v11782_v26  ;;  %v2175_v14 = vadd.f32 %v8419_v4, %v11561_v57  ;;  %v8897_v51 = vpack.i.bf16 %v11794_v49, %v11776_v39  ;;  %vm2266_vm12 = vcmp.ge.f32.partialorder %v2164_v17, 0.0  ;;  %v2299_v24 = vmul.f32 %v11611_v15, %v2164_v17 }
 0x246   : > { %v11801_v2 = vsel %vm688_vm1, %v16140_v36, %v2550_v45  ;;  %v2167_v36 = vadd.f32 %v2166_v34, %v11543_v7  ;;  %v16141_v47 = vrot.slane %v11579_v42, 7  ;;  %v2333_v5 = vsel %vm2268_vm11, %v2172_v32, %v2301_v41  ;;  %v16145_v34 = vld [vmem:[#allocation20_spill] sm:$0xff] }
 0x247   : > { %v7746_v11 = vpop.f32.mrb[44].mxu1  ;;  %vm2269_vm13 = vcmp.ge.f32.partialorder %v2175_v14, 0.0  ;;  %v2302_v16 = vmul.f32 %v11611_v15, %v2175_v14  ;;  %8898 = vrot.lane.b32.xlu1 %v8897_v51, %s9747_s0  ;;  %v2547_v4 = vrot.slane %v11794_v49, 7  ;;  %v11821_v26 = vadd.f32 %v2333_v5, %v16143_v30  ;;  %v16148_v5 = vld [vmem:[#allocation23_spill] sm:$0xff] }
 0x248   : > { %v11815_v46 = vsel %vm688_vm1, %v16141_v47, %v2545_v37  ;;  %v7747_v57 = vpop.f32.mrb[45].mxu1  ;;  %v2331_v58 = vsel %vm2266_vm12, %v2164_v17, %v2299_v24  ;;  %vm2267_vm14 = vcmp.ge.f32.partialorder %v2167_v36, 0.0  ;;  %v2300_v7 = vmul.f32 %v11611_v15, %v2167_v36  ;;  %v11832_v51 = vld [vmem:[#allocation2 + $0x88] sm:$0xff] }
 0x249   : > { %16142 = vst [vmem:[#allocation54_spill] sm:$0xff] %v11815_v46  ;;  %16144 = vst [vmem:[#allocation55_spill] sm:$0xff] %v11821_v26  ;;  %v7749_v42 = vpop.f32.mrb[46].mxu1  ;;  %v11825_v47 = vadd.f32 %v2331_v58, %v16145_v34  ;;  %v2334_v32 = vsel %vm2269_vm13, %v2175_v14, %v2302_v16  ;;  %v11827_v41 = vadd.f32 %v7747_v57, %v7746_v11  ;;  %v8422_v58 = vpop.f32.mrb[76].mxu0  ;;  %v11843_v11 = vld [vmem:[#allocation2 + $0x68] sm:$0xff]  ;;  %v16152_v34 = vrot.slane %v11587_v1, 7 }
 0x24a   : > { %v7750_v25 = vpop.f32.mrb[47].mxu1  ;;  %v11830_v48 = vsel %vm688_vm1, %v2545_v37, %v2547_v4  ;;  %2397 = vst.msk [vmem:[#allocation2 + $0xc8] sm:$0xff] %vm462_vm0, %v11821_v26  ;;  %v11837_v17 = vadd.f32 %v2334_v32, %v16148_v5  ;;  %v2332_v24 = vsel %vm2267_vm14, %v2167_v36, %v2300_v7  ;;  %v16150_v37 = vld [vmem:[#allocation21_spill] sm:$0xff]  ;;  %v2188_v57 = vadd.f32 %v8422_v58, %v11583_v13  ;;  %v2179_v4 = vpop.f32.mrb[77].mxu0 }
 0x24b   : > { %16146 = vst [vmem:[#allocation56_spill] sm:$0xff] %v11825_v47  ;;  %16147 = vst [vmem:[#allocation57_spill] sm:$0xff] %v11830_v48  ;;  %v11839_v30 = vadd.f32 %v7750_v25, %v7749_v42  ;;  %v8882_v16 = vpack.i.bf16 %v11830_v48, %v11815_v46  ;;  %v11848_v14 = vadd.f32 %v2332_v24, %v16150_v37  ;;  %8908 = vrot.lane.b32.xlu1 %v8907_v21, %s9747_s0  ;;  %v11856_v7 = vld [vmem:[#allocation2 + $0x90] sm:$0xff]  ;;  %v8423_v32 = vpop.f32.mrb[78].mxu0 }
 0x24c   : > { %16149 = vst [vmem:[#allocation58_spill] sm:$0xff] %v11837_v17  ;;  %2395 = vst.msk [vmem:[#allocation2 + $0xa8] sm:$0xff] %vm462_vm0, %v11825_v47  ;;  %v11853_v25 = vsel %vm688_vm1, %v2550_v45, %v2552_v23  ;;  %v2555_v36 = vrot.slane %v11843_v11, 7  ;;  %v2180_v42 = vadd.f32 %v2179_v4, %v11567_v28  ;;  %v11864_v24 = vld [vmem:[#allocation2 + $0x70] sm:$0xff]  ;;  %v8927_v45 = vpack.i.bf16 %v11856_v7, %v11832_v51  ;;  %v2182_v28 = vpop.f32.mrb[79].mxu0 }
 0x24d   : > { %16151 = vst [vmem:[#allocation59_spill] sm:$0xff] %v11848_v14  ;;  %2398 = vst.msk [vmem:[#allocation2 + $0xd0] sm:$0xff] %vm462_vm0, %v11837_v17  ;;  %8883 = vrot.lane.b32.xlu0 %v8882_v16, %s9747_s0  ;;  %v8892_v13 = vpack.i.bf16 %v11853_v25, %v11801_v2  ;;  %v2560_v21 = vrot.slane %v11832_v51, 7  ;;  %vm2272_vm15 = vcmp.ge.f32.partialorder %v2188_v57, 0.0  ;;  %v2305_v23 = vmul.f32 %v11611_v15, %v2188_v57  ;;  %v16154_v17 = vld [vmem:[#allocation27_spill] sm:$0xff] }
 0x24e   : > { %2396 = vst.msk [vmem:[#allocation2 + $0xb0] sm:$0xff] %vm462_vm0, %v11848_v14  ;;  %v2191_v58 = vadd.f32 %v8423_v32, %v11605_v33  ;;  %v8917_v16 = vpack.i.bf16 %v11864_v24, %v11843_v11  ;;  %vm2270_vm3 = vcmp.ge.f32.partialorder %v2180_v42, 0.0  ;;  %v2303_v4 = vmul.f32 %v11611_v15, %v2180_v42 }
 0x24f   : > { %v2183_v5 = vadd.f32 %v2182_v28, %v11573_v6  ;;  %v7752_v37 = vpop.f32.mrb[48].mxu1  ;;  %v11880_v47 = vsel %vm688_vm1, %v16152_v34, %v2555_v36  ;;  %v2337_v26 = vsel %vm2272_vm15, %v2188_v57, %v2305_v23  ;;  %v2557_v32 = vrot.slane %v11864_v24, 7  ;;  %v16156_v34 = vld [vmem:[#allocation24_spill] sm:$0xff] }
 0x250   : > { %16153 = vst [vmem:[#allocation60_spill] sm:$0xff] %v11880_v47  ;;  %vm2273_vm4 = vcmp.ge.f32.partialorder %v2191_v58, 0.0  ;;  %v2306_v14 = vmul.f32 %v11611_v15, %v2191_v58  ;;  %v7753_v33 = vpop.f32.mrb[49].mxu1  ;;  %8918 = vrot.lane.b32.xlu1 %v8917_v16, %s9747_s0  ;;  %v11886_v38 = vadd.f32 %v2337_v26, %v16154_v17  ;;  %v2335_v43 = vsel %vm2270_vm3, %v2180_v42, %v2303_v4  ;;  %v16159_v26 = vld [vmem:[#allocation29_spill] sm:$0xff] }
 0x251   : > { %vm2271_vm5 = vcmp.ge.f32.partialorder %v2183_v5, 0.0  ;;  %v2304_v6 = vmul.f32 %v11611_v15, %v2183_v5  ;;  %8893 = vrot.lane.b32.xlu0 %v8892_v13, %s9747_s0  ;;  %v7755_v1 = vpop.f32.mrb[50].mxu1  ;;  %v11891_v57 = vadd.f32 %v2335_v43, %v16156_v34  ;;  %v11893_v28 = vadd.f32 %v7753_v33, %v7752_v37  ;;  %v8426_v13 = vpop.f32.mrb[80].mxu0  ;;  %v9184_v37 = vld [vmem:[%s15598_s4 + $0xc0] sm:$0xff]  }
 0x252   : > { %16155 = vst [vmem:[#allocation61_spill] sm:$0xff] %v11886_v38  ;;  %v2338_v23 = vsel %vm2273_vm4, %v2191_v58, %v2306_v14  ;;  %v7756_v48 = vpop.f32.mrb[51].mxu1  ;;  %v11896_v16 = vsel %vm688_vm1, %v2555_v36, %v2557_v32  ;;  %2401 = vst.msk [vmem:[#allocation2 + $0x108] sm:$0xff] %vm462_vm0, %v11886_v38  ;;  %v9185_v36 = vld [vmem:[%s15598_s4 + $0x80] sm:$0xff]   ;;  %v2204_v58 = vadd.f32 %v8426_v13, %v11715_v0  ;;  %v2195_v33 = vpop.f32.mrb[81].mxu0  ;;  %v16163_v32 = vrot.slane %v11589_v53, 7 }
 0x253   : > { %16157 = vst [vmem:[#allocation62_spill] sm:$0xff] %v11891_v57  ;;  %16158 = vst [vmem:[#allocation63_spill] sm:$0xff] %v11896_v16  ;;  %v11901_v42 = vadd.f32 %v2338_v23, %v16159_v26  ;;  %v2336_v4 = vsel %vm2271_vm5, %v2183_v5, %v2304_v6  ;;  %v11903_v17 = vadd.f32 %v7756_v48, %v7755_v1  ;;  %v11907_v14 = vld [vmem:[#allocation2 + $0xa8] sm:$0xff]  ;;  %v16161_v5 = vld [vmem:[#allocation26_spill] sm:$0xff]  ;;  %v2562_v1 = vrot.slane %v11856_v7, 7 }
 0x254   : > { %v8902_v43 = vpack.i.bf16 %v11896_v16, %v11880_v47  ;;  %2399 = vst.msk [vmem:[#allocation2 + $0xe8] sm:$0xff] %vm462_vm0, %v11891_v57  ;;  %v11918_v48 = vadd.f32 %v2336_v4, %v16161_v5  ;;  %8928 = vrot.lane.b32.xlu1 %v8927_v45, %s9747_s0  ;;  %v11925_v6 = vsel %vm688_vm1, %v16163_v32, %v2560_v21  ;;  %v11928_v23 = vld [vmem:[#allocation2 + $0xc8] sm:$0xff]  ;;  %v11930_v26 = vld [vmem:[#allocation2 + $0xd0] sm:$0xff]  ;;  %v8427_v4 = vpop.f32.mrb[82].mxu0  ;;  %v2565_v13 = vrot.slane %v11907_v14, 7 }
 0x255   : > { %16160 = vst [vmem:[#allocation64_spill] sm:$0xff] %v11901_v42  ;;  %16164 = vst [vmem:[#allocation67_spill] sm:$0xff] %v11925_v6  ;;  %v2196_v0 = vadd.f32 %v2195_v33, %v11652_v22  ;;  %v11936_v45 = vld [vmem:[#allocation2 + $0xb0] sm:$0xff]  ;;  %v2059_v53 = vadd.f32 %v11827_v41, %v11661_v20  ;;  %v8947_v32 = vpack.i.bf16 %v11930_v26, %v11928_v23  ;;  %7908 = vmatprep.subr.bf16.mxu0 %v9184_v37  ;;  %v2198_v33 = vpop.f32.mrb[83].mxu0 }
 0x256   : > { %16162 = vst [vmem:[#allocation65_spill] sm:$0xff] %v11918_v48  ;;  %2402 = vst.msk [vmem:[#allocation2 + $0x110] sm:$0xff] %vm462_vm0, %v11901_v42  ;;  %8903 = vrot.lane.b32.xlu0 %v8902_v43, %s9747_s0  ;;  %vm2276_vm6 = vcmp.ge.f32.partialorder %v2204_v58, 0.0  ;;  %v2309_v43 = vmul.f32 %v11611_v15, %v2204_v58  ;;  %v2207_v22 = vadd.f32 %v8427_v4, %v11724_v31  ;;  %7909 = vmatpush3.bf16.msra.mxu0 %v9185_v36  ;;  %v11966_v36 = vld [vmem:[%s15598_s4 + $0x100] sm:$0xff]  }
 0x257   : > { %2400 = vst.msk [vmem:[#allocation2 + $0xf0] sm:$0xff] %vm462_vm0, %v11918_v48  ;;  %v11948_v5 = vsel %vm688_vm1, %v2560_v21, %v2562_v1  ;;  %vm2274_vm7 = vcmp.ge.f32.partialorder %v2196_v0, 0.0  ;;  %v2307_v20 = vmul.f32 %v11611_v15, %v2196_v0  ;;  %v2199_v41 = vadd.f32 %v2198_v33, %v11672_v8  ;;  %v7758_v34 = vpop.f32.mrb[52].mxu1  ;;  %v9186_v21 = vld [vmem:[%s15598_s4 + $0xc8] sm:$0xff]   ;;  %v16168_v42 = vld [vmem:[#allocation30_spill] sm:$0xff]  ;;  %8440 = vmatprep.subr.bf16.mxu1 %v11966_v36 }
 0x258   : > { %16165 = vst [vmem:[#allocation68_spill] sm:$0xff] %v11948_v5  ;;  %v8912_v37 = vpack.i.bf16 %v11948_v5, %v11925_v6  ;;  %v2341_v57 = vsel %vm2276_vm6, %v2204_v58, %v2309_v43  ;;  %vm2277_vm8 = vcmp.ge.f32.partialorder %v2207_v22, 0.0  ;;  %v2310_v38 = vmul.f32 %v11611_v15, %v2207_v22  ;;  %v7759_v48 = vpop.f32.mrb[53].mxu1  ;;  %v9187_v8 = vld [vmem:[%s15598_s4 + $0x88] sm:$0xff]   ;;  %v16166_v58 = vld [vmem:[#allocation36_spill] sm:$0xff]  ;;  %7910 = vmatprep.subr.bf16.mxu0 %v9186_v21 }
 0x259   : > { %v8937_v31 = vpack.i.bf16 %v11936_v45, %v11907_v14  ;;  %v11969_v1 = vadd.f32 %v2341_v57, %v16166_v58  ;;  %v2339_v4 = vsel %vm2274_vm7, %v2196_v0, %v2307_v20  ;;  %vm2275_vm9 = vcmp.ge.f32.partialorder %v2199_v41, 0.0  ;;  %v7761_v33 = vpop.f32.mrb[54].mxu1  ;;  %v16171_v0 = vld [vmem:[#allocation37_spill] sm:$0xff] }
 0x25a   : > { %v2308_v43 = vmul.f32 %v11611_v15, %v2199_v41  ;;  %8913 = vrot.lane.b32.xlu0 %v8912_v37, %s9747_s0  ;;  %v11974_v5 = vadd.f32 %v2339_v4, %v16168_v42  ;;  %v2342_v6 = vsel %vm2277_vm8, %v2207_v22, %v2310_v38  ;;  %v11976_v16 = vadd.f32 %v7759_v48, %v7758_v34  ;;  %v7762_v47 = vpop.f32.mrb[55].mxu1  ;;  %v8430_v38 = vpop.f32.mrb[84].mxu0 }
 0x25b   : > { %16167 = vst [vmem:[#allocation69_spill] sm:$0xff] %v11969_v1  ;;  %8938 = vrot.lane.b32.xlu1 %v8937_v31, %s9747_s0  ;;  %v16170_v46 = vrot.slane %v11591_v10, 7  ;;  %2405 = vst.msk [vmem:[#allocation2 + $0x148] sm:$0xff] %vm462_vm0, %v11969_v1  ;;  %v11987_v20 = vadd.f32 %v2342_v6, %v16171_v0  ;;  %v11989_v4 = vadd.f32 %v7762_v47, %v7761_v33  ;;  %v2567_v34 = vrot.slane %v11936_v45, 7  ;;  %v16173_v10 = vld [vmem:[#allocation34_spill] sm:$0xff]  ;;  %v2211_v22 = vpop.f32.mrb[85].mxu0 }
 0x25c   : > { %16169 = vst [vmem:[#allocation70_spill] sm:$0xff] %v11974_v5  ;;  %v2340_v37 = vsel %vm2275_vm9, %v2199_v41, %v2308_v43  ;;  %2403 = vst.msk [vmem:[#allocation2 + $0x128] sm:$0xff] %vm462_vm0, %v11974_v5  ;;  %v2220_v48 = vadd.f32 %v8430_v38, %v2059_v53  ;;  %v2062_v6 = vadd.f32 %v11839_v30, %v11665_v59  ;;  %7911 = vmatpush3.bf16.msra.mxu0 %v9187_v8  ;;  %v9189_v41 = vld [vmem:[%s15598_s4 + $0xd0] sm:$0xff]   ;;  %v8431_v30 = vpop.f32.mrb[86].mxu0  ;;  %v16195_v1 = vld [vmem:[#allocation45_spill] sm:$0xff] }
 0x25d   : > { %v11982_v57 = vsel %vm688_vm1, %v16170_v46, %v2565_v13  ;;  %16172 = vst [vmem:[#allocation71_spill] sm:$0xff] %v11987_v20  ;;  %v11996_v46 = vadd.f32 %v2340_v37, %v16173_v10  ;;  %v2054_v47 = vadd.f32 %v11774_v35, %v11669_v12  ;;  %v9190_v31 = vld [vmem:[%s15598_s4 + $0x90] sm:$0xff]   ;;  %2406 = vst.msk [vmem:[#allocation2 + $0x150] sm:$0xff] %vm462_vm0, %v11987_v20  ;;  %v2570_v12 = vrot.slane %v11928_v23, 7  ;;  %v2214_v43 = vpop.f32.mrb[87].mxu0 }
 0x25e   : > { %v12011_v53 = vsel %vm688_vm1, %v2565_v13, %v2567_v34  ;;  %v2212_v59 = vadd.f32 %v2211_v22, %v11789_v18  ;;  %v2572_v35 = vrot.slane %v11930_v26, 7  ;;  %vm2280_vm10 = vcmp.ge.f32.partialorder %v2220_v48, 0.0  ;;  %7912 = vmatprep.subr.bf16.mxu0 %v9189_v41  ;;  %v12033_v41 = vld [vmem:[#allocation2 + $0xf0] sm:$0xff] }
 0x25f   : > { %16174 = vst [vmem:[#allocation72_spill] sm:$0xff] %v11996_v46  ;;  %2404 = vst.msk [vmem:[#allocation2 + $0x130] sm:$0xff] %vm462_vm0, %v11996_v46  ;;  %v2313_v21 = vmul.f32 %v11611_v15, %v2220_v48  ;;  %v8922_v8 = vpack.i.bf16 %v12011_v53, %v11982_v57  ;;  %8948 = vrot.lane.b32.xlu1 %v8947_v32, %s9747_s0  ;;  %v2223_v13 = vadd.f32 %v8431_v30, %v2062_v6  ;;  %v7764_v37 = vpop.f32.mrb[56].mxu1  ;;  %v12048_v10 = vld [vmem:[#allocation2 + $0x110] sm:$0xff] }
 0x260   : > { %vm2278_vm11 = vcmp.ge.f32.partialorder %v2212_v59, 0.0  ;;  %v2311_v18 = vmul.f32 %v11611_v15, %v2212_v59  ;;  %v2215_v33 = vadd.f32 %v2214_v43, %v2054_v47  ;;  %v16175_v38 = vrot.slane %v11595_v55, 7  ;;  %v7765_v6 = vpop.f32.mrb[57].mxu1  ;;  %7913 = vmatpush3.bf16.msra.mxu0 %v9190_v31  ;;  %v16176_v47 = vld [vmem:[#allocation42_spill] sm:$0xff] }
 0x261   : > { %v2345_v22 = vsel %vm2280_vm10, %v2220_v48, %v2313_v21  ;;  %8923 = vrot.lane.b32.xlu0 %v8922_v8, %s9747_s0  ;;  %vm2281_vm12 = vcmp.ge.f32.partialorder %v2223_v13, 0.0  ;;  %v2314_v0 = vmul.f32 %v11611_v15, %v2223_v13  ;;  %v12031_v32 = vsel %vm688_vm1, %v2570_v12, %v2572_v35  ;;  %v12039_v48 = vld [vmem:[#allocation2 + $0xe8] sm:$0xff]  ;;  %v7767_v21 = vpop.f32.mrb[58].mxu1  ;;  %v16178_v8 = vld [vmem:[#allocation40_spill] sm:$0xff] }
 0x262   : > { %v12026_v34 = vsel %vm688_vm1, %v16175_v38, %v2570_v12  ;;  %v12036_v30 = vadd.f32 %v2345_v22, %v16176_v47  ;;  %v2343_v55 = vsel %vm2278_vm11, %v2212_v59, %v2311_v18  ;;  %vm2279_vm13 = vcmp.ge.f32.partialorder %v2215_v33, 0.0  ;;  %v7768_v31 = vpop.f32.mrb[59].mxu1  ;;  %v9191_v59 = vld [vmem:[%s15598_s4 + $0xd8] sm:$0xff]   ;;  %v12065_v47 = vld [vmem:[#allocation2 + $0x108] sm:$0xff] }
 0x263   : > { %v2312_v43 = vmul.f32 %v11611_v15, %v2215_v33  ;;  %v12042_v38 = vadd.f32 %v2343_v55, %v16178_v8  ;;  %v2346_v58 = vsel %vm2281_vm12, %v2223_v13, %v2314_v0  ;;  %v8932_v12 = vpack.i.bf16 %v12031_v32, %v12026_v34  ;;  %v9192_v18 = vld [vmem:[%s15598_s4 + $0x98] sm:$0xff]   ;;  %v16180_v0 = vld [vmem:[#allocation43_spill] sm:$0xff]  ;;  %v8434_v55 = vpop.f32.mrb[88].mxu0  ;;  %7914 = vmatprep.subr.bf16.mxu0 %v9191_v59 }
 0x264   : > { %16177 = vst [vmem:[#allocation73_spill] sm:$0xff] %v12036_v30  ;;  %v12046_v35 = vadd.f32 %v7765_v6, %v7764_v37  ;;  %2409 = vst.msk [vmem:[#allocation2 + $0x188] sm:$0xff] %vm462_vm0, %v12036_v30  ;;  %v12059_v13 = vadd.f32 %v2346_v58, %v16180_v0  ;;  %v8957_v37 = vpack.i.bf16 %v12033_v41, %v12039_v48  ;;  %v16182_v8 = vld [vmem:[#allocation41_spill] sm:$0xff]  ;;  %v16184_v0 = vrot.slane %v11607_v44, 7 }
 0x265   : > { %16179 = vst [vmem:[#allocation74_spill] sm:$0xff] %v12042_v38  ;;  %v2344_v22 = vsel %vm2279_vm13, %v2215_v33, %v2312_v43  ;;  %v12063_v6 = vadd.f32 %v7768_v31, %v7767_v21  ;;  %2407 = vst.msk [vmem:[#allocation2 + $0x168] sm:$0xff] %vm462_vm0, %v12042_v38  ;;  %8933 = vrot.lane.b32.xlu0 %v8932_v12, %s9747_s0  ;;  %v2075_v58 = vadd.f32 %v11976_v16, %v11686_v62  ;;  %v2227_v21 = vpop.f32.mrb[89].mxu0  ;;  %v12131_v38 = vld [vmem:[#allocation2 + $0x150] sm:$0xff] }
 0x266   : > { %16181 = vst [vmem:[#allocation75_spill] sm:$0xff] %v12059_v13  ;;  %v12070_v42 = vadd.f32 %v2344_v22, %v16182_v8  ;;  %v2575_v33 = vrot.slane %v12039_v48, 7  ;;  %v2577_v43 = vrot.slane %v12033_v41, 7  ;;  %2410 = vst.msk [vmem:[#allocation2 + $0x190] sm:$0xff] %vm462_vm0, %v12059_v13  ;;  %8958 = vrot.lane.b32.xlu1 %v8957_v37, %s9747_s0  ;;  %v2067_v31 = vadd.f32 %v11893_v28, %v11676_v56  ;;  %v8435_v16 = vpop.f32.mrb[90].mxu0 }
 0x267   : > { %v8967_v12 = vpack.i.bf16 %v12048_v10, %v12065_v47  ;;  %v2078_v62 = vadd.f32 %v11989_v4, %v11719_v50  ;;  %v2070_v22 = vadd.f32 %v11903_v17, %v11680_v9  ;;  %v2236_v59 = vadd.f32 %v8434_v55, %v2075_v58  ;;  %v2230_v28 = vpop.f32.mrb[91].mxu0  ;;  %7915 = vmatpush3.bf16.msra.mxu0 %v9192_v18  ;;  %v9193_v9 = vld [vmem:[%s15598_s4 + $0xe0] sm:$0xff]   ;;  %v7770_v55 = vpop.f32.mrb[60].mxu1 }
 0x268   : > { %16183 = vst [vmem:[#allocation76_spill] sm:$0xff] %v12070_v42  ;;  %2408 = vst.msk [vmem:[#allocation2 + $0x170] sm:$0xff] %vm462_vm0, %v12070_v42  ;;  %v12093_v37 = vsel %vm688_vm1, %v16184_v0, %v2575_v33  ;;  %v12096_v56 = vsel %vm688_vm1, %v2575_v33, %v2577_v43  ;;  %v2580_v8 = vrot.slane %v12065_v47, 7  ;;  %v9194_v50 = vld [vmem:[%s15598_s4 + $0xa0] sm:$0xff]   ;;  %v2228_v17 = vadd.f32 %v2227_v21, %v2067_v31  ;;  %v7771_v30 = vpop.f32.mrb[61].mxu1 }
 0x269   : > { %16185 = vst [vmem:[#allocation81_spill] sm:$0xff] %v12096_v56  ;;  %v8942_v44 = vpack.i.bf16 %v12096_v56, %v12093_v37  ;;  %v2239_v4 = vadd.f32 %v8435_v16, %v2078_v62  ;;  %v2231_v0 = vadd.f32 %v2230_v28, %v2070_v22  ;;  %vm2284_vm14 = vcmp.ge.f32.partialorder %v2236_v59, 0.0  ;;  %7916 = vmatprep.subr.bf16.mxu0 %v9193_v9  ;;  %v7773_v62 = vpop.f32.mrb[62].mxu1  ;;  %v12122_v28 = vld [vmem:[#allocation2 + $0x128] sm:$0xff]  ;;  %v12124_v9 = vld [vmem:[#allocation2 + $0x130] sm:$0xff] }
 0x26a   : > { %v2317_v58 = vmul.f32 %v11611_v15, %v2236_v59  ;;  %v16186_v18 = vrot.slane %v11609_v61, 7  ;;  %v2582_v43 = vrot.slane %v12048_v10, 7  ;;  %vm2282_vm15 = vcmp.ge.f32.partialorder %v2228_v17, 0.0  ;;  %8968 = vrot.lane.b32.xlu1 %v8967_v12, %s9747_s0 }
 0x26b   : > { %8943 = vrot.lane.b32.xlu0 %v8942_v44, %s9747_s0  ;;  %v2315_v21 = vmul.f32 %v11611_v15, %v2228_v17  ;;  %vm2285_vm3 = vcmp.ge.f32.partialorder %v2239_v4, 0.0  ;;  %v2318_v31 = vmul.f32 %v11611_v15, %v2239_v4  ;;  %vm2283_vm4 = vcmp.ge.f32.partialorder %v2231_v0, 0.0  ;;  %v7774_v44 = vpop.f32.mrb[63].mxu1  ;;  %7917 = vmatpush3.bf16.msra.mxu0 %v9194_v50  ;;  %v16191_v50 = vld [vmem:[#allocation44_spill] sm:$0xff] }
 0x26c   : > { %v12111_v33 = vsel %vm688_vm1, %v16186_v18, %v2580_v8  ;;  %v2349_v16 = vsel %vm2284_vm14, %v2236_v59, %v2317_v58  ;;  %v2316_v61 = vmul.f32 %v11611_v15, %v2231_v0  ;;  %v12120_v22 = vsel %vm688_vm1, %v2580_v8, %v2582_v43  ;;  %v16189_v18 = vld [vmem:[#allocation48_spill] sm:$0xff]  ;;  %v8438_v58 = vpop.f32.mrb[92].mxu0  ;;  %v9195_v8 = vld [vmem:[%s15598_s4 + $0xe8] sm:$0xff]  }
 0x26d   : > { %16187 = vst [vmem:[#allocation82_spill] sm:$0xff] %v12111_v33  ;;  %16188 = vst [vmem:[#allocation83_spill] sm:$0xff] %v12120_v22  ;;  %v12127_v42 = vadd.f32 %v2349_v16, %v16189_v18  ;;  %v2347_v12 = vsel %vm2282_vm15, %v2228_v17, %v2315_v21  ;;  %v2350_v13 = vsel %vm2285_vm3, %v2239_v4, %v2318_v31  ;;  %v9196_v43 = vld [vmem:[%s15598_s4 + $0xa8] sm:$0xff]   ;;  %v16193_v16 = vld [vmem:[#allocation49_spill] sm:$0xff]  ;;  %v2243_v31 = vpop.f32.mrb[93].mxu0  ;;  %7918 = vmatprep.subr.bf16.mxu0 %v9195_v8 }
 0x26e   : > { %v8952_v59 = vpack.i.bf16 %v12120_v22, %v12111_v33  ;;  %v12140_v5 = vadd.f32 %v2347_v12, %v16191_v50  ;;  %v12143_v17 = vadd.f32 %v2350_v13, %v16193_v16  ;;  %v2348_v4 = vsel %vm2283_vm4, %v2231_v0, %v2316_v61  ;;  %v12146_v18 = vld [vmem:[#allocation2 + $0x148] sm:$0xff]  ;;  %v8439_v16 = vpop.f32.mrb[94].mxu0  ;;  %v9197_v8 = vld [vmem:[%s15598_s4 + $0xf0] sm:$0xff]  }
 0x26f   : > { %16190 = vst [vmem:[#allocation84_spill] sm:$0xff] %v12127_v42  ;;  %v7772_v21 = vadd.f32 %v7771_v30, %v7770_v55  ;;  %2413 = vst.msk [vmem:[#allocation2 + $0x1c8] sm:$0xff] %vm462_vm0, %v12127_v42  ;;  %v12151_v46 = vadd.f32 %v2348_v4, %v16195_v1  ;;  %v8977_v12 = vpack.i.bf16 %v12124_v9, %v12122_v28  ;;  %v2585_v13 = vrot.slane %v12122_v28, 7  ;;  %v2246_v61 = vpop.f32.mrb[95].mxu0  ;;  %v12196_v42 = vld [vmem:[#allocation2 + $0x188] sm:$0xff] }
 0x270   : > { %16192 = vst [vmem:[#allocation85_spill] sm:$0xff] %v12140_v5  ;;  %16194 = vst [vmem:[#allocation86_spill] sm:$0xff] %v12143_v17  ;;  %8953 = vrot.lane.b32.xlu0 %v8952_v59, %s9747_s0  ;;  %v7775_v50 = vadd.f32 %v7774_v44, %v7773_v62  ;;  %v2587_v0 = vrot.slane %v12124_v9, 7  ;;  %v2083_v55 = vadd.f32 %v12046_v35, %v11728_v3  ;;  %7919 = vmatpush3.bf16.msra.mxu0 %v9196_v43  ;;  %v9198_v43 = vld [vmem:[%s15598_s4 + $0xb0] sm:$0xff]  }
 0x271   : > { %16196 = vst [vmem:[#allocation77_spill] sm:$0xff] %v12151_v46  ;;  %2411 = vst.msk [vmem:[#allocation2 + $0x1a8] sm:$0xff] %vm462_vm0, %v12140_v5  ;;  %v2091_v30 = vadd.f32 %v7772_v21, %v11748_v60  ;;  %v8987_v62 = vpack.i.bf16 %v12131_v38, %v12146_v18  ;;  %8978 = vrot.lane.b32.xlu1 %v8977_v12, %s9747_s0  ;;  %v16197_v44 = vrot.slane %v11616_v27, 7  ;;  %v2590_v35 = vrot.slane %v12146_v18, 7  ;;  %v16200_v12 = vld [vmem:[#allocation16_spill] sm:$0xff] }
 0x272   : > { %2414 = vst.msk [vmem:[#allocation2 + $0x1d0] sm:$0xff] %vm462_vm0, %v12143_v17  ;;  %2412 = vst.msk [vmem:[#allocation2 + $0x1b0] sm:$0xff] %vm462_vm0, %v12151_v46  ;;  %v2094_v60 = vadd.f32 %v7775_v50, %v11767_v54  ;;  %v2086_v3 = vadd.f32 %v12063_v6, %v11743_v29  ;;  %v12186_v27 = vsel %vm688_vm1, %v2585_v13, %v2587_v0  ;;  %v2592_v54 = vrot.slane %v12131_v38, 7  ;;  %v2426_v0 = vld [vmem:[#allocation2 + $0x38] sm:$0xff] }
 0x273   : > { %v12173_v59 = vsel %vm688_vm1, %v16197_v44, %v2585_v13  ;;  %v2252_v4 = vadd.f32 %v8438_v58, %v2091_v30  ;;  %16199 = vst [vmem:[#allocation80_spill] sm:$0xff] %v12186_v27  ;;  %v2244_v21 = vadd.f32 %v2243_v31, %v2083_v55  ;;  %v16201_v44 = vrot.slane %v16200_v12, 7  ;;  %7920 = vmatprep.subr.bf16.mxu0 %v9197_v8  ;;  %v2430_v30 = vld [vmem:[#allocation2 + $0x58] sm:$0xff] }
 0x274   : > { %16198 = vst [vmem:[#allocation78_spill] sm:$0xff] %v12173_v59  ;;  %v8962_v29 = vpack.i.bf16 %v12186_v27, %v12173_v59  ;;  %v2255_v6 = vadd.f32 %v8439_v16, %v2094_v60  ;;  %v2247_v50 = vadd.f32 %v2246_v61, %v2086_v3  ;;  %7921 = vmatpush3.bf16.msra.mxu0 %v9198_v43  ;;  %v12207_v3 = vld [vmem:[#allocation2 + $0x190] sm:$0xff]  ;;  %v2600_v8 = vrot.slane %v12196_v42, 7  ;;  %v12210_v43 = vld [vmem:[#allocation2 + $0x168] sm:$0xff]  ;;  %v2454_v27 = vld [vmem:[#allocation2 + $0x118] sm:$0xff] }
 0x275   : > { %v12194_v1 = vsel %vm688_vm1, %v16201_v44, %v2590_v35  ;;  %vm2288_vm5 = vcmp.ge.f32.partialorder %v2252_v4, 0.0  ;;  %v2321_v58 = vmul.f32 %v11611_v15, %v2252_v4  ;;  %vm2286_vm6 = vcmp.ge.f32.partialorder %v2244_v21, 0.0  ;;  %8988 = vrot.lane.b32.xlu1 %v8987_v62, %s9747_s0  ;;  %v12212_v62 = vld [vmem:[#allocation2 + $0x170] sm:$0xff]  ;;  %v16206_v44 = vld [vmem:[#allocation50_spill] sm:$0xff]  ;;  %v2486_v59 = vld [vmem:[#allocation2 + $0x218] sm:$0xff] }
 0x276   : > { %16202 = vst [vmem:[#allocation79_spill] sm:$0xff] %v12194_v1  ;;  %v2319_v31 = vmul.f32 %v11611_v15, %v2244_v21  ;;  %8963 = vrot.lane.b32.xlu0 %v8962_v29, %s9747_s0  ;;  %vm2289_vm7 = vcmp.ge.f32.partialorder %v2255_v6, 0.0  ;;  %v2322_v16 = vmul.f32 %v11611_v15, %v2255_v6  ;;  %vm2287_vm8 = vcmp.ge.f32.partialorder %v2247_v50, 0.0  ;;  %v16204_v29 = vld [vmem:[#allocation52_spill] sm:$0xff] }
 0x277   : > { %v2320_v13 = vmul.f32 %v11611_v15, %v2247_v50  ;;  %v2353_v55 = vsel %vm2288_vm5, %v2252_v4, %v2321_v58  ;;  %v12205_v60 = vsel %vm688_vm1, %v2590_v35, %v2592_v54  ;;  %v16210_v35 = vld [vmem:[#allocation51_spill] sm:$0xff]  ;;  %v2680_v5 = vrot.slane %v2430_v30, 1 }
 0x278   : > { %v2351_v61 = vsel %vm2286_vm6, %v2244_v21, %v2319_v31  ;;  %16203 = vst [vmem:[#allocation17_spill] sm:$0xff] %v12205_v60  ;;  %v12215_v12 = vadd.f32 %v2353_v55, %v16204_v29  ;;  %v2354_v17 = vsel %vm2289_vm7, %v2255_v6, %v2322_v16  ;;  %v16208_v21 = vld [vmem:[#allocation53_spill] sm:$0xff]  ;;  %v8972_v31 = vpack.i.bf16 %v12205_v60, %v12194_v1 }
 0x279   : > { %v12218_v46 = vadd.f32 %v2351_v61, %v16206_v44  ;;  %v2352_v4 = vsel %vm2287_vm8, %v2247_v50, %v2320_v13  ;;  %v12221_v58 = vadd.f32 %v2354_v17, %v16208_v21  ;;  %v9199_v55 = vld [vmem:[%s15598_s4 + $0xf8] sm:$0xff]   ;;  %v2602_v17 = vrot.slane %v12207_v3, 7  ;;  %v16216_v44 = vld [vmem:[#allocation31_spill] sm:$0xff] }
 0x27a   : > { %16205 = vst [vmem:[#allocation16_spill] sm:$0xff] %v12215_v12  ;;  %v12224_v54 = vadd.f32 %v2352_v4, %v16210_v35  ;;  %v9200_v61 = vld [vmem:[%s15598_s4 + $0xb8] sm:$0xff]   ;;  %2417 = vst.msk [vmem:[#allocation2 + $0x208] sm:$0xff] %vm462_vm0, %v12215_v12  ;;  %v2595_v6 = vrot.slane %v12210_v43, 7  ;;  %v2597_v50 = vrot.slane %v12212_v62, 7  ;;  %v2675_v16 = vrot.slane %v2426_v0, 1  ;;  %8973 = vrot.lane.b32.xlu0 %v8972_v31, %s9747_s0  ;;  %7922 = vmatprep.subr.bf16.mxu0 %v9199_v55 }
 0x27b   : > { %16207 = vst [vmem:[#allocation87_spill] sm:$0xff] %v12218_v46  ;;  %16209 = vst [vmem:[#allocation88_spill] sm:$0xff] %v12221_v58  ;;  %v16212_v13 = vld [vmem:[#allocation25_spill] sm:$0xff]  ;;  %v2677_v21 = vrot.slane %v11763_v52, 1  ;;  %v2678_v29 = vrot.slane %v11786_v63, 1  ;;  %v2673_v35 = vrot.slane %v11794_v49, 1  ;;  %v12255_v0 = vsel %vm688_vm1, %v2600_v8, %v2602_v17  ;;  %7923 = vmatpush3.bf16.msra.mxu0 %v9200_v61 }
 0x27c   : > { %16211 = vst [vmem:[#allocation89_spill] sm:$0xff] %v12224_v54  ;;  %2415 = vst.msk [vmem:[#allocation2 + $0x1e8] sm:$0xff] %vm462_vm0, %v12218_v46  ;;  %v16213_v30 = vrot.slane %v16212_v13, 7  ;;  %v16217_v12 = vrot.slane %v16216_v44, 7  ;;  %v12263_v31 = vsel %vm688_vm1, %v2595_v6, %v2597_v50  ;;  %v2672_v13 = vrot.slane %v11776_v39, 1  ;;  %v12284_v39 = vld [vmem:[#allocation2 + $0x1d0] sm:$0xff] }
 0x27d   : > { %2418 = vst.msk [vmem:[#allocation2 + $0x210] sm:$0xff] %vm462_vm0, %v12221_v58  ;;  %2416 = vst.msk [vmem:[#allocation2 + $0x1f0] sm:$0xff] %vm462_vm0, %v12224_v54  ;;  %v12271_v49 = vsel %vm817_vm2, %v2677_v21, %v2678_v29  ;;  %v12280_v44 = vsel %vm817_vm2, %v2673_v35, %v2675_v16  ;;  %v12286_v55 = vld [vmem:[#allocation2 + $0x1b0] sm:$0xff]  ;;  %v2475_v61 = vld [vmem:[#allocation2 + $0x1c0] sm:$0xff]  ;;  %v9017_v46 = vpack.i.bf16 %v12207_v3, %v12196_v42  ;;  %v2697_v33 = vrot.slane %v11928_v23, 1 }
 0x27e   : > { %v12249_v4 = vsel %vm688_vm1, %v16213_v30, %v2600_v8  ;;  %16215 = vst [vmem:[#allocation90_spill] sm:$0xff] %v12255_v0  ;;  %v12260_v58 = vsel %vm688_vm1, %v16217_v12, %v2595_v6  ;;  %16219 = vst [vmem:[#allocation91_spill] sm:$0xff] %v12263_v31  ;;  %v12274_v8 = vsel %vm817_vm2, %v2678_v29, %v2680_v5  ;;  %v12292_v29 = vld [vmem:[#allocation2 + $0x1c8] sm:$0xff]  ;;  %v2471_v17 = vld [vmem:[#allocation2 + $0x1a0] sm:$0xff]  ;;  %v2612_v6 = vrot.slane %v12284_v39, 7 }
 0x27f   : > { %16214 = vst [vmem:[#allocation25_spill] sm:$0xff] %v12249_v4  ;;  %16218 = vst [vmem:[#allocation31_spill] sm:$0xff] %v12260_v58  ;;  %v8997_v52 = vpack.i.bf16 %v12255_v0, %v12249_v4  ;;  %v8982_v63 = vpack.i.bf16 %v12263_v31, %v12260_v58  ;;  %v12277_v12 = vsel %vm817_vm2, %v2672_v13, %v2673_v35  ;;  %v12294_v35 = vld [vmem:[#allocation2 + $0x1a8] sm:$0xff]  ;;  %v2607_v50 = vrot.slane %v12286_v55, 7  ;;  %v2438_v16 = vld [vmem:[#allocation2 + $0x98] sm:$0xff] }
 0x280   : > { %v9007_v21 = vpack.i.bf16 %v12274_v8, %v12271_v49  ;;  %v8992_v5 = vpack.i.bf16 %v12280_v44, %v12277_v12  ;;  %v2434_v30 = vld [vmem:[#allocation2 + $0x78] sm:$0xff]  ;;  %v2609_v13 = vrot.slane %v2475_v61, 7  ;;  %v2605_v54 = vrot.slane %v12294_v35, 7 }
 0x281   : > { %8998 = vrot.lane.b32.xlu1 %v8997_v52, %s9747_s0  ;;  %8983 = vrot.lane.b32.xlu0 %v8982_v63, %s9747_s0  ;;  %v2610_v52 = vrot.slane %v12292_v29, 7  ;;  %v2604_v63 = vrot.slane %v2471_v17, 7  ;;  %v9002_v20 = vpack.i.bf16 %v12212_v62, %v12210_v43  ;;  %v2690_v15 = vrot.slane %v2438_v16, 1 }
 0x282   : > { %v2685_v0 = vrot.slane %v2434_v30, 1  ;;  %v2688_v61 = vrot.slane %v11856_v7, 1  ;;  %v2682_v30 = vrot.slane %v11843_v11, 1  ;;  %v9047_v22 = vpack.i.bf16 %v12284_v39, %v12292_v29 }
 0x283   : > { %v12307_v4 = vsel %vm688_vm1, %v2610_v52, %v2612_v6  ;;  %v12317_v17 = vsel %vm688_vm1, %v2609_v13, %v2610_v52  ;;  %v12320_v16 = vsel %vm688_vm1, %v2604_v63, %v2605_v54  ;;  %v2687_v6 = vrot.slane %v11832_v51, 1  ;;  %v2483_v13 = vld [vmem:[#allocation2 + $0x200] sm:$0xff]  ;;  %v12346_v52 = vld [vmem:[#allocation2 + $0x208] sm:$0xff] }
 0x284   : > { %16220 = vst [vmem:[#allocation92_spill] sm:$0xff] %v12307_v4  ;;  %16222 = vst [vmem:[#allocation94_spill] sm:$0xff] %v12317_v17  ;;  %v12340_v51 = vld [vmem:[#allocation2 + $0x210] sm:$0xff]  ;;  %v2710_v56 = vrot.slane %v2454_v27, 1 }
 0x285   : > { %9008 = vrot.lane.b32.xlu1 %v9007_v21, %s9747_s0  ;;  %8993 = vrot.lane.b32.xlu0 %v8992_v5, %s9747_s0  ;;  %v12310_v21 = vsel %vm688_vm1, %v2605_v54, %v2607_v50  ;;  %v2683_v5 = vrot.slane %v11864_v24, 1  ;;  %16223 = vst [vmem:[#allocation95_spill] sm:$0xff] %v12320_v16  ;;  %v9027_v50 = vpack.i.bf16 %v12307_v4, %v12317_v17  ;;  %v12344_v11 = vld [vmem:[#allocation2 + $0x1f0] sm:$0xff]  ;;  %v2782_v4 = vrot.slane %v2483_v13, 7 }
 0x286   : > { %16221 = vst [vmem:[#allocation93_spill] sm:$0xff] %v12310_v21  ;;  %v9012_v7 = vpack.i.bf16 %v12310_v21, %v12320_v16  ;;  %v12329_v24 = vsel %vm817_vm2, %v2687_v6, %v2688_v61  ;;  %v2446_v6 = vld [vmem:[#allocation2 + $0xd8] sm:$0xff]  ;;  %v2783_v17 = vrot.slane %v12346_v52, 7  ;;  %v9629_v16 = vld [vmem:[#allocation2 + $0x8] sm:$0xff]  ;;  %v2698_v13 = vrot.slane %v11930_v26, 1 }
 0x287   : > { %v12338_v54 = vsel %vm817_vm2, %v2683_v5, %v2685_v0  ;;  %v2785_v0 = vrot.slane %v12340_v51, 7  ;;  %v2442_v21 = vld [vmem:[#allocation2 + $0xb8] sm:$0xff]  ;;  %v2667_v31 = vrot.slane %v9629_v16, 1  ;;  %v2700_v1 = vrot.slane %v2446_v6, 1 }
 0x288   : > { %v2693_v16 = vrot.slane %v11936_v45, 1  ;;  %v12378_v6 = vsel %vm688_vm1, %v2782_v4, %v2783_v17  ;;  %v2692_v45 = vrot.slane %v11907_v14, 1  ;;  %v12391_v4 = vsel %vm817_vm2, %v2697_v33, %v2698_v13 }
 0x289   : > { %9018 = vrot.lane.b32.xlu1 %v9017_v46, %s9747_s0  ;;  %9003 = vrot.lane.b32.xlu0 %v9002_v20, %s9747_s0  ;;  %v12332_v20 = vsel %vm817_vm2, %v2688_v61, %v2690_v15  ;;  %v12335_v46 = vsel %vm817_vm2, %v2682_v30, %v2683_v5  ;;  %v2479_v61 = vld [vmem:[#allocation2 + $0x1e0] sm:$0xff]  ;;  %v12353_v5 = vld [vmem:[#allocation2 + $0x1e8] sm:$0xff]  ;;  %v2617_v30 = vrot.slane %v12344_v11, 7  ;;  %16225 = vst [vmem:[#allocation97_spill] sm:$0xff] %v12378_v6  ;;  %v2788_v33 = vrot.slane %v12346_v52, 1 }
 0x28a   : > { %v9037_v15 = vpack.i.bf16 %v12332_v20, %v12329_v24  ;;  %v9022_v63 = vpack.i.bf16 %v12338_v54, %v12335_v46  ;;  %v2614_v58 = vrot.slane %v2479_v61, 7  ;;  %v2615_v60 = vrot.slane %v12353_v5, 7 }
 0x28b   : > { %v2695_v61 = vrot.slane %v2442_v21, 1  ;;  %v2789_v21 = vrot.slane %v12340_v51, 1  ;;  %v12394_v23 = vsel %vm817_vm2, %v2698_v13, %v2700_v1  ;;  %v2462_v1 = vld [vmem:[#allocation2 + $0x158] sm:$0xff] }
 0x28d   : > { %9028 = vrot.lane.b32.xlu1 %v9027_v50, %s9747_s0  ;;  %9013 = vrot.lane.b32.xlu0 %v9012_v7, %s9747_s0  ;;  %v12356_v50 = vld [vmem:[#allocation2 + $0x10] sm:$0xff]  ;;  %v12372_v7 = vsel %vm688_vm1, %v2615_v60, %v2617_v30  ;;  %v12384_v30 = vsel %vm688_vm1, %v2614_v58, %v2615_v60  ;;  %v12402_v60 = vsel %vm817_vm2, %v2692_v45, %v2693_v16  ;;  %v2708_v58 = vrot.slane %v12048_v10, 1  ;;  %v2470_v45 = vld [vmem:[#allocation2 + $0x198] sm:$0xff] }
 0x28e   : > { %v12405_v14 = vsel %vm817_vm2, %v2693_v16, %v2695_v61  ;;  %v9067_v16 = vpack.i.bf16 %v12394_v23, %v12391_v4  ;;  %v2718_v61 = vrot.slane %v12131_v38, 1 }
 0x28f   : > { %v9052_v10 = vpack.i.bf16 %v12405_v14, %v12402_v60 }
 0x291   : > { %9038 = vrot.lane.b32.xlu1 %v9037_v15, %s9747_s0  ;;  %9023 = vrot.lane.b32.xlu0 %v9022_v63, %s9747_s0  ;;  %v9032_v15 = vpack.i.bf16 %v12286_v55, %v12294_v35  ;;  %v12368_v63 = vsel %vm688_vm1, %v2783_v17, %v2785_v0  ;;  %v2791_v0 = vrot.slane %v2486_v59, 1  ;;  %v16226_v59 = vrot.slane %v12356_v50, 1  ;;  %v2450_v17 = vld [vmem:[#allocation2 + $0xf8] sm:$0xff] }
 0x292   : > { %16224 = vst [vmem:[#allocation96_spill] sm:$0xff] %v12368_v63  ;;  %v9057_v26 = vpack.i.bf16 %v12368_v63, %v12378_v6  ;;  %v2730_v63 = vrot.slane %v2470_v45, 1 }
 0x293   : > { %v12399_v27 = vsel %vm817_vm2, %v2667_v31, %v16226_v59  ;;  %v12413_v31 = vsel %vm817_vm2, %v2788_v33, %v2789_v21  ;;  %v12416_v13 = vsel %vm817_vm2, %v2789_v21, %v2791_v0  ;;  %v2720_v33 = vrot.slane %v2462_v1, 1 }
 0x294   : > { %16227 = vst [vmem:[#allocation98_spill] sm:$0xff] %v12413_v31  ;;  %16228 = vst [vmem:[#allocation99_spill] sm:$0xff] %v12416_v13  ;;  %v2703_v0 = vrot.slane %v12033_v41, 1  ;;  %v2717_v21 = vrot.slane %v12146_v18, 1  ;;  %v2728_v1 = vrot.slane %v12207_v3, 1  ;;  %v2466_v18 = vld [vmem:[#allocation2 + $0x178] sm:$0xff] }
 0x295   : > { %9048 = vrot.lane.b32.xlu1 %v9047_v22, %s9747_s0  ;;  %9033 = vrot.lane.b32.xlu0 %v9032_v15, %s9747_s0  ;;  %v9042_v22 = vpack.i.bf16 %v12372_v7, %v12384_v30  ;;  %v2707_v15 = vrot.slane %v12065_v47, 1  ;;  %v12427_v47 = vsel %vm817_vm2, %v2708_v58, %v2710_v56  ;;  %v2712_v3 = vrot.slane %v12122_v28, 1 }
 0x296   : > { %v12441_v41 = vsel %vm817_vm2, %v2717_v21, %v2718_v61  ;;  %v2727_v21 = vrot.slane %v12196_v42, 1  ;;  %v2725_v6 = vrot.slane %v2466_v18, 1 }
 0x297   : > { %v12424_v59 = vsel %vm817_vm2, %v2707_v15, %v2708_v58  ;;  %v9062_v58 = vpack.i.bf16 %v12344_v11, %v12353_v5 }
 0x298   : > { %v9077_v56 = vpack.i.bf16 %v12427_v47, %v12424_v59 }
 0x299   : > { %9058 = vrot.lane.b32.xlu1 %v9057_v26, %s9747_s0  ;;  %9043 = vrot.lane.b32.xlu0 %v9042_v22, %s9747_s0  ;;  %v2705_v26 = vrot.slane %v2450_v17, 1  ;;  %v2458_v22 = vld [vmem:[#allocation2 + $0x138] sm:$0xff]  ;;  %v2702_v17 = vrot.slane %v12039_v48, 1 }
 0x29a   : > { %v2715_v15 = vrot.slane %v2458_v22, 1  ;;  %v2713_v22 = vrot.slane %v12124_v9, 1  ;;  %v2738_v9 = vrot.slane %v12284_v39, 1  ;;  %v2722_v39 = vrot.slane %v12210_v43, 1 }
 0x29b   : > { %v12448_v48 = vsel %vm817_vm2, %v2702_v17, %v2703_v0  ;;  %v12451_v45 = vsel %vm817_vm2, %v2703_v0, %v2705_v26  ;;  %v12463_v26 = vsel %vm817_vm2, %v2727_v21, %v2728_v1  ;;  %v2482_v0 = vld [vmem:[#allocation2 + $0x1f8] sm:$0xff]  ;;  %v2743_v43 = vrot.slane %v12344_v11, 1 }
 0x29c   : > { %v2474_v17 = vld [vmem:[#allocation2 + $0x1b8] sm:$0xff]  ;;  %v12470_v42 = vsel %vm817_vm2, %v2712_v3, %v2713_v22  ;;  %v12473_v28 = vsel %vm817_vm2, %v2713_v22, %v2715_v15  ;;  %v2745_v18 = vrot.slane %v2482_v0, 1  ;;  %v2733_v3 = vrot.slane %v12286_v55, 1 }
 0x29d   : > { %9068 = vrot.lane.b32.xlu1 %v9067_v16, %s9747_s0  ;;  %9053 = vrot.lane.b32.xlu0 %v9052_v10, %s9747_s0  ;;  %v2478_v16 = vld [vmem:[#allocation2 + $0x1d8] sm:$0xff]  ;;  %v12445_v10 = vsel %vm817_vm2, %v2718_v61, %v2720_v33  ;;  %v9072_v33 = vpack.i.bf16 %v12451_v45, %v12448_v48  ;;  %v2735_v21 = vrot.slane %v2474_v17, 1  ;;  %v12526_v17 = vld [vmem:[#allocation2 + $0x228] sm:$0xff] }
 0x29e   : > { %v2740_v38 = vrot.slane %v2478_v16, 1  ;;  %v9087_v61 = vpack.i.bf16 %v12445_v10, %v12441_v41  ;;  %v2737_v16 = vrot.slane %v12292_v29, 1  ;;  %v12510_v11 = vsel %vm817_vm2, %v2743_v43, %v2745_v18 }
 0x29f   : > { %v12516_v0 = vsel %vm817_vm2, %v2733_v3, %v2735_v21  ;;  %v2422_v21 = vld [vmem:[#allocation2 + $0x18] sm:$0xff] }
 0x2a0   : > { %v12485_v15 = vsel %vm817_vm2, %v2737_v16, %v2738_v9  ;;  %v9127_v16 = vpack.i.bf16 %v12416_v13, %v12413_v31 }
 0x2a1   : > { %9078 = vrot.lane.b32.xlu1 %v9077_v56, %s9747_s0  ;;  %9063 = vrot.lane.b32.xlu0 %v9062_v58, %s9747_s0  ;;  %v12467_v56 = vsel %vm817_vm2, %v2728_v1, %v2730_v63  ;;  %v2723_v58 = vrot.slane %v12212_v62, 1  ;;  %v9082_v1 = vpack.i.bf16 %v12473_v28, %v12470_v42  ;;  %v12488_v62 = vsel %vm817_vm2, %v2738_v9, %v2740_v38 }
 0x2a2   : > { %v9097_v63 = vpack.i.bf16 %v12467_v56, %v12463_v26  ;;  %v9107_v38 = vpack.i.bf16 %v12488_v62, %v12485_v15 }
 0x2a3   : > { %v12491_v22 = vsel %vm817_vm2, %v2722_v39, %v2723_v58  ;;  %v12494_v29 = vsel %vm817_vm2, %v2723_v58, %v2725_v6  ;;  %v12528_v58 = vld [vmem:[#allocation2 + $0x230] sm:$0xff]  ;;  %v9112_v39 = vpack.i.bf16 %v12340_v51, %v12346_v52 }
 0x2a4   : > { %v9092_v9 = vpack.i.bf16 %v12494_v29, %v12491_v22  ;;  %16229 = vst [vmem:[#allocation100_spill] sm:$0xff] %v12528_v58  ;;  %v9122_v18 = vpack.i.bf16 %v12528_v58, %v12526_v17 }
 0x2a5   : > { %9088 = vrot.lane.b32.xlu1 %v9087_v61, %s9747_s0  ;;  %9073 = vrot.lane.b32.xlu0 %v9072_v33, %s9747_s0  ;;  %v2742_v61 = vrot.slane %v12353_v5, 1  ;;  %v2732_v33 = vrot.slane %v12294_v35, 1 }
 0x2a7   : > { %v12507_v6 = vsel %vm817_vm2, %v2742_v61, %v2743_v43  ;;  %v12513_v55 = vsel %vm817_vm2, %v2732_v33, %v2733_v3 }
 0x2a8   : > { %v9117_v35 = vpack.i.bf16 %v12510_v11, %v12507_v6  ;;  %v9102_v5 = vpack.i.bf16 %v12516_v0, %v12513_v55 }
 0x2a9   : > { %9098 = vrot.lane.b32.xlu1 %v9097_v63, %s9747_s0  ;;  %9083 = vrot.lane.b32.xlu0 %v9082_v1, %s9747_s0  ;;  %v2670_v1 = vrot.slane %v2422_v21, 1 }
 0x2ad   : > { %9108 = vrot.lane.b32.xlu1 %v9107_v38, %s9747_s0  ;;  %9093 = vrot.lane.b32.xlu0 %v9092_v9, %s9747_s0  ;;  %v16230_v38 = vrot.slane %v12356_v50, 1 }
 0x2af   : > { %v2671_v51 = vsel %vm817_vm2, %v16230_v38, %v2670_v1  ;;  %v9201_v1 = vld [vmem:[%s15598_s4 + $0x108] sm:$0xff]  }
 0x2b1   : > { %9118 = vrot.lane.b32.xlu1 %v9117_v35, %s9747_s0  ;;  %9103 = vrot.lane.b32.xlu0 %v9102_v5, %s9747_s0 }
 0x2b5   : > { %9128 = vrot.lane.b32.xlu1 %v9127_v16, %s9747_s0  ;;  %9113 = vrot.lane.b32.xlu0 %v9112_v39, %s9747_s0 }
 0x2b9   : > { %9123 = vrot.lane.b32.xlu0 %v9122_v18, %s9747_s0  ;;  %v8899_v63 = vpop.permute.xlu1 %8898  ;;  %s418_s0 = sand.u32 1, %s9735_s22  }
 0x2ba   : > { %s7360_s29 = sshll.u32 %s418_s0, 8  ;;  %s15553_s25 = scalar_lea.sflag [#allocation4], %s418_s0 }
 0x2bd   : > { %v8909_v43 = vpop.permute.xlu1 %8908 }
 0x2be   : > { %v8911_v61 = vunpack.i.h.bf16 %v8909_v43  ;;  %v8910_v33 = vunpack.i.l.bf16 %v8909_v43 }
 0x2bf   : > { %v8884_v3 = vpop.permute.xlu0 %8883 }
 0x2c0   : > { %v8886_v52 = vunpack.i.h.bf16 %v8884_v3  ;;  %v8885_v9 = vunpack.i.l.bf16 %v8884_v3  ;;  %v3119_v35 = vsel %vm462_vm0, %v11801_v2, %v8910_v33  ;;  %v3120_v5 = vsel %vm462_vm0, %v11853_v25, %v8911_v61 }
 0x2c1   : > { %v3218_v21 = vpack.c.bf16 %v3120_v5, %v3119_v35  ;;  %v8901_v2 = vunpack.i.h.bf16 %v8899_v63  ;;  %v8900_v3 = vunpack.i.l.bf16 %v8899_v63  ;;  %v16231_v25 = vpack.c.bf16 %v11702_v40, %v11731_v19  ;;  %v16232_v40 = vld [vmem:[#allocation54_spill] sm:$0xff]  ;;  %v16233_v63 = vld [vmem:[#allocation57_spill] sm:$0xff] }
 0x2c2   : > { %v8919_v16 = vpop.permute.xlu1 %8918  ;;  %v3147_v39 = vsel %vm462_vm0, %v12399_v27, %v8885_v9  ;;  %v3148_v18 = vsel %vm462_vm0, %v2671_v51, %v8886_v52 }
 0x2c3   : > { %v8894_v43 = vpop.permute.xlu0 %8893  ;;  %v3216_v31 = vpack.c.bf16 %v3148_v18, %v3147_v39  ;;  %3817 = vmatprep.mubr.bf16.mxu0 %v3218_v21  ;;  %v3117_v19 = vsel %vm462_vm0, %v16232_v40, %v8900_v3  ;;  %v9203_v39 = vld [vmem:[%s15598_s4 + $0x118] sm:$0xff]  }
 0x2c4   : > { %v8896_v50 = vunpack.i.h.bf16 %v8894_v43  ;;  %v8895_v13 = vunpack.i.l.bf16 %v8894_v43 }
 0x2c5   : > { %3656 = vmatprep.mubr.bf16.mxu1 %v3216_v31  ;;  %v9202_v31 = vld [vmem:[%s15598_s4 + $0x110] sm:$0xff]  }
 0x2c6   : > { %3657 = vmatmul.mubr.bf16.vlgmr.msra.gmra.mrb[64].mxu1 %v16231_v25  ;;  %v8929_v27 = vpop.permute.xlu1 %8928  ;;  %v3149_v61 = vsel %vm462_vm0, %v12277_v12, %v8895_v13  ;;  %v3150_v33 = vsel %vm462_vm0, %v12280_v44, %v8896_v50  ;;  %v3118_v12 = vsel %vm462_vm0, %v16233_v63, %v8901_v2  ;;  %v16235_v63 = vld [vmem:[#allocation63_spill] sm:$0xff] }
 0x2c7   : > { %v3221_v51 = vpack.c.bf16 %v3150_v33, %v3149_v61  ;;  %8441 = vmatpush3.bf16.msra.mxu1 %v11966_v36  ;;  %v3220_v5 = vpack.c.bf16 %v3118_v12, %v3117_v19  ;;  %v8921_v61 = vunpack.i.h.bf16 %v8919_v16  ;;  %v8920_v33 = vunpack.i.l.bf16 %v8919_v16 }
 0x2c8   : > { %v8904_v38 = vpop.permute.xlu0 %8903  ;;  %8442 = vmatprep.subr.bf16.mxu1 %v9201_v1 }
 0x2c9   : > { %v8906_v52 = vunpack.i.h.bf16 %v8904_v38  ;;  %v8905_v9 = vunpack.i.l.bf16 %v8904_v38  ;;  %3664 = vmatprep.mubr.bf16.mxu1 %v3221_v51  ;;  %v3122_v12 = vsel %vm462_vm0, %v16235_v63, %v8921_v61  ;;  %v16237_v61 = vld [vmem:[#allocation68_spill] sm:$0xff] }
 0x2cb   : > { %v3151_v44 = vsel %vm462_vm0, %v12271_v49, %v8905_v9  ;;  %v3152_v36 = vsel %vm462_vm0, %v12274_v8, %v8906_v52  ;;  %8443 = vmatpush3.bf16.msra.mxu1 %v9201_v1 }
 0x2cc   : > { %v8914_v13 = vpop.permute.xlu0 %8913  ;;  %8444 = vmatprep.subr.bf16.mxu1 %v9202_v31  ;;  %v3225_v18 = vpack.c.bf16 %v3152_v36, %v3151_v44 }
 0x2cd   : > { %v8939_v35 = vpop.permute.xlu1 %8938  ;;  %v8916_v43 = vunpack.i.h.bf16 %v8914_v13  ;;  %v8915_v50 = vunpack.i.l.bf16 %v8914_v13 }
 0x2ce   : > { %3665 = vmatmul.mubr.bf16.gmra.mrb[68].mxu1 %v3220_v5  ;;  %v8931_v5 = vunpack.i.h.bf16 %v8929_v27 }
 0x2cf   : > { %3672 = vmatprep.mubr.bf16.mxu1 %v3225_v18  ;;  %8445 = vmatpush3.bf16.msra.mxu1 %v9202_v31  ;;  %v3153_v25 = vsel %vm462_vm0, %v12335_v46, %v8915_v50  ;;  %v3154_v1 = vsel %vm462_vm0, %v12338_v54, %v8916_v43  ;;  %v16234_v31 = vld [vmem:[#allocation60_spill] sm:$0xff] }
 0x2d0   : > { %8446 = vmatprep.subr.bf16.mxu1 %v9203_v39  ;;  %v3229_v38 = vpack.c.bf16 %v3154_v1, %v3153_v25  ;;  %v3121_v19 = vsel %vm462_vm0, %v16234_v31, %v8920_v33  ;;  %v16236_v25 = vld [vmem:[#allocation67_spill] sm:$0xff]  ;;  %v3124_v33 = vsel %vm462_vm0, %v16237_v61, %v8931_v5  ;;  %v8940_v31 = vunpack.i.l.bf16 %v8939_v35 }
 0x2d1   : > { %v8949_v3 = vpop.permute.xlu1 %8948  ;;  %v12588_v13 = vpack.c.bf16 %v3122_v12, %v3121_v19 }
 0x2d3   : > { %v8924_v2 = vpop.permute.xlu0 %8923  ;;  %8447 = vmatpush3.bf16.msra.mxu1 %v9203_v39 }
 0x2d4   : > { %v8926_v51 = vunpack.i.h.bf16 %v8924_v2  ;;  %v8925_v52 = vunpack.i.l.bf16 %v8924_v2 }
 0x2d6   : > { %3673 = vmatmul.mubr.bf16.gmra.mrb[72].mxu1 %v3218_v21  ;;  %v3155_v44 = vsel %vm462_vm0, %v12329_v24, %v8925_v52  ;;  %v3156_v16 = vsel %vm462_vm0, %v12332_v20, %v8926_v51  ;;  %v8930_v21 = vunpack.i.l.bf16 %v8929_v27 }
 0x2d7   : > { %v8934_v9 = vpop.permute.xlu0 %8933  ;;  %3680 = vmatprep.mubr.bf16.mxu1 %v3229_v38  ;;  %v3233_v39 = vpack.c.bf16 %v3156_v16, %v3155_v44  ;;  %v3125_v16 = vsel %vm462_vm0, %v11982_v57, %v8940_v31 }
 0x2d8   : > { %v12578_v40 = vpop.permute.xlu1 %8958  ;;  %v8936_v18 = vunpack.i.h.bf16 %v8934_v9  ;;  %v8935_v43 = vunpack.i.l.bf16 %v8934_v9  ;;  %v3123_v1 = vsel %vm462_vm0, %v16236_v25, %v8930_v21  ;;  %v8941_v9 = vunpack.i.h.bf16 %v8939_v35 }
 0x2d9   : > { %v12603_v52 = vpack.c.bf16 %v3124_v33, %v3123_v1  ;;  %v8950_v25 = vunpack.i.l.bf16 %v8949_v3 }
 0x2da   : > { %v3157_v38 = vsel %vm462_vm0, %v12402_v60, %v8935_v43  ;;  %v3158_v27 = vsel %vm462_vm0, %v12405_v14, %v8936_v18  ;;  %v3126_v5 = vsel %vm462_vm0, %v12011_v53, %v8941_v9  ;;  %v8951_v43 = vunpack.i.h.bf16 %v8949_v3 }
 0x2db   : > { %v3237_v63 = vpack.c.bf16 %v3158_v27, %v3157_v38  ;;  %v3127_v38 = vsel %vm462_vm0, %v12026_v34, %v8950_v25  ;;  %v9630_v34 = vld [vmem:[#allocation2 + $0x30] sm:$0xff] }
 0x2dc   : > { %v12590_v50 = vpop.permute.xlu1 %8968  ;;  %v3128_v27 = vsel %vm462_vm0, %v12031_v32, %v8951_v43  ;;  %v9631_v32 = vld [vmem:[#allocation2 + $0x28] sm:$0xff] }
 0x2dd   : > { %v8944_v36 = vpop.permute.xlu0 %8943 }
 0x2de   : > { %3681 = vmatmul.mubr.bf16.gmra.mrb[76].mxu1 %v12588_v13  ;;  %v8946_v12 = vunpack.i.h.bf16 %v8944_v36  ;;  %v8945_v44 = vunpack.i.l.bf16 %v8944_v36  ;;  %v12618_v36 = vpack.c.bf16 %v3126_v5, %v3125_v16  ;;  %v12634_v16 = vpack.c.bf16 %v3128_v27, %v3127_v38 }
 0x2df   : > { %3688 = vmatprep.mubr.bf16.mxu1 %v3233_v39  ;;  %v8960_v5 = vunpack.i.l.bf16 %v12578_v40 }
 0x2e0   : > { %v3159_v35 = vsel %vm462_vm0, %v12391_v4, %v8945_v44  ;;  %v3160_v18 = vsel %vm462_vm0, %v12394_v23, %v8946_v12  ;;  %v8961_v44 = vunpack.i.h.bf16 %v12578_v40 }
 0x2e1   : > { %v3241_v1 = vpack.c.bf16 %v3160_v18, %v3159_v35  ;;  %v3129_v40 = vsel %vm462_vm0, %v12093_v37, %v8960_v5  ;;  %v8970_v5 = vunpack.i.l.bf16 %v12590_v50 }
 0x2e2   : > { %v8954_v2 = vpop.permute.xlu0 %8953 }
 0x2e3   : > { %v12601_v51 = vpop.permute.xlu1 %8978  ;;  %v8956_v61 = vunpack.i.h.bf16 %v8954_v2  ;;  %v8955_v57 = vunpack.i.l.bf16 %v8954_v2 }
 0x2e5   : > { %v3161_v3 = vsel %vm462_vm0, %v12448_v48, %v8955_v57  ;;  %v3162_v2 = vsel %vm462_vm0, %v12451_v45, %v8956_v61 }
 0x2e6   : > { %3689 = vmatmul.mubr.bf16.gmra.mrb[80].mxu1 %v12603_v52  ;;  %v3245_v43 = vpack.c.bf16 %v3162_v2, %v3161_v3 }
 0x2e7   : > { %3696 = vmatprep.mubr.bf16.mxu1 %v3237_v63  ;;  %v12610_v21 = vpop.permute.xlu1 %8988 }
 0x2e8   : > { %v8964_v19 = vpop.permute.xlu0 %8963 }
 0x2e9   : > { %v8966_v25 = vunpack.i.h.bf16 %v8964_v19 }
 0x2ec   : > { %v12612_v39 = vpop.permute.xlu0 %8973 }
 0x2ee   : > { %3697 = vmatmul.mubr.bf16.gmra.mrb[84].mxu1 %v12618_v36 }
 0x2ef   : > { %3704 = vmatprep.mubr.bf16.mxu1 %v3241_v1  ;;  %v8965_v1 = vunpack.i.l.bf16 %v8964_v19 }
 0x2f1   : > { %v3163_v2 = vsel %vm462_vm0, %v12424_v59, %v8965_v1 }
 0x2f3   : > { %v12620_v33 = vpop.permute.xlu1 %8998  ;;  %v12622_v53 = vpop.permute.xlu0 %8983 }
 0x2f6   : > { %3705 = vmatmul.mubr.bf16.gmra.mrb[88].mxu1 %v12634_v16 }
 0x2f7   : > { %v9009_v9 = vpop.permute.xlu1 %9008  ;;  %v8994_v31 = vpop.permute.xlu0 %8993  ;;  %3712 = vmatprep.mubr.bf16.mxu1 %v3245_v43  ;;  %v8975_v43 = vunpack.i.l.bf16 %v12612_v39 }
 0x2f8   : > { %v8996_v63 = vunpack.i.h.bf16 %v8994_v31  ;;  %v8995_v12 = vunpack.i.l.bf16 %v8994_v31  ;;  %v9011_v38 = vunpack.i.h.bf16 %v9009_v9  ;;  %v9010_v27 = vunpack.i.l.bf16 %v9009_v9  ;;  %v16238_v31 = vld [vmem:[#allocation81_spill] sm:$0xff] }
 0x2f9   : > { %v3130_v3 = vsel %vm462_vm0, %v16238_v31, %v8961_v44  ;;  %v8971_v44 = vunpack.i.h.bf16 %v12590_v50  ;;  %v16240_v31 = vld [vmem:[#allocation83_spill] sm:$0xff] }
 0x2fa   : > { %v3180_v35 = vsel %vm462_vm0, %v9630_v34, %v8996_v63  ;;  %v3179_v18 = vsel %vm462_vm0, %v9631_v32, %v8995_v12  ;;  %v3164_v63 = vsel %vm462_vm0, %v12427_v47, %v8966_v25  ;;  %v9632_v12 = vld [vmem:[#allocation2 + $0x48] sm:$0xff]  ;;  %v9633_v34 = vld [vmem:[#allocation2 + $0x50] sm:$0xff]  ;;  %v12659_v37 = vpack.c.bf16 %v3130_v3, %v3129_v40 }
 0x2fb   : > { %v3217_v57 = vpack.c.bf16 %v3180_v35, %v3179_v18  ;;  %v12639_v58 = vpop.permute.xlu1 %9018  ;;  %v12641_v61 = vpop.permute.xlu0 %9003  ;;  %v3181_v9 = vsel %vm462_vm0, %v9632_v12, %v9010_v27  ;;  %v3249_v32 = vpack.c.bf16 %v3164_v63, %v3163_v2  ;;  %v8976_v18 = vunpack.i.h.bf16 %v12612_v39  ;;  %v9634_v12 = vld [vmem:[#allocation2 + $0x68] sm:$0xff] }
 0x2fc   : > { %v3132_v50 = vsel %vm462_vm0, %v16240_v31, %v8971_v44  ;;  %v3165_v39 = vsel %vm462_vm0, %v12470_v42, %v8975_v43  ;;  %v8980_v44 = vunpack.i.l.bf16 %v12601_v51  ;;  %v8985_v43 = vunpack.i.l.bf16 %v12622_v53  ;;  %v16242_v31 = vld [vmem:[#allocation80_spill] sm:$0xff] }
 0x2fd   : > { %3818 = vmatmul.mubr.bf16.vlgmr.msra.gmra.mrb[96].mxu0 %v3217_v57  ;;  %v3166_v63 = vsel %vm462_vm0, %v12473_v28, %v8976_v18 }
 0x2fe   : > { %3825 = vmatprep.mubr.bf16.mxu0 %v12588_v13  ;;  %v3182_v13 = vsel %vm462_vm0, %v9633_v34, %v9011_v38  ;;  %3713 = vmatmul.mubr.bf16.gmra.mrb[92].mxu1 %v12659_v37  ;;  %v16239_v38 = vld [vmem:[#allocation82_spill] sm:$0xff]  ;;  %v9635_v34 = vld [vmem:[#allocation2 + $0x70] sm:$0xff] }
 0x2ff   : > { %v12649_v19 = vpop.permute.xlu0 %9013  ;;  %v12657_v35 = vpop.permute.xlu1 %9028  ;;  %v3222_v1 = vpack.c.bf16 %v3182_v13, %v3181_v9  ;;  %3720 = vmatprep.mubr.bf16.mxu1 %v3249_v32  ;;  %v3131_v40 = vsel %vm462_vm0, %v16239_v38, %v8970_v5  ;;  %v8981_v5 = vunpack.i.h.bf16 %v12601_v51  ;;  %v3253_v32 = vpack.c.bf16 %v3166_v63, %v3165_v39  ;;  %v9636_v63 = vld [vmem:[#allocation2 + $0x88] sm:$0xff] }
 0x300   : > { %v12679_v13 = vpack.c.bf16 %v3132_v50, %v3131_v40  ;;  %v16241_v40 = vld [vmem:[#allocation78_spill] sm:$0xff] }
 0x301   : > { %v3133_v51 = vsel %vm462_vm0, %v16241_v40, %v8980_v44  ;;  %v3134_v50 = vsel %vm462_vm0, %v16242_v31, %v8981_v5  ;;  %v8990_v44 = vunpack.i.l.bf16 %v12610_v21 }
 0x303   : > { %v9024_v25 = vpop.permute.xlu0 %9023  ;;  %v9039_v3 = vpop.permute.xlu1 %9038 }
 0x304   : > { %v9026_v57 = vunpack.i.h.bf16 %v9024_v25  ;;  %v9025_v27 = vunpack.i.l.bf16 %v9024_v25  ;;  %v8986_v25 = vunpack.i.h.bf16 %v12622_v53  ;;  %v9040_v38 = vunpack.i.l.bf16 %v9039_v3 }
 0x305   : > { %3826 = vmatmul.mubr.bf16.gmra.mrb[100].mxu0 %v3222_v1  ;;  %v3167_v53 = vsel %vm462_vm0, %v12441_v41, %v8985_v43  ;;  %v9000_v43 = vunpack.i.l.bf16 %v12620_v33 }
 0x306   : > { %3833 = vmatprep.mubr.bf16.mxu0 %v12603_v52  ;;  %v3183_v9 = vsel %vm462_vm0, %v9634_v12, %v9025_v27  ;;  %v3184_v52 = vsel %vm462_vm0, %v9635_v34, %v9026_v57  ;;  %3721 = vmatmul.mubr.bf16.gmra.mrb[96].mxu1 %v12679_v13  ;;  %v9041_v27 = vunpack.i.h.bf16 %v9039_v3  ;;  %v3168_v39 = vsel %vm462_vm0, %v12445_v10, %v8986_v25  ;;  %v9637_v12 = vld [vmem:[#allocation2 + $0x90] sm:$0xff] }
 0x307   : > { %v12671_v2 = vpop.permute.xlu0 %9033  ;;  %v3226_v18 = vpack.c.bf16 %v3184_v52, %v3183_v9  ;;  %3728 = vmatprep.mubr.bf16.mxu1 %v3253_v32  ;;  %v12688_v57 = vpop.permute.xlu1 %9048  ;;  %v3185_v3 = vsel %vm462_vm0, %v9636_v63, %v9040_v38  ;;  %v8991_v52 = vunpack.i.h.bf16 %v12610_v21  ;;  %v3257_v5 = vpack.c.bf16 %v3168_v39, %v3167_v53  ;;  %v16244_v21 = vld [vmem:[#allocation17_spill] sm:$0xff]  ;;  %v9638_v53 = vld [vmem:[#allocation2 + $0xa8] sm:$0xff]  ;;  %v9639_v63 = vld [vmem:[#allocation2 + $0xb0] sm:$0xff] }
 0x308   : > { %v3186_v9 = vsel %vm462_vm0, %v9637_v12, %v9041_v27  ;;  %v9001_v32 = vunpack.i.h.bf16 %v12620_v33  ;;  %v16243_v27 = vld [vmem:[#allocation79_spill] sm:$0xff]  ;;  %v3169_v33 = vsel %vm462_vm0, %v12491_v22, %v9000_v43 }
 0x309   : > { %v3230_v25 = vpack.c.bf16 %v3186_v9, %v3185_v3  ;;  %v3136_v31 = vsel %vm462_vm0, %v16244_v21, %v8991_v52  ;;  %v9006_v9 = vunpack.i.h.bf16 %v12641_v61 }
 0x30b   : > { %v12685_v1 = vpop.permute.xlu0 %9043 }
 0x30d   : > { %3834 = vmatmul.mubr.bf16.gmra.mrb[104].mxu0 %v3226_v18  ;;  %v12707_v18 = vpop.permute.xlu1 %9058 }
 0x30e   : > { %3841 = vmatprep.mubr.bf16.mxu0 %v12618_v36  ;;  %v12701_v36 = vpack.c.bf16 %v3134_v50, %v3133_v51  ;;  %v3135_v51 = vsel %vm462_vm0, %v16243_v27, %v8990_v44  ;;  %v3170_v50 = vsel %vm462_vm0, %v12494_v29, %v9001_v32  ;;  %v9016_v44 = vunpack.i.h.bf16 %v12649_v19 }
 0x30f   : > { %v9054_v34 = vpop.permute.xlu0 %9053  ;;  %v3261_v52 = vpack.c.bf16 %v3170_v50, %v3169_v33  ;;  %v9641_v50 = vld [vmem:[#allocation2 + $0xd0] sm:$0xff] }
 0x310   : > { %3729 = vmatmul.mubr.bf16.gmra.mrb[100].mxu1 %v12701_v36  ;;  %v9056_v38 = vunpack.i.h.bf16 %v9054_v34  ;;  %v9055_v40 = vunpack.i.l.bf16 %v9054_v34  ;;  %v9005_v34 = vunpack.i.l.bf16 %v12641_v61  ;;  %v16246_v61 = vld [vmem:[#allocation91_spill] sm:$0xff]  ;;  %v3172_v21 = vsel %vm462_vm0, %v12467_v56, %v9016_v44 }
 0x311   : > { %3736 = vmatprep.mubr.bf16.mxu1 %v3257_v5  ;;  %v9069_v12 = vpop.permute.xlu1 %9068  ;;  %v9015_v5 = vunpack.i.l.bf16 %v12649_v19 }
 0x312   : > { %v3187_v39 = vsel %vm462_vm0, %v9638_v53, %v9055_v40  ;;  %v3188_v3 = vsel %vm462_vm0, %v9639_v63, %v9056_v38  ;;  %v9070_v40 = vunpack.i.l.bf16 %v9069_v12  ;;  %v16245_v38 = vld [vmem:[#allocation31_spill] sm:$0xff]  ;;  %v9021_v63 = vunpack.i.h.bf16 %v12639_v58 }
 0x313   : > { %v12727_v43 = vpop.permute.xlu0 %9063  ;;  %v3234_v32 = vpack.c.bf16 %v3188_v3, %v3187_v39  ;;  %v3137_v27 = vsel %vm462_vm0, %v16245_v38, %v9005_v34  ;;  %v3171_v19 = vsel %vm462_vm0, %v12463_v26, %v9015_v5  ;;  %v9020_v3 = vunpack.i.l.bf16 %v12639_v58 }
 0x314   : > { %v9030_v34 = vunpack.i.l.bf16 %v12657_v35 }
 0x315   : > { %3842 = vmatmul.mubr.bf16.gmra.mrb[108].mxu0 %v3230_v25  ;;  %v9071_v25 = vunpack.i.h.bf16 %v9069_v12  ;;  %v3265_v12 = vpack.c.bf16 %v3172_v21, %v3171_v19  ;;  %v9079_v21 = vpop.permute.xlu1 %9078 }
 0x316   : > { %3849 = vmatprep.mubr.bf16.mxu0 %v12634_v16  ;;  %v12721_v16 = vpack.c.bf16 %v3136_v31, %v3135_v51  ;;  %v3138_v51 = vsel %vm462_vm0, %v16246_v61, %v9006_v9  ;;  %v9640_v31 = vld [vmem:[#allocation2 + $0xc8] sm:$0xff]  ;;  %v9031_v9 = vunpack.i.h.bf16 %v12657_v35  ;;  %v3173_v38 = vsel %vm462_vm0, %v12513_v55, %v9030_v34 }
 0x317   : > { %v3189_v33 = vsel %vm462_vm0, %v9640_v31, %v9070_v40  ;;  %v3190_v53 = vsel %vm462_vm0, %v9641_v50, %v9071_v25  ;;  %v9074_v39 = vpop.permute.xlu0 %9073  ;;  %v16248_v40 = vld [vmem:[#allocation90_spill] sm:$0xff]  ;;  %v9036_v31 = vunpack.i.h.bf16 %v12671_v2 }
 0x318   : > { %3737 = vmatmul.mubr.bf16.gmra.mrb[104].mxu1 %v12721_v16  ;;  %v9076_v44 = vunpack.i.h.bf16 %v9074_v39  ;;  %v9075_v5 = vunpack.i.l.bf16 %v9074_v39  ;;  %v3140_v58 = vsel %vm462_vm0, %v16248_v40, %v9021_v63  ;;  %v3174_v35 = vsel %vm462_vm0, %v12516_v0, %v9031_v9  ;;  %v16249_v9 = vld [vmem:[#allocation95_spill] sm:$0xff] }
 0x319   : > { %3744 = vmatprep.mubr.bf16.mxu1 %v3261_v52  ;;  %v3238_v52 = vpack.c.bf16 %v3190_v53, %v3189_v33  ;;  %v9035_v33 = vunpack.i.l.bf16 %v12671_v2  ;;  %v3269_v50 = vpack.c.bf16 %v3174_v35, %v3173_v38  ;;  %v9046_v53 = vunpack.i.h.bf16 %v12685_v1 }
 0x31a   : > { %v9045_v39 = vunpack.i.l.bf16 %v12685_v1  ;;  %v9051_v38 = vunpack.i.h.bf16 %v12688_v57  ;;  %v9050_v35 = vunpack.i.l.bf16 %v12688_v57 }
 0x31b   : > { %v3141_v34 = vsel %vm462_vm0, %v16249_v9, %v9035_v33  ;;  %v3176_v1 = vsel %vm462_vm0, %v12488_v62, %v9046_v53  ;;  %v16251_v33 = vld [vmem:[#allocation94_spill] sm:$0xff]  ;;  %v16252_v53 = vld [vmem:[#allocation92_spill] sm:$0xff] }
 0x31c   : > { %v3144_v57 = vsel %vm462_vm0, %v16252_v53, %v9051_v38  ;;  %v3224_v53 = vpack.c.bf16 %v12338_v54, %v12335_v46 }
 0x31d   : > { %3850 = vmatmul.mubr.bf16.gmra.mrb[112].mxu0 %v3234_v32  ;;  %v16247_v32 = vld [vmem:[#allocation25_spill] sm:$0xff] }
 0x31e   : > { %3857 = vmatprep.mubr.bf16.mxu0 %v12659_v37  ;;  %v12741_v37 = vpack.c.bf16 %v3138_v51, %v3137_v27  ;;  %v3139_v25 = vsel %vm462_vm0, %v16247_v32, %v9020_v3  ;;  %v9642_v27 = vld [vmem:[#allocation2 + $0xe8] sm:$0xff]  ;;  %v9643_v51 = vld [vmem:[#allocation2 + $0xf0] sm:$0xff]  ;;  %v9081_v3 = vunpack.i.h.bf16 %v9079_v21 }
 0x31f   : > { %v3191_v61 = vsel %vm462_vm0, %v9642_v27, %v9075_v5  ;;  %v3192_v19 = vsel %vm462_vm0, %v9643_v51, %v9076_v44  ;;  %v3175_v44 = vsel %vm462_vm0, %v12485_v15, %v9045_v39  ;;  %v9644_v5 = vld [vmem:[#allocation2 + $0x108] sm:$0xff]  ;;  %v9060_v51 = vunpack.i.l.bf16 %v12707_v18 }
 0x320   : > { %3745 = vmatmul.mubr.bf16.gmra.mrb[108].mxu1 %v12741_v37  ;;  %v3242_v63 = vpack.c.bf16 %v3192_v19, %v3191_v61  ;;  %v3273_v27 = vpack.c.bf16 %v3176_v1, %v3175_v44  ;;  %v9061_v61 = vunpack.i.h.bf16 %v12707_v18 }
 0x321   : > { %3752 = vmatprep.mubr.bf16.mxu1 %v3265_v12  ;;  %v9080_v12 = vunpack.i.l.bf16 %v9079_v21  ;;  %v3177_v39 = vsel %vm462_vm0, %v12507_v6, %v9060_v51 }
 0x322   : > { %v3178_v18 = vsel %vm462_vm0, %v12510_v11, %v9061_v61 }
 0x323   : > { %v3193_v32 = vsel %vm462_vm0, %v9644_v5, %v9080_v12  ;;  %v9647_v12 = vld [vmem:[#allocation2 + $0x130] sm:$0xff]  ;;  %v3277_v44 = vpack.c.bf16 %v3178_v18, %v3177_v39 }
 0x325   : > { %3858 = vmatmul.mubr.bf16.gmra.mrb[116].mxu0 %v3238_v52  ;;  %v16250_v52 = vld [vmem:[#allocation93_spill] sm:$0xff] }
 0x326   : > { %3865 = vmatprep.mubr.bf16.mxu0 %v12679_v13  ;;  %v12759_v13 = vpack.c.bf16 %v3140_v58, %v3139_v25  ;;  %v3142_v2 = vsel %vm462_vm0, %v16250_v52, %v9036_v31  ;;  %v9645_v25 = vld [vmem:[#allocation2 + $0x110] sm:$0xff]  ;;  %v9084_v58 = vpop.permute.xlu0 %9083  ;;  %v9066_v52 = vunpack.i.h.bf16 %v12727_v43 }
 0x327   : > { %v3194_v40 = vsel %vm462_vm0, %v9645_v25, %v9081_v3  ;;  %v9086_v21 = vunpack.i.h.bf16 %v9084_v58  ;;  %v9085_v31 = vunpack.i.l.bf16 %v9084_v58  ;;  %v9204_v25 = vld [vmem:[%s15600_s6] sm:$0xff]  }
 0x328   : > { %3753 = vmatmul.mubr.bf16.gmra.mrb[112].mxu1 %v12759_v13  ;;  %v3246_v19 = vpack.c.bf16 %v3194_v40, %v3193_v32  ;;  %v3146_v58 = vsel %vm462_vm0, %v12372_v7, %v9066_v52  ;;  %8480 = vmatprep.subr.bf16.mxu0 %v9204_v25  ;;  %v9650_v7 = vld [vmem:[#allocation2 + $0x168] sm:$0xff] }
 0x329   : > { %3760 = vmatprep.mubr.bf16.mxu1 %v3269_v50  ;;  %v3143_v50 = vsel %vm462_vm0, %v16251_v33, %v9050_v35  ;;  %v3196_v9 = vsel %vm462_vm0, %v9647_v12, %v9086_v21  ;;  %8481 = vmatpush3.bf16.msra.mxu0 %v9204_v25  ;;  %v9649_v35 = vld [vmem:[#allocation2 + $0x150] sm:$0xff] }
 0x32a   : > { %v9094_v61 = vpop.permute.xlu0 %9093  ;;  %v9651_v33 = vld [vmem:[#allocation2 + $0x170] sm:$0xff] }
 0x32b   : > { %v9096_v21 = vunpack.i.h.bf16 %v9094_v61 }
 0x32d   : > { %3866 = vmatmul.mubr.bf16.gmra.mrb[120].mxu0 %v3242_v63  ;;  %v9646_v63 = vld [vmem:[#allocation2 + $0x128] sm:$0xff] }
 0x32e   : > { %3873 = vmatprep.mubr.bf16.mxu0 %v12701_v36  ;;  %v12777_v36 = vpack.c.bf16 %v3142_v2, %v3141_v34  ;;  %v3195_v3 = vsel %vm462_vm0, %v9646_v63, %v9085_v31  ;;  %v9089_v34 = vpop.permute.xlu1 %9088  ;;  %v9065_v2 = vunpack.i.l.bf16 %v12727_v43  ;;  %v9648_v43 = vld [vmem:[#allocation2 + $0x148] sm:$0xff]  ;;  %v9104_v54 = vpop.permute.xlu0 %9103 }
 0x32f   : > { %v3250_v1 = vpack.c.bf16 %v3196_v9, %v3195_v3  ;;  %v9091_v5 = vunpack.i.h.bf16 %v9089_v34  ;;  %v9090_v32 = vunpack.i.l.bf16 %v9089_v34  ;;  %v9653_v3 = vld [vmem:[#allocation2 + $0x190] sm:$0xff]  ;;  %v9106_v9 = vunpack.i.h.bf16 %v9104_v54 }
 0x330   : > { %3761 = vmatmul.mubr.bf16.gmra.mrb[116].mxu1 %v12777_v36  ;;  %v3145_v40 = vsel %vm462_vm0, %v12384_v30, %v9065_v2  ;;  %v9095_v30 = vunpack.i.l.bf16 %v9094_v61  ;;  %v9105_v34 = vunpack.i.l.bf16 %v9104_v54  ;;  %v9655_v2 = vld [vmem:[#allocation2 + $0x1b0] sm:$0xff]  ;;  %v3260_v54 = vpack.c.bf16 %v12467_v56, %v12463_v26 }
 0x331   : > { %3768 = vmatprep.mubr.bf16.mxu1 %v3273_v27  ;;  %v3197_v38 = vsel %vm462_vm0, %v9648_v43, %v9090_v32  ;;  %v3198_v27 = vsel %vm462_vm0, %v9649_v35, %v9091_v5  ;;  %v3271_v51 = vpack.c.bf16 %v3146_v58, %v3145_v40  ;;  %v2797_v43 = vrot.slane %v12526_v17, 7  ;;  %v16253_v35 = vld [vmem:[#allocation100_spill] sm:$0xff] }
 0x332   : > { %v3199_v31 = vsel %vm462_vm0, %v9650_v7, %v9095_v30  ;;  %v3252_v7 = vpack.c.bf16 %v12445_v10, %v12441_v41  ;;  %v3268_v26 = vpack.c.bf16 %v12488_v62, %v12485_v15 }
 0x335   : > { %3874 = vmatmul.mubr.bf16.gmra.mrb[124].mxu0 %v3246_v19  ;;  %v3219_v19 = vpack.c.bf16 %v12274_v8, %v12271_v49  ;;  %v3228_v49 = vpack.c.bf16 %v12332_v20, %v12329_v24  ;;  %v3232_v24 = vpack.c.bf16 %v12405_v14, %v12402_v60  ;;  %v3236_v20 = vpack.c.bf16 %v12394_v23, %v12391_v4  ;;  %v9114_v4 = vpop.permute.xlu0 %9113 }
 0x336   : > { %3881 = vmatprep.mubr.bf16.mxu0 %v12721_v16  ;;  %v3267_v16 = vpack.c.bf16 %v3144_v57, %v3143_v50  ;;  %v3200_v50 = vsel %vm462_vm0, %v9651_v33, %v9096_v21  ;;  %v9099_v57 = vpop.permute.xlu1 %9098  ;;  %v3240_v60 = vpack.c.bf16 %v12451_v45, %v12448_v48  ;;  %v3244_v23 = vpack.c.bf16 %v12427_v47, %v12424_v59  ;;  %v9656_v48 = vld [vmem:[#allocation2 + $0x1c8] sm:$0xff]  ;;  %v16255_v21 = vld [vmem:[#allocation96_spill] sm:$0xff] }
 0x337   : > { %v3258_v8 = vpack.c.bf16 %v3200_v50, %v3199_v31  ;;  %v9101_v39 = vunpack.i.h.bf16 %v9099_v57  ;;  %v9100_v18 = vunpack.i.l.bf16 %v9099_v57  ;;  %v9116_v25 = vunpack.i.h.bf16 %v9114_v4 }
 0x338   : > { %3769 = vmatmul.mubr.bf16.gmra.mrb[120].mxu1 %v3267_v16  ;;  %v9115_v40 = vunpack.i.l.bf16 %v9114_v4  ;;  %v3272_v4 = vpack.c.bf16 %v12510_v11, %v12507_v6 }
 0x339   : > { %3776 = vmatprep.mubr.bf16.mxu1 %v3277_v44  ;;  %v3202_v46 = vsel %vm462_vm0, %v9653_v3, %v9101_v39  ;;  %v3204_v44 = vsel %vm462_vm0, %v9655_v2, %v9106_v9  ;;  %v9124_v47 = vpop.permute.xlu0 %9123  ;;  %v3212_v30 = vsel %vm462_vm0, %v16255_v21, %v9116_v25 }
 0x33a   : > { %v9126_v33 = vunpack.i.h.bf16 %v9124_v47  ;;  %v9125_v50 = vunpack.i.l.bf16 %v9124_v47 }
 0x33d   : > { %3882 = vmatmul.mubr.bf16.gmra.mrb[128].mxu0 %v3250_v1  ;;  %v9109_v1 = vpop.permute.xlu1 %9108 }
 0x33e   : > { %3889 = vmatprep.mubr.bf16.mxu0 %v12741_v37  ;;  %v3254_v37 = vpack.c.bf16 %v3198_v27, %v3197_v38  ;;  %v9111_v5 = vunpack.i.h.bf16 %v9109_v1  ;;  %v9110_v32 = vunpack.i.l.bf16 %v9109_v1  ;;  %v9657_v38 = vld [vmem:[#allocation2 + $0x1d0] sm:$0xff]  ;;  %v2799_v27 = vrot.slane %v16253_v35, 7 }
 0x33f   : > { %v2806_v1 = vrot.slane %v12526_v17, 1  ;;  %v9206_v17 = vld [vmem:[%s15600_s6 + $0x10] sm:$0xff]  }
 0x340   : > { %3777 = vmatmul.mubr.bf16.gmra.mrb[124].mxu1 %v3271_v51  ;;  %v3205_v45 = vsel %vm462_vm0, %v9656_v48, %v9110_v32  ;;  %v3206_v59 = vsel %vm462_vm0, %v9657_v38, %v9111_v5  ;;  %v2800_v39 = vsel %vm688_vm1, %v2797_v43, %v2799_v27 }
 0x341   : > { %8448 = vmatprep.mubr.msk.bf16.mxu1 %vm462_vm0, %v3219_v19  ;;  %v9119_v61 = vpop.permute.xlu1 %9118  ;;  %v16254_v19 = vld [vmem:[#allocation97_spill] sm:$0xff]  ;;  %v3270_v31 = vpack.c.bf16 %v3206_v59, %v3205_v45  ;;  %v3214_v10 = vsel %vm462_vm0, %v2800_v39, %v9126_v33 }
 0x342   : > { %v9121_v57 = vunpack.i.h.bf16 %v9119_v61 }
 0x345   : > { %3890 = vmatmul.mubr.bf16.gmra.mrb[132].mxu0 %v3254_v37  ;;  %v3211_v37 = vsel %vm462_vm0, %v16254_v19, %v9115_v40  ;;  %v9129_v3 = vpop.permute.xlu1 %9128  ;;  %v9207_v40 = vld [vmem:[%s15600_s6 + $0x18] sm:$0xff]  }
 0x346   : > { %3897 = vmatprep.mubr.bf16.mxu0 %v12759_v13  ;;  %v9652_v13 = vld [vmem:[#allocation2 + $0x188] sm:$0xff]  ;;  %v9130_v9 = vunpack.i.l.bf16 %v9129_v3 }
 0x347   : > { %v3201_v63 = vsel %vm462_vm0, %v9652_v13, %v9100_v18  ;;  %v9659_v13 = vld [vmem:[#allocation2 + $0x1f0] sm:$0xff] }
 0x348   : > { %8449 = vmatmul.mubr.msk.bf16.vlgmr.msra.gmra.mrb[128].mxu1 %vm462_vm0, %v3224_v53  ;;  %v3262_v12 = vpack.c.bf16 %v3202_v46, %v3201_v63  ;;  %v3208_v63 = vsel %vm462_vm0, %v9659_v13, %v9121_v57  ;;  %v3256_v46 = vpack.c.bf16 %v12494_v29, %v12491_v22  ;;  %v3264_v22 = vpack.c.bf16 %v12516_v0, %v12513_v55  ;;  %v2490_v29 = vld [vmem:[#allocation2 + $0x238] sm:$0xff]  ;;  %v16256_v55 = vld [vmem:[#allocation99_spill] sm:$0xff]  ;;  %v16257_v0 = vld [vmem:[#allocation98_spill] sm:$0xff] }
 0x349   : > { %8452 = vmatprep.mubr.msk.bf16.mxu1 %vm462_vm0, %v3228_v49  ;;  %v9120_v49 = vunpack.i.l.bf16 %v9119_v61  ;;  %v16258_v15 = vpack.c.bf16 %v16256_v55, %v16257_v0 }
 0x34d   : > { %3898 = vmatmul.mubr.bf16.gmra.mrb[136].mxu0 %v3258_v8  ;;  %v3275_v8 = vpack.c.bf16 %v3212_v30, %v3211_v37 }
 0x34e   : > { %3905 = vmatprep.mubr.bf16.mxu0 %v12777_v36  ;;  %v9654_v36 = vld [vmem:[#allocation2 + $0x1a8] sm:$0xff] }
 0x34f   : > { %v3203_v52 = vsel %vm462_vm0, %v9654_v36, %v9105_v34  ;;  %v9660_v34 = vld [vmem:[#allocation2 + $0x208] sm:$0xff] }
 0x350   : > { %8453 = vmatmul.mubr.msk.bf16.gmra.mrb[132].mxu1 %vm462_vm0, %v3232_v24  ;;  %v3266_v14 = vpack.c.bf16 %v3204_v44, %v3203_v52  ;;  %v3209_v36 = vsel %vm462_vm0, %v9660_v34, %v9130_v9  ;;  %v9661_v52 = vld [vmem:[#allocation2 + $0x210] sm:$0xff]  ;;  %v2807_v44 = vrot.slane %v16253_v35, 1 }
 0x351   : > { %8456 = vmatprep.mubr.msk.bf16.mxu1 %vm462_vm0, %v3236_v20 }
 0x352   : > { %v2808_v62 = vsel %vm817_vm2, %v2806_v1, %v2807_v44 }
 0x355   : > { %3906 = vmatmul.mubr.bf16.gmra.mrb[140].mxu0 %v3262_v12  ;;  %v9131_v12 = vunpack.i.h.bf16 %v9129_v3  ;;  %v12908_v3 = vld [vmem:[%s15599_s5] ss:$0 sm:$0xff] }
 0x356   : > { %3913 = vmatprep.mubr.bf16.mxu0 %v3267_v16  ;;  %v2487_v16 = vld [vmem:[#allocation2 + $0x220] sm:$0xff] }
 0x357   : > { %v2796_v58 = vrot.slane %v2487_v16, 7  ;;  %v3210_v2 = vsel %vm462_vm0, %v9661_v52, %v9131_v12 }
 0x358   : > { %8457 = vmatmul.mubr.msk.bf16.gmra.mrb[136].mxu1 %vm462_vm0, %v3240_v60  ;;  %v3278_v56 = vpack.c.bf16 %v3210_v2, %v3209_v36  ;;  %v2809_v60 = vrot.slane %v2490_v29, 1 }
 0x359   : > { %8460 = vmatprep.mubr.msk.bf16.mxu1 %vm462_vm0, %v3244_v23  ;;  %v2798_v53 = vsel %vm688_vm1, %v2796_v58, %v2797_v43 }
 0x35a   : > { %v3213_v41 = vsel %vm462_vm0, %v2798_v53, %v9125_v50  ;;  %v2810_v23 = vsel %vm817_vm2, %v2807_v44, %v2809_v60 }
 0x35b   : > { %v3279_v24 = vpack.c.bf16 %v3214_v10, %v3213_v41 }
 0x35d   : > { %3914 = vmatmul.mubr.bf16.gmra.mrb[144].mxu0 %v3266_v14  ;;  %v3280_v14 = vpack.c.bf16 %v2810_v23, %v2808_v62 }
 0x35e   : > { %3921 = vmatprep.mubr.bf16.mxu0 %v3271_v51  ;;  %v3248_v51 = vpack.c.bf16 %v12473_v28, %v12470_v42  ;;  %v9205_v42 = vld [vmem:[%s15600_s6 + $0x8] sm:$0xff]  }
 0x35f   : > { %8482 = vmatprep.subr.bf16.mxu0 %v9205_v42  ;;  %v9658_v28 = vld [vmem:[#allocation2 + $0x1e8] sm:$0xff] }
 0x360   : > { %8461 = vmatmul.mubr.msk.bf16.gmra.mrb[140].mxu1 %vm462_vm0, %v3248_v51  ;;  %8483 = vmatpush3.bf16.msra.mxu0 %v9205_v42  ;;  %v3207_v18 = vsel %vm462_vm0, %v9658_v28, %v9120_v49 }
 0x361   : > { %8464 = vmatprep.mubr.msk.bf16.mxu1 %vm462_vm0, %v3252_v7  ;;  %v3274_v20 = vpack.c.bf16 %v3208_v63, %v3207_v18  ;;  %8484 = vmatprep.subr.bf16.mxu0 %v9206_v17 }
 0x364   : > { %8485 = vmatpush3.bf16.msra.mxu0 %v9206_v17 }
 0x365   : > { %3922 = vmatmul.mubr.bf16.gmra.mrb[148].mxu0 %v3270_v31  ;;  %8486 = vmatprep.subr.bf16.mxu0 %v9207_v40 }
 0x366   : > { %3929 = vmatprep.mubr.bf16.mxu0 %v3275_v8 }
 0x368   : > { %8465 = vmatmul.mubr.msk.bf16.gmra.mrb[144].mxu1 %vm462_vm0, %v3256_v46  ;;  %8487 = vmatpush3.bf16.msra.mxu0 %v9207_v40 }
 0x369   : > { %8468 = vmatprep.mubr.msk.bf16.mxu1 %vm462_vm0, %v3260_v54 }
 0x36d   : > { %3930 = vmatmul.mubr.bf16.gmra.mrb[152].mxu0 %v3274_v20 }
 0x36e   : > { %3937 = vmatprep.mubr.bf16.mxu0 %v3279_v24 }
 0x370   : > { %8469 = vmatmul.mubr.msk.bf16.gmra.mrb[148].mxu1 %vm462_vm0, %v3264_v22 }
 0x371   : > { %8472 = vmatprep.mubr.msk.bf16.mxu1 %vm462_vm0, %v3268_v26 }
 0x375   : > { %3938 = vmatmul.mubr.bf16.gmra.mrb[156].mxu0 %v3278_v56 }
 0x378   : > { %8473 = vmatmul.mubr.msk.bf16.gmra.mrb[152].mxu1 %vm462_vm0, %v3272_v4 }
 0x379   : > { %8476 = vmatprep.mubr.msk.bf16.mxu1 %vm462_vm0, %v16258_v15 }
 0x380   : > { %8477 = vmatmul.mubr.msk.bf16.gmra.mrb[156].mxu1 %vm462_vm0, %v3280_v14 }
 0x399   : > { %v7812_v6 = vpop.f32.mrb[64].mxu1 }
 0x39a   : > { %v7813_v11 = vpop.f32.mrb[65].mxu1 }
 0x39b   : > { %v7814_v5 = vadd.f32 %v7813_v11, %v7812_v6  ;;  %v7815_v32 = vpop.f32.mrb[66].mxu1 }
 0x39c   : > { %v7816_v16 = vpop.f32.mrb[67].mxu1 }
 0x39d   : > { %v7817_v25 = vadd.f32 %v7816_v16, %v7815_v32  ;;  %v3659_v34 = vadd.f32 %v7814_v5, %v12908_v3 }
 0x39f   : > { %v3662_v26 = vadd.f32 %v7817_v25, %v12908_v3 }
 0x3a1   : > { %v7818_v58 = vpop.f32.mrb[68].mxu1 }
 0x3a2   : > { %v7819_v43 = vpop.f32.mrb[69].mxu1 }
 0x3a3   : > { %v7820_v48 = vadd.f32 %v7819_v43, %v7818_v58  ;;  %v7821_v45 = vpop.f32.mrb[70].mxu1 }
 0x3a4   : > { %v7822_v38 = vpop.f32.mrb[71].mxu1 }
 0x3a5   : > { %v7823_v59 = vadd.f32 %v7822_v38, %v7821_v45  ;;  %v3667_v23 = vadd.f32 %v7820_v48, %v12908_v3 }
 0x3a7   : > { %v3670_v5 = vadd.f32 %v7823_v59, %v12908_v3 }
 0x3a9   : > { %v7824_v47 = vpop.f32.mrb[72].mxu1 }
 0x3aa   : > { %v7825_v35 = vpop.f32.mrb[73].mxu1 }
 0x3ab   : > { %v7826_v27 = vadd.f32 %v7825_v35, %v7824_v47  ;;  %v7827_v61 = vpop.f32.mrb[74].mxu1 }
 0x3ac   : > { %v7828_v19 = vpop.f32.mrb[75].mxu1 }
 0x3ad   : > { %v12891_v37 = vadd.f32 %v7828_v19, %v7827_v61  ;;  %v3675_v35 = vadd.f32 %v7826_v27, %v12908_v3 }
 0x3b1   : > { %v7830_v21 = vpop.f32.mrb[76].mxu1 }
 0x3b2   : > { %v7831_v30 = vpop.f32.mrb[77].mxu1 }
 0x3b3   : > { %v12893_v51 = vadd.f32 %v7831_v30, %v7830_v21  ;;  %v7833_v7 = vpop.f32.mrb[78].mxu1  ;;  %v3678_v30 = vadd.f32 %v12891_v37, %v12908_v3 }
 0x3b4   : > { %v7834_v31 = vpop.f32.mrb[79].mxu1 }
 0x3b5   : > { %v12895_v33 = vadd.f32 %v7834_v31, %v7833_v7 }
 0x3b9   : > { %v7836_v50 = vpop.f32.mrb[80].mxu1 }
 0x3ba   : > { %v7837_v53 = vpop.f32.mrb[81].mxu1 }
 0x3bb   : > { %v12897_v57 = vadd.f32 %v7837_v53, %v7836_v50  ;;  %v7839_v49 = vpop.f32.mrb[82].mxu1 }
 0x3bc   : > { %v7840_v8 = vpop.f32.mrb[83].mxu1 }
 0x3bd   : > { %v12899_v39 = vadd.f32 %v7840_v8, %v7839_v49 }
 0x3c1   : > { %v7842_v42 = vpop.f32.mrb[84].mxu1 }
 0x3c2   : > { %v7843_v41 = vpop.f32.mrb[85].mxu1 }
 0x3c3   : > { %v12901_v10 = vadd.f32 %v7843_v41, %v7842_v42  ;;  %v7845_v28 = vpop.f32.mrb[86].mxu1 }
 0x3c4   : > { %v7846_v18 = vpop.f32.mrb[87].mxu1 }
 0x3c5   : > { %v12903_v13 = vadd.f32 %v7846_v18, %v7845_v28  ;;  %v3683_v18 = vadd.f32 %v12893_v51, %v12908_v3 }
 0x3c9   : > { %v7848_v63 = vpop.f32.mrb[88].mxu1 }
 0x3ca   : > { %v7849_v46 = vpop.f32.mrb[89].mxu1 }
 0x3cb   : > { %v12910_v24 = vadd.f32 %v7849_v46, %v7848_v63  ;;  %v7851_v20 = vpop.f32.mrb[90].mxu1 }
 0x3cc   : > { %v7852_v9 = vpop.f32.mrb[91].mxu1 }
 0x3cd   : > { %v12913_v2 = vadd.f32 %v7852_v9, %v7851_v20  ;;  %v3686_v20 = vadd.f32 %v12895_v33, %v12908_v3 }
 0x3d0   : > { %v7924_v54 = vpop.f32.mrb[96].mxu0 }
 0x3d1   : > { %v7925_v12 = vpop.f32.mrb[97].mxu0  ;;  %v7854_v44 = vpop.f32.mrb[92].mxu1 }
 0x3d2   : > { %v7926_v36 = vadd.f32 %v7925_v12, %v7924_v54  ;;  %v7927_v52 = vpop.f32.mrb[98].mxu0  ;;  %v7855_v60 = vpop.f32.mrb[93].mxu1 }
 0x3d3   : > { %v7928_v22 = vpop.f32.mrb[99].mxu0  ;;  %v12920_v55 = vadd.f32 %v7855_v60, %v7854_v44  ;;  %v7857_v0 = vpop.f32.mrb[94].mxu1  ;;  %v3691_v60 = vadd.f32 %v12897_v57, %v12908_v3 }
 0x3d4   : > { %v7929_v56 = vadd.f32 %v7928_v22, %v7927_v52  ;;  %v12916_v29 = vadd.f32 %v7926_v36, %v3659_v34  ;;  %v7858_v62 = vpop.f32.mrb[95].mxu1 }
 0x3d5   : > { %v12923_v6 = vadd.f32 %v7858_v62, %v7857_v0  ;;  %v3694_v62 = vadd.f32 %v12899_v39, %v12908_v3 }
 0x3d6   : > { %v12918_v1 = vadd.f32 %v7929_v56, %v3662_v26 }
 0x3d8   : > { %v7930_v4 = vpop.f32.mrb[100].mxu0 }
 0x3d9   : > { %v7931_v15 = vpop.f32.mrb[101].mxu0  ;;  %v7860_v25 = vpop.f32.mrb[96].mxu1 }
 0x3da   : > { %v7932_v14 = vadd.f32 %v7931_v15, %v7930_v4  ;;  %v7933_v17 = vpop.f32.mrb[102].mxu0  ;;  %v7861_v58 = vpop.f32.mrb[97].mxu1 }
 0x3db   : > { %v7934_v11 = vpop.f32.mrb[103].mxu0  ;;  %v12930_v45 = vadd.f32 %v7861_v58, %v7860_v25  ;;  %v7863_v38 = vpop.f32.mrb[98].mxu1 }
 0x3dc   : > { %v7935_v32 = vadd.f32 %v7934_v11, %v7933_v17  ;;  %v12926_v16 = vadd.f32 %v7932_v14, %v3667_v23  ;;  %v7864_v48 = vpop.f32.mrb[99].mxu1 }
 0x3dd   : > { %v12933_v21 = vadd.f32 %v7864_v48, %v7863_v38  ;;  %v3699_v38 = vadd.f32 %v12901_v10, %v12908_v3 }
 0x3de   : > { %v12928_v40 = vadd.f32 %v7935_v32, %v3670_v5 }
 0x3e0   : > { %v7936_v43 = vpop.f32.mrb[104].mxu0 }
 0x3e1   : > { %v7937_v47 = vpop.f32.mrb[105].mxu0 }
 0x3e2   : > { %v7938_v61 = vadd.f32 %v7937_v47, %v7936_v43  ;;  %v7939_v19 = vpop.f32.mrb[106].mxu0 }
 0x3e3   : > { %v7940_v59 = vpop.f32.mrb[107].mxu0  ;;  %v7866_v50 = vpop.f32.mrb[100].mxu1 }
 0x3e4   : > { %v7941_v7 = vadd.f32 %v7940_v59, %v7939_v19  ;;  %v12937_v31 = vadd.f32 %v7938_v61, %v3675_v35  ;;  %v7867_v49 = vpop.f32.mrb[101].mxu1  ;;  %v3702_v61 = vadd.f32 %v12903_v13, %v12908_v3 }
 0x3e5   : > { %v12941_v42 = vadd.f32 %v7867_v49, %v7866_v50  ;;  %v7869_v41 = vpop.f32.mrb[102].mxu1 }
 0x3e6   : > { %v12939_v53 = vadd.f32 %v7941_v7, %v3678_v30  ;;  %v7870_v28 = vpop.f32.mrb[103].mxu1 }
 0x3e7   : > { %v12945_v54 = vadd.f32 %v7870_v28, %v7869_v41  ;;  %v3707_v28 = vadd.f32 %v12910_v24, %v12908_v3 }
 0x3e8   : > { %v7942_v8 = vpop.f32.mrb[108].mxu0 }
 0x3e9   : > { %v7943_v27 = vpop.f32.mrb[109].mxu0 }
 0x3ea   : > { %v7944_v63 = vadd.f32 %v7943_v27, %v7942_v8  ;;  %v7945_v46 = vpop.f32.mrb[110].mxu0 }
 0x3eb   : > { %v7946_v37 = vpop.f32.mrb[111].mxu0  ;;  %v7872_v34 = vpop.f32.mrb[104].mxu1 }
 0x3ec   : > { %v7947_v12 = vadd.f32 %v7946_v37, %v7945_v46  ;;  %v12949_v9 = vadd.f32 %v7944_v63, %v3683_v18  ;;  %v7873_v52 = vpop.f32.mrb[105].mxu1  ;;  %v3710_v37 = vadd.f32 %v12913_v2, %v12908_v3 }
 0x3ed   : > { %v12953_v26 = vadd.f32 %v7873_v52, %v7872_v34  ;;  %v7875_v56 = vpop.f32.mrb[106].mxu1 }
 0x3ee   : > { %v12951_v36 = vadd.f32 %v7947_v12, %v3686_v20  ;;  %v7876_v44 = vpop.f32.mrb[107].mxu1 }
 0x3ef   : > { %v12957_v15 = vadd.f32 %v7876_v44, %v7875_v56 }
 0x3f0   : > { %v7948_v22 = vpop.f32.mrb[112].mxu0 }
 0x3f1   : > { %v7949_v51 = vpop.f32.mrb[113].mxu0 }
 0x3f2   : > { %v7950_v4 = vadd.f32 %v7949_v51, %v7948_v22  ;;  %v7951_v0 = vpop.f32.mrb[114].mxu0 }
 0x3f3   : > { %v7952_v33 = vpop.f32.mrb[115].mxu0  ;;  %v7878_v17 = vpop.f32.mrb[108].mxu1 }
 0x3f4   : > { %v7953_v23 = vadd.f32 %v7952_v33, %v7951_v0  ;;  %v12961_v14 = vadd.f32 %v7950_v4, %v3691_v60  ;;  %v7879_v5 = vpop.f32.mrb[109].mxu1  ;;  %v3715_v4 = vadd.f32 %v12920_v55, %v12908_v3 }
 0x3f5   : > { %v12965_v25 = vadd.f32 %v7879_v5, %v7878_v17  ;;  %v7881_v58 = vpop.f32.mrb[110].mxu1 }
 0x3f6   : > { %v12963_v11 = vadd.f32 %v7953_v23, %v3694_v62  ;;  %v7882_v43 = vpop.f32.mrb[111].mxu1  ;;  %v3718_v23 = vadd.f32 %v12923_v6, %v12908_v3 }
 0x3f7   : > { %v12969_v35 = vadd.f32 %v7882_v43, %v7881_v58 }
 0x3f8   : > { %v7954_v32 = vpop.f32.mrb[116].mxu0 }
 0x3f9   : > { %v7955_v57 = vpop.f32.mrb[117].mxu0 }
 0x3fa   : > { %v7956_v47 = vadd.f32 %v7955_v57, %v7954_v32  ;;  %v7957_v48 = vpop.f32.mrb[118].mxu0 }
 0x3fb   : > { %v7958_v39 = vpop.f32.mrb[119].mxu0  ;;  %v7884_v30 = vpop.f32.mrb[112].mxu1 }
 0x3fc   : > { %v7959_v19 = vadd.f32 %v7958_v39, %v7957_v48  ;;  %v12973_v59 = vadd.f32 %v7956_v47, %v3699_v38  ;;  %v7885_v50 = vpop.f32.mrb[113].mxu1  ;;  %v3723_v39 = vadd.f32 %v12930_v45, %v12908_v3 }
 0x3fd   : > { %v12977_v8 = vadd.f32 %v7885_v50, %v7884_v30  ;;  %v7887_v41 = vpop.f32.mrb[114].mxu1  ;;  %v3726_v50 = vadd.f32 %v12933_v21, %v12908_v3 }
 0x3fe   : > { %v12975_v7 = vadd.f32 %v7959_v19, %v3702_v61  ;;  %v7888_v27 = vpop.f32.mrb[115].mxu1 }
 0x3ff   : > { %v12981_v46 = vadd.f32 %v7888_v27, %v7887_v41 }
 0x400   : > { %v7960_v49 = vpop.f32.mrb[120].mxu0 }
 0x401   : > { %v7961_v10 = vpop.f32.mrb[121].mxu0 }
 0x402   : > { %v7962_v18 = vadd.f32 %v7961_v10, %v7960_v49  ;;  %v7963_v63 = vpop.f32.mrb[122].mxu0 }
 0x403   : > { %v7964_v13 = vpop.f32.mrb[123].mxu0  ;;  %v7890_v34 = vpop.f32.mrb[116].mxu1 }
 0x404   : > { %v7965_v20 = vadd.f32 %v7964_v13, %v7963_v63  ;;  %v12985_v12 = vadd.f32 %v7962_v18, %v3707_v28  ;;  %v7891_v22 = vpop.f32.mrb[117].mxu1 }
 0x405   : > { %v12989_v51 = vadd.f32 %v7891_v22, %v7890_v34  ;;  %v7893_v44 = vpop.f32.mrb[118].mxu1 }
 0x406   : > { %v12987_v52 = vadd.f32 %v7965_v20, %v3710_v37  ;;  %v7894_v60 = vpop.f32.mrb[119].mxu1  ;;  %v3731_v20 = vadd.f32 %v12941_v42, %v12908_v3 }
 0x407   : > { %v12993_v62 = vadd.f32 %v7894_v60, %v7893_v44  ;;  %v3734_v44 = vadd.f32 %v12945_v54, %v12908_v3 }
 0x408   : > { %v7966_v56 = vpop.f32.mrb[124].mxu0 }
 0x409   : > { %v7967_v24 = vpop.f32.mrb[125].mxu0 }
 0x40a   : > { %v7968_v0 = vadd.f32 %v7967_v24, %v7966_v56  ;;  %v7969_v33 = vpop.f32.mrb[126].mxu0 }
 0x40b   : > { %v7970_v2 = vpop.f32.mrb[127].mxu0  ;;  %v7896_v32 = vpop.f32.mrb[120].mxu1 }
 0x40c   : > { %v7971_v17 = vadd.f32 %v7970_v2, %v7969_v33  ;;  %v12997_v5 = vadd.f32 %v7968_v0, %v3715_v4  ;;  %v7897_v57 = vpop.f32.mrb[121].mxu1 }
 0x40d   : > { %v13001_v38 = vadd.f32 %v7897_v57, %v7896_v32  ;;  %v7899_v47 = vpop.f32.mrb[122].mxu1  ;;  %v3739_v32 = vadd.f32 %v12953_v26, %v12908_v3  ;;  %v3742_v26 = vadd.f32 %v12957_v15, %v12908_v3  ;;  %v16260_v15 = vld [vmem:[#allocation33_spill] sm:$0xff] }
 0x40e   : > { %v12999_v58 = vadd.f32 %v7971_v17, %v3718_v23  ;;  %v7900_v48 = vpop.f32.mrb[123].mxu1 }
 0x40f   : > { %v13005_v30 = vadd.f32 %v7900_v48, %v7899_v47  ;;  %v16259_v48 = vld [vmem:[#allocation28_spill] sm:$0xff] }
 0x410   : > { %v7972_v43 = vpop.f32.mrb[128].mxu0 }
 0x411   : > { %v7973_v55 = vpop.f32.mrb[129].mxu0 }
 0x412   : > { %v7974_v61 = vadd.f32 %v7973_v55, %v7972_v43  ;;  %v7975_v19 = vpop.f32.mrb[130].mxu0 }
 0x413   : > { %v7976_v6 = vpop.f32.mrb[131].mxu0  ;;  %v7902_v10 = vpop.f32.mrb[124].mxu1 }
 0x414   : > { %v7977_v49 = vadd.f32 %v7976_v6, %v7975_v19  ;;  %v13009_v41 = vadd.f32 %v7974_v61, %v3723_v39  ;;  %v7903_v28 = vpop.f32.mrb[125].mxu1 }
 0x415   : > { %v13013_v63 = vadd.f32 %v7903_v28, %v7902_v10  ;;  %v7905_v13 = vpop.f32.mrb[126].mxu1 }
 0x416   : > { %v13011_v27 = vadd.f32 %v7977_v49, %v3726_v50  ;;  %v7906_v37 = vpop.f32.mrb[127].mxu1 }
 0x417   : > { %v13017_v56 = vadd.f32 %v7906_v37, %v7905_v13 }
 0x418   : > { %v7978_v18 = vpop.f32.mrb[132].mxu0 }
 0x419   : > { %v7979_v45 = vpop.f32.mrb[133].mxu0 }
 0x41a   : > { %v7980_v34 = vadd.f32 %v7979_v45, %v7978_v18  ;;  %v7981_v22 = vpop.f32.mrb[134].mxu0 }
 0x41b   : > { %v7982_v21 = vpop.f32.mrb[135].mxu0  ;;  %v8450_v4 = vpop.f32.mrb[128].mxu1 }
 0x41c   : > { %v7983_v24 = vadd.f32 %v7982_v21, %v7981_v22  ;;  %v13021_v60 = vadd.f32 %v7980_v34, %v3731_v20  ;;  %v3989_v33 = vadd.f32 %v8450_v4, %v12926_v16  ;;  %v3980_v2 = vpop.f32.mrb[129].mxu1  ;;  %v3747_v20 = vadd.f32 %v12965_v25, %v12908_v3  ;;  %v16262_v21 = vld [vmem:[#allocation35_spill] sm:$0xff] }
 0x41d   : > { %v3981_v42 = vadd.f32 %v3980_v2, %v12916_v29  ;;  %v8451_v17 = vpop.f32.mrb[130].mxu1 }
 0x41e   : > { %v13023_v0 = vadd.f32 %v7983_v24, %v3734_v44  ;;  %v3992_v43 = vadd.f32 %v8451_v17, %v12928_v40  ;;  %v3983_v54 = vpop.f32.mrb[131].mxu1  ;;  %v4141_v39 = vmul.f32 %v3989_v33, %v16259_v48  ;;  %vm4109_vm1 = vcmp.ge.f32.partialorder %v3989_v33, 0.0 }
 0x41f   : > { %v4139_v61 = vmul.f32 %v3981_v42, %v16259_v48  ;;  %v3984_v16 = vadd.f32 %v3983_v54, %v12918_v1  ;;  %vm4107_vm2 = vcmp.ge.f32.partialorder %v3981_v42, 0.0 }
 0x420   : > { %v7984_v23 = vpop.f32.mrb[136].mxu0  ;;  %vm4110_vm9 = vcmp.ge.f32.partialorder %v3992_v43, 0.0  ;;  %v4142_v29 = vmul.f32 %v3992_v43, %v16259_v48  ;;  %v4173_v10 = vsel %vm4109_vm1, %v3989_v33, %v4141_v39  ;;  %v16264_v33 = vld [vmem:[#allocation32_spill] sm:$0xff] }
 0x421   : > { %v7985_v57 = vpop.f32.mrb[137].mxu0  ;;  %vm4108_vm10 = vcmp.ge.f32.partialorder %v3984_v16, 0.0  ;;  %v4140_v50 = vmul.f32 %v3984_v16, %v16259_v48  ;;  %v4171_v28 = vsel %vm4107_vm2, %v3981_v42, %v4139_v61  ;;  %v13052_v2 = vadd.f32 %v4173_v10, %v16264_v33  ;;  %v16274_v33 = vld [vmem:[#allocation39_spill] sm:$0xff] }
 0x422   : > { %v7986_v47 = vadd.f32 %v7985_v57, %v7984_v23  ;;  %v7987_v55 = vpop.f32.mrb[138].mxu0  ;;  %v4174_v40 = vsel %vm4110_vm9, %v3992_v43, %v4142_v29  ;;  %v16266_v23 = vld [vmem:[#allocation66_spill] sm:$0xff] }
 0x423   : > { %v7988_v19 = vpop.f32.mrb[139].mxu0  ;;  %v8454_v18 = vpop.f32.mrb[132].mxu1  ;;  %v4172_v13 = vsel %vm4108_vm10, %v3984_v16, %v4140_v50  ;;  %v13045_v34 = vadd.f32 %v4174_v40, %v16260_v15  ;;  %16265 = vst [vmem:[#allocation60_spill] sm:$0xff] %v13052_v2  ;;  %v13055_v42 = vadd.f32 %v4171_v28, %v16266_v23  ;;  %v16270_v15 = vld [vmem:[#allocation47_spill] sm:$0xff] }
 0x424   : > { %v7989_v6 = vadd.f32 %v7988_v19, %v7987_v55  ;;  %v13037_v49 = vadd.f32 %v7986_v47, %v3739_v32  ;;  %v4005_v45 = vadd.f32 %v8454_v18, %v12949_v9  ;;  %v3996_v37 = vpop.f32.mrb[133].mxu1  ;;  %v13048_v44 = vadd.f32 %v4172_v13, %v16262_v21  ;;  %v16268_v13 = vld [vmem:[#allocation46_spill] sm:$0xff] }
 0x425   : > { %16261 = vst [vmem:[#allocation54_spill] sm:$0xff] %v13045_v34  ;;  %v3997_v24 = vadd.f32 %v3996_v37, %v12937_v31  ;;  %v8455_v4 = vpop.f32.mrb[134].mxu1  ;;  %16267 = vst [vmem:[#allocation63_spill] sm:$0xff] %v13055_v42  ;;  %v4300_v61 = vpack.c.bf16 %v13045_v34, %v13052_v2  ;;  %v3755_v18 = vadd.f32 %v12977_v8, %v12908_v3 }
 0x426   : > { %v13039_v1 = vadd.f32 %v7989_v6, %v3742_v26  ;;  %16263 = vst [vmem:[#allocation57_spill] sm:$0xff] %v13048_v44  ;;  %vm4113_vm11 = vcmp.ge.f32.partialorder %v4005_v45, 0.0  ;;  %v4008_v25 = vadd.f32 %v8455_v4, %v12951_v36  ;;  %v3999_v17 = vpop.f32.mrb[135].mxu1  ;;  %v4145_v43 = vmul.f32 %v4005_v45, %v16259_v48 }
 0x427   : > { %v4143_v54 = vmul.f32 %v3997_v24, %v16259_v48  ;;  %v4000_v31 = vadd.f32 %v3999_v17, %v12939_v53  ;;  %vm4111_vm12 = vcmp.ge.f32.partialorder %v3997_v24, 0.0  ;;  %v4299_v39 = vpack.c.bf16 %v13048_v44, %v13055_v42 }
 0x428   : > { %v7990_v22 = vpop.f32.mrb[140].mxu0  ;;  %vm4114_vm13 = vcmp.ge.f32.partialorder %v4008_v25, 0.0  ;;  %v4146_v55 = vmul.f32 %v4008_v25, %v16259_v48  ;;  %v3750_v36 = vadd.f32 %v12969_v35, %v12908_v3  ;;  %v4177_v26 = vsel %vm4113_vm11, %v4005_v45, %v4145_v43 }
 0x429   : > { %v7991_v9 = vpop.f32.mrb[141].mxu0  ;;  %vm4112_vm14 = vcmp.ge.f32.partialorder %v4000_v31, 0.0  ;;  %v4144_v29 = vmul.f32 %v4000_v31, %v16259_v48  ;;  %8488 = vmatprep.mubr.msk.bf16.mxu0 %vm462_vm0, %v4299_v39  ;;  %v4175_v6 = vsel %vm4111_vm12, %v3997_v24, %v4143_v54  ;;  %v16272_v24 = vld [vmem:[#allocation38_spill] sm:$0xff] }
 0x42a   : > { %v7992_v32 = vadd.f32 %v7991_v9, %v7990_v22  ;;  %v7993_v57 = vpop.f32.mrb[142].mxu0  ;;  %v4178_v19 = vsel %vm4114_vm13, %v4008_v25, %v4146_v55  ;;  %8489 = vmatmul.mubr.msk.bf16.vlgmr.msra.gmra.mrb[160].mxu0 %vm462_vm0, %v4300_v61  ;;  %v13087_v4 = vadd.f32 %v4177_v26, %v16272_v24  ;;  %v13090_v23 = vadd.f32 %v4175_v6, %v16274_v33  ;;  %v16282_v24 = vld [vmem:[#allocation56_spill] sm:$0xff] }
 0x42b   : > { %v7994_v47 = vpop.f32.mrb[143].mxu0  ;;  %v8458_v40 = vpop.f32.mrb[136].mxu1  ;;  %v4176_v35 = vsel %vm4112_vm14, %v4000_v31, %v4144_v29  ;;  %v13080_v37 = vadd.f32 %v4178_v19, %v16268_v13  ;;  %v16278_v13 = vld [vmem:[#allocation59_spill] sm:$0xff] }
 0x42c   : > { %v7995_v16 = vadd.f32 %v7994_v47, %v7993_v57  ;;  %v13070_v53 = vadd.f32 %v7992_v32, %v3747_v20  ;;  %v4021_v10 = vadd.f32 %v8458_v40, %v12973_v59  ;;  %v4012_v28 = vpop.f32.mrb[137].mxu1  ;;  %v13083_v22 = vadd.f32 %v4176_v35, %v16270_v15  ;;  %16273 = vst [vmem:[#allocation81_spill] sm:$0xff] %v13087_v4  ;;  %v16276_v35 = vld [vmem:[#allocation58_spill] sm:$0xff] }
 0x42d   : > { %16269 = vst [vmem:[#allocation67_spill] sm:$0xff] %v13080_v37  ;;  %v4013_v45 = vadd.f32 %v4012_v28, %v12961_v14  ;;  %v8459_v21 = vpop.f32.mrb[138].mxu1  ;;  %16275 = vst [vmem:[#allocation82_spill] sm:$0xff] %v13090_v23  ;;  %v4302_v55 = vpack.c.bf16 %v13080_v37, %v13087_v4  ;;  %v3763_v40 = vadd.f32 %v12989_v51, %v12908_v3  ;;  %v4281_v4 = vld [vmem:[%s15604_s10 + $0x170] sm:$0xff] }
 0x42e   : > { %v13074_v50 = vadd.f32 %v7995_v16, %v3750_v36  ;;  %16271 = vst [vmem:[#allocation68_spill] sm:$0xff] %v13083_v22  ;;  %vm4117_vm15 = vcmp.ge.f32.partialorder %v4021_v10, 0.0  ;;  %v4024_v8 = vadd.f32 %v8459_v21, %v12975_v7  ;;  %v4015_v9 = vpop.f32.mrb[139].mxu1  ;;  %v4149_v32 = vmul.f32 %v4021_v10, %v16259_v48 }
 0x42f   : > { %v4147_v57 = vmul.f32 %v4013_v45, %v16259_v48  ;;  %v4016_v14 = vadd.f32 %v4015_v9, %v12963_v11  ;;  %vm4115_vm3 = vcmp.ge.f32.partialorder %v4013_v45, 0.0  ;;  %v4301_v31 = vpack.c.bf16 %v13083_v22, %v13090_v23 }
 0x430   : > { %v7996_v20 = vpop.f32.mrb[144].mxu0  ;;  %vm4118_vm4 = vcmp.ge.f32.partialorder %v4024_v8, 0.0  ;;  %v4150_v54 = vmul.f32 %v4024_v8, %v16259_v48  ;;  %v3758_v7 = vadd.f32 %v12981_v46, %v12908_v3  ;;  %v4181_v61 = vsel %vm4117_vm15, %v4021_v10, %v4149_v32 }
 0x431   : > { %v7997_v59 = vpop.f32.mrb[145].mxu0  ;;  %vm4116_vm5 = vcmp.ge.f32.partialorder %v4016_v14, 0.0  ;;  %v4148_v36 = vmul.f32 %v4016_v14, %v16259_v48  ;;  %8492 = vmatprep.mubr.msk.bf16.mxu0 %vm462_vm0, %v4301_v31  ;;  %v4179_v16 = vsel %vm4115_vm3, %v4013_v45, %v4147_v57  ;;  %v16280_v45 = vld [vmem:[#allocation55_spill] sm:$0xff] }
 0x432   : > { %v7998_v25 = vadd.f32 %v7997_v59, %v7996_v20  ;;  %v7999_v17 = vpop.f32.mrb[146].mxu0  ;;  %v4182_v39 = vsel %vm4118_vm4, %v4024_v8, %v4150_v54  ;;  %8493 = vmatmul.mubr.msk.bf16.gmra.mrb[164].mxu0 %vm462_vm0, %v4302_v55  ;;  %v13122_v21 = vadd.f32 %v4181_v61, %v16280_v45  ;;  %v13125_v33 = vadd.f32 %v4179_v16, %v16282_v24  ;;  %v16290_v45 = vld [vmem:[#allocation62_spill] sm:$0xff] }
 0x433   : > { %v8000_v43 = vpop.f32.mrb[147].mxu0  ;;  %v8462_v19 = vpop.f32.mrb[140].mxu1  ;;  %v4180_v46 = vsel %vm4116_vm5, %v4016_v14, %v4148_v36  ;;  %v13115_v28 = vadd.f32 %v4182_v39, %v16276_v35  ;;  %v16286_v35 = vld [vmem:[#allocation65_spill] sm:$0xff] }
 0x434   : > { %v8001_v47 = vadd.f32 %v8000_v43, %v7999_v17  ;;  %v13105_v11 = vadd.f32 %v7998_v25, %v3755_v18  ;;  %v4037_v26 = vadd.f32 %v8462_v19, %v12997_v5  ;;  %v4028_v6 = vpop.f32.mrb[141].mxu1  ;;  %v13118_v20 = vadd.f32 %v4180_v46, %v16278_v13  ;;  %16281 = vst [vmem:[#allocation80_spill] sm:$0xff] %v13122_v21  ;;  %v16284_v46 = vld [vmem:[#allocation64_spill] sm:$0xff] }
 0x435   : > { %16277 = vst [vmem:[#allocation83_spill] sm:$0xff] %v13115_v28  ;;  %v4029_v10 = vadd.f32 %v4028_v6, %v12985_v12  ;;  %v8463_v15 = vpop.f32.mrb[142].mxu1  ;;  %16283 = vst [vmem:[#allocation79_spill] sm:$0xff] %v13125_v33  ;;  %v4304_v54 = vpack.c.bf16 %v13115_v28, %v13122_v21  ;;  %v3771_v19 = vadd.f32 %v13001_v38, %v12908_v3 }
 0x436   : > { %v13109_v29 = vadd.f32 %v8001_v47, %v3758_v7  ;;  %16279 = vst [vmem:[#allocation78_spill] sm:$0xff] %v13118_v20  ;;  %vm4121_vm6 = vcmp.ge.f32.partialorder %v4037_v26, 0.0  ;;  %v4040_v51 = vadd.f32 %v8463_v15, %v12999_v58  ;;  %v4031_v59 = vpop.f32.mrb[143].mxu1  ;;  %v4153_v25 = vmul.f32 %v4037_v26, %v16259_v48 }
 0x437   : > { %v4151_v17 = vmul.f32 %v4029_v10, %v16259_v48  ;;  %v4032_v12 = vadd.f32 %v4031_v59, %v12987_v52  ;;  %vm4119_vm7 = vcmp.ge.f32.partialorder %v4029_v10, 0.0  ;;  %v4303_v14 = vpack.c.bf16 %v13118_v20, %v13125_v33  ;;  %v4275_v33 = vld [vmem:[%s15604_s10 + $0x140] sm:$0xff] }
 0x438   : > { %v8002_v18 = vpop.f32.mrb[148].mxu0  ;;  %vm4122_vm8 = vcmp.ge.f32.partialorder %v4040_v51, 0.0  ;;  %v4154_v57 = vmul.f32 %v4040_v51, %v16259_v48  ;;  %v3766_v58 = vadd.f32 %v12993_v62, %v12908_v3  ;;  %v4185_v47 = vsel %vm4121_vm6, %v4037_v26, %v4153_v25 }
 0x439   : > { %v8003_v5 = vpop.f32.mrb[149].mxu0  ;;  %vm4120_vm1 = vcmp.ge.f32.partialorder %v4032_v12, 0.0  ;;  %v4152_v7 = vmul.f32 %v4032_v12, %v16259_v48  ;;  %8496 = vmatprep.mubr.msk.bf16.mxu0 %vm462_vm0, %v4303_v14  ;;  %v4183_v55 = vsel %vm4119_vm7, %v4029_v10, %v4151_v17  ;;  %v16288_v10 = vld [vmem:[#allocation61_spill] sm:$0xff] }
 0x43a   : > { %v8004_v8 = vadd.f32 %v8003_v5, %v8002_v18  ;;  %v8005_v9 = vpop.f32.mrb[150].mxu0  ;;  %v4186_v31 = vsel %vm4122_vm8, %v4040_v51, %v4154_v57  ;;  %8497 = vmatmul.mubr.msk.bf16.gmra.mrb[168].mxu0 %vm462_vm0, %v4304_v54  ;;  %v13157_v15 = vadd.f32 %v4185_v47, %v16288_v10  ;;  %v13160_v24 = vadd.f32 %v4183_v55, %v16290_v45  ;;  %v16298_v10 = vld [vmem:[#allocation70_spill] sm:$0xff] }
 0x43b   : > { %v8006_v32 = vpop.f32.mrb[151].mxu0  ;;  %v8466_v39 = vpop.f32.mrb[144].mxu1  ;;  %v4184_v62 = vsel %vm4120_vm1, %v4032_v12, %v4152_v7  ;;  %v13150_v6 = vadd.f32 %v4186_v31, %v16284_v46  ;;  %v16294_v46 = vld [vmem:[#allocation72_spill] sm:$0xff] }
 0x43c   : > { %v8007_v43 = vadd.f32 %v8006_v32, %v8005_v9  ;;  %v13140_v52 = vadd.f32 %v8004_v8, %v3763_v40  ;;  %v4053_v61 = vadd.f32 %v8466_v39, %v13021_v60  ;;  %v4044_v16 = vpop.f32.mrb[145].mxu1  ;;  %v13153_v18 = vadd.f32 %v4184_v62, %v16286_v35  ;;  %16289 = vst [vmem:[#allocation91_spill] sm:$0xff] %v13157_v15  ;;  %v16292_v62 = vld [vmem:[#allocation71_spill] sm:$0xff] }
 0x43d   : > { %16285 = vst [vmem:[#allocation17_spill] sm:$0xff] %v13150_v6  ;;  %v4045_v26 = vadd.f32 %v4044_v16, %v13009_v41  ;;  %v8467_v13 = vpop.f32.mrb[146].mxu1  ;;  %16291 = vst [vmem:[#allocation25_spill] sm:$0xff] %v13160_v24  ;;  %v4306_v57 = vpack.c.bf16 %v13150_v6, %v13157_v15  ;;  %v3779_v39 = vadd.f32 %v13013_v63, %v12908_v3 }
 0x43e   : > { %v13144_v36 = vadd.f32 %v8007_v43, %v3766_v58  ;;  %16287 = vst [vmem:[#allocation31_spill] sm:$0xff] %v13153_v18  ;;  %vm4125_vm2 = vcmp.ge.f32.partialorder %v4053_v61, 0.0  ;;  %v4056_v38 = vadd.f32 %v8467_v13, %v13023_v0  ;;  %v4047_v5 = vpop.f32.mrb[147].mxu1  ;;  %v4157_v8 = vmul.f32 %v4053_v61, %v16259_v48 }
 0x43f   : > { %v4155_v9 = vmul.f32 %v4045_v26, %v16259_v48  ;;  %v4048_v41 = vadd.f32 %v4047_v5, %v13011_v27  ;;  %vm4123_vm9 = vcmp.ge.f32.partialorder %v4045_v26, 0.0  ;;  %v4305_v12 = vpack.c.bf16 %v13153_v18, %v13160_v24  ;;  %v4267_v24 = vld [vmem:[%s15604_s10 + $0x100] sm:$0xff] }
 0x440   : > { %v8008_v40 = vpop.f32.mrb[152].mxu0  ;;  %vm4126_vm10 = vcmp.ge.f32.partialorder %v4056_v38, 0.0  ;;  %v4158_v17 = vmul.f32 %v4056_v38, %v16259_v48  ;;  %v3774_v0 = vadd.f32 %v13005_v30, %v12908_v3  ;;  %v4189_v43 = vsel %vm4125_vm2, %v4053_v61, %v4157_v8 }
 0x441   : > { %v8009_v60 = vpop.f32.mrb[153].mxu0  ;;  %vm4124_vm11 = vcmp.ge.f32.partialorder %v4048_v41, 0.0  ;;  %v4156_v58 = vmul.f32 %v4048_v41, %v16259_v48  ;;  %8500 = vmatprep.mubr.msk.bf16.mxu0 %vm462_vm0, %v4305_v12  ;;  %v4187_v54 = vsel %vm4123_vm9, %v4045_v26, %v4155_v9  ;;  %v16296_v26 = vld [vmem:[#allocation69_spill] sm:$0xff]  ;;  %vm4627_vm9 = vcmask 64512  }
 0x442   : > { %v8010_v51 = vadd.f32 %v8009_v60, %v8008_v40  ;;  %v8011_v59 = vpop.f32.mrb[154].mxu0  ;;  %v4190_v14 = vsel %vm4126_vm10, %v4056_v38, %v4158_v17  ;;  %8501 = vmatmul.mubr.msk.bf16.gmra.mrb[172].mxu0 %vm462_vm0, %v4306_v57  ;;  %v13192_v13 = vadd.f32 %v4189_v43, %v16296_v26  ;;  %v13195_v45 = vadd.f32 %v4187_v54, %v16298_v10  ;;  %v16300_v54 = vld [vmem:[#allocation74_spill] sm:$0xff] }
 0x443   : > { %v8012_v25 = vpop.f32.mrb[155].mxu0  ;;  %v8470_v31 = vpop.f32.mrb[148].mxu1  ;;  %v4188_v30 = vsel %vm4124_vm11, %v4048_v41, %v4156_v58  ;;  %v13185_v16 = vadd.f32 %v4190_v14, %v16292_v62  ;;  %v16304_v62 = vld [vmem:[#allocation76_spill] sm:$0xff] }
 0x444   : > { %v8013_v32 = vadd.f32 %v8012_v25, %v8011_v59  ;;  %v13175_v27 = vadd.f32 %v8010_v51, %v3771_v19  ;;  %v4069_v47 = vadd.f32 %v8470_v31, %v13070_v53  ;;  %v4060_v55 = vpop.f32.mrb[149].mxu1  ;;  %v13188_v40 = vadd.f32 %v4188_v30, %v16294_v46  ;;  %16297 = vst [vmem:[#allocation93_spill] sm:$0xff] %v13192_v13  ;;  %v16302_v30 = vld [vmem:[#allocation75_spill] sm:$0xff]  ;;  %v16306_v46 = vld [vmem:[#allocation73_spill] sm:$0xff] }
 0x445   : > { %16293 = vst [vmem:[#allocation90_spill] sm:$0xff] %v13185_v16  ;;  %v4061_v61 = vadd.f32 %v4060_v55, %v13037_v49  ;;  %v8471_v35 = vpop.f32.mrb[150].mxu1  ;;  %16299 = vst [vmem:[#allocation94_spill] sm:$0xff] %v13195_v45  ;;  %v3782_v25 = vadd.f32 %v13017_v56, %v12908_v3  ;;  %v4308_v17 = vpack.c.bf16 %v13185_v16, %v13192_v13 }
 0x446   : > { %v13179_v7 = vadd.f32 %v8013_v32, %v3774_v0  ;;  %16295 = vst [vmem:[#allocation95_spill] sm:$0xff] %v13188_v40  ;;  %v4161_v60 = vmul.f32 %v4069_v47, %v16259_v48  ;;  %v4072_v63 = vadd.f32 %v8471_v35, %v13074_v50  ;;  %v4063_v38 = vpop.f32.mrb[151].mxu1  ;;  %vm4129_vm13 = vcmp.ge.f32.partialorder %v4069_v47, 0.0 }
 0x447   : > { %vm4127_vm12 = vcmp.ge.f32.partialorder %v4061_v61, 0.0  ;;  %v4159_v59 = vmul.f32 %v4061_v61, %v16259_v48  ;;  %v4064_v49 = vadd.f32 %v4063_v38, %v13039_v1  ;;  %v4307_v41 = vpack.c.bf16 %v13188_v40, %v13195_v45  ;;  %v4259_v45 = vld [vmem:[%s15604_s10 + $0xc0] sm:$0xff] }
 0x448   : > { %v8014_v19 = vpop.f32.mrb[156].mxu0  ;;  %vm4130_vm14 = vcmp.ge.f32.partialorder %v4072_v63, 0.0  ;;  %v4162_v9 = vmul.f32 %v4072_v63, %v16259_v48  ;;  %v4193_v57 = vsel %vm4129_vm13, %v4069_v47, %v4161_v60 }
 0x449   : > { %v8015_v53 = vpop.f32.mrb[157].mxu0  ;;  %vm4128_vm15 = vcmp.ge.f32.partialorder %v4064_v49, 0.0  ;;  %v4191_v12 = vsel %vm4127_vm12, %v4061_v61, %v4159_v59  ;;  %v4160_v1 = vmul.f32 %v4064_v49, %v16259_v48  ;;  %8504 = vmatprep.mubr.msk.bf16.mxu0 %vm462_vm0, %v4307_v41  ;;  %v13223_v61 = vadd.f32 %v4193_v57, %v16306_v46  ;;  %v16314_v57 = vld [vmem:[#allocation84_spill] sm:$0xff] }
 0x44a   : > { %v8016_v5 = vadd.f32 %v8015_v53, %v8014_v19  ;;  %v8017_v51 = vpop.f32.mrb[158].mxu0  ;;  %v4194_v0 = vsel %vm4130_vm14, %v4072_v63, %v4162_v9  ;;  %8505 = vmatmul.mubr.msk.bf16.gmra.mrb[176].mxu0 %vm462_vm0, %v4308_v17  ;;  %v13213_v31 = vadd.f32 %v4191_v12, %v16300_v54  ;;  %v16310_v9 = vld [vmem:[#allocation86_spill] sm:$0xff] }
 0x44b   : > { %v8018_v8 = vpop.f32.mrb[159].mxu0  ;;  %v8474_v14 = vpop.f32.mrb[152].mxu1  ;;  %v4192_v43 = vsel %vm4128_vm15, %v4064_v49, %v4160_v1  ;;  %v13216_v55 = vadd.f32 %v4194_v0, %v16302_v30  ;;  %16307 = vst [vmem:[#allocation96_spill] sm:$0xff] %v13223_v61  ;;  %v16308_v49 = vld [vmem:[#allocation85_spill] sm:$0xff] }
 0x44c   : > { %v8019_v50 = vadd.f32 %v8018_v8, %v8017_v51  ;;  %v3940_v32 = vadd.f32 %v8016_v5, %v3779_v39  ;;  %v4085_v3 = vadd.f32 %v8474_v14, %v13140_v52  ;;  %v4076_v56 = vpop.f32.mrb[153].mxu1  ;;  %16301 = vst [vmem:[#allocation92_spill] sm:$0xff] %v13213_v31  ;;  %v13219_v19 = vadd.f32 %v4192_v43, %v16304_v62 }
 0x44d   : > { %16303 = vst [vmem:[#allocation100_spill] sm:$0xff] %v13216_v55  ;;  %v4077_v39 = vadd.f32 %v4076_v56, %v13105_v11  ;;  %v8475_v47 = vpop.f32.mrb[154].mxu1 }
 0x44e   : > { %v3943_v58 = vadd.f32 %v8019_v50, %v3782_v25  ;;  %16305 = vst [vmem:[#allocation97_spill] sm:$0xff] %v13219_v19  ;;  %v4165_v35 = vmul.f32 %v4085_v3, %v16259_v48  ;;  %v4088_v52 = vadd.f32 %v8475_v47, %v13144_v36  ;;  %v4079_v26 = vpop.f32.mrb[155].mxu1  ;;  %v4309_v60 = vpack.c.bf16 %v13219_v19, %v13213_v31  ;;  %v16312_v25 = vld [vmem:[#allocation77_spill] sm:$0xff]  ;;  %v4251_v19 = vld [vmem:[%s15604_s10 + $0x80] sm:$0xff]  ;;  %v4252_v31 = vld [vmem:[%s15604_s10 + $0x88] sm:$0xff] }
 0x44f   : > { %vm4131_vm3 = vcmp.ge.f32.partialorder %v4077_v39, 0.0  ;;  %v4163_v10 = vmul.f32 %v4077_v39, %v16259_v48  ;;  %v4080_v53 = vadd.f32 %v4079_v26, %v13109_v29  ;;  %vm4133_vm4 = vcmp.ge.f32.partialorder %v4085_v3, 0.0  ;;  %v16318_v26 = vld [vmem:[#allocation89_spill] sm:$0xff] }
 0x450   : > { %vm4134_vm5 = vcmp.ge.f32.partialorder %v4088_v52, 0.0  ;;  %v4166_v11 = vmul.f32 %v4088_v52, %v16259_v48  ;;  %8508 = vmatprep.mubr.msk.bf16.mxu0 %vm462_vm0, %v4309_v60  ;;  %v4310_v36 = vpack.c.bf16 %v13216_v55, %v13223_v61  ;;  %v4197_v51 = vsel %vm4133_vm4, %v4085_v3, %v4165_v35  ;;  %v16316_v35 = vld [vmem:[#allocation87_spill] sm:$0xff] }
 0x451   : > { %v4195_v63 = vsel %vm4131_vm3, %v4077_v39, %v4163_v10  ;;  %vm4132_vm6 = vcmp.ge.f32.partialorder %v4080_v53, 0.0  ;;  %v4164_v38 = vmul.f32 %v4080_v53, %v16259_v48  ;;  %v13248_v14 = vadd.f32 %v4197_v51, %v16314_v57 }
 0x452   : > { %v4198_v5 = vsel %vm4134_vm5, %v4088_v52, %v4166_v11  ;;  %8509 = vmatmul.mubr.msk.bf16.gmra.mrb[180].mxu0 %vm462_vm0, %v4310_v36  ;;  %v13238_v8 = vadd.f32 %v4195_v63, %v16308_v49  ;;  %v16322_v63 = vld [vmem:[#allocation16_spill] sm:$0xff] }
 0x453   : > { %v4196_v59 = vsel %vm4132_vm6, %v4080_v53, %v4164_v38  ;;  %v8478_v29 = vpop.f32.mrb[156].mxu1  ;;  %v13241_v41 = vadd.f32 %v4198_v5, %v16310_v9  ;;  %16315 = vst [vmem:[#allocation33_spill] sm:$0xff] %v13248_v14  ;;  %v16320_v53 = vld [vmem:[#allocation88_spill] sm:$0xff]  ;;  %v13282_v5 = vld [vmem:[%s15601_s7] ss:$0 sm:$0xff] }
 0x454   : > { %16309 = vst [vmem:[#allocation99_spill] sm:$0xff] %v13238_v8  ;;  %v13244_v50 = vadd.f32 %v4196_v59, %v16312_v25  ;;  %v4101_v17 = vadd.f32 %v8478_v29, %v3940_v32  ;;  %v4092_v12 = vpop.f32.mrb[157].mxu1 }
 0x455   : > { %16311 = vst [vmem:[#allocation98_spill] sm:$0xff] %v13241_v41  ;;  %v4093_v0 = vadd.f32 %v4092_v12, %v13175_v27  ;;  %v8479_v1 = vpop.f32.mrb[158].mxu1  ;;  %v4312_v27 = vpack.c.bf16 %v13241_v41, %v13248_v14 }
 0x456   : > { %16313 = vst [vmem:[#allocation28_spill] sm:$0xff] %v13244_v50  ;;  %v4104_v43 = vadd.f32 %v8479_v1, %v3943_v58  ;;  %v4095_v3 = vpop.f32.mrb[159].mxu1  ;;  %v4311_v56 = vpack.c.bf16 %v13244_v50, %v13238_v8  ;;  %v4169_v62 = vmul.f32 %v4101_v17, %v16259_v48  ;;  %vm4137_vm1 = vcmp.ge.f32.partialorder %v4101_v17, 0.0 }
 0x457   : > { %vm4135_vm7 = vcmp.ge.f32.partialorder %v4093_v0, 0.0  ;;  %v4167_v54 = vmul.f32 %v4093_v0, %v16259_v48  ;;  %v4096_v30 = vadd.f32 %v4095_v3, %v13179_v7 }
 0x458   : > { %vm4138_vm8 = vcmp.ge.f32.partialorder %v4104_v43, 0.0  ;;  %v4170_v32 = vmul.f32 %v4104_v43, %v16259_v48  ;;  %8512 = vmatprep.mubr.msk.bf16.mxu0 %vm462_vm0, %v4311_v56  ;;  %v4201_v7 = vsel %vm4137_vm1, %v4101_v17, %v4169_v62 }
 0x459   : > { %v4199_v58 = vsel %vm4135_vm7, %v4093_v0, %v4167_v54  ;;  %vm4136_vm2 = vcmp.ge.f32.partialorder %v4096_v30, 0.0  ;;  %v4168_v39 = vmul.f32 %v4096_v30, %v16259_v48  ;;  %v13273_v38 = vadd.f32 %v4201_v7, %v16322_v63 }
 0x45a   : > { %v4202_v47 = vsel %vm4138_vm8, %v4104_v43, %v4170_v32  ;;  %8513 = vmatmul.mubr.msk.bf16.gmra.mrb[184].mxu0 %vm462_vm0, %v4312_v27  ;;  %v13262_v52 = vadd.f32 %v4199_v58, %v16316_v35 }
 0x45b   : > { %v4200_v46 = vsel %vm4136_vm2, %v4096_v30, %v4168_v39  ;;  %v13268_v60 = vadd.f32 %v4202_v47, %v16320_v53  ;;  %16323 = vst [vmem:[#allocation46_spill] sm:$0xff] %v13273_v38 }
 0x45c   : > { %16317 = vst [vmem:[#allocation35_spill] sm:$0xff] %v13262_v52  ;;  %v13265_v10 = vadd.f32 %v4200_v46, %v16318_v26 }
 0x45d   : > { %16321 = vst [vmem:[#allocation66_spill] sm:$0xff] %v13268_v60  ;;  %v4314_v48 = vpack.c.bf16 %v13268_v60, %v13273_v38 }
 0x45e   : > { %16319 = vst [vmem:[#allocation32_spill] sm:$0xff] %v13265_v10  ;;  %v4313_v11 = vpack.c.bf16 %v13265_v10, %v13262_v52  ;;  %v4262_v10 = vld [vmem:[%s15604_s10 + $0xd8] sm:$0xff] }
 0x460   : > { %8516 = vmatprep.mubr.msk.bf16.mxu0 %vm462_vm0, %v4313_v11 }
 0x462   : > { %8517 = vmatmul.mubr.msk.bf16.gmra.mrb[188].mxu0 %vm462_vm0, %v4314_v48 }
 0x4fd   : > { %v8490_v36 = vpop.f32.mrb[160].mxu0 }
 0x4fe   : > { %v4436_v51 = vpop.f32.mrb[161].mxu0  ;;  %v4445_v29 = vadd.f32 %v8490_v36, %v13282_v5 }
 0x4ff   : > { %v8491_v59 = vpop.f32.mrb[162].mxu0  ;;  %v4437_v25 = vadd.f32 %v13282_v5, %v4436_v51 }
 0x500   : > { %v4448_v49 = vadd.f32 %v8491_v59, %v13282_v5  ;;  %v4439_v9 = vpop.f32.mrb[163].mxu0 }
 0x501   : > { %v4440_v17 = vadd.f32 %v13282_v5, %v4439_v9 }
 0x502   : > { %v13288_v12 = vpack.c.bf16 %v4448_v49, %v4445_v29 }
 0x503   : > { %v13290_v0 = vpack.c.bf16 %v4440_v17, %v4437_v25 }
 0x505   : > { %4595 = vrot.lane.b32.xlu0 %v13290_v0, %s9748_s28  ;;  %v8494_v1 = vpop.f32.mrb[164].mxu0  ;;  %8076 = vmatprep.mubr.msk.bf16.mxu1 %vm4627_vm9, %v13290_v0 }
 0x506   : > { %v4452_v57 = vpop.f32.mrb[165].mxu0  ;;  %v4461_v3 = vadd.f32 %v8494_v1, %v13282_v5 }
 0x507   : > { %v8495_v43 = vpop.f32.mrb[166].mxu0  ;;  %v4453_v30 = vadd.f32 %v13282_v5, %v4452_v57 }
 0x508   : > { %v4464_v56 = vadd.f32 %v8495_v43, %v13282_v5  ;;  %v4455_v54 = vpop.f32.mrb[167].mxu0 }
 0x509   : > { %v4456_v62 = vadd.f32 %v13282_v5, %v4455_v54  ;;  %4597 = vrot.lane.b32.xlu0 %v13288_v12, %s9748_s28 }
 0x50a   : > { %v13302_v32 = vpack.c.bf16 %v4464_v56, %v4461_v3 }
 0x50b   : > { %v13304_v27 = vpack.c.bf16 %v4456_v62, %v4453_v30 }
 0x50d   : > { %v8498_v58 = vpop.f32.mrb[168].mxu0  ;;  %4599 = vrot.lane.b32.xlu0 %v13304_v27, %s9748_s28 }
 0x50e   : > { %v4468_v39 = vpop.f32.mrb[169].mxu0  ;;  %v4477_v46 = vadd.f32 %v8498_v58, %v13282_v5 }
 0x50f   : > { %v8499_v47 = vpop.f32.mrb[170].mxu0  ;;  %v4469_v26 = vadd.f32 %v13282_v5, %v4468_v39 }
 0x510   : > { %v4480_v7 = vadd.f32 %v8499_v47, %v13282_v5  ;;  %v4471_v35 = vpop.f32.mrb[171].mxu0 }
 0x511   : > { %v4472_v53 = vadd.f32 %v13282_v5, %v4471_v35  ;;  %4601 = vrot.lane.b32.xlu0 %v13302_v32, %s9748_s28 }
 0x512   : > { %v13314_v11 = vpack.c.bf16 %v4480_v7, %v4477_v46 }
 0x513   : > { %v13316_v63 = vpack.c.bf16 %v4472_v53, %v4469_v26 }
 0x515   : > { %v8502_v48 = vpop.f32.mrb[172].mxu0  ;;  %4603 = vrot.lane.b32.xlu0 %v13316_v63, %s9748_s28 }
 0x516   : > { %v4484_v36 = vpop.f32.mrb[173].mxu0  ;;  %v4493_v59 = vadd.f32 %v8502_v48, %v13282_v5 }
 0x517   : > { %v8503_v51 = vpop.f32.mrb[174].mxu0  ;;  %v4485_v9 = vadd.f32 %v13282_v5, %v4484_v36 }
 0x518   : > { %v4496_v29 = vadd.f32 %v8503_v51, %v13282_v5  ;;  %v4487_v49 = vpop.f32.mrb[175].mxu0 }
 0x519   : > { %v4488_v25 = vadd.f32 %v13282_v5, %v4487_v49  ;;  %4605 = vrot.lane.b32.xlu0 %v13314_v11, %s9748_s28 }
 0x51a   : > { %v13326_v17 = vpack.c.bf16 %v4496_v29, %v4493_v59 }
 0x51b   : > { %v13328_v1 = vpack.c.bf16 %v4488_v25, %v4485_v9 }
 0x51d   : > { %v8506_v57 = vpop.f32.mrb[176].mxu0  ;;  %4607 = vrot.lane.b32.xlu0 %v13328_v1, %s9748_s28 }
 0x51e   : > { %v4500_v43 = vpop.f32.mrb[177].mxu0  ;;  %v4509_v56 = vadd.f32 %v8506_v57, %v13282_v5 }
 0x51f   : > { %v8507_v3 = vpop.f32.mrb[178].mxu0  ;;  %v4501_v62 = vadd.f32 %v13282_v5, %v4500_v43 }
 0x520   : > { %v4512_v54 = vadd.f32 %v8507_v3, %v13282_v5  ;;  %v4503_v30 = vpop.f32.mrb[179].mxu0 }
 0x521   : > { %v4504_v58 = vadd.f32 %v13282_v5, %v4503_v30  ;;  %4609 = vrot.lane.b32.xlu0 %v13326_v17, %s9748_s28 }
 0x522   : > { %v13338_v39 = vpack.c.bf16 %v4512_v54, %v4509_v56 }
 0x523   : > { %v13340_v47 = vpack.c.bf16 %v4504_v58, %v4501_v62 }
 0x525   : > { %v8510_v46 = vpop.f32.mrb[180].mxu0  ;;  %4611 = vrot.lane.b32.xlu1 %v13340_v47, %s9748_s28  ;;  %5429 = vrot.lane.b32.xlu0 %v13290_v0, %s9749_s15 }
 0x526   : > { %v4516_v7 = vpop.f32.mrb[181].mxu0  ;;  %v4525_v26 = vadd.f32 %v8510_v46, %v13282_v5 }
 0x527   : > { %v8511_v35 = vpop.f32.mrb[182].mxu0  ;;  %v4517_v36 = vadd.f32 %v13282_v5, %v4516_v7 }
 0x528   : > { %v4528_v53 = vadd.f32 %v8511_v35, %v13282_v5  ;;  %v4519_v48 = vpop.f32.mrb[183].mxu0 }
 0x529   : > { %v4520_v51 = vadd.f32 %v13282_v5, %v4519_v48  ;;  %4613 = vrot.lane.b32.xlu1 %v13338_v39, %s9748_s28  ;;  %5431 = vrot.lane.b32.xlu0 %v13288_v12, %s9749_s15 }
 0x52a   : > { %v13354_v59 = vpack.c.bf16 %v4528_v53, %v4525_v26 }
 0x52b   : > { %v13356_v29 = vpack.c.bf16 %v4520_v51, %v4517_v36 }
 0x52d   : > { %v8514_v49 = vpop.f32.mrb[184].mxu0  ;;  %4615 = vrot.lane.b32.xlu1 %v13356_v29, %s9748_s28  ;;  %5451 = vrot.lane.b32.xlu0 %v13354_v59, %s9749_s15 }
 0x52e   : > { %v4532_v9 = vpop.f32.mrb[185].mxu0  ;;  %v4541_v57 = vadd.f32 %v8514_v49, %v13282_v5 }
 0x52f   : > { %v8515_v25 = vpop.f32.mrb[186].mxu0  ;;  %v4533_v56 = vadd.f32 %v13282_v5, %v4532_v9 }
 0x530   : > { %v4544_v43 = vadd.f32 %v8515_v25, %v13282_v5  ;;  %v4535_v3 = vpop.f32.mrb[187].mxu0 }
 0x531   : > { %v4536_v54 = vadd.f32 %v13282_v5, %v4535_v3  ;;  %4617 = vrot.lane.b32.xlu1 %v13354_v59, %s9748_s28 }
 0x532   : > { %v13368_v30 = vpack.c.bf16 %v4544_v43, %v4541_v57 }
 0x533   : > { %v13370_v62 = vpack.c.bf16 %v4536_v54, %v4533_v56 }
 0x534   : > { %5455 = vrot.lane.b32.xlu0 %v13368_v30, %s9749_s15 }
 0x535   : > { %v8518_v58 = vpop.f32.mrb[188].mxu0  ;;  %4619 = vrot.lane.b32.xlu1 %v13370_v62, %s9748_s28 }
 0x536   : > { %v4548_v46 = vpop.f32.mrb[189].mxu0  ;;  %v4557_v35 = vadd.f32 %v8518_v58, %v13282_v5 }
 0x537   : > { %v8519_v7 = vpop.f32.mrb[190].mxu0  ;;  %v4549_v48 = vadd.f32 %v13282_v5, %v4548_v46 }
 0x538   : > { %v4560_v26 = vadd.f32 %v8519_v7, %v13282_v5  ;;  %v4551_v53 = vpop.f32.mrb[191].mxu0 }
 0x539   : > { %v4552_v36 = vadd.f32 %v13282_v5, %v4551_v53  ;;  %4621 = vrot.lane.b32.xlu1 %v13368_v30, %s9748_s28 }
 0x53a   : > { %v13382_v51 = vpack.c.bf16 %v4560_v26, %v4557_v35 }
 0x53b   : > { %v13384_v49 = vpack.c.bf16 %v4552_v36, %v4549_v48 }
 0x53d   : > { %4623 = vrot.lane.b32.xlu1 %v13384_v49, %s9748_s28 }
 0x541   : > { %4625 = vrot.lane.b32.xlu1 %v13382_v51, %s9748_s28 }
 0x545   : > { %5445 = vrot.lane.b32.xlu1 %v13340_v47, %s9749_s15 }
 0x549   : > { %5447 = vrot.lane.b32.xlu1 %v13338_v39, %s9749_s15 }
 0x54d   : > { %5449 = vrot.lane.b32.xlu1 %v13356_v29, %s9749_s15 }
 0x551   : > { %5433 = vrot.lane.b32.xlu1 %v13304_v27, %s9749_s15 }
 0x555   : > { %5435 = vrot.lane.b32.xlu1 %v13302_v32, %s9749_s15 }
 0x559   : > { %5453 = vrot.lane.b32.xlu1 %v13370_v62, %s9749_s15 }
 0x55d   : > { %5437 = vrot.lane.b32.xlu1 %v13316_v63, %s9749_s15 }
 0x561   : > { %5439 = vrot.lane.b32.xlu1 %v13314_v11, %s9749_s15 }
 0x565   : > { %5457 = vrot.lane.b32.xlu1 %v13384_v49, %s9749_s15 }
 0x577   : > { %v4596_v5 = vpop.permute.xlu0 %4595 }
 0x578   : > { %v4677_v43 = vsel %vm4627_vm9, %v4596_v5, 0 }
 0x57b   : > { %v4598_v9 = vpop.permute.xlu0 %4597 }
 0x57c   : > { %v4680_v46 = vsel %vm4627_vm9, %v4598_v9, 0 }
 0x57f   : > { %v4600_v25 = vpop.permute.xlu0 %4599 }
 0x580   : > { %v4683_v53 = vsel %vm4627_vm9, %v4600_v25, 0 }
 0x583   : > { %v4602_v3 = vpop.permute.xlu0 %4601 }
 0x587   : > { %v4604_v54 = vpop.permute.xlu0 %4603 }
 0x58b   : > { %v4606_v35 = vpop.permute.xlu0 %4605 }
 0x58f   : > { %v4608_v48 = vpop.permute.xlu0 %4607 }
 0x597   : > { %v4612_v57 = vpop.permute.xlu1 %4611 }
 0x598   : > { %8560 = vmatprep.subr.msk.bf16.mxu1 %vm4627_vm9, %v4612_v57  ;;  %v4686_v57 = vsel %vm4627_vm9, %v4602_v3, 0  ;;  %v4692_v3 = vsel %vm4627_vm9, %v4606_v35, 0 }
 0x599   : > { %8061 = vmatpush3.bf16.xpose.msra.mxu1 %v4677_v43  ;;  %v4610_v43 = vpop.permute.xlu0 %4609 }
 0x59a   : > { %v4698_v35 = vsel %vm4627_vm9, %v4610_v43, 0  ;;  %v4239_v43 = vld [vmem:[%s15604_s10 + $0x20] sm:$0xff] }
 0x59b   : > { %v4614_v56 = vpop.permute.xlu1 %4613 }
 0x59c   : > { %8561 = vmatprep.subr.msk.bf16.mxu1 %vm4627_vm9, %v4614_v56 }
 0x59d   : > { %v5430_v56 = vpop.permute.xlu0 %5429 }
 0x59f   : > { %v4616_v58 = vpop.permute.xlu1 %4615 }
 0x5a1   : > { %8063 = vmatpush3.bf16.xpose.msra.mxu1 %v4680_v46  ;;  %v4689_v46 = vsel %vm4627_vm9, %v4604_v54, 0 }
 0x5a2   : > { %8562 = vmatprep.subr.msk.bf16.mxu1 %vm4627_vm9, %v4616_v58 }
 0x5a3   : > { %v4618_v7 = vpop.permute.xlu1 %4617 }
 0x5a7   : > { %v4620_v26 = vpop.permute.xlu1 %4619 }
 0x5a9   : > { %8065 = vmatpush3.bf16.xpose.msra.mxu1 %v4683_v53 }
 0x5aa   : > { %8563 = vmatprep.subr.msk.bf16.mxu1 %vm4627_vm9, %v4618_v7  ;;  %v5432_v7 = vpop.permute.xlu0 %5431 }
 0x5ab   : > { %v4622_v36 = vpop.permute.xlu1 %4621 }
 0x5af   : > { %v4624_v5 = vpop.permute.xlu1 %4623 }
 0x5b1   : > { %8067 = vmatpush3.bf16.xpose.msra.mxu1 %v4686_v57  ;;  %v5452_v57 = vpop.permute.xlu0 %5451 }
 0x5b2   : > { %8564 = vmatprep.subr.msk.bf16.mxu1 %vm4627_vm9, %v4620_v26 }
 0x5b3   : > { %v4626_v9 = vpop.permute.xlu1 %4625 }
 0x5b7   : > { %v5446_v58 = vpop.permute.xlu1 %5445 }
 0x5b8   : > { %8108 = vmatprep.subr.bf16.mxu0 %v5446_v58 }
 0x5b9   : > { %8069 = vmatpush3.bf16.xpose.msra.mxu1 %v4689_v46  ;;  %8109 = vmatpush3.bf16.msra.mxu0 %v5430_v56  ;;  %v4695_v56 = vsel %vm4627_vm9, %v4608_v48, 0  ;;  %v5456_v46 = vpop.permute.xlu0 %5455 }
 0x5ba   : > { %8565 = vmatprep.subr.msk.bf16.mxu1 %vm4627_vm9, %v4622_v36 }
 0x5bb   : > { %v5448_v25 = vpop.permute.xlu1 %5447 }
 0x5bc   : > { %8110 = vmatprep.subr.bf16.mxu0 %v5448_v25 }
 0x5bd   : > { %8111 = vmatpush3.bf16.msra.mxu0 %v5432_v7 }
 0x5bf   : > { %v5450_v53 = vpop.permute.xlu1 %5449 }
 0x5c0   : > { %8112 = vmatprep.subr.bf16.mxu0 %v5450_v53 }
 0x5c1   : > { %8071 = vmatpush3.bf16.xpose.msra.mxu1 %v4692_v3 }
 0x5c2   : > { %8566 = vmatprep.subr.msk.bf16.mxu1 %vm4627_vm9, %v4624_v5 }
 0x5c3   : > { %v5434_v26 = vpop.permute.xlu1 %5433 }
 0x5c4   : > { %8113 = vmatpush3.bf16.msra.mxu0 %v5434_v26  ;;  %v4241_v26 = vld [vmem:[%s15604_s10 + $0x30] sm:$0xff] }
 0x5c5   : > { %8114 = vmatprep.subr.bf16.mxu0 %v5452_v57  ;;  %v4242_v57 = vld [vmem:[%s15604_s10 + $0x38] sm:$0xff] }
 0x5c7   : > { %v5436_v54 = vpop.permute.xlu1 %5435 }
 0x5c8   : > { %8115 = vmatpush3.bf16.msra.mxu0 %v5436_v54 }
 0x5c9   : > { %8073 = vmatpush3.bf16.xpose.msra.mxu1 %v4695_v56 }
 0x5ca   : > { %8567 = vmatprep.subr.msk.bf16.mxu1 %vm4627_vm9, %v4626_v9  ;;  %v4240_v9 = vld [vmem:[%s15604_s10 + $0x28] sm:$0xff] }
 0x5cb   : > { %v5454_v36 = vpop.permute.xlu1 %5453 }
 0x5cc   : > { %8116 = vmatprep.subr.bf16.mxu0 %v5454_v36 }
 0x5cf   : > { %v5438_v58 = vpop.permute.xlu1 %5437 }
 0x5d0   : > { %8117 = vmatpush3.bf16.msra.mxu0 %v5438_v58 }
 0x5d1   : > { %8075 = vmatpush3.bf16.xpose.msra.mxu1 %v4698_v35  ;;  %8118 = vmatprep.subr.bf16.mxu0 %v5456_v46 }
 0x5d3   : > { %v5440_v5 = vpop.permute.xlu1 %5439 }
 0x5d4   : > { %8119 = vmatpush3.bf16.msra.mxu0 %v5440_v5 }
 0x5d7   : > { %v5458_v25 = vpop.permute.xlu1 %5457 }
 0x5d8   : > { %8077 = vmatmul.mubr.msk.bf16.vlgmr.msra.gmra.mrb[160].mxu1 %vm4627_vm9, %v13290_v0  ;;  %8120 = vmatprep.subr.bf16.mxu0 %v5458_v25  ;;  %v4236_v0 = vld [vmem:[%s15604_s10 + $0x8] sm:$0xff] }
 0x5d9   : > { %8078 = vmatprep.mubr.msk.bf16.mxu1 %vm4627_vm9, %v13288_v12 }
 0x5e0   : > { %8079 = vmatmul.mubr.msk.bf16.gmra.mrb[164].mxu1 %vm4627_vm9, %v13288_v12  ;;  %v4235_v12 = vld [vmem:[%s15604_s10] sm:$0xff] }
 0x5e1   : > { %8080 = vmatprep.mubr.msk.bf16.mxu1 %vm4627_vm9, %v13304_v27 }
 0x5e8   : > { %8081 = vmatmul.mubr.msk.bf16.gmra.mrb[168].mxu1 %vm4627_vm9, %v13304_v27  ;;  %v4237_v27 = vld [vmem:[%s15604_s10 + $0x10] sm:$0xff] }
 0x5e9   : > { %8082 = vmatprep.mubr.msk.bf16.mxu1 %vm4627_vm9, %v13302_v32 }
 0x5f0   : > { %8083 = vmatmul.mubr.msk.bf16.gmra.mrb[172].mxu1 %vm4627_vm9, %v13302_v32 }
 0x5f1   : > { %8084 = vmatprep.mubr.msk.bf16.mxu1 %vm4627_vm9, %v13316_v63 }
 0x5f8   : > { %8085 = vmatmul.mubr.msk.bf16.gmra.mrb[176].mxu1 %vm4627_vm9, %v13316_v63 }
 0x5f9   : > { %8086 = vmatprep.mubr.msk.bf16.mxu1 %vm4627_vm9, %v13314_v11 }
 0x600   : > { %8087 = vmatmul.mubr.msk.bf16.gmra.mrb[180].mxu1 %vm4627_vm9, %v13314_v11 }
 0x601   : > { %8088 = vmatprep.mubr.msk.bf16.mxu1 %vm4627_vm9, %v13328_v1 }
 0x608   : > { %8089 = vmatmul.mubr.msk.bf16.gmra.mrb[184].mxu1 %vm4627_vm9, %v13328_v1 }
 0x609   : > { %8090 = vmatprep.mubr.msk.bf16.mxu1 %vm4627_vm9, %v13326_v17 }
 0x610   : > { %8091 = vmatmul.mubr.msk.bf16.gmra.mrb[188].mxu1 %vm4627_vm9, %v13326_v17 }
 0x611   : > { %8092 = vmatprep.mubr.msk.bf16.mxu1 %vm4627_vm9, %v13340_v47 }
 0x618   : > { %8093 = vmatmul.mubr.msk.bf16.gmra.mrb[192].mxu1 %vm4627_vm9, %v13340_v47 }
 0x619   : > { %8094 = vmatprep.mubr.msk.bf16.mxu1 %vm4627_vm9, %v13338_v39 }
 0x620   : > { %8095 = vmatmul.mubr.msk.bf16.gmra.mrb[196].mxu1 %vm4627_vm9, %v13338_v39  ;;  %v4238_v39 = vld [vmem:[%s15604_s10 + $0x18] sm:$0xff] }
 0x621   : > { %8096 = vmatprep.mubr.msk.bf16.mxu1 %vm4627_vm9, %v13356_v29 }
 0x628   : > { %8097 = vmatmul.mubr.msk.bf16.gmra.mrb[200].mxu1 %vm4627_vm9, %v13356_v29 }
 0x629   : > { %8098 = vmatprep.mubr.msk.bf16.mxu1 %vm4627_vm9, %v13354_v59 }
 0x630   : > { %8099 = vmatmul.mubr.msk.bf16.gmra.mrb[204].mxu1 %vm4627_vm9, %v13354_v59 }
 0x631   : > { %8100 = vmatprep.mubr.msk.bf16.mxu1 %vm4627_vm9, %v13370_v62 }
 0x638   : > { %8101 = vmatmul.mubr.msk.bf16.gmra.mrb[208].mxu1 %vm4627_vm9, %v13370_v62 }
 0x639   : > { %8102 = vmatprep.mubr.msk.bf16.mxu1 %vm4627_vm9, %v13368_v30 }
 0x640   : > { %8103 = vmatmul.mubr.msk.bf16.gmra.mrb[212].mxu1 %vm4627_vm9, %v13368_v30 }
 0x641   : > { %8104 = vmatprep.mubr.msk.bf16.mxu1 %vm4627_vm9, %v13384_v49 }
 0x648   : > { %8105 = vmatmul.mubr.msk.bf16.gmra.mrb[216].mxu1 %vm4627_vm9, %v13384_v49 }
 0x649   : > { %8106 = vmatprep.mubr.msk.bf16.mxu1 %vm4627_vm9, %v13382_v51 }
 0x650   : > { %8107 = vmatmul.mubr.msk.bf16.gmra.mrb[220].mxu1 %vm4627_vm9, %v13382_v51 }
 0x6ab   : > { %v4758_v32 = vpop.f32.mrb[160].mxu1 }
 0x6ac   : > { %v13495_v11 = vadd.f32 %v4758_v32, %v4235_v12  ;;  %v4760_v63 = vpop.f32.mrb[161].mxu1  ;;  %v4245_v12 = vld [vmem:[%s15604_s10 + $0x50] sm:$0xff]  ;;  %v4246_v32 = vld [vmem:[%s15604_s10 + $0x58] sm:$0xff] }
 0x6ad   : > { %v13500_v47 = vadd.f32 %v4760_v63, %v4236_v0  ;;  %v4762_v59 = vpop.f32.mrb[162].mxu1 }
 0x6ae   : > { %v13502_v29 = vadd.f32 %v4762_v59, %v4237_v27  ;;  %v4764_v30 = vpop.f32.mrb[163].mxu1 }
 0x6af   : > { %v4917_v62 = vmax.f32 %v13495_v11, %v13500_v47  ;;  %v13506_v49 = vadd.f32 %v4764_v30, %v4238_v39 }
 0x6b1   : > { %v4920_v48 = vmax.f32 %v13502_v29, %v13506_v49  ;;  %4918 = vmax.xlane.f32.xlu0 %v4917_v62 }
 0x6b3   : > { %v4768_v7 = vpop.f32.mrb[164].mxu1  ;;  %4921 = vmax.xlane.f32.xlu1 %v4920_v48  ;;  %v4249_v48 = vld [vmem:[%s15604_s10 + $0x70] sm:$0xff] }
 0x6b4   : > { %v13516_v53 = vadd.f32 %v4768_v7, %v4239_v43  ;;  %v4770_v3 = vpop.f32.mrb[165].mxu1 }
 0x6b5   : > { %v13524_v54 = vadd.f32 %v4770_v3, %v4240_v9  ;;  %v4772_v56 = vpop.f32.mrb[166].mxu1  ;;  %v4250_v9 = vld [vmem:[%s15604_s10 + $0x78] sm:$0xff] }
 0x6b6   : > { %v4774_v36 = vpop.f32.mrb[167].mxu1  ;;  %v13528_v35 = vadd.f32 %v4772_v56, %v4241_v26 }
 0x6b7   : > { %v4923_v58 = vmax.f32 %v13516_v53, %v13524_v54  ;;  %v13530_v46 = vadd.f32 %v4774_v36, %v4242_v57 }
 0x6b9   : > { %4924 = vmax.xlane.f32.xlu0 %v4923_v58  ;;  %v4926_v5 = vmax.f32 %v13528_v35, %v13530_v46  ;;  %v4253_v58 = vld [vmem:[%s15604_s10 + $0x90] sm:$0xff] }
 0x6bb   : > { %v4778_v25 = vpop.f32.mrb[168].mxu1 }
 0x6bc   : > { %v4780_v0 = vpop.f32.mrb[169].mxu1 }
 0x6bd   : > { %v4782_v27 = vpop.f32.mrb[170].mxu1  ;;  %4927 = vmax.xlane.f32.xlu0 %v4926_v5  ;;  %v4254_v5 = vld [vmem:[%s15604_s10 + $0x98] sm:$0xff] }
 0x6be   : > { %v13540_v63 = vadd.f32 %v4782_v27, %v4245_v12  ;;  %v4784_v39 = vpop.f32.mrb[171].mxu1 }
 0x6bf   : > { %v13542_v59 = vadd.f32 %v4784_v39, %v4246_v32 }
 0x6c1   : > { %v4932_v30 = vmax.f32 %v13540_v63, %v13542_v59 }
 0x6c3   : > { %v4788_v62 = vpop.f32.mrb[172].mxu1  ;;  %4933 = vmax.xlane.f32.xlu0 %v4932_v30 }
 0x6c4   : > { %v4790_v43 = vpop.f32.mrb[173].mxu1  ;;  %5441 = vrot.lane.b32.xlu1 %v13328_v1, %s9749_s15 }
 0x6c5   : > { %v4792_v7 = vpop.f32.mrb[174].mxu1 }
 0x6c6   : > { %v13554_v3 = vadd.f32 %v4792_v7, %v4249_v48  ;;  %v4794_v26 = vpop.f32.mrb[175].mxu1 }
 0x6c7   : > { %v13556_v57 = vadd.f32 %v4794_v26, %v4250_v9  ;;  %v4257_v9 = vld [vmem:[%s15604_s10 + $0xb0] sm:$0xff]  ;;  %v4258_v26 = vld [vmem:[%s15604_s10 + $0xb8] sm:$0xff] }
 0x6c9   : > { %v4938_v56 = vmax.f32 %v13554_v3, %v13556_v57 }
 0x6cb   : > { %v4798_v36 = vpop.f32.mrb[176].mxu1  ;;  %4939 = vmax.xlane.f32.xlu0 %v4938_v56 }
 0x6cc   : > { %v4800_v1 = vpop.f32.mrb[177].mxu1 }
 0x6cd   : > { %v4802_v12 = vpop.f32.mrb[178].mxu1 }
 0x6ce   : > { %v13566_v32 = vadd.f32 %v4802_v12, %v4253_v58  ;;  %v4804_v27 = vpop.f32.mrb[179].mxu1 }
 0x6cf   : > { %v13568_v39 = vadd.f32 %v4804_v27, %v4254_v5 }
 0x6d1   : > { %v4944_v30 = vmax.f32 %v13566_v32, %v13568_v39 }
 0x6d3   : > { %v4808_v48 = vpop.f32.mrb[180].mxu1  ;;  %4945 = vmax.xlane.f32.xlu0 %v4944_v30  ;;  %v4261_v30 = vld [vmem:[%s15604_s10 + $0xd0] sm:$0xff] }
 0x6d4   : > { %v4810_v7 = vpop.f32.mrb[181].mxu1 }
 0x6d5   : > { %v4812_v56 = vpop.f32.mrb[182].mxu1 }
 0x6d6   : > { %v13578_v58 = vadd.f32 %v4812_v56, %v4257_v9  ;;  %v4814_v12 = vpop.f32.mrb[183].mxu1 }
 0x6d7   : > { %v13580_v5 = vadd.f32 %v4814_v12, %v4258_v26  ;;  %v4243_v26 = vld [vmem:[%s15604_s10 + $0x40] sm:$0xff]  ;;  %v4244_v12 = vld [vmem:[%s15604_s10 + $0x48] sm:$0xff] }
 0x6d8   : > { %v13602_v14 = vadd.f32 %v4778_v25, %v4243_v26  ;;  %v13604_v50 = vadd.f32 %v4780_v0, %v4244_v12  ;;  %v4266_v25 = vld [vmem:[%s15604_s10 + $0xf8] sm:$0xff] }
 0x6d9   : > { %v4950_v27 = vmax.f32 %v13578_v58, %v13580_v5 }
 0x6da   : > { %v4929_v26 = vmax.f32 %v13602_v14, %v13604_v50 }
 0x6db   : > { %v4818_v60 = vpop.f32.mrb[184].mxu1  ;;  %4951 = vmax.xlane.f32.xlu0 %v4950_v27 }
 0x6dc   : > { %v4820_v38 = vpop.f32.mrb[185].mxu1 }
 0x6dd   : > { %v4822_v52 = vpop.f32.mrb[186].mxu1 }
 0x6de   : > { %v13590_v9 = vadd.f32 %v4822_v52, %v4261_v30  ;;  %v4824_v56 = vpop.f32.mrb[187].mxu1  ;;  %v4247_v52 = vld [vmem:[%s15604_s10 + $0x60] sm:$0xff]  ;;  %v4248_v30 = vld [vmem:[%s15604_s10 + $0x68] sm:$0xff] }
 0x6df   : > { %v13598_v27 = vadd.f32 %v4824_v56, %v4262_v10  ;;  %v4265_v10 = vld [vmem:[%s15604_s10 + $0xf0] sm:$0xff]  ;;  %v13620_v12 = vadd.f32 %v4788_v62, %v4247_v52  ;;  %v13622_v55 = vadd.f32 %v4790_v43, %v4248_v30  ;;  %v13638_v52 = vadd.f32 %v4798_v36, %v4251_v19 }
 0x6e0   : > { %v13640_v30 = vadd.f32 %v4800_v1, %v4252_v31  ;;  %v4270_v31 = vld [vmem:[%s15604_s10 + $0x118] sm:$0xff] }
 0x6e1   : > { %v4956_v41 = vmax.f32 %v13590_v9, %v13598_v27  ;;  %v4935_v43 = vmax.f32 %v13620_v12, %v13622_v55 }
 0x6e2   : > { %v4941_v36 = vmax.f32 %v13638_v52, %v13640_v30 }
 0x6e3   : > { %v4828_v8 = vpop.f32.mrb[188].mxu1  ;;  %4957 = vmax.xlane.f32.xlu0 %v4956_v41 }
 0x6e4   : > { %v4830_v56 = vpop.f32.mrb[189].mxu1 }
 0x6e5   : > { %v4832_v0 = vpop.f32.mrb[190].mxu1 }
 0x6e6   : > { %v13624_v61 = vadd.f32 %v4832_v0, %v4265_v10  ;;  %v4834_v41 = vpop.f32.mrb[191].mxu1  ;;  %v4255_v10 = vld [vmem:[%s15604_s10 + $0xa0] sm:$0xff] }
 0x6e7   : > { %v13632_v16 = vadd.f32 %v4834_v41, %v4266_v25  ;;  %v4256_v25 = vld [vmem:[%s15604_s10 + $0xa8] sm:$0xff]  ;;  %v13656_v1 = vadd.f32 %v4808_v48, %v4255_v10  ;;  %v13674_v10 = vadd.f32 %v4818_v60, %v4259_v45  ;;  %v4274_v45 = vld [vmem:[%s15604_s10 + $0x138] sm:$0xff] }
 0x6e8   : > { %4930 = vmax.xlane.f32.xlu1 %v4929_v26  ;;  %v4269_v26 = vld [vmem:[%s15604_s10 + $0x110] sm:$0xff]  ;;  %v13658_v13 = vadd.f32 %v4810_v7, %v4256_v25 }
 0x6e9   : > { %v4962_v62 = vmax.f32 %v13624_v61, %v13632_v16 }
 0x6ea   : > { %v4947_v7 = vmax.f32 %v13656_v1, %v13658_v13 }
 0x6eb   : > { %v4838_v0 = vpop.f32.mrb[192].mxu1  ;;  %4963 = vmax.xlane.f32.xlu0 %v4962_v62 }
 0x6ec   : > { %v4840_v41 = vpop.f32.mrb[193].mxu1  ;;  %4936 = vmax.xlane.f32.xlu1 %v4935_v43  ;;  %v4260_v43 = vld [vmem:[%s15604_s10 + $0xc8] sm:$0xff] }
 0x6ed   : > { %v4842_v19 = vpop.f32.mrb[194].mxu1  ;;  %v13676_v25 = vadd.f32 %v4820_v38, %v4260_v43 }
 0x6ee   : > { %v13660_v40 = vadd.f32 %v4842_v19, %v4269_v26  ;;  %v4844_v62 = vpop.f32.mrb[195].mxu1  ;;  %v4263_v26 = vld [vmem:[%s15604_s10 + $0xe0] sm:$0xff] }
 0x6ef   : > { %v13668_v6 = vadd.f32 %v4844_v62, %v4270_v31  ;;  %v4264_v31 = vld [vmem:[%s15604_s10 + $0xe8] sm:$0xff]  ;;  %v4953_v38 = vmax.f32 %v13674_v10, %v13676_v25  ;;  %v13692_v43 = vadd.f32 %v4828_v8, %v4263_v26  ;;  %v13710_v26 = vadd.f32 %v4838_v0, %v4267_v24  ;;  %v4278_v24 = vld [vmem:[%s15604_s10 + $0x158] sm:$0xff] }
 0x6f0   : > { %4942 = vmax.xlane.f32.xlu1 %v4941_v36  ;;  %v4273_v36 = vld [vmem:[%s15604_s10 + $0x130] sm:$0xff]  ;;  %v13694_v15 = vadd.f32 %v4830_v56, %v4264_v31 }
 0x6f1   : > { %16324 = vst [vmem:[#allocation47_spill] sm:$0xff] %v13668_v6  ;;  %v4968_v48 = vmax.f32 %v13660_v40, %v13668_v6 }
 0x6f2   : > { %v4959_v56 = vmax.f32 %v13692_v43, %v13694_v15 }
 0x6f3   : > { %v4848_v19 = vpop.f32.mrb[196].mxu1  ;;  %4969 = vmax.xlane.f32.xlu0 %v4968_v48 }
 0x6f4   : > { %v4850_v62 = vpop.f32.mrb[197].mxu1  ;;  %4948 = vmax.xlane.f32.xlu1 %v4947_v7  ;;  %v4268_v7 = vld [vmem:[%s15604_s10 + $0x108] sm:$0xff] }
 0x6f5   : > { %v4852_v60 = vpop.f32.mrb[198].mxu1  ;;  %v13712_v31 = vadd.f32 %v4840_v41, %v4268_v7 }
 0x6f6   : > { %v13696_v18 = vadd.f32 %v4852_v60, %v4273_v36  ;;  %v4854_v48 = vpop.f32.mrb[199].mxu1  ;;  %v4271_v36 = vld [vmem:[%s15604_s10 + $0x120] sm:$0xff] }
 0x6f7   : > { %v13704_v28 = vadd.f32 %v4854_v48, %v4274_v45  ;;  %v4272_v45 = vld [vmem:[%s15604_s10 + $0x128] sm:$0xff]  ;;  %v4965_v41 = vmax.f32 %v13710_v26, %v13712_v31  ;;  %v13728_v7 = vadd.f32 %v4848_v19, %v4271_v36 }
 0x6f8   : > { %16325 = vst [vmem:[#allocation38_spill] sm:$0xff] %v13696_v18  ;;  %4954 = vmax.xlane.f32.xlu1 %v4953_v38  ;;  %v4277_v38 = vld [vmem:[%s15604_s10 + $0x150] sm:$0xff]  ;;  %v13730_v21 = vadd.f32 %v4850_v62, %v4272_v45  ;;  %v4279_v62 = vld [vmem:[%s15604_s10 + $0x160] sm:$0xff] }
 0x6f9   : > { %16326 = vst [vmem:[#allocation39_spill] sm:$0xff] %v13704_v28  ;;  %v4974_v8 = vmax.f32 %v13696_v18, %v13704_v28 }
 0x6fa   : > { %v4971_v36 = vmax.f32 %v13728_v7, %v13730_v21 }
 0x6fb   : > { %v4858_v60 = vpop.f32.mrb[200].mxu1  ;;  %4975 = vmax.xlane.f32.xlu0 %v4974_v8 }
 0x6fc   : > { %v4860_v48 = vpop.f32.mrb[201].mxu1  ;;  %4960 = vmax.xlane.f32.xlu1 %v4959_v56  ;;  %v4276_v56 = vld [vmem:[%s15604_s10 + $0x148] sm:$0xff]  ;;  %v13749_v45 = vadd.f32 %v4858_v60, %v4275_v33  ;;  %v4282_v33 = vld [vmem:[%s15604_s10 + $0x178] sm:$0xff] }
 0x6fd   : > { %v4862_v0 = vpop.f32.mrb[202].mxu1 }
 0x6fe   : > { %v13732_v20 = vadd.f32 %v4862_v0, %v4277_v38  ;;  %v4864_v8 = vpop.f32.mrb[203].mxu1  ;;  %v13751_v38 = vadd.f32 %v4860_v48, %v4276_v56 }
 0x6ff   : > { %v13740_v37 = vadd.f32 %v4864_v8, %v4278_v24  ;;  %v4280_v24 = vld [vmem:[%s15604_s10 + $0x168] sm:$0xff] }
 0x700   : > { %16327 = vst [vmem:[#allocation58_spill] sm:$0xff] %v13732_v20  ;;  %4966 = vmax.xlane.f32.xlu1 %v4965_v41  ;;  %v4977_v56 = vmax.f32 %v13749_v45, %v13751_v38 }
 0x701   : > { %16328 = vst [vmem:[#allocation59_spill] sm:$0xff] %v13740_v37  ;;  %v4980_v19 = vmax.f32 %v13732_v20, %v13740_v37 }
 0x703   : > { %v4868_v0 = vpop.f32.mrb[204].mxu1  ;;  %4981 = vmax.xlane.f32.xlu0 %v4980_v19 }
 0x704   : > { %v13756_v41 = vadd.f32 %v4868_v0, %v4279_v62  ;;  %v4870_v8 = vpop.f32.mrb[205].mxu1  ;;  %4972 = vmax.xlane.f32.xlu1 %v4971_v36  ;;  %v4283_v0 = vld [vmem:[%s15604_s10 + $0x180] sm:$0xff] }
 0x705   : > { %v13764_v60 = vadd.f32 %v4870_v8, %v4280_v24  ;;  %v4872_v48 = vpop.f32.mrb[206].mxu1  ;;  %v4284_v24 = vld [vmem:[%s15604_s10 + $0x188] sm:$0xff] }
 0x706   : > { %v4874_v22 = vpop.f32.mrb[207].mxu1  ;;  %v13770_v62 = vadd.f32 %v4872_v48, %v4281_v4  ;;  %v4285_v4 = vld [vmem:[%s15604_s10 + $0x190] sm:$0xff]  ;;  %v4286_v48 = vld [vmem:[%s15604_s10 + $0x198] sm:$0xff] }
 0x707   : > { %v4983_v19 = vmax.f32 %v13756_v41, %v13764_v60  ;;  %v13772_v36 = vadd.f32 %v4874_v22, %v4282_v33 }
 0x708   : > { %16329 = vst [vmem:[#allocation55_spill] sm:$0xff] %v13770_v62  ;;  %4978 = vmax.xlane.f32.xlu1 %v4977_v56 }
 0x709   : > { %16330 = vst [vmem:[#allocation56_spill] sm:$0xff] %v13772_v36  ;;  %4984 = vmax.xlane.f32.xlu0 %v4983_v19  ;;  %v4986_v8 = vmax.f32 %v13770_v62, %v13772_v36 }
 0x70b   : > { %v4878_v23 = vpop.f32.mrb[208].mxu1 }
 0x70c   : > { %v13785_v22 = vadd.f32 %v4878_v23, %v4283_v0  ;;  %v4880_v33 = vpop.f32.mrb[209].mxu1  ;;  %v4287_v0 = vld [vmem:[%s15604_s10 + $0x1a0] sm:$0xff] }
 0x70d   : > { %v13790_v56 = vadd.f32 %v4880_v33, %v4284_v24  ;;  %v4882_v19 = vpop.f32.mrb[210].mxu1  ;;  %4987 = vmax.xlane.f32.xlu0 %v4986_v8  ;;  %v4288_v24 = vld [vmem:[%s15604_s10 + $0x1a8] sm:$0xff] }
 0x70e   : > { %v13792_v34 = vadd.f32 %v4882_v19, %v4285_v4  ;;  %v4884_v2 = vpop.f32.mrb[211].mxu1  ;;  %v4289_v4 = vld [vmem:[%s15604_s10 + $0x1b0] sm:$0xff] }
 0x70f   : > { %v4989_v44 = vmax.f32 %v13785_v22, %v13790_v56  ;;  %v13796_v42 = vadd.f32 %v4884_v2, %v4286_v48 }
 0x710   : > { %16331 = vst [vmem:[#allocation64_spill] sm:$0xff] %v13792_v34 }
 0x711   : > { %16332 = vst [vmem:[#allocation65_spill] sm:$0xff] %v13796_v42  ;;  %v4992_v23 = vmax.f32 %v13792_v34, %v13796_v42  ;;  %4990 = vmax.xlane.f32.xlu1 %v4989_v44  ;;  %v4290_v44 = vld [vmem:[%s15604_s10 + $0x1b8] sm:$0xff] }
 0x713   : > { %v4888_v8 = vpop.f32.mrb[212].mxu1  ;;  %4993 = vmax.xlane.f32.xlu0 %v4992_v23 }
 0x714   : > { %v13809_v2 = vadd.f32 %v4888_v8, %v4287_v0  ;;  %v4890_v33 = vpop.f32.mrb[213].mxu1  ;;  %v4291_v8 = vld [vmem:[%s15604_s10 + $0x1c0] sm:$0xff] }
 0x715   : > { %v13814_v48 = vadd.f32 %v4890_v33, %v4288_v24  ;;  %v4892_v19 = vpop.f32.mrb[214].mxu1  ;;  %v4292_v24 = vld [vmem:[%s15604_s10 + $0x1c8] sm:$0xff]  ;;  %v4293_v33 = vld [vmem:[%s15604_s10 + $0x1d0] sm:$0xff] }
 0x716   : > { %v13816_v42 = vadd.f32 %v4892_v19, %v4289_v4  ;;  %v4894_v34 = vpop.f32.mrb[215].mxu1  ;;  %v4294_v19 = vld [vmem:[%s15604_s10 + $0x1d8] sm:$0xff] }
 0x717   : > { %v4995_v23 = vmax.f32 %v13809_v2, %v13814_v48  ;;  %v13820_v36 = vadd.f32 %v4894_v34, %v4290_v44 }
 0x718   : > { %16333 = vst [vmem:[#allocation61_spill] sm:$0xff] %v13816_v42 }
 0x719   : > { %16334 = vst [vmem:[#allocation62_spill] sm:$0xff] %v13820_v36  ;;  %v4998_v0 = vmax.f32 %v13816_v42, %v13820_v36  ;;  %4996 = vmax.xlane.f32.xlu1 %v4995_v23 }
 0x71b   : > { %v4898_v4 = vpop.f32.mrb[216].mxu1  ;;  %4999 = vmax.xlane.f32.xlu0 %v4998_v0 }
 0x71c   : > { %v13833_v34 = vadd.f32 %v4898_v4, %v4291_v8  ;;  %v4900_v44 = vpop.f32.mrb[217].mxu1 }
 0x71d   : > { %v13838_v23 = vadd.f32 %v4900_v44, %v4292_v24  ;;  %v4902_v36 = vpop.f32.mrb[218].mxu1 }
 0x71e   : > { %v13840_v42 = vadd.f32 %v4902_v36, %v4293_v33  ;;  %v4904_v62 = vpop.f32.mrb[219].mxu1 }
 0x71f   : > { %v5001_v0 = vmax.f32 %v13833_v34, %v13838_v23  ;;  %v13844_v37 = vadd.f32 %v4904_v62, %v4294_v19 }
 0x720   : > { %16335 = vst [vmem:[#allocation71_spill] sm:$0xff] %v13840_v42 }
 0x721   : > { %16336 = vst [vmem:[#allocation72_spill] sm:$0xff] %v13844_v37  ;;  %v5004_v8 = vmax.f32 %v13840_v42, %v13844_v37  ;;  %5002 = vmax.xlane.f32.xlu1 %v5001_v0 }
 0x723   : > { %v13848_v4 = vpop.f32.mrb[220].mxu1  ;;  %5005 = vmax.xlane.f32.xlu0 %v5004_v8 }
 0x724   : > { %v13850_v20 = vpop.f32.mrb[221].mxu1 }
 0x725   : > { %v13852_v24 = vpop.f32.mrb[222].mxu1 }
 0x726   : > { %v13854_v44 = vpop.f32.mrb[223].mxu1 }
 0x727   : > { %16337 = vst [vmem:[#allocation69_spill] sm:$0xff] %v13854_v44 }
 0x73e   : > { %v4919_v36 = vpop.xlane.xlu0 %4918 }
 0x73f   : > { %v5013_v33 = vsub.f32 %v13495_v11, %v4919_v36  ;;  %v5014_v28 = vsub.f32 %v13500_v47, %v4919_v36 }
 0x740   : > { %v4922_v62 = vpop.xlane.xlu1 %4921 }
 0x741   : > { %v5077_v19 = vmul.f32 1.442695, %v5013_v33  ;;  %v5079_v18 = vmul.f32 1.442695, %v5014_v28  ;;  %v5015_v37 = vsub.f32 %v13502_v29, %v4922_v62  ;;  %v5016_v0 = vsub.f32 %v13506_v49, %v4922_v62 }
 0x743   : > { %9212 = vpow2.f32 %v5077_v19  ;;  %v5081_v8 = vmul.f32 1.442695, %v5015_v37  ;;  %v5083_v42 = vmul.f32 1.442695, %v5016_v0 }
 0x744   : > { %9214 = vpow2.f32 %v5079_v18  ;;  %v5442_v6 = vpop.permute.xlu1 %5441 }
 0x745   : > { %9216 = vpow2.f32 %v5081_v8  ;;  %8121 = vmatpush3.bf16.msra.mxu0 %v5442_v6 }
 0x746   : > { %9218 = vpow2.f32 %v5083_v42  ;;  %v4925_v44 = vpop.xlane.xlu0 %4924 }
 0x747   : > { %v5017_v11 = vsub.f32 %v13516_v53, %v4925_v44  ;;  %v5018_v47 = vsub.f32 %v13524_v54, %v4925_v44 }
 0x749   : > { %v5085_v36 = vmul.f32 1.442695, %v5017_v11  ;;  %v5087_v33 = vmul.f32 1.442695, %v5018_v47 }
 0x74a   : > { %v4928_v28 = vpop.xlane.xlu0 %4927 }
 0x74b   : > { %9220 = vpow2.f32 %v5085_v36  ;;  %v5019_v29 = vsub.f32 %v13528_v35, %v4928_v28  ;;  %v5020_v49 = vsub.f32 %v13530_v46, %v4928_v28 }
 0x74c   : > { %9222 = vpow2.f32 %v5087_v33 }
 0x74d   : > { %v13864_v37 = vpop.eup %9212  ;;  %v5089_v18 = vmul.f32 1.442695, %v5019_v29  ;;  %v5091_v62 = vmul.f32 1.442695, %v5020_v49 }
 0x74e   : > { %v13866_v6 = vpop.eup %9214 }
 0x74f   : > { %v13868_v42 = vpop.eup %9216  ;;  %9224 = vpow2.f32 %v5089_v18  ;;  %v5205_v53 = vadd.f32 %v13866_v6, %v13864_v37 }
 0x750   : > { %v13872_v54 = vpop.eup %9218  ;;  %9226 = vpow2.f32 %v5091_v62  ;;  %v4934_v47 = vpop.xlane.xlu0 %4933 }
 0x751   : > { %5206 = vadd.xlane.f32.xlu1 %v5205_v53  ;;  %v5208_v35 = vadd.f32 %v13872_v54, %v13868_v42  ;;  %v5023_v33 = vsub.f32 %v13540_v63, %v4934_v47  ;;  %v5024_v28 = vsub.f32 %v13542_v59, %v4934_v47 }
 0x753   : > { %5209 = vadd.xlane.f32.xlu0 %v5208_v35  ;;  %v5097_v35 = vmul.f32 1.442695, %v5023_v33 }
 0x755   : > { %v13876_v46 = vpop.eup %9220 }
 0x756   : > { %16338 = vst [vmem:[#allocation70_spill] sm:$0xff] %v13876_v46  ;;  %v13878_v44 = vpop.eup %9222 }
 0x757   : > { %16339 = vst [vmem:[#allocation74_spill] sm:$0xff] %v13878_v44  ;;  %v5211_v19 = vadd.f32 %v13878_v44, %v13876_v46  ;;  %v5099_v46 = vmul.f32 1.442695, %v5024_v28 }
 0x758   : > { %v4940_v36 = vpop.xlane.xlu0 %4939 }
 0x759   : > { %v13882_v0 = vpop.eup %9224  ;;  %5212 = vadd.xlane.f32.xlu0 %v5211_v19  ;;  %v5027_v49 = vsub.f32 %v13554_v3, %v4940_v36  ;;  %v5028_v53 = vsub.f32 %v13556_v57, %v4940_v36 }
 0x75a   : > { %16340 = vst [vmem:[#allocation75_spill] sm:$0xff] %v13882_v0  ;;  %v13884_v8 = vpop.eup %9226 }
 0x75b   : > { %v5214_v11 = vadd.f32 %v13884_v8, %v13882_v0  ;;  %v5105_v44 = vmul.f32 1.442695, %v5027_v49  ;;  %v5107_v47 = vmul.f32 1.442695, %v5028_v53 }
 0x75d   : > { %5215 = vadd.xlane.f32.xlu0 %v5214_v11 }
 0x762   : > { %5443 = vrot.lane.b32.xlu1 %v13326_v17, %s9749_s15  ;;  %v4946_v17 = vpop.xlane.xlu0 %4945 }
 0x763   : > { %v5031_v3 = vsub.f32 %v13566_v32, %v4946_v17  ;;  %v5032_v36 = vsub.f32 %v13568_v39, %v4946_v17 }
 0x765   : > { %v5113_v32 = vmul.f32 1.442695, %v5031_v3 }
 0x775   : > { %v4931_v29 = vpop.xlane.xlu1 %4930 }
 0x776   : > { %v5021_v18 = vsub.f32 %v13602_v14, %v4931_v29  ;;  %v5022_v62 = vsub.f32 %v13604_v50, %v4931_v29  ;;  %v4295_v50 = vld [vmem:[%s15604_s10 + $0x1e0] sm:$0xff]  ;;  %v4296_v14 = vld [vmem:[%s15604_s10 + $0x1e8] sm:$0xff] }
 0x777   : > { %v13911_v29 = vadd.f32 %v13848_v4, %v4295_v50  ;;  %v13914_v49 = vadd.f32 %v13850_v20, %v4296_v14 }
 0x778   : > { %v5093_v19 = vmul.f32 1.442695, %v5021_v18  ;;  %v5095_v11 = vmul.f32 1.442695, %v5022_v62  ;;  %v5115_v18 = vmul.f32 1.442695, %v5032_v36 }
 0x779   : > { %v4937_v0 = vpop.xlane.xlu1 %4936  ;;  %v5007_v20 = vmax.f32 %v13911_v29, %v13914_v49 }
 0x77a   : > { %9228 = vpow2.f32 %v5093_v19  ;;  %v5025_v63 = vsub.f32 %v13620_v12, %v4937_v0  ;;  %v5026_v59 = vsub.f32 %v13622_v55, %v4937_v0  ;;  %v13906_v55 = vpop.xlane.xlu0 %4951 }
 0x77b   : > { %9230 = vpow2.f32 %v5095_v11 }
 0x77c   : > { %9232 = vpow2.f32 %v5097_v35  ;;  %v5101_v57 = vmul.f32 1.442695, %v5025_v63  ;;  %v5103_v12 = vmul.f32 1.442695, %v5026_v59 }
 0x77d   : > { %9234 = vpow2.f32 %v5099_v46  ;;  %v4943_v33 = vpop.xlane.xlu1 %4942 }
 0x77e   : > { %9236 = vpow2.f32 %v5105_v44  ;;  %v5029_v0 = vsub.f32 %v13638_v52, %v4943_v33  ;;  %v5030_v28 = vsub.f32 %v13640_v30, %v4943_v33  ;;  %v13916_v62 = vpop.xlane.xlu0 %4957 }
 0x77f   : > { %9238 = vpow2.f32 %v5107_v47 }
 0x780   : > { %9240 = vpow2.f32 %v5101_v57  ;;  %v5109_v46 = vmul.f32 1.442695, %v5029_v0  ;;  %v5111_v39 = vmul.f32 1.442695, %v5030_v28 }
 0x781   : > { %9242 = vpow2.f32 %v5103_v12  ;;  %v4949_v44 = vpop.xlane.xlu1 %4948 }
 0x782   : > { %9244 = vpow2.f32 %v5109_v46  ;;  %v5033_v52 = vsub.f32 %v13656_v1, %v4949_v44  ;;  %v5034_v30 = vsub.f32 %v13658_v13, %v4949_v44  ;;  %v13928_v63 = vpop.xlane.xlu0 %4963 }
 0x783   : > { %9246 = vpow2.f32 %v5111_v39 }
 0x784   : > { %v13920_v4 = vpop.eup %9228  ;;  %9248 = vpow2.f32 %v5113_v32  ;;  %v5117_v53 = vmul.f32 1.442695, %v5033_v52  ;;  %v5119_v19 = vmul.f32 1.442695, %v5034_v30 }
 0x785   : > { %v13924_v35 = vpop.eup %9230  ;;  %9250 = vpow2.f32 %v5115_v18  ;;  %v4955_v11 = vpop.xlane.xlu1 %4954 }
 0x786   : > { %v13926_v17 = vpop.eup %9232  ;;  %v5037_v1 = vsub.f32 %v13674_v10, %v4955_v11  ;;  %v5038_v13 = vsub.f32 %v13676_v25, %v4955_v11  ;;  %5008 = vmax.xlane.f32.xlu1 %v5007_v20  ;;  %v5217_v59 = vadd.f32 %v13924_v35, %v13920_v4  ;;  %9252 = vpow2.f32 %v5117_v53  ;;  %v13942_v10 = vpop.xlane.xlu0 %4969 }
 0x787   : > { %v13934_v47 = vpop.eup %9234  ;;  %9254 = vpow2.f32 %v5119_v19 }
 0x788   : > { %v13936_v50 = vpop.eup %9236  ;;  %v5125_v14 = vmul.f32 1.442695, %v5037_v1  ;;  %5218 = vadd.xlane.f32.xlu0 %v5217_v59  ;;  %v5127_v57 = vmul.f32 1.442695, %v5038_v13  ;;  %v5220_v0 = vadd.f32 %v13934_v47, %v13926_v17 }
 0x789   : > { %v13938_v3 = vpop.eup %9238  ;;  %v4961_v36 = vpop.xlane.xlu1 %4960 }
 0x78a   : > { %v13940_v12 = vpop.eup %9240  ;;  %v5041_v25 = vsub.f32 %v13692_v43, %v4961_v36  ;;  %v5042_v33 = vsub.f32 %v13694_v15, %v4961_v36  ;;  %9256 = vpow2.f32 %v5125_v14  ;;  %v13956_v43 = vpop.xlane.xlu0 %4975 }
 0x78b   : > { %v13948_v28 = vpop.eup %9242  ;;  %9258 = vpow2.f32 %v5127_v57  ;;  %v5226_v57 = vadd.f32 %v13938_v3, %v13936_v50 }
 0x78c   : > { %v13950_v32 = vpop.eup %9244  ;;  %v5133_v46 = vmul.f32 1.442695, %v5041_v25  ;;  %5221 = vadd.xlane.f32.xlu0 %v5220_v0  ;;  %v5135_v18 = vmul.f32 1.442695, %v5042_v33  ;;  %v5223_v53 = vadd.f32 %v13948_v28, %v13940_v12 }
 0x78d   : > { %v13952_v39 = vpop.eup %9246  ;;  %v4967_v44 = vpop.xlane.xlu1 %4966 }
 0x78e   : > { %v13954_v52 = vpop.eup %9248  ;;  %v5045_v15 = vsub.f32 %v13710_v26, %v4967_v44  ;;  %v5046_v30 = vsub.f32 %v13712_v31, %v4967_v44  ;;  %v5229_v20 = vadd.f32 %v13952_v39, %v13950_v32  ;;  %9260 = vpow2.f32 %v5133_v46 }
 0x78f   : > { %v13964_v19 = vpop.eup %9250  ;;  %9262 = vpow2.f32 %v5135_v18 }
 0x790   : > { %v5141_v11 = vmul.f32 1.442695, %v5045_v15  ;;  %5230 = vadd.xlane.f32.xlu1 %v5229_v20  ;;  %5224 = vadd.xlane.f32.xlu0 %v5223_v53  ;;  %v5143_v1 = vmul.f32 1.442695, %v5046_v30  ;;  %v13966_v59 = vpop.eup %9252  ;;  %v13968_v26 = vpop.xlane.xlu0 %4981  ;;  %v5232_v36 = vadd.f32 %v13964_v19, %v13954_v52 }
 0x791   : > { %v4973_v13 = vpop.xlane.xlu1 %4972  ;;  %v13976_v25 = vpop.eup %9254 }
 0x792   : > { %v5049_v31 = vsub.f32 %v13728_v7, %v4973_v13  ;;  %v5050_v14 = vsub.f32 %v13730_v21, %v4973_v13  ;;  %9264 = vpow2.f32 %v5141_v11  ;;  %v5235_v15 = vadd.f32 %v13976_v25, %v13966_v59 }
 0x793   : > { %9266 = vpow2.f32 %v5143_v1 }
 0x794   : > { %v5149_v33 = vmul.f32 1.442695, %v5049_v31  ;;  %5227 = vadd.xlane.f32.xlu0 %v5226_v57  ;;  %5233 = vadd.xlane.f32.xlu1 %v5232_v36  ;;  %v5151_v0 = vmul.f32 1.442695, %v5050_v14  ;;  %v13978_v18 = vpop.eup %9256 }
 0x795   : > { %v4979_v46 = vpop.xlane.xlu1 %4978  ;;  %v13984_v30 = vpop.eup %9258 }
 0x796   : > { %v5053_v7 = vsub.f32 %v13749_v45, %v4979_v46  ;;  %v5054_v21 = vsub.f32 %v13751_v38, %v4979_v46  ;;  %v4985_v44 = vpop.xlane.xlu0 %4984  ;;  %9268 = vpow2.f32 %v5149_v33  ;;  %v5241_v45 = vadd.f32 %v13984_v30, %v13978_v18 }
 0x797   : > { %v5057_v53 = vsub.f32 %v13756_v41, %v4985_v44  ;;  %9270 = vpow2.f32 %v5151_v0  ;;  %v5058_v1 = vsub.f32 %v13764_v60, %v4985_v44 }
 0x798   : > { %v5157_v20 = vmul.f32 1.442695, %v5053_v7  ;;  %5236 = vadd.xlane.f32.xlu1 %v5235_v15  ;;  %v5159_v11 = vmul.f32 1.442695, %v5054_v21  ;;  %v13988_v13 = vpop.eup %9260 }
 0x799   : > { %v13992_v38 = vpop.eup %9262  ;;  %v5165_v31 = vmul.f32 1.442695, %v5057_v53  ;;  %v5167_v14 = vmul.f32 1.442695, %v5058_v1 }
 0x79a   : > { %9272 = vpow2.f32 %v5157_v20  ;;  %v5247_v36 = vadd.f32 %v13992_v38, %v13988_v13 }
 0x79b   : > { %9274 = vpow2.f32 %v5159_v11 }
 0x79c   : > { %5242 = vadd.xlane.f32.xlu1 %v5241_v45  ;;  %v13994_v57 = vpop.eup %9264  ;;  %9276 = vpow2.f32 %v5165_v31 }
 0x79d   : > { %v13998_v33 = vpop.eup %9266  ;;  %9278 = vpow2.f32 %v5167_v14 }
 0x79e   : > { %v4991_v41 = vpop.xlane.xlu1 %4990  ;;  %v5253_v44 = vadd.f32 %v13998_v33, %v13994_v57 }
 0x79f   : > { %v5061_v60 = vsub.f32 %v13785_v22, %v4991_v41  ;;  %v5062_v0 = vsub.f32 %v13790_v56, %v4991_v41 }
 0x7a0   : > { %5248 = vadd.xlane.f32.xlu1 %v5247_v36  ;;  %v14002_v21 = vpop.eup %9268 }
 0x7a1   : > { %v5173_v46 = vmul.f32 1.442695, %v5061_v60  ;;  %v5175_v7 = vmul.f32 1.442695, %v5062_v0  ;;  %v14006_v15 = vpop.eup %9270 }
 0x7a2   : > { %v5259_v56 = vadd.f32 %v14006_v15, %v14002_v21 }
 0x7a3   : > { %9280 = vpow2.f32 %v5173_v46 }
 0x7a4   : > { %5254 = vadd.xlane.f32.xlu1 %v5253_v44  ;;  %9282 = vpow2.f32 %v5175_v7  ;;  %v14008_v20 = vpop.eup %9272 }
 0x7a5   : > { %v14012_v53 = vpop.eup %9274 }
 0x7a6   : > { %v4997_v22 = vpop.xlane.xlu1 %4996  ;;  %v14016_v14 = vpop.eup %9276  ;;  %v5265_v41 = vadd.f32 %v14012_v53, %v14008_v20 }
 0x7a7   : > { %v5065_v11 = vsub.f32 %v13809_v2, %v4997_v22  ;;  %v5066_v1 = vsub.f32 %v13814_v48, %v4997_v22  ;;  %16341 = vst [vmem:[#allocation76_spill] sm:$0xff] %v14016_v14  ;;  %v14022_v36 = vpop.eup %9278 }
 0x7a8   : > { %5260 = vadd.xlane.f32.xlu1 %v5259_v56  ;;  %v5271_v48 = vadd.f32 %v14022_v36, %v14016_v14 }
 0x7a9   : > { %v5181_v45 = vmul.f32 1.442695, %v5065_v11  ;;  %v5183_v31 = vmul.f32 1.442695, %v5066_v1  ;;  %v5035_v11 = vsub.f32 %v13578_v58, %v13906_v55 }
 0x7aa   : > { %5459 = vrot.lane.b32.xlu0 %v13382_v51, %s9749_s15 }
 0x7ab   : > { %9284 = vpow2.f32 %v5181_v45  ;;  %v5121_v45 = vmul.f32 1.442695, %v5035_v11  ;;  %v16349_v11 = vld [vmem:[#allocation69_spill] sm:$0xff] }
 0x7ac   : > { %9286 = vpow2.f32 %v5183_v31  ;;  %5266 = vadd.xlane.f32.xlu1 %v5265_v41  ;;  %v5039_v31 = vsub.f32 %v13590_v9, %v13916_v62 }
 0x7ad   : > { %v14024_v60 = vpop.eup %9280 }
 0x7ae   : > { %16342 = vst [vmem:[#allocation73_spill] sm:$0xff] %v14024_v60  ;;  %v5003_v2 = vpop.xlane.xlu1 %5002  ;;  %v14028_v0 = vpop.eup %9282  ;;  %v5129_v58 = vmul.f32 1.442695, %v5039_v31 }
 0x7af   : > { %16343 = vst [vmem:[#allocation85_spill] sm:$0xff] %v14028_v0  ;;  %v5069_v46 = vsub.f32 %v13833_v34, %v5003_v2  ;;  %v5070_v51 = vsub.f32 %v13838_v23, %v5003_v2  ;;  %v5277_v22 = vadd.f32 %v14028_v0, %v14024_v60  ;;  %v5036_v34 = vsub.f32 %v13580_v5, %v13906_v55 }
 0x7b0   : > { %5272 = vadd.xlane.f32.xlu1 %v5271_v48  ;;  %v5040_v2 = vsub.f32 %v13598_v27, %v13916_v62  ;;  %v4297_v27 = vld [vmem:[%s15604_s10 + $0x1f0] sm:$0xff]  ;;  %v4298_v62 = vld [vmem:[%s15604_s10 + $0x1f8] sm:$0xff] }
 0x7b1   : > { %v5189_v7 = vmul.f32 1.442695, %v5069_v46  ;;  %v5191_v44 = vmul.f32 1.442695, %v5070_v51  ;;  %v5123_v41 = vmul.f32 1.442695, %v5036_v34  ;;  %v5043_v46 = vsub.f32 %v13624_v61, %v13928_v63 }
 0x7b2   : > { %v5131_v55 = vmul.f32 1.442695, %v5040_v2  ;;  %v5044_v51 = vsub.f32 %v13632_v16, %v13928_v63  ;;  %v16348_v16 = vld [vmem:[#allocation47_spill] sm:$0xff]  ;;  %v14072_v34 = vadd.f32 %v16349_v11, %v4298_v62 }
 0x7b3   : > { %9288 = vpow2.f32 %v5189_v7  ;;  %v5137_v61 = vmul.f32 1.442695, %v5043_v46  ;;  %v5047_v7 = vsub.f32 %v13660_v40, %v13942_v10  ;;  %v5048_v63 = vsub.f32 %v16348_v16, %v13942_v10  ;;  %v16351_v40 = vld [vmem:[#allocation39_spill] sm:$0xff] }
 0x7b4   : > { %9290 = vpow2.f32 %v5191_v44  ;;  %5278 = vadd.xlane.f32.xlu1 %v5277_v22  ;;  %v5139_v44 = vmul.f32 1.442695, %v5044_v51  ;;  %v14069_v22 = vadd.f32 %v13852_v24, %v4297_v27  ;;  %v5052_v2 = vsub.f32 %v16351_v40, %v13956_v43  ;;  %v16353_v62 = vld [vmem:[#allocation59_spill] sm:$0xff] }
 0x7b5   : > { %v14034_v56 = vpop.eup %9284  ;;  %9292 = vpow2.f32 %v5121_v45  ;;  %v16350_v45 = vld [vmem:[#allocation38_spill] sm:$0xff] }
 0x7b6   : > { %16344 = vst [vmem:[#allocation86_spill] sm:$0xff] %v14034_v56  ;;  %v14038_v1 = vpop.eup %9286  ;;  %9294 = vpow2.f32 %v5123_v41  ;;  %v5051_v31 = vsub.f32 %v16350_v45, %v13956_v43  ;;  %v5147_v41 = vmul.f32 1.442695, %v5048_v63  ;;  %v5010_v10 = vmax.f32 %v14069_v22, %v14072_v34  ;;  %v16354_v63 = vld [vmem:[#allocation55_spill] sm:$0xff] }
 0x7b7   : > { %16345 = vst [vmem:[#allocation77_spill] sm:$0xff] %v14038_v1  ;;  %v5283_v23 = vadd.f32 %v14038_v1, %v14034_v56  ;;  %9296 = vpow2.f32 %v5129_v58  ;;  %v5155_v27 = vmul.f32 1.442695, %v5052_v2 }
 0x7b8   : > { %9298 = vpow2.f32 %v5131_v55  ;;  %v5153_v46 = vmul.f32 1.442695, %v5051_v31  ;;  %v16352_v55 = vld [vmem:[#allocation58_spill] sm:$0xff]  ;;  %v16355_v31 = vld [vmem:[#allocation56_spill] sm:$0xff] }
 0x7b9   : > { %5284 = vadd.xlane.f32.xlu1 %v5283_v23  ;;  %9300 = vpow2.f32 %v5137_v61  ;;  %v5145_v23 = vmul.f32 1.442695, %v5047_v7  ;;  %v5055_v51 = vsub.f32 %v16352_v55, %v13968_v26  ;;  %v5056_v61 = vsub.f32 %v16353_v62, %v13968_v26  ;;  %v16356_v55 = vld [vmem:[#allocation64_spill] sm:$0xff] }
 0x7ba   : > { %9302 = vpow2.f32 %v5139_v44 }
 0x7bb   : > { %9304 = vpow2.f32 %v5145_v23  ;;  %v5161_v16 = vmul.f32 1.442695, %v5055_v51  ;;  %v5163_v45 = vmul.f32 1.442695, %v5056_v61 }
 0x7bc   : > { %9306 = vpow2.f32 %v5147_v41 }
 0x7bd   : > { %v14048_v48 = vpop.eup %9288  ;;  %9308 = vpow2.f32 %v5153_v46 }
 0x7be   : > { %16346 = vst [vmem:[#allocation84_spill] sm:$0xff] %v14048_v48  ;;  %v14052_v5 = vpop.eup %9290  ;;  %9310 = vpow2.f32 %v5155_v27 }
 0x7bf   : > { %16347 = vst [vmem:[#allocation87_spill] sm:$0xff] %v14052_v5  ;;  %v5289_v9 = vadd.f32 %v14052_v5, %v14048_v48  ;;  %v14078_v58 = vpop.eup %9292  ;;  %9312 = vpow2.f32 %v5161_v16  ;;  %v16358_v48 = vld [vmem:[#allocation61_spill] sm:$0xff]  ;;  %v16360_v5 = vld [vmem:[#allocation71_spill] sm:$0xff] }
 0x7c0   : > { %v14082_v24 = vpop.eup %9294  ;;  %9314 = vpow2.f32 %v5163_v45 }
 0x7c1   : > { %5290 = vadd.xlane.f32.xlu1 %v5289_v9  ;;  %v4988_v9 = vpop.xlane.xlu0 %4987  ;;  %v14088_v43 = vpop.eup %9296  ;;  %v5238_v7 = vadd.f32 %v14082_v24, %v14078_v58 }
 0x7c2   : > { %v14092_v44 = vpop.eup %9298  ;;  %v5059_v11 = vsub.f32 %v16354_v63, %v4988_v9  ;;  %v5060_v41 = vsub.f32 %v16355_v31, %v4988_v9 }
 0x7c3   : > { %v14096_v40 = vpop.eup %9300  ;;  %v5244_v26 = vadd.f32 %v14092_v44, %v14088_v43 }
 0x7c4   : > { %v14100_v2 = vpop.eup %9302  ;;  %v5171_v62 = vmul.f32 1.442695, %v5060_v41 }
 0x7c5   : > { %v4994_v23 = vpop.xlane.xlu0 %4993  ;;  %v14104_v61 = vpop.eup %9304  ;;  %v5250_v9 = vadd.f32 %v14100_v2, %v14096_v40 }
 0x7c6   : > { %v5063_v46 = vsub.f32 %v16356_v55, %v4994_v23  ;;  %v14108_v63 = vpop.eup %9306 }
 0x7c7   : > { %v14112_v41 = vpop.eup %9308 }
 0x7c8   : > { %v5177_v31 = vmul.f32 1.442695, %v5063_v46  ;;  %v16361_v46 = vld [vmem:[#allocation72_spill] sm:$0xff] }
 0x7c9   : > { %5011 = vmax.xlane.f32.xlu0 %v5010_v10  ;;  %v5169_v10 = vmul.f32 1.442695, %v5059_v11  ;;  %v5000_v51 = vpop.xlane.xlu0 %4999 }
 0x7ca   : > { %v5067_v16 = vsub.f32 %v16358_v48, %v5000_v51 }
 0x7cb   : > { %9316 = vpow2.f32 %v5169_v10 }
 0x7cc   : > { %9318 = vpow2.f32 %v5171_v62  ;;  %v5185_v10 = vmul.f32 1.442695, %v5067_v16 }
 0x7cd   : > { %5239 = vadd.xlane.f32.xlu0 %v5238_v7  ;;  %v16357_v7 = vld [vmem:[#allocation65_spill] sm:$0xff]  ;;  %v5006_v11 = vpop.xlane.xlu0 %5005  ;;  %9320 = vpow2.f32 %v5177_v31 }
 0x7ce   : > { %v5064_v27 = vsub.f32 %v16357_v7, %v4994_v23  ;;  %v5256_v23 = vadd.f32 %v14108_v63, %v14104_v61  ;;  %v14116_v7 = vpop.eup %9310  ;;  %v5071_v56 = vsub.f32 %v16360_v5, %v5006_v11 }
 0x7cf   : > { %v14120_v62 = vpop.eup %9312 }
 0x7d0   : > { %v5179_v55 = vmul.f32 1.442695, %v5064_v27  ;;  %v14124_v27 = vpop.eup %9314 }
 0x7d1   : > { %5245 = vadd.xlane.f32.xlu0 %v5244_v26  ;;  %v16359_v26 = vld [vmem:[#allocation62_spill] sm:$0xff]  ;;  %v5268_v16 = vadd.f32 %v14124_v27, %v14120_v62 }
 0x7d2   : > { %v5068_v45 = vsub.f32 %v16359_v26, %v5000_v51  ;;  %9322 = vpow2.f32 %v5179_v55  ;;  %v5262_v51 = vadd.f32 %v14116_v7, %v14112_v41  ;;  %v5193_v26 = vmul.f32 1.442695, %v5071_v56 }
 0x7d3   : > { %9324 = vpow2.f32 %v5185_v10 }
 0x7d4   : > { %v5187_v48 = vmul.f32 1.442695, %v5068_v45 }
 0x7d5   : > { %5251 = vadd.xlane.f32.xlu0 %v5250_v9  ;;  %v5072_v9 = vsub.f32 %v16361_v46, %v5006_v11  ;;  %v14126_v31 = vpop.eup %9316 }
 0x7d6   : > { %9326 = vpow2.f32 %v5187_v48  ;;  %16362 = vst [vmem:[#allocation89_spill] sm:$0xff] %v14126_v31  ;;  %v14130_v11 = vpop.eup %9318 }
 0x7d7   : > { %v5195_v1 = vmul.f32 1.442695, %v5072_v9  ;;  %v14132_v45 = vpop.eup %9320  ;;  %v5274_v56 = vadd.f32 %v14130_v11, %v14126_v31 }
 0x7d8   : > { %16363 = vst [vmem:[#allocation88_spill] sm:$0xff] %v14132_v45 }
 0x7d9   : > { %5257 = vadd.xlane.f32.xlu0 %v5256_v23 }
 0x7dc   : > { %v14136_v23 = vpop.eup %9322 }
 0x7dd   : > { %5263 = vadd.xlane.f32.xlu0 %v5262_v51  ;;  %16364 = vst [vmem:[#allocation16_spill] sm:$0xff] %v14136_v23  ;;  %v14138_v10 = vpop.eup %9324  ;;  %v5280_v48 = vadd.f32 %v14136_v23, %v14132_v45 }
 0x7de   : > { %v5207_v5 = vpop.xlane.xlu1 %5206  ;;  %16365 = vst [vmem:[#allocation47_spill] sm:$0xff] %v14138_v10 }
 0x7df   : > { %9328 = vrcp.f32 %v5207_v5 }
 0x7e0   : > { %9330 = vpow2.f32 %v5193_v26  ;;  %v5210_v55 = vpop.xlane.xlu0 %5209  ;;  %v14142_v46 = vpop.eup %9326 }
 0x7e1   : > { %9332 = vrcp.f32 %v5210_v55  ;;  %5269 = vadd.xlane.f32.xlu0 %v5268_v16  ;;  %16366 = vst [vmem:[#allocation69_spill] sm:$0xff] %v14142_v46  ;;  %v5286_v26 = vadd.f32 %v14142_v46, %v14138_v10 }
 0x7e2   : > { %9334 = vpow2.f32 %v5195_v1  ;;  %v5444_v10 = vpop.permute.xlu1 %5443 }
 0x7e5   : > { %5275 = vadd.xlane.f32.xlu0 %v5274_v56 }
 0x7e6   : > { %v5213_v14 = vpop.xlane.xlu0 %5212 }
 0x7e9   : > { %v9329_v9 = vpop.eup %9328  ;;  %5281 = vadd.xlane.f32.xlu0 %v5280_v48 }
 0x7ea   : > { %v14144_v51 = vpop.eup %9330  ;;  %v5333_v16 = vmul.f32 %v9329_v9, %v13864_v37  ;;  %v5334_v56 = vmul.f32 %v9329_v9, %v13866_v6  ;;  %v5216_v46 = vpop.xlane.xlu0 %5215 }
 0x7eb   : > { %v9333_v1 = vpop.eup %9332  ;;  %9336 = vrcp.f32 %v5216_v46 }
 0x7ec   : > { %v14148_v5 = vpop.eup %9334  ;;  %v5335_v55 = vmul.f32 %v9333_v1, %v13868_v42  ;;  %v5336_v60 = vmul.f32 %v9333_v1, %v13872_v54 }
 0x7ed   : > { %5287 = vadd.xlane.f32.xlu0 %v5286_v26  ;;  %v5292_v48 = vadd.f32 %v14148_v5, %v14144_v51 }
 0x7ee   : > { %v5398_v45 = vpack.c.bf16 %v5336_v60, %v5334_v56  ;;  %v5397_v0 = vpack.c.bf16 %v5335_v55, %v5333_v16 }
 0x7f0   : > { %5509 = vmatprep.mubr.bf16.mxu0 %v5398_v45 }
 0x7f1   : > { %5293 = vadd.xlane.f32.xlu0 %v5292_v48 }
 0x7f5   : > { %v9337_v45 = vpop.eup %9336 }
 0x7f6   : > { %v5340_v46 = vmul.f32 %v9337_v45, %v13884_v8 }
 0x813   : > { %v5009_v23 = vpop.xlane.xlu1 %5008 }
 0x814   : > { %v5073_v37 = vsub.f32 %v13911_v29, %v5009_v23  ;;  %v5074_v42 = vsub.f32 %v13914_v49, %v5009_v23 }
 0x815   : > { %v5219_v31 = vpop.xlane.xlu0 %5218 }
 0x816   : > { %v5197_v6 = vmul.f32 1.442695, %v5073_v37  ;;  %v5199_v9 = vmul.f32 1.442695, %v5074_v42  ;;  %v16369_v42 = vld [vmem:[#allocation75_spill] sm:$0xff] }
 0x818   : > { %9338 = vpow2.f32 %v5197_v6  ;;  %v5339_v6 = vmul.f32 %v9337_v45, %v16369_v42 }
 0x819   : > { %9340 = vpow2.f32 %v5199_v9  ;;  %v5222_v54 = vpop.xlane.xlu0 %5221 }
 0x81a   : > { %9342 = vrcp.f32 %v5213_v14  ;;  %v16368_v14 = vld [vmem:[#allocation74_spill] sm:$0xff] }
 0x81b   : > { %9344 = vrcp.f32 %v5222_v54 }
 0x81c   : > { %9346 = vrcp.f32 %v5219_v31 }
 0x81d   : > { %v5225_v60 = vpop.xlane.xlu0 %5224  ;;  %v5231_v55 = vpop.xlane.xlu1 %5230 }
 0x821   : > { %v5228_v1 = vpop.xlane.xlu0 %5227  ;;  %v5234_v9 = vpop.xlane.xlu1 %5233 }
 0x822   : > { %v14158_v26 = vpop.eup %9338  ;;  %9348 = vrcp.f32 %v5228_v1 }
 0x823   : > { %16367 = vst [vmem:[#allocation38_spill] sm:$0xff] %v14158_v26  ;;  %v14160_v16 = vpop.eup %9340  ;;  %9350 = vrcp.f32 %v5225_v60 }
 0x824   : > { %v9343_v29 = vpop.eup %9342  ;;  %v5295_v49 = vadd.f32 %v14160_v16, %v14158_v26  ;;  %v16370_v26 = vld [vmem:[#allocation70_spill] sm:$0xff]  ;;  %9352 = vrcp.f32 %v5234_v9 }
 0x825   : > { %v5460_v23 = vpop.permute.xlu0 %5459  ;;  %v5338_v56 = vmul.f32 %v9343_v29, %v16368_v14  ;;  %v9345_v37 = vpop.eup %9344  ;;  %v5337_v8 = vmul.f32 %v9343_v29, %v16370_v26  ;;  %9354 = vrcp.f32 %v5231_v55 }
 0x826   : > { %5296 = vadd.xlane.f32.xlu1 %v5295_v49  ;;  %8122 = vmatprep.subr.bf16.mxu0 %v5460_v23  ;;  %v9347_v31 = vpop.eup %9346  ;;  %v5344_v54 = vmul.f32 %v9345_v37, %v13934_v47  ;;  %v5237_v42 = vpop.xlane.xlu1 %5236 }
 0x827   : > { %8123 = vmatpush3.bf16.msra.mxu0 %v5444_v10  ;;  %v5400_v48 = vpack.c.bf16 %v5340_v46, %v5338_v56  ;;  %v5342_v49 = vmul.f32 %v9347_v31, %v13924_v35  ;;  %v5399_v10 = vpack.c.bf16 %v5339_v6, %v5337_v8  ;;  %v5341_v45 = vmul.f32 %v9347_v31, %v13920_v4 }
 0x828   : > { %9356 = vrcp.f32 %v5237_v42 }
 0x829   : > { %v5402_v23 = vpack.c.bf16 %v5344_v54, %v5342_v49 }
 0x82a   : > { %5510 = vmatmul.mubr.bf16.vlgmr.msra.gmra.mrb[192].mxu0 %v5397_v0  ;;  %v5343_v0 = vmul.f32 %v9345_v37, %v13926_v17  ;;  %v5243_v9 = vpop.xlane.xlu1 %5242 }
 0x82b   : > { %5517 = vmatprep.mubr.bf16.mxu0 %v5400_v48  ;;  %9358 = vrcp.f32 %v5243_v9 }
 0x82c   : > { %v9349_v14 = vpop.eup %9348  ;;  %v5401_v46 = vpack.c.bf16 %v5343_v0, %v5341_v45 }
 0x82d   : > { %v9351_v60 = vpop.eup %9350  ;;  %v5348_v1 = vmul.f32 %v9349_v14, %v13938_v3  ;;  %v5347_v56 = vmul.f32 %v9349_v14, %v13936_v50 }
 0x82e   : > { %v5346_v47 = vmul.f32 %v9351_v60, %v13948_v28  ;;  %v9353_v29 = vpop.eup %9352  ;;  %v5345_v48 = vmul.f32 %v9351_v60, %v13940_v12 }
 0x82f   : > { %v9355_v35 = vpop.eup %9354  ;;  %v5352_v55 = vmul.f32 %v9353_v29, %v13964_v19  ;;  %v5351_v4 = vmul.f32 %v9353_v29, %v13954_v52 }
 0x830   : > { %v5404_v26 = vpack.c.bf16 %v5348_v1, %v5346_v47  ;;  %v5350_v17 = vmul.f32 %v9355_v35, %v13952_v39  ;;  %v5403_v37 = vpack.c.bf16 %v5347_v56, %v5345_v48  ;;  %v5349_v28 = vmul.f32 %v9355_v35, %v13950_v32  ;;  %v5249_v32 = vpop.xlane.xlu1 %5248 }
 0x832   : > { %5518 = vmatmul.mubr.bf16.gmra.mrb[196].mxu0 %v5399_v10  ;;  %v5406_v3 = vpack.c.bf16 %v5352_v55, %v5350_v17  ;;  %v5405_v31 = vpack.c.bf16 %v5351_v4, %v5349_v28  ;;  %v9357_v49 = vpop.eup %9356 }
 0x833   : > { %5525 = vmatprep.mubr.bf16.mxu0 %v5402_v23  ;;  %v5354_v0 = vmul.f32 %v9357_v49, %v13976_v25  ;;  %v5353_v45 = vmul.f32 %v9357_v49, %v13966_v59 }
 0x835   : > { %v9359_v10 = vpop.eup %9358 }
 0x836   : > { %v5358_v56 = vmul.f32 %v9359_v10, %v13984_v30 }
 0x83a   : > { %5526 = vmatmul.mubr.bf16.gmra.mrb[200].mxu0 %v5401_v46 }
 0x83b   : > { %5533 = vmatprep.mubr.bf16.mxu0 %v5404_v26  ;;  %v5255_v26 = vpop.xlane.xlu1 %5254 }
 0x842   : > { %5534 = vmatmul.mubr.bf16.gmra.mrb[204].mxu0 %v5403_v37  ;;  %v5357_v37 = vmul.f32 %v9359_v10, %v13978_v18 }
 0x843   : > { %5541 = vmatprep.mubr.bf16.mxu0 %v5406_v3  ;;  %v5261_v3 = vpop.xlane.xlu1 %5260 }
 0x847   : > { %v5267_v9 = vpop.xlane.xlu1 %5266 }
 0x84a   : > { %5542 = vmatmul.mubr.bf16.gmra.mrb[208].mxu0 %v5405_v31 }
 0x856   : > { %v5012_v6 = vpop.xlane.xlu0 %5011 }
 0x857   : > { %v5075_v50 = vsub.f32 %v14069_v22, %v5012_v6  ;;  %v5076_v19 = vsub.f32 %v14072_v34, %v5012_v6 }
 0x859   : > { %v5201_v12 = vmul.f32 1.442695, %v5075_v50  ;;  %v5203_v39 = vmul.f32 1.442695, %v5076_v19 }
 0x85a   : > { %v5240_v54 = vpop.xlane.xlu0 %5239 }
 0x85b   : > { %9360 = vpow2.f32 %v5201_v12 }
 0x85c   : > { %9362 = vpow2.f32 %v5203_v39 }
 0x85d   : > { %9364 = vrcp.f32 %v5240_v54 }
 0x85e   : > { %v5246_v52 = vpop.xlane.xlu0 %5245 }
 0x85f   : > { %9366 = vrcp.f32 %v5246_v52  ;;  %v5273_v52 = vpop.xlane.xlu1 %5272 }
 0x862   : > { %v5252_v8 = vpop.xlane.xlu0 %5251 }
 0x863   : > { %9368 = vrcp.f32 %v5252_v8 }
 0x864   : > { %9370 = vrcp.f32 %v5249_v32 }
 0x865   : > { %v14182_v23 = vpop.eup %9360 }
 0x866   : > { %v14184_v22 = vpop.eup %9362  ;;  %v5258_v60 = vpop.xlane.xlu0 %5257 }
 0x867   : > { %v9365_v34 = vpop.eup %9364  ;;  %v5298_v14 = vadd.f32 %v14184_v22, %v14182_v23  ;;  %9372 = vrcp.f32 %v5258_v60 }
 0x868   : > { %v5356_v1 = vmul.f32 %v9365_v34, %v14082_v24  ;;  %v5355_v47 = vmul.f32 %v9365_v34, %v14078_v58  ;;  %9374 = vrcp.f32 %v5255_v26 }
 0x869   : > { %v9367_v46 = vpop.eup %9366  ;;  %5299 = vadd.xlane.f32.xlu0 %v5298_v14  ;;  %v5279_v14 = vpop.xlane.xlu1 %5278 }
 0x86a   : > { %v5408_v29 = vpack.c.bf16 %v5356_v1, %v5354_v0  ;;  %v5407_v35 = vpack.c.bf16 %v5355_v47, %v5353_v45  ;;  %v5360_v55 = vmul.f32 %v9367_v46, %v14092_v44  ;;  %v5359_v59 = vmul.f32 %v9367_v46, %v14088_v43  ;;  %v5264_v58 = vpop.xlane.xlu0 %5263 }
 0x86b   : > { %9376 = vrcp.f32 %v5264_v58  ;;  %v16373_v58 = vld [vmem:[#allocation76_spill] sm:$0xff] }
 0x86c   : > { %5549 = vmatprep.mubr.bf16.mxu0 %v5408_v29  ;;  %v5410_v48 = vpack.c.bf16 %v5360_v55, %v5358_v56  ;;  %v5409_v44 = vpack.c.bf16 %v5359_v59, %v5357_v37  ;;  %9378 = vrcp.f32 %v5261_v3  ;;  %v16372_v59 = vld [vmem:[#allocation16_spill] sm:$0xff] }
 0x86d   : > { %v9369_v17 = vpop.eup %9368  ;;  %5550 = vmatmul.mubr.bf16.gmra.mrb[212].mxu0 %v5407_v35  ;;  %v5285_v29 = vpop.xlane.xlu1 %5284 }
 0x86e   : > { %5557 = vmatprep.mubr.bf16.mxu0 %v5410_v48  ;;  %v9371_v25 = vpop.eup %9370  ;;  %v5364_v24 = vmul.f32 %v9369_v17, %v14100_v2  ;;  %v5363_v42 = vmul.f32 %v9369_v17, %v14096_v40  ;;  %v5270_v6 = vpop.xlane.xlu0 %5269  ;;  %v16371_v17 = vld [vmem:[#allocation89_spill] sm:$0xff] }
 0x86f   : > { %v5362_v30 = vmul.f32 %v9371_v25, %v13992_v38  ;;  %v5361_v2 = vmul.f32 %v9371_v25, %v13988_v13  ;;  %9380 = vrcp.f32 %v5270_v6  ;;  %v16376_v6 = vld [vmem:[#allocation69_spill] sm:$0xff] }
 0x870   : > { %9382 = vrcp.f32 %v5267_v9 }
 0x871   : > { %v5412_v4 = vpack.c.bf16 %v5364_v24, %v5362_v30  ;;  %v9373_v28 = vpop.eup %9372  ;;  %v5411_v38 = vpack.c.bf16 %v5363_v42, %v5361_v2  ;;  %v5291_v37 = vpop.xlane.xlu1 %5290  ;;  %v16377_v2 = vld [vmem:[#allocation73_spill] sm:$0xff] }
 0x872   : > { %v9375_v31 = vpop.eup %9374  ;;  %v5368_v43 = vmul.f32 %v9373_v28, %v14108_v63  ;;  %v5367_v39 = vmul.f32 %v9373_v28, %v14104_v61  ;;  %v5276_v54 = vpop.xlane.xlu0 %5275  ;;  %v9208_v61 = vld [vmem:[%s15602_s8] sm:$0xff]  }
 0x873   : > { %v5366_v18 = vmul.f32 %v9375_v31, %v13998_v33  ;;  %v5365_v63 = vmul.f32 %v9375_v31, %v13994_v57  ;;  %9384 = vrcp.f32 %v5276_v54  ;;  %v9209_v57 = vld [vmem:[%s15602_s8 + $0x8] sm:$0xff]   ;;  %8520 = vmatprep.subr.bf16.mxu1 %v9208_v61  ;;  %v16375_v31 = vld [vmem:[#allocation88_spill] sm:$0xff] }
 0x874   : > { %9386 = vrcp.f32 %v5273_v52  ;;  %8521 = vmatpush3.bf16.msra.mxu1 %v9208_v61  ;;  %v16379_v54 = vld [vmem:[#allocation47_spill] sm:$0xff]  ;;  %v16380_v52 = vld [vmem:[#allocation86_spill] sm:$0xff]  ;;  %v16382_v61 = vld [vmem:[#allocation84_spill] sm:$0xff] }
 0x875   : > { %5558 = vmatmul.mubr.bf16.gmra.mrb[216].mxu0 %v5409_v44  ;;  %v5414_v50 = vpack.c.bf16 %v5368_v43, %v5366_v18  ;;  %v9377_v19 = vpop.eup %9376  ;;  %v5413_v33 = vpack.c.bf16 %v5367_v39, %v5365_v63  ;;  %8522 = vmatprep.subr.bf16.mxu1 %v9209_v57  ;;  %v16378_v18 = vld [vmem:[#allocation77_spill] sm:$0xff] }
 0x876   : > { %5565 = vmatprep.mubr.bf16.mxu0 %v5412_v4  ;;  %v9379_v12 = vpop.eup %9378  ;;  %v5372_v40 = vmul.f32 %v9377_v19, %v14116_v7  ;;  %v5371_v10 = vmul.f32 %v9377_v19, %v14112_v41  ;;  %v5282_v7 = vpop.xlane.xlu0 %5281 }
 0x877   : > { %v5370_v13 = vmul.f32 %v9379_v12, %v14006_v15  ;;  %v5369_v34 = vmul.f32 %v9379_v12, %v14002_v21  ;;  %9388 = vrcp.f32 %v5282_v7  ;;  %v9210_v21 = vld [vmem:[%s15602_s8 + $0x10] sm:$0xff]  }
 0x878   : > { %9390 = vrcp.f32 %v5279_v14  ;;  %8523 = vmatpush3.bf16.msra.mxu1 %v9209_v57 }
 0x879   : > { %v5416_v32 = vpack.c.bf16 %v5372_v40, %v5370_v13  ;;  %v9381_v8 = vpop.eup %9380  ;;  %v5415_v41 = vpack.c.bf16 %v5371_v10, %v5369_v34  ;;  %8524 = vmatprep.subr.bf16.mxu1 %v9210_v21 }
 0x87a   : > { %v9383_v49 = vpop.eup %9382  ;;  %v5376_v15 = vmul.f32 %v9381_v8, %v14124_v27  ;;  %v5375_v47 = vmul.f32 %v9381_v8, %v14120_v62  ;;  %v5288_v27 = vpop.xlane.xlu0 %5287 }
 0x87b   : > { %v5374_v60 = vmul.f32 %v9383_v49, %v14012_v53  ;;  %v9211_v53 = vld [vmem:[%s15602_s8 + $0x18] sm:$0xff]   ;;  %v5373_v26 = vmul.f32 %v9383_v49, %v14008_v20  ;;  %9392 = vrcp.f32 %v5288_v27 }
 0x87c   : > { %8525 = vmatpush3.bf16.msra.mxu1 %v9210_v21  ;;  %9394 = vrcp.f32 %v5285_v29 }
 0x87d   : > { %5566 = vmatmul.mubr.bf16.gmra.mrb[220].mxu0 %v5411_v38  ;;  %v5418_v0 = vpack.c.bf16 %v5376_v15, %v5374_v60  ;;  %v9385_v1 = vpop.eup %9384  ;;  %v5417_v62 = vpack.c.bf16 %v5375_v47, %v5373_v26  ;;  %8526 = vmatprep.subr.bf16.mxu1 %v9211_v53  ;;  %v14240_v60 = vstv %s7363_s30  ;;  %s7364_s30 = sld [smem:[#allocation3 + $0x2]] }
 0x87e   : > { %5573 = vmatprep.mubr.bf16.mxu0 %v5414_v50  ;;  %v9387_v45 = vpop.eup %9386  ;;  %v5380_v46 = vmul.f32 %v9385_v1, %v14130_v11  ;;  %v5379_v25 = vmul.f32 %v9385_v1, %v16371_v17  ;;  %v5294_v11 = vpop.xlane.xlu0 %5293  ;;  %v16386_v17 = vld [vmem:[#allocation57_spill] sm:$0xff] }
 0x87f   : > { %v5378_v35 = vmul.f32 %v9387_v45, %v14022_v36  ;;  %v5377_v24 = vmul.f32 %v9387_v45, %v16373_v58  ;;  %v16374_v36 = vld [vmem:[#allocation85_spill] sm:$0xff]  ;;  %9396 = vrcp.f32 %v5294_v11 }
 0x880   : > { %8527 = vmatpush3.bf16.msra.mxu1 %v9211_v53  ;;  %9398 = vrcp.f32 %v5291_v37 }
 0x881   : > { %v5420_v56 = vpack.c.bf16 %v5380_v46, %v5378_v35  ;;  %v9389_v55 = vpop.eup %9388  ;;  %v5419_v30 = vpack.c.bf16 %v5379_v25, %v5377_v24  ;;  %v16383_v46 = vld [vmem:[#allocation38_spill] sm:$0xff] }
 0x882   : > { %v9391_v48 = vpop.eup %9390  ;;  %v5384_v20 = vmul.f32 %v9389_v55, %v16372_v59  ;;  %v5383_v42 = vmul.f32 %v9389_v55, %v16375_v31  ;;  %v16384_v55 = vld [vmem:[#allocation63_spill] sm:$0xff] }
 0x883   : > { %v5382_v3 = vmul.f32 %v9391_v48, %v16374_v36  ;;  %v5381_v9 = vmul.f32 %v9391_v48, %v16377_v2  ;;  %v16388_v36 = vld [vmem:[#allocation60_spill] sm:$0xff] }
 0x885   : > { %5574 = vmatmul.mubr.bf16.gmra.mrb[224].mxu0 %v5413_v33  ;;  %v5422_v44 = vpack.c.bf16 %v5384_v20, %v5382_v3  ;;  %v9393_v4 = vpop.eup %9392  ;;  %v5421_v50 = vpack.c.bf16 %v5383_v42, %v5381_v9  ;;  %v16381_v33 = vld [vmem:[#allocation87_spill] sm:$0xff] }
 0x886   : > { %5581 = vmatprep.mubr.bf16.mxu0 %v5416_v32  ;;  %v9395_v28 = vpop.eup %9394  ;;  %v5388_v43 = vmul.f32 %v9393_v4, %v16376_v6  ;;  %v5387_v40 = vmul.f32 %v9393_v4, %v16379_v54 }
 0x887   : > { %v5386_v38 = vmul.f32 %v9395_v28, %v16378_v18  ;;  %v5385_v13 = vmul.f32 %v9395_v28, %v16380_v52 }
 0x889   : > { %v5424_v19 = vpack.c.bf16 %v5388_v43, %v5386_v38  ;;  %v9397_v12 = vpop.eup %9396  ;;  %v5423_v8 = vpack.c.bf16 %v5387_v40, %v5385_v13  ;;  %v16392_v38 = vld [vmem:[#allocation82_spill] sm:$0xff] }
 0x88a   : > { %v9399_v39 = vpop.eup %9398  ;;  %v5392_v63 = vmul.f32 %v9397_v12, %v14148_v5  ;;  %v5391_v10 = vmul.f32 %v9397_v12, %v14144_v51 }
 0x88b   : > { %v5390_v32 = vmul.f32 %v9399_v39, %v16381_v33  ;;  %v5389_v57 = vmul.f32 %v9399_v39, %v16382_v61  ;;  %v16398_v61 = vld [vmem:[#allocation67_spill] sm:$0xff] }
 0x88d   : > { %5582 = vmatmul.mubr.bf16.gmra.mrb[228].mxu0 %v5415_v41  ;;  %v5426_v49 = vpack.c.bf16 %v5392_v63, %v5390_v32  ;;  %v5425_v7 = vpack.c.bf16 %v5391_v10, %v5389_v57 }
 0x88e   : > { %5589 = vmatprep.mubr.bf16.mxu0 %v5418_v0 }
 0x895   : > { %5590 = vmatmul.mubr.bf16.gmra.mrb[232].mxu0 %v5417_v62 }
 0x896   : > { %5597 = vmatprep.mubr.bf16.mxu0 %v5420_v56 }
 0x89d   : > { %5598 = vmatmul.mubr.bf16.gmra.mrb[236].mxu0 %v5419_v30  ;;  %v16390_v30 = vld [vmem:[#allocation54_spill] sm:$0xff] }
 0x89e   : > { %5605 = vmatprep.mubr.bf16.mxu0 %v5422_v44 }
 0x8a5   : > { %5606 = vmatmul.mubr.bf16.gmra.mrb[240].mxu0 %v5421_v50 }
 0x8a6   : > { %5613 = vmatprep.mubr.bf16.mxu0 %v5424_v19  ;;  %v16394_v19 = vld [vmem:[#allocation68_spill] sm:$0xff] }
 0x8ad   : > { %5614 = vmatmul.mubr.bf16.gmra.mrb[244].mxu0 %v5423_v8 }
 0x8ae   : > { %5621 = vmatprep.mubr.bf16.mxu0 %v5426_v49  ;;  %v16396_v49 = vld [vmem:[#allocation81_spill] sm:$0xff] }
 0x8b3   : > { %v5297_v15 = vpop.xlane.xlu1 %5296 }
 0x8b4   : > { %9400 = vrcp.f32 %v5297_v15 }
 0x8b5   : > { %5622 = vmatmul.mubr.bf16.gmra.mrb[248].mxu0 %v5425_v7 }
 0x8be   : > { %v9401_v41 = vpop.eup %9400 }
 0x8bf   : > { %v5394_v53 = vmul.f32 %v9401_v41, %v14160_v16  ;;  %v5393_v26 = vmul.f32 %v9401_v41, %v16383_v46 }
 0x8f6   : > { %v5300_v34 = vpop.xlane.xlu0 %5299 }
 0x8f7   : > { %9402 = vrcp.f32 %v5300_v34 }
 0x8fd   : > { %v8124_v5 = vpop.f32.mrb[192].mxu0 }
 0x8fe   : > { %v8125_v14 = vpop.f32.mrb[193].mxu0 }
 0x8ff   : > { %v8126_v0 = vadd.f32 %v8125_v14, %v8124_v5  ;;  %v8127_v1 = vpop.f32.mrb[194].mxu0 }
 0x900   : > { %v8128_v45 = vpop.f32.mrb[195].mxu0 }
 0x901   : > { %v9403_v47 = vpop.eup %9402  ;;  %v5639_v51 = vmul.f32 %v8126_v0, %v14240_v60  ;;  %v8129_v21 = vadd.f32 %v8128_v45, %v8127_v1 }
 0x902   : > { %v5396_v27 = vmul.f32 %v9403_v47, %v14184_v22  ;;  %v5395_v29 = vmul.f32 %v9403_v47, %v14182_v23  ;;  %v16400_v47 = vld [vmem:[#allocation79_spill] sm:$0xff] }
 0x903   : > { %v5640_v35 = vmul.f32 %v8129_v21, %v14240_v60  ;;  %v14249_v48 = vadd.f32 %v5639_v51, %v16384_v55  ;;  %v16402_v21 = vld [vmem:[#allocation78_spill] sm:$0xff] }
 0x904   : > { %v5428_v62 = vpack.c.bf16 %v5396_v27, %v5394_v53  ;;  %v5427_v56 = vpack.c.bf16 %v5395_v29, %v5393_v26 }
 0x905   : > { %16385 = vst [vmem:[#allocation39_spill] sm:$0xff] %v14249_v48  ;;  %v14252_v25 = vadd.f32 %v5640_v35, %v16386_v17  ;;  %v8130_v11 = vpop.f32.mrb[196].mxu0 }
 0x906   : > { %5629 = vmatprep.mubr.bf16.mxu0 %v5428_v62  ;;  %v8131_v59 = vpop.f32.mrb[197].mxu0 }
 0x907   : > { %16387 = vst [vmem:[#allocation58_spill] sm:$0xff] %v14252_v25  ;;  %v5767_v16 = vpack.c.bf16 %v14252_v25, %v14249_v48  ;;  %v8132_v22 = vadd.f32 %v8131_v59, %v8130_v11  ;;  %5630 = vmatmul.mubr.bf16.gmra.mrb[252].mxu0 %v5427_v56  ;;  %v8133_v20 = vpop.f32.mrb[198].mxu0  ;;  %v16404_v11 = vld [vmem:[#allocation80_spill] sm:$0xff] }
 0x908   : > { %v8134_v23 = vpop.f32.mrb[199].mxu0 }
 0x909   : > { %v5641_v58 = vmul.f32 %v8132_v22, %v14240_v60  ;;  %v8135_v24 = vadd.f32 %v8134_v23, %v8133_v20  ;;  %8528 = vmatprep.mubr.msk.bf16.mxu1 %vm462_vm0, %v5767_v16  ;;  %v16406_v16 = vld [vmem:[#allocation83_spill] sm:$0xff] }
 0x90b   : > { %v5642_v37 = vmul.f32 %v8135_v24, %v14240_v60  ;;  %v14260_v3 = vadd.f32 %v5641_v58, %v16388_v36 }
 0x90d   : > { %16389 = vst [vmem:[#allocation59_spill] sm:$0xff] %v14260_v3  ;;  %v14263_v44 = vadd.f32 %v5642_v37, %v16390_v30  ;;  %v8136_v4 = vpop.f32.mrb[200].mxu0 }
 0x90e   : > { %v8137_v28 = vpop.f32.mrb[201].mxu0 }
 0x90f   : > { %16391 = vst [vmem:[#allocation55_spill] sm:$0xff] %v14263_v44  ;;  %v5768_v31 = vpack.c.bf16 %v14263_v44, %v14260_v3  ;;  %v8138_v42 = vadd.f32 %v8137_v28, %v8136_v4  ;;  %v8139_v6 = vpop.f32.mrb[202].mxu0 }
 0x910   : > { %v8140_v43 = vpop.f32.mrb[203].mxu0 }
 0x911   : > { %v5643_v2 = vmul.f32 %v8138_v42, %v14240_v60  ;;  %v8141_v9 = vadd.f32 %v8140_v43, %v8139_v6  ;;  %8529 = vmatmul.mubr.msk.bf16.vlgmr.msra.gmra.mrb[224].mxu1 %vm462_vm0, %v5768_v31  ;;  %v16408_v31 = vld [vmem:[#allocation25_spill] sm:$0xff]  ;;  %v16410_v6 = vld [vmem:[#allocation31_spill] sm:$0xff] }
 0x913   : > { %v5644_v18 = vmul.f32 %v8141_v9, %v14240_v60  ;;  %v14271_v50 = vadd.f32 %v5643_v2, %v16392_v38 }
 0x915   : > { %16393 = vst [vmem:[#allocation56_spill] sm:$0xff] %v14271_v50  ;;  %v14274_v12 = vadd.f32 %v5644_v18, %v16394_v19  ;;  %v8142_v39 = vpop.f32.mrb[204].mxu0 }
 0x916   : > { %v8143_v54 = vpop.f32.mrb[205].mxu0 }
 0x917   : > { %16395 = vst [vmem:[#allocation64_spill] sm:$0xff] %v14274_v12  ;;  %v5769_v40 = vpack.c.bf16 %v14274_v12, %v14271_v50  ;;  %v8144_v63 = vadd.f32 %v8143_v54, %v8142_v39  ;;  %v8145_v52 = vpop.f32.mrb[206].mxu0 }
 0x918   : > { %v8146_v13 = vpop.f32.mrb[207].mxu0 }
 0x919   : > { %v5645_v33 = vmul.f32 %v8144_v63, %v14240_v60  ;;  %v8147_v32 = vadd.f32 %v8146_v13, %v8145_v52  ;;  %8532 = vmatprep.mubr.msk.bf16.mxu1 %vm462_vm0, %v5769_v40  ;;  %v16412_v52 = vld [vmem:[#allocation91_spill] sm:$0xff] }
 0x91b   : > { %v5646_v8 = vmul.f32 %v8147_v32, %v14240_v60  ;;  %v14282_v10 = vadd.f32 %v5645_v33, %v16396_v49  ;;  %v16414_v33 = vld [vmem:[#allocation17_spill] sm:$0xff] }
 0x91d   : > { %16397 = vst [vmem:[#allocation65_spill] sm:$0xff] %v14282_v10  ;;  %v14285_v57 = vadd.f32 %v5646_v8, %v16398_v61  ;;  %v8148_v7 = vpop.f32.mrb[208].mxu0 }
 0x91e   : > { %v8149_v15 = vpop.f32.mrb[209].mxu0 }
 0x91f   : > { %16399 = vst [vmem:[#allocation61_spill] sm:$0xff] %v14285_v57  ;;  %v5770_v34 = vpack.c.bf16 %v14285_v57, %v14282_v10  ;;  %v8150_v5 = vadd.f32 %v8149_v15, %v8148_v7  ;;  %v8151_v14 = vpop.f32.mrb[210].mxu0  ;;  %v5749_v10 = vld [vmem:[%s15605_s11 + $0x170] sm:$0xff] }
 0x920   : > { %v8152_v41 = vpop.f32.mrb[211].mxu0 }
 0x921   : > { %v5647_v0 = vmul.f32 %v8150_v5, %v14240_v60  ;;  %v8153_v1 = vadd.f32 %v8152_v41, %v8151_v14  ;;  %8533 = vmatmul.mubr.msk.bf16.gmra.mrb[228].mxu1 %vm462_vm0, %v5770_v34 }
 0x923   : > { %v5648_v45 = vmul.f32 %v8153_v1, %v14240_v60  ;;  %v14293_v51 = vadd.f32 %v5647_v0, %v16400_v47  ;;  %v16416_v0 = vld [vmem:[#allocation94_spill] sm:$0xff] }
 0x925   : > { %16401 = vst [vmem:[#allocation62_spill] sm:$0xff] %v14293_v51  ;;  %v14296_v53 = vadd.f32 %v5648_v45, %v16402_v21  ;;  %v16418_v45 = vld [vmem:[#allocation95_spill] sm:$0xff] }
 0x927   : > { %16403 = vst [vmem:[#allocation71_spill] sm:$0xff] %v14296_v53  ;;  %v5771_v27 = vpack.c.bf16 %v14296_v53, %v14293_v51  ;;  %v5743_v51 = vld [vmem:[%s15605_s11 + $0x140] sm:$0xff] }
 0x929   : > { %8536 = vmatprep.mubr.msk.bf16.mxu1 %vm462_vm0, %v5771_v27 }
 0x940   : > { %v8154_v46 = vpop.f32.mrb[212].mxu0 }
 0x941   : > { %v8155_v26 = vpop.f32.mrb[213].mxu0 }
 0x942   : > { %v8156_v29 = vadd.f32 %v8155_v26, %v8154_v46  ;;  %v8157_v35 = vpop.f32.mrb[214].mxu0 }
 0x943   : > { %v8158_v62 = vpop.f32.mrb[215].mxu0 }
 0x944   : > { %v5649_v56 = vmul.f32 %v8156_v29, %v14240_v60  ;;  %v8159_v55 = vadd.f32 %v8158_v62, %v8157_v35 }
 0x946   : > { %v5650_v17 = vmul.f32 %v8159_v55, %v14240_v60  ;;  %v14304_v59 = vadd.f32 %v5649_v56, %v16404_v11 }
 0x948   : > { %16405 = vst [vmem:[#allocation72_spill] sm:$0xff] %v14304_v59  ;;  %v14307_v22 = vadd.f32 %v5650_v17, %v16406_v16  ;;  %v8160_v20 = vpop.f32.mrb[216].mxu0  ;;  %v16420_v17 = vld [vmem:[#allocation93_spill] sm:$0xff]  ;;  %v16422_v16 = vld [vmem:[#allocation90_spill] sm:$0xff] }
 0x949   : > { %v8161_v23 = vpop.f32.mrb[217].mxu0 }
 0x94a   : > { %16407 = vst [vmem:[#allocation74_spill] sm:$0xff] %v14307_v22  ;;  %v5772_v58 = vpack.c.bf16 %v14307_v22, %v14304_v59  ;;  %v8162_v24 = vadd.f32 %v8161_v23, %v8160_v20  ;;  %v8163_v37 = vpop.f32.mrb[218].mxu0 }
 0x94b   : > { %v8164_v36 = vpop.f32.mrb[219].mxu0 }
 0x94c   : > { %v5651_v30 = vmul.f32 %v8162_v24, %v14240_v60  ;;  %v8165_v4 = vadd.f32 %v8164_v36, %v8163_v37  ;;  %8537 = vmatmul.mubr.msk.bf16.gmra.mrb[232].mxu1 %vm462_vm0, %v5772_v58 }
 0x94e   : > { %v5652_v28 = vmul.f32 %v8165_v4, %v14240_v60  ;;  %v14315_v42 = vadd.f32 %v5651_v30, %v16408_v31 }
 0x950   : > { %16409 = vst [vmem:[#allocation75_spill] sm:$0xff] %v14315_v42  ;;  %v14318_v43 = vadd.f32 %v5652_v28, %v16410_v6  ;;  %v8166_v2 = vpop.f32.mrb[220].mxu0  ;;  %v16424_v6 = vld [vmem:[#allocation92_spill] sm:$0xff] }
 0x951   : > { %v8167_v9 = vpop.f32.mrb[221].mxu0 }
 0x952   : > { %16411 = vst [vmem:[#allocation70_spill] sm:$0xff] %v14318_v43  ;;  %v5773_v18 = vpack.c.bf16 %v14318_v43, %v14315_v42  ;;  %v8168_v38 = vadd.f32 %v8167_v9, %v8166_v2  ;;  %v8169_v19 = vpop.f32.mrb[222].mxu0  ;;  %v16426_v9 = vld [vmem:[#allocation97_spill] sm:$0xff]  ;;  %v5735_v42 = vld [vmem:[%s15605_s11 + $0x100] sm:$0xff] }
 0x953   : > { %v8170_v39 = vpop.f32.mrb[223].mxu0 }
 0x954   : > { %v5653_v54 = vmul.f32 %v8168_v38, %v14240_v60  ;;  %v8171_v40 = vadd.f32 %v8170_v39, %v8169_v19  ;;  %8540 = vmatprep.mubr.msk.bf16.mxu1 %vm462_vm0, %v5773_v18 }
 0x956   : > { %v5654_v63 = vmul.f32 %v8171_v40, %v14240_v60  ;;  %v14326_v13 = vadd.f32 %v5653_v54, %v16412_v52 }
 0x958   : > { %16413 = vst [vmem:[#allocation89_spill] sm:$0xff] %v14326_v13  ;;  %v14329_v32 = vadd.f32 %v5654_v63, %v16414_v33  ;;  %v8172_v8 = vpop.f32.mrb[224].mxu0 }
 0x959   : > { %v8173_v49 = vpop.f32.mrb[225].mxu0 }
 0x95a   : > { %16415 = vst [vmem:[#allocation16_spill] sm:$0xff] %v14329_v32  ;;  %v5774_v61 = vpack.c.bf16 %v14329_v32, %v14326_v13  ;;  %v8174_v7 = vadd.f32 %v8173_v49, %v8172_v8  ;;  %v8175_v15 = vpop.f32.mrb[226].mxu0  ;;  %v16428_v49 = vld [vmem:[#allocation96_spill] sm:$0xff] }
 0x95b   : > { %v8176_v34 = vpop.f32.mrb[227].mxu0 }
 0x95c   : > { %v5655_v5 = vmul.f32 %v8174_v7, %v14240_v60  ;;  %v8177_v14 = vadd.f32 %v8176_v34, %v8175_v15  ;;  %8541 = vmatmul.mubr.msk.bf16.gmra.mrb[236].mxu1 %vm462_vm0, %v5774_v61  ;;  %v16430_v7 = vld [vmem:[#allocation100_spill] sm:$0xff] }
 0x95e   : > { %v5656_v41 = vmul.f32 %v8177_v14, %v14240_v60  ;;  %v14337_v1 = vadd.f32 %v5655_v5, %v16416_v0 }
 0x960   : > { %16417 = vst [vmem:[#allocation76_spill] sm:$0xff] %v14337_v1  ;;  %v14340_v47 = vadd.f32 %v5656_v41, %v16418_v45  ;;  %v8178_v21 = vpop.f32.mrb[228].mxu0 }
 0x961   : > { %v8179_v27 = vpop.f32.mrb[229].mxu0 }
 0x962   : > { %16419 = vst [vmem:[#allocation85_spill] sm:$0xff] %v14340_v47  ;;  %v5775_v46 = vpack.c.bf16 %v14340_v47, %v14337_v1  ;;  %v8180_v26 = vadd.f32 %v8179_v27, %v8178_v21  ;;  %v8181_v29 = vpop.f32.mrb[230].mxu0  ;;  %v5727_v1 = vld [vmem:[%s15605_s11 + $0xc0] sm:$0xff] }
 0x963   : > { %v8182_v35 = vpop.f32.mrb[231].mxu0 }
 0x964   : > { %v5657_v62 = vmul.f32 %v8180_v26, %v14240_v60  ;;  %v8183_v56 = vadd.f32 %v8182_v35, %v8181_v29  ;;  %8544 = vmatprep.mubr.msk.bf16.mxu1 %vm462_vm0, %v5775_v46  ;;  %v16432_v26 = vld [vmem:[#allocation99_spill] sm:$0xff]  ;;  %v16434_v35 = vld [vmem:[#allocation28_spill] sm:$0xff] }
 0x966   : > { %v5658_v55 = vmul.f32 %v8183_v56, %v14240_v60  ;;  %v14348_v11 = vadd.f32 %v5657_v62, %v16420_v17 }
 0x968   : > { %16421 = vst [vmem:[#allocation88_spill] sm:$0xff] %v14348_v11  ;;  %v14351_v20 = vadd.f32 %v5658_v55, %v16422_v16  ;;  %v8184_v23 = vpop.f32.mrb[232].mxu0 }
 0x969   : > { %v8185_v58 = vpop.f32.mrb[233].mxu0 }
 0x96a   : > { %16423 = vst [vmem:[#allocation69_spill] sm:$0xff] %v14351_v20  ;;  %v5776_v24 = vpack.c.bf16 %v14351_v20, %v14348_v11  ;;  %v8186_v37 = vadd.f32 %v8185_v58, %v8184_v23  ;;  %v8187_v36 = vpop.f32.mrb[234].mxu0 }
 0x96b   : > { %v8188_v30 = vpop.f32.mrb[235].mxu0 }
 0x96c   : > { %v5659_v4 = vmul.f32 %v8186_v37, %v14240_v60  ;;  %v8189_v28 = vadd.f32 %v8188_v30, %v8187_v36  ;;  %8545 = vmatmul.mubr.msk.bf16.gmra.mrb[240].mxu1 %vm462_vm0, %v5776_v24  ;;  %v16436_v30 = vld [vmem:[#allocation33_spill] sm:$0xff] }
 0x96e   : > { %v5660_v31 = vmul.f32 %v8189_v28, %v14240_v60  ;;  %v14359_v2 = vadd.f32 %v5659_v4, %v16424_v6  ;;  %v16438_v28 = vld [vmem:[#allocation98_spill] sm:$0xff] }
 0x970   : > { %16425 = vst [vmem:[#allocation73_spill] sm:$0xff] %v14359_v2  ;;  %v14362_v18 = vadd.f32 %v5660_v31, %v16426_v9  ;;  %v8190_v38 = vpop.f32.mrb[236].mxu0 }
 0x971   : > { %v8191_v19 = vpop.f32.mrb[237].mxu0 }
 0x972   : > { %16427 = vst [vmem:[#allocation77_spill] sm:$0xff] %v14362_v18  ;;  %v5777_v39 = vpack.c.bf16 %v14362_v18, %v14359_v2  ;;  %v8192_v54 = vadd.f32 %v8191_v19, %v8190_v38  ;;  %v8193_v40 = vpop.f32.mrb[238].mxu0  ;;  %v5719_v18 = vld [vmem:[%s15605_s11 + $0x80] sm:$0xff]  ;;  %v5720_v2 = vld [vmem:[%s15605_s11 + $0x88] sm:$0xff] }
 0x973   : > { %v8194_v63 = vpop.f32.mrb[239].mxu0 }
 0x974   : > { %v5661_v52 = vmul.f32 %v8192_v54, %v14240_v60  ;;  %v8195_v33 = vadd.f32 %v8194_v63, %v8193_v40  ;;  %8548 = vmatprep.mubr.msk.bf16.mxu1 %vm462_vm0, %v5777_v39 }
 0x976   : > { %v5662_v8 = vmul.f32 %v8195_v33, %v14240_v60  ;;  %v14370_v61 = vadd.f32 %v5661_v52, %v16428_v49  ;;  %v16440_v33 = vld [vmem:[#allocation35_spill] sm:$0xff]  ;;  %v16442_v49 = vld [vmem:[#allocation32_spill] sm:$0xff] }
 0x978   : > { %16429 = vst [vmem:[#allocation47_spill] sm:$0xff] %v14370_v61  ;;  %v14373_v15 = vadd.f32 %v5662_v8, %v16430_v7  ;;  %v8196_v34 = vpop.f32.mrb[240].mxu0 }
 0x979   : > { %v8197_v5 = vpop.f32.mrb[241].mxu0 }
 0x97a   : > { %16431 = vst [vmem:[#allocation86_spill] sm:$0xff] %v14373_v15  ;;  %v5778_v14 = vpack.c.bf16 %v14373_v15, %v14370_v61  ;;  %v8198_v41 = vadd.f32 %v8197_v5, %v8196_v34  ;;  %v8199_v0 = vpop.f32.mrb[242].mxu0 }
 0x97b   : > { %v8200_v45 = vpop.f32.mrb[243].mxu0 }
 0x97c   : > { %v5663_v21 = vmul.f32 %v8198_v41, %v14240_v60  ;;  %v8201_v27 = vadd.f32 %v8200_v45, %v8199_v0  ;;  %8549 = vmatmul.mubr.msk.bf16.gmra.mrb[244].mxu1 %vm462_vm0, %v5778_v14 }
 0x97e   : > { %v5664_v46 = vmul.f32 %v8201_v27, %v14240_v60  ;;  %v14381_v29 = vadd.f32 %v5663_v21, %v16432_v26  ;;  %v16444_v26 = vld [vmem:[#allocation46_spill] sm:$0xff] }
 0x980   : > { %16433 = vst [vmem:[#allocation87_spill] sm:$0xff] %v14381_v29  ;;  %v14384_v62 = vadd.f32 %v5664_v46, %v16434_v35  ;;  %v8202_v56 = vpop.f32.mrb[244].mxu0 }
 0x981   : > { %v8203_v55 = vpop.f32.mrb[245].mxu0 }
 0x982   : > { %16435 = vst [vmem:[#allocation84_spill] sm:$0xff] %v14384_v62  ;;  %v5779_v17 = vpack.c.bf16 %v14384_v62, %v14381_v29  ;;  %v8204_v16 = vadd.f32 %v8203_v55, %v8202_v56  ;;  %v8205_v23 = vpop.f32.mrb[246].mxu0  ;;  %v16446_v56 = vld [vmem:[#allocation66_spill] sm:$0xff] }
 0x983   : > { %v8206_v58 = vpop.f32.mrb[247].mxu0 }
 0x984   : > { %v5665_v24 = vmul.f32 %v8204_v16, %v14240_v60  ;;  %v8207_v37 = vadd.f32 %v8206_v58, %v8205_v23  ;;  %8552 = vmatprep.mubr.msk.bf16.mxu1 %vm462_vm0, %v5779_v17  ;;  %v14424_v23 = vld [vmem:[%s15603_s9] ss:$0 sm:$0xff] }
 0x986   : > { %v5666_v36 = vmul.f32 %v8207_v37, %v14240_v60  ;;  %v14392_v4 = vadd.f32 %v5665_v24, %v16436_v30 }
 0x988   : > { %16437 = vst [vmem:[#allocation38_spill] sm:$0xff] %v14392_v4  ;;  %v14395_v31 = vadd.f32 %v5666_v36, %v16438_v28  ;;  %v8208_v6 = vpop.f32.mrb[248].mxu0 }
 0x989   : > { %v8209_v9 = vpop.f32.mrb[249].mxu0 }
 0x98a   : > { %16439 = vst [vmem:[#allocation63_spill] sm:$0xff] %v14395_v31  ;;  %v5780_v38 = vpack.c.bf16 %v14395_v31, %v14392_v4  ;;  %v8210_v19 = vadd.f32 %v8209_v9, %v8208_v6  ;;  %v8211_v39 = vpop.f32.mrb[250].mxu0 }
 0x98b   : > { %v8212_v54 = vpop.f32.mrb[251].mxu0 }
 0x98c   : > { %v5667_v40 = vmul.f32 %v8210_v19, %v14240_v60  ;;  %v8213_v63 = vadd.f32 %v8212_v54, %v8211_v39  ;;  %8553 = vmatmul.mubr.msk.bf16.gmra.mrb[248].mxu1 %vm462_vm0, %v5780_v38 }
 0x98e   : > { %v5668_v52 = vmul.f32 %v8213_v63, %v14240_v60  ;;  %v14403_v8 = vadd.f32 %v5667_v40, %v16440_v33 }
 0x990   : > { %16441 = vst [vmem:[#allocation57_spill] sm:$0xff] %v14403_v8  ;;  %v14406_v7 = vadd.f32 %v5668_v52, %v16442_v49 }
 0x992   : > { %16443 = vst [vmem:[#allocation60_spill] sm:$0xff] %v14406_v7  ;;  %v5781_v34 = vpack.c.bf16 %v14406_v7, %v14403_v8  ;;  %v5730_v7 = vld [vmem:[%s15605_s11 + $0xd8] sm:$0xff] }
 0x994   : > { %8556 = vmatprep.mubr.msk.bf16.mxu1 %vm462_vm0, %v5781_v34 }
 0x9da   : > { %v8214_v5 = vpop.f32.mrb[252].mxu0 }
 0x9db   : > { %v8215_v14 = vpop.f32.mrb[253].mxu0 }
 0x9dc   : > { %v8216_v41 = vadd.f32 %v8215_v14, %v8214_v5  ;;  %v8217_v0 = vpop.f32.mrb[254].mxu0 }
 0x9dd   : > { %v8218_v45 = vpop.f32.mrb[255].mxu0 }
 0x9de   : > { %v5669_v21 = vmul.f32 %v8216_v41, %v14240_v60  ;;  %v8219_v27 = vadd.f32 %v8218_v45, %v8217_v0 }
 0x9e0   : > { %v5670_v46 = vmul.f32 %v8219_v27, %v14240_v60  ;;  %v14414_v35 = vadd.f32 %v5669_v21, %v16444_v26 }
 0x9e2   : > { %16445 = vst [vmem:[#allocation54_spill] sm:$0xff] %v14414_v35  ;;  %v14417_v55 = vadd.f32 %v5670_v46, %v16446_v56 }
 0x9e4   : > { %16447 = vst [vmem:[#allocation82_spill] sm:$0xff] %v14417_v55  ;;  %v5782_v17 = vpack.c.bf16 %v14417_v55, %v14414_v35  ;;  %v8530_v16 = vpop.f32.mrb[224].mxu1 }
 0x9e5   : > { %v5904_v58 = vpop.f32.mrb[225].mxu1  ;;  %v5913_v60 = vadd.f32 %v8530_v16, %v14424_v23 }
 0x9e6   : > { %8557 = vmatmul.mubr.msk.bf16.gmra.mrb[252].mxu1 %vm462_vm0, %v5782_v17  ;;  %v8531_v24 = vpop.f32.mrb[226].mxu1  ;;  %v5905_v30 = vadd.f32 %v14424_v23, %v5904_v58 }
 0x9e7   : > { %v5916_v37 = vadd.f32 %v8531_v24, %v14424_v23  ;;  %v5907_v36 = vpop.f32.mrb[227].mxu1 }
 0x9e8   : > { %v5908_v28 = vadd.f32 %v14424_v23, %v5907_v36 }
 0x9e9   : > { %v14431_v6 = vpack.c.bf16 %v5916_v37, %v5913_v60 }
 0x9ea   : > { %v14433_v9 = vpack.c.bf16 %v5908_v28, %v5905_v30 }
 0x9ec   : > { %6063 = vrot.lane.b32.xlu1 %v14433_v9, %s9748_s28  ;;  %8256 = vmatprep.mubr.msk.bf16.mxu0 %vm4627_vm9, %v14433_v9 }
 0x9f0   : > { %6065 = vrot.lane.b32.xlu1 %v14431_v6, %s9748_s28 }
 0x9f4   : > { %v8534_v38 = vpop.f32.mrb[228].mxu1 }
 0x9f5   : > { %v5920_v19 = vpop.f32.mrb[229].mxu1  ;;  %v5929_v54 = vadd.f32 %v8534_v38, %v14424_v23 }
 0x9f6   : > { %v8535_v39 = vpop.f32.mrb[230].mxu1  ;;  %v5921_v52 = vadd.f32 %v14424_v23, %v5920_v19 }
 0x9f7   : > { %v5932_v40 = vadd.f32 %v8535_v39, %v14424_v23  ;;  %v5923_v63 = vpop.f32.mrb[231].mxu1 }
 0x9f8   : > { %v5924_v33 = vadd.f32 %v14424_v23, %v5923_v63 }
 0x9f9   : > { %v14445_v49 = vpack.c.bf16 %v5932_v40, %v5929_v54 }
 0x9fa   : > { %v14447_v34 = vpack.c.bf16 %v5924_v33, %v5921_v52 }
 0xa1f   : > { %v8538_v5 = vpop.f32.mrb[232].mxu1 }
 0xa20   : > { %v5936_v14 = vpop.f32.mrb[233].mxu1  ;;  %v5945_v0 = vadd.f32 %v8538_v5, %v14424_v23 }
 0xa21   : > { %v8539_v41 = vpop.f32.mrb[234].mxu1  ;;  %v5937_v27 = vadd.f32 %v14424_v23, %v5936_v14 }
 0xa22   : > { %v5948_v45 = vadd.f32 %v8539_v41, %v14424_v23  ;;  %v5939_v21 = vpop.f32.mrb[235].mxu1 }
 0xa23   : > { %v5940_v46 = vadd.f32 %v14424_v23, %v5939_v21 }
 0xa24   : > { %v14453_v26 = vpack.c.bf16 %v5948_v45, %v5945_v0 }
 0xa25   : > { %v14455_v56 = vpack.c.bf16 %v5940_v46, %v5937_v27 }
 0xa2f   : > { %v8542_v17 = vpop.f32.mrb[236].mxu1 }
 0xa30   : > { %v5952_v16 = vpop.f32.mrb[237].mxu1  ;;  %v5961_v24 = vadd.f32 %v8542_v17, %v14424_v23 }
 0xa31   : > { %v8543_v58 = vpop.f32.mrb[238].mxu1  ;;  %v5953_v36 = vadd.f32 %v14424_v23, %v5952_v16 }
 0xa32   : > { %v5964_v60 = vadd.f32 %v8543_v58, %v14424_v23  ;;  %v5955_v37 = vpop.f32.mrb[239].mxu1 }
 0xa33   : > { %v5956_v30 = vadd.f32 %v14424_v23, %v5955_v37 }
 0xa34   : > { %v14461_v28 = vpack.c.bf16 %v5964_v60, %v5961_v24 }
 0xa35   : > { %v14463_v38 = vpack.c.bf16 %v5956_v30, %v5953_v36 }
 0xa3f   : > { %v8546_v19 = vpop.f32.mrb[240].mxu1 }
 0xa40   : > { %v5968_v39 = vpop.f32.mrb[241].mxu1  ;;  %v5977_v40 = vadd.f32 %v8546_v19, %v14424_v23 }
 0xa41   : > { %v8547_v54 = vpop.f32.mrb[242].mxu1  ;;  %v5969_v33 = vadd.f32 %v14424_v23, %v5968_v39 }
 0xa42   : > { %v5980_v63 = vadd.f32 %v8547_v54, %v14424_v23  ;;  %v5971_v52 = vpop.f32.mrb[243].mxu1 }
 0xa43   : > { %v5972_v5 = vadd.f32 %v14424_v23, %v5971_v52 }
 0xa44   : > { %v14469_v14 = vpack.c.bf16 %v5980_v63, %v5977_v40 }
 0xa45   : > { %v14471_v41 = vpack.c.bf16 %v5972_v5, %v5969_v33 }
 0xa46   : > { %6081 = vrot.lane.b32.xlu1 %v14469_v14, %s9748_s28 }
 0xa47   : > { %6079 = vrot.lane.b32.xlu0 %v14471_v41, %s9748_s28 }
 0xa4b   : > { %6067 = vrot.lane.b32.xlu0 %v14447_v34, %s9748_s28 }
 0xa4f   : > { %6069 = vrot.lane.b32.xlu0 %v14445_v49, %s9748_s28  ;;  %v8550_v0 = vpop.f32.mrb[244].mxu1 }
 0xa50   : > { %v5984_v45 = vpop.f32.mrb[245].mxu1  ;;  %v5993_v27 = vadd.f32 %v8550_v0, %v14424_v23 }
 0xa51   : > { %v8551_v21 = vpop.f32.mrb[246].mxu1  ;;  %v5985_v16 = vadd.f32 %v14424_v23, %v5984_v45 }
 0xa52   : > { %v5996_v46 = vadd.f32 %v8551_v21, %v14424_v23  ;;  %v5987_v17 = vpop.f32.mrb[247].mxu1 }
 0xa53   : > { %v5988_v58 = vadd.f32 %v14424_v23, %v5987_v17  ;;  %6071 = vrot.lane.b32.xlu0 %v14455_v56, %s9748_s28 }
 0xa54   : > { %v14487_v24 = vpack.c.bf16 %v5996_v46, %v5993_v27 }
 0xa55   : > { %v14489_v60 = vpack.c.bf16 %v5988_v58, %v5985_v16 }
 0xa57   : > { %6073 = vrot.lane.b32.xlu0 %v14453_v26, %s9748_s28  ;;  %6083 = vrot.lane.b32.xlu1 %v14489_v60, %s9748_s28 }
 0xa5b   : > { %6075 = vrot.lane.b32.xlu0 %v14463_v38, %s9748_s28  ;;  %6085 = vrot.lane.b32.xlu1 %v14487_v24, %s9748_s28 }
 0xa5e   : > { %v6064_v5 = vpop.permute.xlu1 %6063 }
 0xa5f   : > { %6077 = vrot.lane.b32.xlu0 %v14461_v28, %s9748_s28  ;;  %v8554_v37 = vpop.f32.mrb[248].mxu1  ;;  %v6144_v27 = vsel %vm4627_vm9, %v6064_v5, 0 }
 0xa60   : > { %v6000_v36 = vpop.f32.mrb[249].mxu1  ;;  %v6009_v19 = vadd.f32 %v8554_v37, %v14424_v23 }
 0xa61   : > { %v8555_v30 = vpop.f32.mrb[250].mxu1  ;;  %v6001_v40 = vadd.f32 %v14424_v23, %v6000_v36 }
 0xa62   : > { %v6012_v39 = vadd.f32 %v8555_v30, %v14424_v23  ;;  %v6003_v54 = vpop.f32.mrb[251].mxu1  ;;  %v6066_v0 = vpop.permute.xlu1 %6065 }
 0xa63   : > { %v6004_v63 = vadd.f32 %v14424_v23, %v6003_v54  ;;  %6896 = vrot.lane.b32.xlu0 %v14433_v9, %s9749_s15 }
 0xa64   : > { %v14507_v52 = vpack.c.bf16 %v6012_v39, %v6009_v19 }
 0xa65   : > { %v14509_v33 = vpack.c.bf16 %v6004_v63, %v6001_v40  ;;  %v6147_v40 = vsel %vm4627_vm9, %v6066_v0, 0 }
 0xa67   : > { %6898 = vrot.lane.b32.xlu0 %v14431_v6, %s9749_s15  ;;  %6087 = vrot.lane.b32.xlu1 %v14509_v33, %s9748_s28 }
 0xa6b   : > { %6918 = vrot.lane.b32.xlu0 %v14487_v24, %s9749_s15  ;;  %6089 = vrot.lane.b32.xlu1 %v14507_v52, %s9748_s28 }
 0xa6f   : > { %6922 = vrot.lane.b32.xlu0 %v14507_v52, %s9749_s15 }
 0xab8   : > { %v6082_v17 = vpop.permute.xlu1 %6081 }
 0xab9   : > { %v6080_v45 = vpop.permute.xlu0 %6079  ;;  %v8558_v21 = vpop.f32.mrb[252].mxu1 }
 0xaba   : > { %8568 = vmatprep.subr.msk.bf16.mxu0 %vm4627_vm9, %v6080_v45  ;;  %v6016_v46 = vpop.f32.mrb[253].mxu1  ;;  %v6025_v58 = vadd.f32 %v8558_v21, %v14424_v23 }
 0xabb   : > { %8241 = vmatpush3.bf16.xpose.msra.mxu0 %v6144_v27  ;;  %v8559_v16 = vpop.f32.mrb[254].mxu1  ;;  %v6017_v30 = vadd.f32 %v14424_v23, %v6016_v46 }
 0xabc   : > { %v6028_v37 = vadd.f32 %v8559_v16, %v14424_v23  ;;  %8569 = vmatprep.subr.msk.bf16.mxu0 %vm4627_vm9, %v6082_v17  ;;  %v6019_v36 = vpop.f32.mrb[255].mxu1 }
 0xabd   : > { %v6020_v19 = vadd.f32 %v14424_v23, %v6019_v36  ;;  %v6068_v63 = vpop.permute.xlu0 %6067 }
 0xabe   : > { %v14528_v39 = vpack.c.bf16 %v6028_v37, %v6025_v58  ;;  %v6150_v23 = vsel %vm4627_vm9, %v6068_v63, 0 }
 0xabf   : > { %v14530_v54 = vpack.c.bf16 %v6020_v19, %v6017_v30 }
 0xac1   : > { %6091 = vrot.lane.b32.xlu1 %v14530_v54, %s9748_s28  ;;  %v6070_v0 = vpop.permute.xlu0 %6069 }
 0xac2   : > { %v6153_v21 = vsel %vm4627_vm9, %v6070_v0, 0 }
 0xac3   : > { %8243 = vmatpush3.bf16.xpose.msra.mxu0 %v6147_v40 }
 0xac5   : > { %6093 = vrot.lane.b32.xlu1 %v14528_v39, %s9748_s28  ;;  %v6072_v27 = vpop.permute.xlu0 %6071  ;;  %s15385_s28 = scalar_lea.vmem [#allocation6], %s7360_s29 }
 0xac6   : > { %v6156_v17 = vsel %vm4627_vm9, %v6072_v27, 0  ;;  %s7280_s18 = sshll.u32 %s15385_s28, 4  ;;  %s15544_s18 = int_to_ptr.vmem [resolvable:$true] %s7280_s18 }
 0xac7   : > { %s9677_s26 = scalar_lea.vmem %s15544_s18, 4096 }
 0xac8   : > { %p9678_p9 = scmp.ne.s32.totalorder %s15544_s18, %s9677_s26 }
 0xac9   : > { %v6084_v5 = vpop.permute.xlu1 %6083  ;;  %6912 = vrot.lane.b32.xlu1 %v14471_v41, %s9749_s15  ;;  %v6074_v58 = vpop.permute.xlu0 %6073 }
 0xaca   : > { %8570 = vmatprep.subr.msk.bf16.mxu0 %vm4627_vm9, %v6084_v5  ;;  %v6159_v37 = vsel %vm4627_vm9, %v6074_v58, 0  ;;  %p9679_p10 = pnand %p9678_p9, %p9856_p5 }
 0xacb   : > { %8245 = vmatpush3.bf16.xpose.msra.mxu0 %v6150_v23 }
 0xacc   : > { %p9680_p12 = pneg %p9679_p10 }
 0xacd   : > { %v6086_v45 = vpop.permute.xlu1 %6085  ;;  %6914 = vrot.lane.b32.xlu1 %v14469_v14, %s9749_s15  ;;  %v6076_v36 = vpop.permute.xlu0 %6075 }
 0xace   : > { %8571 = vmatprep.subr.msk.bf16.mxu0 %vm4627_vm9, %v6086_v45  ;;  %v6162_v19 = vsel %vm4627_vm9, %v6076_v36, 0 }
 0xad1   : > { %6916 = vrot.lane.b32.xlu1 %v14489_v60, %s9749_s15  ;;  %v6078_v40 = vpop.permute.xlu0 %6077 }
 0xad2   : > { %v6165_v45 = vsel %vm4627_vm9, %v6078_v40, 0 }
 0xad3   : > { %8247 = vmatpush3.bf16.xpose.msra.mxu0 %v6153_v21 }
 0xad5   : > { %6900 = vrot.lane.b32.xlu1 %v14447_v34, %s9749_s15  ;;  %v6897_v5 = vpop.permute.xlu0 %6896 }
 0xad9   : > { %v6088_v46 = vpop.permute.xlu1 %6087  ;;  %6902 = vrot.lane.b32.xlu1 %v14445_v49, %s9749_s15  ;;  %v6899_v21 = vpop.permute.xlu0 %6898 }
 0xada   : > { %8572 = vmatprep.subr.msk.bf16.mxu0 %vm4627_vm9, %v6088_v46 }
 0xadb   : > { %8249 = vmatpush3.bf16.xpose.msra.mxu0 %v6156_v17 }
 0xadd   : > { %v6090_v16 = vpop.permute.xlu1 %6089  ;;  %6920 = vrot.lane.b32.xlu1 %v14509_v33, %s9749_s15  ;;  %v6919_v17 = vpop.permute.xlu0 %6918 }
 0xade   : > { %8573 = vmatprep.subr.msk.bf16.mxu0 %vm4627_vm9, %v6090_v16 }
 0xae1   : > { %6904 = vrot.lane.b32.xlu1 %v14455_v56, %s9749_s15 }
 0xae3   : > { %8251 = vmatpush3.bf16.xpose.msra.mxu0 %v6159_v37 }
 0xae5   : > { %6906 = vrot.lane.b32.xlu1 %v14453_v26, %s9749_s15 }
 0xae9   : > { %6924 = vrot.lane.b32.xlu1 %v14530_v54, %s9749_s15 }
 0xb33   : > { %v6092_v30 = vpop.permute.xlu1 %6091 }
 0xb34   : > { %8574 = vmatprep.subr.msk.bf16.mxu0 %vm4627_vm9, %v6092_v30 }
 0xb35   : > { %8253 = vmatpush3.bf16.xpose.msra.mxu0 %v6162_v19 }
 0xb37   : > { %v6094_v63 = vpop.permute.xlu1 %6093 }
 0xb38   : > { %8575 = vmatprep.subr.msk.bf16.mxu0 %vm4627_vm9, %v6094_v63  ;;  %v5707_v63 = vld [vmem:[%s15605_s11 + $0x20] sm:$0xff] }
 0xb3b   : > { %v6913_v23 = vpop.permute.xlu1 %6912 }
 0xb3c   : > { %8288 = vmatprep.subr.bf16.mxu1 %v6913_v23 }
 0xb3d   : > { %8255 = vmatpush3.bf16.xpose.msra.mxu0 %v6165_v45  ;;  %8289 = vmatpush3.bf16.msra.mxu1 %v6897_v5  ;;  %v5708_v5 = vld [vmem:[%s15605_s11 + $0x28] sm:$0xff] }
 0xb3f   : > { %v6915_v0 = vpop.permute.xlu1 %6914 }
 0xb40   : > { %8290 = vmatprep.subr.bf16.mxu1 %v6915_v0 }
 0xb41   : > { %8291 = vmatpush3.bf16.msra.mxu1 %v6899_v21  ;;  %v5709_v21 = vld [vmem:[%s15605_s11 + $0x30] sm:$0xff] }
 0xb43   : > { %v6917_v27 = vpop.permute.xlu1 %6916 }
 0xb44   : > { %8257 = vmatmul.mubr.msk.bf16.vlgmr.msra.gmra.mrb[0].mxu0 %vm4627_vm9, %v14433_v9  ;;  %8292 = vmatprep.subr.bf16.mxu1 %v6917_v27  ;;  %v6923_v9 = vpop.permute.xlu0 %6922  ;;  %v5710_v27 = vld [vmem:[%s15605_s11 + $0x38] sm:$0xff] }
 0xb45   : > { %8258 = vmatprep.mubr.msk.bf16.mxu0 %vm4627_vm9, %v14431_v6 }
 0xb47   : > { %v6901_v46 = vpop.permute.xlu1 %6900 }
 0xb48   : > { %8293 = vmatpush3.bf16.msra.mxu1 %v6901_v46 }
 0xb49   : > { %8294 = vmatprep.subr.bf16.mxu1 %v6919_v17 }
 0xb4b   : > { %v6903_v16 = vpop.permute.xlu1 %6902 }
 0xb4c   : > { %8259 = vmatmul.mubr.msk.bf16.gmra.mrb[4].mxu0 %vm4627_vm9, %v14431_v6  ;;  %8295 = vmatpush3.bf16.msra.mxu1 %v6903_v16  ;;  %v5703_v6 = vld [vmem:[%s15605_s11] sm:$0xff] }
 0xb4d   : > { %8260 = vmatprep.mubr.msk.bf16.mxu0 %vm4627_vm9, %v14447_v34 }
 0xb4f   : > { %v6921_v58 = vpop.permute.xlu1 %6920 }
 0xb50   : > { %8296 = vmatprep.subr.bf16.mxu1 %v6921_v58 }
 0xb53   : > { %v6905_v37 = vpop.permute.xlu1 %6904 }
 0xb54   : > { %8261 = vmatmul.mubr.msk.bf16.gmra.mrb[8].mxu0 %vm4627_vm9, %v14447_v34  ;;  %8297 = vmatpush3.bf16.msra.mxu1 %v6905_v37 }
 0xb55   : > { %8262 = vmatprep.mubr.msk.bf16.mxu0 %vm4627_vm9, %v14445_v49  ;;  %8298 = vmatprep.subr.bf16.mxu1 %v6923_v9 }
 0xb57   : > { %v6907_v36 = vpop.permute.xlu1 %6906 }
 0xb58   : > { %8299 = vmatpush3.bf16.msra.mxu1 %v6907_v36 }
 0xb5b   : > { %v6925_v30 = vpop.permute.xlu1 %6924 }
 0xb5c   : > { %8263 = vmatmul.mubr.msk.bf16.gmra.mrb[12].mxu0 %vm4627_vm9, %v14445_v49  ;;  %8300 = vmatprep.subr.bf16.mxu1 %v6925_v30  ;;  %v5704_v49 = vld [vmem:[%s15605_s11 + $0x8] sm:$0xff] }
 0xb5d   : > { %8264 = vmatprep.mubr.msk.bf16.mxu0 %vm4627_vm9, %v14455_v56 }
 0xb64   : > { %8265 = vmatmul.mubr.msk.bf16.gmra.mrb[16].mxu0 %vm4627_vm9, %v14455_v56 }
 0xb65   : > { %8266 = vmatprep.mubr.msk.bf16.mxu0 %vm4627_vm9, %v14453_v26 }
 0xb6c   : > { %8267 = vmatmul.mubr.msk.bf16.gmra.mrb[20].mxu0 %vm4627_vm9, %v14453_v26  ;;  %v5705_v26 = vld [vmem:[%s15605_s11 + $0x10] sm:$0xff] }
 0xb6d   : > { %8268 = vmatprep.mubr.msk.bf16.mxu0 %vm4627_vm9, %v14463_v38 }
 0xb74   : > { %8269 = vmatmul.mubr.msk.bf16.gmra.mrb[24].mxu0 %vm4627_vm9, %v14463_v38 }
 0xb75   : > { %8270 = vmatprep.mubr.msk.bf16.mxu0 %vm4627_vm9, %v14461_v28 }
 0xb7c   : > { %8271 = vmatmul.mubr.msk.bf16.gmra.mrb[28].mxu0 %vm4627_vm9, %v14461_v28 }
 0xb7d   : > { %8272 = vmatprep.mubr.msk.bf16.mxu0 %vm4627_vm9, %v14471_v41 }
 0xb84   : > { %8273 = vmatmul.mubr.msk.bf16.gmra.mrb[32].mxu0 %vm4627_vm9, %v14471_v41  ;;  %v5706_v41 = vld [vmem:[%s15605_s11 + $0x18] sm:$0xff] }
 0xb85   : > { %8274 = vmatprep.mubr.msk.bf16.mxu0 %vm4627_vm9, %v14469_v14 }
 0xb8c   : > { %8275 = vmatmul.mubr.msk.bf16.gmra.mrb[36].mxu0 %vm4627_vm9, %v14469_v14 }
 0xb8d   : > { %8276 = vmatprep.mubr.msk.bf16.mxu0 %vm4627_vm9, %v14489_v60 }
 0xb94   : > { %8277 = vmatmul.mubr.msk.bf16.gmra.mrb[40].mxu0 %vm4627_vm9, %v14489_v60 }
 0xb95   : > { %8278 = vmatprep.mubr.msk.bf16.mxu0 %vm4627_vm9, %v14487_v24 }
 0xb9c   : > { %8279 = vmatmul.mubr.msk.bf16.gmra.mrb[44].mxu0 %vm4627_vm9, %v14487_v24 }
 0xb9d   : > { %8280 = vmatprep.mubr.msk.bf16.mxu0 %vm4627_vm9, %v14509_v33 }
 0xba4   : > { %8281 = vmatmul.mubr.msk.bf16.gmra.mrb[48].mxu0 %vm4627_vm9, %v14509_v33 }
 0xba5   : > { %8282 = vmatprep.mubr.msk.bf16.mxu0 %vm4627_vm9, %v14507_v52 }
 0xbac   : > { %8283 = vmatmul.mubr.msk.bf16.gmra.mrb[52].mxu0 %vm4627_vm9, %v14507_v52 }
 0xbad   : > { %8284 = vmatprep.mubr.msk.bf16.mxu0 %vm4627_vm9, %v14530_v54 }
 0xbb4   : > { %8285 = vmatmul.mubr.msk.bf16.gmra.mrb[56].mxu0 %vm4627_vm9, %v14530_v54 }
 0xbb5   : > { %8286 = vmatprep.mubr.msk.bf16.mxu0 %vm4627_vm9, %v14528_v39 }
 0xbbc   : > { %8287 = vmatmul.mubr.msk.bf16.gmra.mrb[60].mxu0 %vm4627_vm9, %v14528_v39 }
 0xc17   : > { %v6225_v34 = vpop.f32.mrb[0].mxu0 }
 0xc18   : > { %v14638_v56 = vadd.f32 %v6225_v34, %v5703_v6  ;;  %v6227_v14 = vpop.f32.mrb[1].mxu0  ;;  %v5713_v6 = vld [vmem:[%s15605_s11 + $0x50] sm:$0xff]  ;;  %v5714_v34 = vld [vmem:[%s15605_s11 + $0x58] sm:$0xff] }
 0xc19   : > { %v14643_v24 = vadd.f32 %v6227_v14, %v5704_v49  ;;  %v6229_v60 = vpop.f32.mrb[2].mxu0 }
 0xc1a   : > { %v14645_v52 = vadd.f32 %v6229_v60, %v5705_v26  ;;  %v6231_v33 = vpop.f32.mrb[3].mxu0 }
 0xc1b   : > { %v6384_v54 = vmax.f32 %v14638_v56, %v14643_v24  ;;  %v14649_v19 = vadd.f32 %v6231_v33, %v5706_v41 }
 0xc1d   : > { %v6387_v40 = vmax.f32 %v14645_v52, %v14649_v19  ;;  %6385 = vmax.xlane.f32.xlu0 %v6384_v54 }
 0xc1f   : > { %v6235_v23 = vpop.f32.mrb[4].mxu0  ;;  %6388 = vmax.xlane.f32.xlu1 %v6387_v40  ;;  %v5717_v40 = vld [vmem:[%s15605_s11 + $0x70] sm:$0xff] }
 0xc20   : > { %v14659_v45 = vadd.f32 %v6235_v23, %v5707_v63  ;;  %v6237_v0 = vpop.f32.mrb[5].mxu0 }
 0xc21   : > { %v14667_v46 = vadd.f32 %v6237_v0, %v5708_v5  ;;  %v6239_v17 = vpop.f32.mrb[6].mxu0  ;;  %v5718_v5 = vld [vmem:[%s15605_s11 + $0x78] sm:$0xff] }
 0xc22   : > { %v6241_v16 = vpop.f32.mrb[7].mxu0  ;;  %v14671_v37 = vadd.f32 %v6239_v17, %v5709_v21 }
 0xc23   : > { %v6390_v58 = vmax.f32 %v14659_v45, %v14667_v46  ;;  %v14673_v9 = vadd.f32 %v6241_v16, %v5710_v27 }
 0xc25   : > { %6391 = vmax.xlane.f32.xlu0 %v6390_v58  ;;  %v6393_v36 = vmax.f32 %v14671_v37, %v14673_v9  ;;  %v5721_v58 = vld [vmem:[%s15605_s11 + $0x90] sm:$0xff] }
 0xc27   : > { %v6245_v30 = vpop.f32.mrb[8].mxu0 }
 0xc28   : > { %v6247_v49 = vpop.f32.mrb[9].mxu0 }
 0xc29   : > { %v6249_v26 = vpop.f32.mrb[10].mxu0  ;;  %6394 = vmax.xlane.f32.xlu0 %v6393_v36  ;;  %v5722_v36 = vld [vmem:[%s15605_s11 + $0x98] sm:$0xff] }
 0xc2a   : > { %v14683_v14 = vadd.f32 %v6249_v26, %v5713_v6  ;;  %v6251_v41 = vpop.f32.mrb[11].mxu0 }
 0xc2b   : > { %v14685_v60 = vadd.f32 %v6251_v41, %v5714_v34 }
 0xc2d   : > { %v6399_v33 = vmax.f32 %v14683_v14, %v14685_v60 }
 0xc2f   : > { %v6255_v54 = vpop.f32.mrb[12].mxu0  ;;  %6400 = vmax.xlane.f32.xlu0 %v6399_v33 }
 0xc30   : > { %v6257_v63 = vpop.f32.mrb[13].mxu0  ;;  %6908 = vrot.lane.b32.xlu1 %v14463_v38, %s9749_s15 }
 0xc31   : > { %v6259_v23 = vpop.f32.mrb[14].mxu0 }
 0xc32   : > { %v14697_v0 = vadd.f32 %v6259_v23, %v5717_v40  ;;  %v6261_v21 = vpop.f32.mrb[15].mxu0 }
 0xc33   : > { %v14699_v27 = vadd.f32 %v6261_v21, %v5718_v5  ;;  %v5725_v5 = vld [vmem:[%s15605_s11 + $0xb0] sm:$0xff]  ;;  %v5726_v21 = vld [vmem:[%s15605_s11 + $0xb8] sm:$0xff] }
 0xc35   : > { %v6405_v17 = vmax.f32 %v14697_v0, %v14699_v27 }
 0xc37   : > { %v6265_v16 = vpop.f32.mrb[16].mxu0  ;;  %6406 = vmax.xlane.f32.xlu0 %v6405_v17 }
 0xc38   : > { %v6267_v38 = vpop.f32.mrb[17].mxu0 }
 0xc39   : > { %v6269_v6 = vpop.f32.mrb[18].mxu0 }
 0xc3a   : > { %v14709_v34 = vadd.f32 %v6269_v6, %v5721_v58  ;;  %v6271_v26 = vpop.f32.mrb[19].mxu0 }
 0xc3b   : > { %v14711_v41 = vadd.f32 %v6271_v26, %v5722_v36 }
 0xc3d   : > { %v6411_v33 = vmax.f32 %v14709_v34, %v14711_v41 }
 0xc3f   : > { %v6275_v40 = vpop.f32.mrb[20].mxu0  ;;  %6412 = vmax.xlane.f32.xlu0 %v6411_v33  ;;  %v5729_v33 = vld [vmem:[%s15605_s11 + $0xd0] sm:$0xff] }
 0xc40   : > { %v6277_v23 = vpop.f32.mrb[21].mxu0 }
 0xc41   : > { %v6279_v17 = vpop.f32.mrb[22].mxu0 }
 0xc42   : > { %v14721_v58 = vadd.f32 %v6279_v17, %v5725_v5  ;;  %v6281_v6 = vpop.f32.mrb[23].mxu0 }
 0xc43   : > { %v14723_v36 = vadd.f32 %v6281_v6, %v5726_v21  ;;  %v5711_v21 = vld [vmem:[%s15605_s11 + $0x40] sm:$0xff]  ;;  %v5712_v6 = vld [vmem:[%s15605_s11 + $0x48] sm:$0xff] }
 0xc44   : > { %v14745_v4 = vadd.f32 %v6245_v30, %v5711_v21  ;;  %v14747_v62 = vadd.f32 %v6247_v49, %v5712_v6  ;;  %v5734_v30 = vld [vmem:[%s15605_s11 + $0xf8] sm:$0xff] }
 0xc45   : > { %v6417_v26 = vmax.f32 %v14721_v58, %v14723_v36 }
 0xc46   : > { %v6396_v21 = vmax.f32 %v14745_v4, %v14747_v62 }
 0xc47   : > { %v6285_v55 = vpop.f32.mrb[24].mxu0  ;;  %6418 = vmax.xlane.f32.xlu0 %v6417_v26 }
 0xc48   : > { %v6287_v35 = vpop.f32.mrb[25].mxu0 }
 0xc49   : > { %v6289_v8 = vpop.f32.mrb[26].mxu0 }
 0xc4a   : > { %v14733_v5 = vadd.f32 %v6289_v8, %v5729_v33  ;;  %v6291_v17 = vpop.f32.mrb[27].mxu0  ;;  %v5715_v8 = vld [vmem:[%s15605_s11 + $0x60] sm:$0xff]  ;;  %v5716_v33 = vld [vmem:[%s15605_s11 + $0x68] sm:$0xff] }
 0xc4b   : > { %v14741_v26 = vadd.f32 %v6291_v17, %v5730_v7  ;;  %v5733_v7 = vld [vmem:[%s15605_s11 + $0xf0] sm:$0xff]  ;;  %v14763_v6 = vadd.f32 %v6255_v54, %v5715_v8  ;;  %v14765_v15 = vadd.f32 %v6257_v63, %v5716_v33  ;;  %v14781_v8 = vadd.f32 %v6265_v16, %v5719_v18 }
 0xc4c   : > { %v14783_v33 = vadd.f32 %v6267_v38, %v5720_v2  ;;  %v5738_v2 = vld [vmem:[%s15605_s11 + $0x118] sm:$0xff] }
 0xc4d   : > { %v6423_v31 = vmax.f32 %v14733_v5, %v14741_v26  ;;  %v6402_v63 = vmax.f32 %v14763_v6, %v14765_v15 }
 0xc4e   : > { %v6408_v16 = vmax.f32 %v14781_v8, %v14783_v33 }
 0xc4f   : > { %v6295_v29 = vpop.f32.mrb[28].mxu0  ;;  %6424 = vmax.xlane.f32.xlu0 %v6423_v31 }
 0xc50   : > { %v6297_v17 = vpop.f32.mrb[29].mxu0 }
 0xc51   : > { %v6299_v49 = vpop.f32.mrb[30].mxu0 }
 0xc52   : > { %v14767_v61 = vadd.f32 %v6299_v49, %v5733_v7  ;;  %v6301_v31 = vpop.f32.mrb[31].mxu0  ;;  %v5723_v7 = vld [vmem:[%s15605_s11 + $0xa0] sm:$0xff] }
 0xc53   : > { %v14775_v20 = vadd.f32 %v6301_v31, %v5734_v30  ;;  %v5724_v30 = vld [vmem:[%s15605_s11 + $0xa8] sm:$0xff]  ;;  %v14799_v38 = vadd.f32 %v6275_v40, %v5723_v7  ;;  %v14817_v7 = vadd.f32 %v6285_v55, %v5727_v1  ;;  %v5742_v1 = vld [vmem:[%s15605_s11 + $0x138] sm:$0xff] }
 0xc54   : > { %6397 = vmax.xlane.f32.xlu1 %v6396_v21  ;;  %v5737_v21 = vld [vmem:[%s15605_s11 + $0x110] sm:$0xff]  ;;  %v14801_v11 = vadd.f32 %v6277_v23, %v5724_v30 }
 0xc55   : > { %v6429_v54 = vmax.f32 %v14767_v61, %v14775_v20 }
 0xc56   : > { %v6414_v23 = vmax.f32 %v14799_v38, %v14801_v11 }
 0xc57   : > { %v6305_v49 = vpop.f32.mrb[32].mxu0  ;;  %6430 = vmax.xlane.f32.xlu0 %v6429_v54 }
 0xc58   : > { %v6307_v31 = vpop.f32.mrb[33].mxu0  ;;  %6403 = vmax.xlane.f32.xlu1 %v6402_v63  ;;  %v5728_v63 = vld [vmem:[%s15605_s11 + $0xc8] sm:$0xff] }
 0xc59   : > { %v6309_v18 = vpop.f32.mrb[34].mxu0  ;;  %v14819_v30 = vadd.f32 %v6287_v35, %v5728_v63 }
 0xc5a   : > { %v14803_v47 = vadd.f32 %v6309_v18, %v5737_v21  ;;  %v6311_v54 = vpop.f32.mrb[35].mxu0  ;;  %v5731_v21 = vld [vmem:[%s15605_s11 + $0xe0] sm:$0xff] }
 0xc5b   : > { %v14811_v32 = vadd.f32 %v6311_v54, %v5738_v2  ;;  %v5732_v2 = vld [vmem:[%s15605_s11 + $0xe8] sm:$0xff]  ;;  %v6420_v55 = vmax.f32 %v14817_v7, %v14819_v30  ;;  %v14835_v63 = vadd.f32 %v6295_v29, %v5731_v21  ;;  %v14853_v21 = vadd.f32 %v6305_v49, %v5735_v42  ;;  %v5746_v42 = vld [vmem:[%s15605_s11 + $0x158] sm:$0xff] }
 0xc5c   : > { %6409 = vmax.xlane.f32.xlu1 %v6408_v16  ;;  %v5741_v16 = vld [vmem:[%s15605_s11 + $0x130] sm:$0xff]  ;;  %v14837_v13 = vadd.f32 %v6297_v17, %v5732_v2 }
 0xc5d   : > { %16448 = vst [vmem:[#allocation68_spill] sm:$0xff] %v14811_v32  ;;  %v6435_v40 = vmax.f32 %v14803_v47, %v14811_v32 }
 0xc5e   : > { %v6426_v17 = vmax.f32 %v14835_v63, %v14837_v13 }
 0xc5f   : > { %v6315_v18 = vpop.f32.mrb[36].mxu0  ;;  %6436 = vmax.xlane.f32.xlu0 %v6435_v40 }
 0xc60   : > { %v6317_v54 = vpop.f32.mrb[37].mxu0  ;;  %6415 = vmax.xlane.f32.xlu1 %v6414_v23  ;;  %v5736_v23 = vld [vmem:[%s15605_s11 + $0x108] sm:$0xff] }
 0xc61   : > { %v6319_v35 = vpop.f32.mrb[38].mxu0  ;;  %v14855_v2 = vadd.f32 %v6307_v31, %v5736_v23 }
 0xc62   : > { %v14839_v43 = vadd.f32 %v6319_v35, %v5741_v16  ;;  %v6321_v40 = vpop.f32.mrb[39].mxu0  ;;  %v5739_v16 = vld [vmem:[%s15605_s11 + $0x120] sm:$0xff] }
 0xc63   : > { %v14847_v22 = vadd.f32 %v6321_v40, %v5742_v1  ;;  %v5740_v1 = vld [vmem:[%s15605_s11 + $0x128] sm:$0xff]  ;;  %v6432_v31 = vmax.f32 %v14853_v21, %v14855_v2  ;;  %v14871_v23 = vadd.f32 %v6315_v18, %v5739_v16 }
 0xc64   : > { %16449 = vst [vmem:[#allocation81_spill] sm:$0xff] %v14839_v43  ;;  %6421 = vmax.xlane.f32.xlu1 %v6420_v55  ;;  %v5745_v55 = vld [vmem:[%s15605_s11 + $0x150] sm:$0xff]  ;;  %v14873_v59 = vadd.f32 %v6317_v54, %v5740_v1  ;;  %v5747_v54 = vld [vmem:[%s15605_s11 + $0x160] sm:$0xff] }
 0xc65   : > { %16450 = vst [vmem:[#allocation67_spill] sm:$0xff] %v14847_v22  ;;  %v6441_v29 = vmax.f32 %v14839_v43, %v14847_v22 }
 0xc66   : > { %v6438_v16 = vmax.f32 %v14871_v23, %v14873_v59 }
 0xc67   : > { %v6325_v35 = vpop.f32.mrb[40].mxu0  ;;  %6442 = vmax.xlane.f32.xlu0 %v6441_v29 }
 0xc68   : > { %v6327_v40 = vpop.f32.mrb[41].mxu0  ;;  %6427 = vmax.xlane.f32.xlu1 %v6426_v17  ;;  %v5744_v17 = vld [vmem:[%s15605_s11 + $0x148] sm:$0xff]  ;;  %v14892_v1 = vadd.f32 %v6325_v35, %v5743_v51  ;;  %v5750_v51 = vld [vmem:[%s15605_s11 + $0x178] sm:$0xff] }
 0xc69   : > { %v6329_v49 = vpop.f32.mrb[42].mxu0 }
 0xc6a   : > { %v14875_v53 = vadd.f32 %v6329_v49, %v5745_v55  ;;  %v6331_v29 = vpop.f32.mrb[43].mxu0  ;;  %v14894_v55 = vadd.f32 %v6327_v40, %v5744_v17 }
 0xc6b   : > { %v14883_v57 = vadd.f32 %v6331_v29, %v5746_v42  ;;  %v5748_v42 = vld [vmem:[%s15605_s11 + $0x168] sm:$0xff] }
 0xc6c   : > { %16451 = vst [vmem:[#allocation79_spill] sm:$0xff] %v14875_v53  ;;  %6433 = vmax.xlane.f32.xlu1 %v6432_v31  ;;  %v6444_v17 = vmax.f32 %v14892_v1, %v14894_v55 }
 0xc6d   : > { %16452 = vst [vmem:[#allocation78_spill] sm:$0xff] %v14883_v57  ;;  %v6447_v18 = vmax.f32 %v14875_v53, %v14883_v57 }
 0xc6f   : > { %v6335_v49 = vpop.f32.mrb[44].mxu0  ;;  %6448 = vmax.xlane.f32.xlu0 %v6447_v18 }
 0xc70   : > { %v14899_v31 = vadd.f32 %v6335_v49, %v5747_v54  ;;  %v6337_v29 = vpop.f32.mrb[45].mxu0  ;;  %6439 = vmax.xlane.f32.xlu1 %v6438_v16  ;;  %v5751_v49 = vld [vmem:[%s15605_s11 + $0x180] sm:$0xff] }
 0xc71   : > { %v14907_v35 = vadd.f32 %v6337_v29, %v5748_v42  ;;  %v6339_v40 = vpop.f32.mrb[46].mxu0  ;;  %v5752_v42 = vld [vmem:[%s15605_s11 + $0x188] sm:$0xff] }
 0xc72   : > { %v6341_v12 = vpop.f32.mrb[47].mxu0  ;;  %v14913_v54 = vadd.f32 %v6339_v40, %v5749_v10  ;;  %v5753_v10 = vld [vmem:[%s15605_s11 + $0x190] sm:$0xff]  ;;  %v5754_v40 = vld [vmem:[%s15605_s11 + $0x198] sm:$0xff] }
 0xc73   : > { %v6450_v18 = vmax.f32 %v14899_v31, %v14907_v35  ;;  %v14915_v16 = vadd.f32 %v6341_v12, %v5750_v51 }
 0xc74   : > { %16453 = vst [vmem:[#allocation80_spill] sm:$0xff] %v14913_v54  ;;  %6445 = vmax.xlane.f32.xlu1 %v6444_v17 }
 0xc75   : > { %16454 = vst [vmem:[#allocation83_spill] sm:$0xff] %v14915_v16  ;;  %6451 = vmax.xlane.f32.xlu0 %v6450_v18  ;;  %v6453_v29 = vmax.f32 %v14913_v54, %v14915_v16 }
 0xc77   : > { %v6345_v50 = vpop.f32.mrb[48].mxu0 }
 0xc78   : > { %v14928_v12 = vadd.f32 %v6345_v50, %v5751_v49  ;;  %v6347_v51 = vpop.f32.mrb[49].mxu0  ;;  %v5755_v49 = vld [vmem:[%s15605_s11 + $0x1a0] sm:$0xff] }
 0xc79   : > { %v14933_v17 = vadd.f32 %v6347_v51, %v5752_v42  ;;  %v6349_v18 = vpop.f32.mrb[50].mxu0  ;;  %6454 = vmax.xlane.f32.xlu0 %v6453_v29  ;;  %v5756_v42 = vld [vmem:[%s15605_s11 + $0x1a8] sm:$0xff] }
 0xc7a   : > { %v14935_v44 = vadd.f32 %v6349_v18, %v5753_v10  ;;  %v6351_v3 = vpop.f32.mrb[51].mxu0  ;;  %v5757_v10 = vld [vmem:[%s15605_s11 + $0x1b0] sm:$0xff] }
 0xc7b   : > { %v6456_v25 = vmax.f32 %v14928_v12, %v14933_v17  ;;  %v14939_v48 = vadd.f32 %v6351_v3, %v5754_v40 }
 0xc7c   : > { %16455 = vst [vmem:[#allocation25_spill] sm:$0xff] %v14935_v44 }
 0xc7d   : > { %16456 = vst [vmem:[#allocation31_spill] sm:$0xff] %v14939_v48  ;;  %v6459_v50 = vmax.f32 %v14935_v44, %v14939_v48  ;;  %6457 = vmax.xlane.f32.xlu1 %v6456_v25  ;;  %v5758_v25 = vld [vmem:[%s15605_s11 + $0x1b8] sm:$0xff] }
 0xc7f   : > { %v6355_v29 = vpop.f32.mrb[52].mxu0  ;;  %6460 = vmax.xlane.f32.xlu0 %v6459_v50 }
 0xc80   : > { %v14952_v3 = vadd.f32 %v6355_v29, %v5755_v49  ;;  %v6357_v51 = vpop.f32.mrb[53].mxu0  ;;  %v5759_v29 = vld [vmem:[%s15605_s11 + $0x1c0] sm:$0xff] }
 0xc81   : > { %v14957_v40 = vadd.f32 %v6357_v51, %v5756_v42  ;;  %v6359_v18 = vpop.f32.mrb[54].mxu0  ;;  %v5760_v42 = vld [vmem:[%s15605_s11 + $0x1c8] sm:$0xff]  ;;  %v5761_v51 = vld [vmem:[%s15605_s11 + $0x1d0] sm:$0xff] }
 0xc82   : > { %v14959_v48 = vadd.f32 %v6359_v18, %v5757_v10  ;;  %v6361_v44 = vpop.f32.mrb[55].mxu0  ;;  %v5762_v18 = vld [vmem:[%s15605_s11 + $0x1d8] sm:$0xff] }
 0xc83   : > { %v6462_v50 = vmax.f32 %v14952_v3, %v14957_v40  ;;  %v14963_v16 = vadd.f32 %v6361_v44, %v5758_v25 }
 0xc84   : > { %16457 = vst [vmem:[#allocation91_spill] sm:$0xff] %v14959_v48 }
 0xc85   : > { %16458 = vst [vmem:[#allocation17_spill] sm:$0xff] %v14963_v16  ;;  %v6465_v49 = vmax.f32 %v14959_v48, %v14963_v16  ;;  %6463 = vmax.xlane.f32.xlu1 %v6462_v50 }
 0xc87   : > { %v6365_v10 = vpop.f32.mrb[56].mxu0  ;;  %6466 = vmax.xlane.f32.xlu0 %v6465_v49 }
 0xc88   : > { %v14976_v44 = vadd.f32 %v6365_v10, %v5759_v29  ;;  %v6367_v25 = vpop.f32.mrb[57].mxu0 }
 0xc89   : > { %v14981_v50 = vadd.f32 %v6367_v25, %v5760_v42  ;;  %v6369_v16 = vpop.f32.mrb[58].mxu0 }
 0xc8a   : > { %v14983_v48 = vadd.f32 %v6369_v16, %v5761_v51  ;;  %v6371_v54 = vpop.f32.mrb[59].mxu0 }
 0xc8b   : > { %v6468_v49 = vmax.f32 %v14976_v44, %v14981_v50  ;;  %v14987_v57 = vadd.f32 %v6371_v54, %v5762_v18 }
 0xc8c   : > { %16459 = vst [vmem:[#allocation94_spill] sm:$0xff] %v14983_v48 }
 0xc8d   : > { %16460 = vst [vmem:[#allocation95_spill] sm:$0xff] %v14987_v57  ;;  %v6471_v29 = vmax.f32 %v14983_v48, %v14987_v57  ;;  %6469 = vmax.xlane.f32.xlu1 %v6468_v49 }
 0xc8f   : > { %v14991_v10 = vpop.f32.mrb[60].mxu0  ;;  %6472 = vmax.xlane.f32.xlu0 %v6471_v29 }
 0xc90   : > { %v14993_v53 = vpop.f32.mrb[61].mxu0 }
 0xc91   : > { %v14995_v42 = vpop.f32.mrb[62].mxu0 }
 0xc92   : > { %v14997_v25 = vpop.f32.mrb[63].mxu0 }
 0xc93   : > { %16461 = vst [vmem:[#allocation93_spill] sm:$0xff] %v14997_v25 }
 0xcaa   : > { %v6386_v16 = vpop.xlane.xlu0 %6385 }
 0xcab   : > { %v6480_v51 = vsub.f32 %v14638_v56, %v6386_v16  ;;  %v6481_v22 = vsub.f32 %v14643_v24, %v6386_v16 }
 0xcac   : > { %v6389_v54 = vpop.xlane.xlu1 %6388 }
 0xcad   : > { %v6544_v18 = vmul.f32 1.442695, %v6480_v51  ;;  %v6546_v43 = vmul.f32 1.442695, %v6481_v22  ;;  %v6482_v57 = vsub.f32 %v14645_v52, %v6389_v54  ;;  %v6483_v49 = vsub.f32 %v14649_v19, %v6389_v54 }
 0xcaf   : > { %9404 = vpow2.f32 %v6544_v18  ;;  %v6548_v29 = vmul.f32 1.442695, %v6482_v57  ;;  %v6550_v48 = vmul.f32 1.442695, %v6483_v49 }
 0xcb0   : > { %9406 = vpow2.f32 %v6546_v43  ;;  %v6909_v32 = vpop.permute.xlu1 %6908 }
 0xcb1   : > { %9408 = vpow2.f32 %v6548_v29  ;;  %8301 = vmatpush3.bf16.msra.mxu1 %v6909_v32 }
 0xcb2   : > { %9410 = vpow2.f32 %v6550_v48  ;;  %v6392_v25 = vpop.xlane.xlu0 %6391 }
 0xcb3   : > { %v6484_v56 = vsub.f32 %v14659_v45, %v6392_v25  ;;  %v6485_v24 = vsub.f32 %v14667_v46, %v6392_v25 }
 0xcb5   : > { %v6552_v16 = vmul.f32 1.442695, %v6484_v56  ;;  %v6554_v51 = vmul.f32 1.442695, %v6485_v24 }
 0xcb6   : > { %v6395_v22 = vpop.xlane.xlu0 %6394 }
 0xcb7   : > { %9412 = vpow2.f32 %v6552_v16  ;;  %v6486_v52 = vsub.f32 %v14671_v37, %v6395_v22  ;;  %v6487_v19 = vsub.f32 %v14673_v9, %v6395_v22 }
 0xcb8   : > { %9414 = vpow2.f32 %v6554_v51 }
 0xcb9   : > { %v15007_v57 = vpop.eup %9404  ;;  %v6556_v43 = vmul.f32 1.442695, %v6486_v52  ;;  %v6558_v54 = vmul.f32 1.442695, %v6487_v19 }
 0xcba   : > { %v15009_v32 = vpop.eup %9406 }
 0xcbb   : > { %v15011_v48 = vpop.eup %9408  ;;  %9416 = vpow2.f32 %v6556_v43  ;;  %v6672_v45 = vadd.f32 %v15009_v32, %v15007_v57 }
 0xcbc   : > { %v15015_v46 = vpop.eup %9410  ;;  %9418 = vpow2.f32 %v6558_v54  ;;  %v6401_v24 = vpop.xlane.xlu0 %6400 }
 0xcbd   : > { %6673 = vadd.xlane.f32.xlu1 %v6672_v45  ;;  %v6675_v37 = vadd.f32 %v15015_v46, %v15011_v48  ;;  %v6490_v51 = vsub.f32 %v14683_v14, %v6401_v24  ;;  %v6491_v22 = vsub.f32 %v14685_v60, %v6401_v24 }
 0xcbf   : > { %6676 = vadd.xlane.f32.xlu0 %v6675_v37  ;;  %v6564_v37 = vmul.f32 1.442695, %v6490_v51 }
 0xcc1   : > { %v15019_v9 = vpop.eup %9412 }
 0xcc2   : > { %16462 = vst [vmem:[#allocation90_spill] sm:$0xff] %v15019_v9  ;;  %v15021_v25 = vpop.eup %9414 }
 0xcc3   : > { %16463 = vst [vmem:[#allocation92_spill] sm:$0xff] %v15021_v25  ;;  %v6678_v18 = vadd.f32 %v15021_v25, %v15019_v9  ;;  %v6566_v9 = vmul.f32 1.442695, %v6491_v22 }
 0xcc4   : > { %v6407_v16 = vpop.xlane.xlu0 %6406 }
 0xcc5   : > { %v15025_v49 = vpop.eup %9416  ;;  %6679 = vadd.xlane.f32.xlu0 %v6678_v18  ;;  %v6494_v19 = vsub.f32 %v14697_v0, %v6407_v16  ;;  %v6495_v45 = vsub.f32 %v14699_v27, %v6407_v16 }
 0xcc6   : > { %16464 = vst [vmem:[#allocation97_spill] sm:$0xff] %v15025_v49  ;;  %v15027_v29 = vpop.eup %9418 }
 0xcc7   : > { %v6681_v56 = vadd.f32 %v15027_v29, %v15025_v49  ;;  %v6572_v25 = vmul.f32 1.442695, %v6494_v19  ;;  %v6574_v24 = vmul.f32 1.442695, %v6495_v45 }
 0xcc9   : > { %6682 = vadd.xlane.f32.xlu0 %v6681_v56 }
 0xcce   : > { %6910 = vrot.lane.b32.xlu1 %v14461_v28, %s9749_s15  ;;  %v6413_v28 = vpop.xlane.xlu0 %6412 }
 0xccf   : > { %v6498_v0 = vsub.f32 %v14709_v34, %v6413_v28  ;;  %v6499_v16 = vsub.f32 %v14711_v41, %v6413_v28 }
 0xcd1   : > { %v6580_v34 = vmul.f32 1.442695, %v6498_v0 }
 0xce1   : > { %v6398_v52 = vpop.xlane.xlu1 %6397 }
 0xce2   : > { %v6488_v43 = vsub.f32 %v14745_v4, %v6398_v52  ;;  %v6489_v54 = vsub.f32 %v14747_v62, %v6398_v52  ;;  %v5763_v62 = vld [vmem:[%s15605_s11 + $0x1e0] sm:$0xff]  ;;  %v5764_v4 = vld [vmem:[%s15605_s11 + $0x1e8] sm:$0xff] }
 0xce3   : > { %v15054_v52 = vadd.f32 %v14991_v10, %v5763_v62  ;;  %v15057_v19 = vadd.f32 %v14993_v53, %v5764_v4 }
 0xce4   : > { %v6560_v18 = vmul.f32 1.442695, %v6488_v43  ;;  %v6562_v56 = vmul.f32 1.442695, %v6489_v54  ;;  %v6582_v43 = vmul.f32 1.442695, %v6499_v16 }
 0xce5   : > { %v6404_v49 = vpop.xlane.xlu1 %6403  ;;  %v6474_v53 = vmax.f32 %v15054_v52, %v15057_v19 }
 0xce6   : > { %9420 = vpow2.f32 %v6560_v18  ;;  %v6492_v14 = vsub.f32 %v14763_v6, %v6404_v49  ;;  %v6493_v60 = vsub.f32 %v14765_v15, %v6404_v49  ;;  %v15049_v15 = vpop.xlane.xlu0 %6418 }
 0xce7   : > { %9422 = vpow2.f32 %v6562_v56 }
 0xce8   : > { %9424 = vpow2.f32 %v6564_v37  ;;  %v6568_v27 = vmul.f32 1.442695, %v6492_v14  ;;  %v6570_v6 = vmul.f32 1.442695, %v6493_v60 }
 0xce9   : > { %9426 = vpow2.f32 %v6566_v9  ;;  %v6410_v51 = vpop.xlane.xlu1 %6409 }
 0xcea   : > { %9428 = vpow2.f32 %v6572_v25  ;;  %v6496_v49 = vsub.f32 %v14781_v8, %v6410_v51  ;;  %v6497_v22 = vsub.f32 %v14783_v33, %v6410_v51  ;;  %v15059_v54 = vpop.xlane.xlu0 %6424 }
 0xceb   : > { %9430 = vpow2.f32 %v6574_v24 }
 0xcec   : > { %9432 = vpow2.f32 %v6568_v27  ;;  %v6576_v9 = vmul.f32 1.442695, %v6496_v49  ;;  %v6578_v41 = vmul.f32 1.442695, %v6497_v22 }
 0xced   : > { %9434 = vpow2.f32 %v6570_v6  ;;  %v6416_v25 = vpop.xlane.xlu1 %6415 }
 0xcee   : > { %9436 = vpow2.f32 %v6576_v9  ;;  %v6500_v8 = vsub.f32 %v14799_v38, %v6416_v25  ;;  %v6501_v33 = vsub.f32 %v14801_v11, %v6416_v25  ;;  %v15071_v14 = vpop.xlane.xlu0 %6430 }
 0xcef   : > { %9438 = vpow2.f32 %v6578_v41 }
 0xcf0   : > { %v15063_v10 = vpop.eup %9420  ;;  %9440 = vpow2.f32 %v6580_v34  ;;  %v6584_v45 = vmul.f32 1.442695, %v6500_v8  ;;  %v6586_v18 = vmul.f32 1.442695, %v6501_v33 }
 0xcf1   : > { %v15067_v37 = vpop.eup %9422  ;;  %9442 = vpow2.f32 %v6582_v43  ;;  %v6422_v56 = vpop.xlane.xlu1 %6421 }
 0xcf2   : > { %v15069_v28 = vpop.eup %9424  ;;  %v6504_v38 = vsub.f32 %v14817_v7, %v6422_v56  ;;  %v6505_v11 = vsub.f32 %v14819_v30, %v6422_v56  ;;  %6475 = vmax.xlane.f32.xlu1 %v6474_v53  ;;  %v6684_v60 = vadd.f32 %v15067_v37, %v15063_v10  ;;  %9444 = vpow2.f32 %v6584_v45  ;;  %v15085_v7 = vpop.xlane.xlu0 %6436 }
 0xcf3   : > { %v15077_v24 = vpop.eup %9426  ;;  %9446 = vpow2.f32 %v6586_v18 }
 0xcf4   : > { %v15079_v62 = vpop.eup %9428  ;;  %v6592_v4 = vmul.f32 1.442695, %v6504_v38  ;;  %6685 = vadd.xlane.f32.xlu0 %v6684_v60  ;;  %v6594_v27 = vmul.f32 1.442695, %v6505_v11  ;;  %v6687_v49 = vadd.f32 %v15077_v24, %v15069_v28 }
 0xcf5   : > { %v15081_v0 = vpop.eup %9430  ;;  %v6428_v16 = vpop.xlane.xlu1 %6427 }
 0xcf6   : > { %v15083_v6 = vpop.eup %9432  ;;  %v6508_v30 = vsub.f32 %v14835_v63, %v6428_v16  ;;  %v6509_v51 = vsub.f32 %v14837_v13, %v6428_v16  ;;  %9448 = vpow2.f32 %v6592_v4  ;;  %v15099_v63 = vpop.xlane.xlu0 %6442 }
 0xcf7   : > { %v15091_v22 = vpop.eup %9434  ;;  %9450 = vpow2.f32 %v6594_v27  ;;  %v6693_v27 = vadd.f32 %v15081_v0, %v15079_v62 }
 0xcf8   : > { %v15093_v34 = vpop.eup %9436  ;;  %v6600_v9 = vmul.f32 1.442695, %v6508_v30  ;;  %6688 = vadd.xlane.f32.xlu0 %v6687_v49  ;;  %v6602_v43 = vmul.f32 1.442695, %v6509_v51  ;;  %v6690_v45 = vadd.f32 %v15091_v22, %v15083_v6 }
 0xcf9   : > { %v15095_v41 = vpop.eup %9438  ;;  %v6434_v25 = vpop.xlane.xlu1 %6433 }
 0xcfa   : > { %v15097_v8 = vpop.eup %9440  ;;  %v6512_v13 = vsub.f32 %v14853_v21, %v6434_v25  ;;  %v6513_v33 = vsub.f32 %v14855_v2, %v6434_v25  ;;  %v6696_v53 = vadd.f32 %v15095_v41, %v15093_v34  ;;  %9452 = vpow2.f32 %v6600_v9 }
 0xcfb   : > { %v15107_v18 = vpop.eup %9442  ;;  %9454 = vpow2.f32 %v6602_v43 }
 0xcfc   : > { %v6608_v56 = vmul.f32 1.442695, %v6512_v13  ;;  %6697 = vadd.xlane.f32.xlu1 %v6696_v53  ;;  %6691 = vadd.xlane.f32.xlu0 %v6690_v45  ;;  %v6610_v38 = vmul.f32 1.442695, %v6513_v33  ;;  %v15109_v60 = vpop.eup %9444  ;;  %v15111_v21 = vpop.xlane.xlu0 %6448  ;;  %v6699_v16 = vadd.f32 %v15107_v18, %v15097_v8 }
 0xcfd   : > { %v6440_v11 = vpop.xlane.xlu1 %6439  ;;  %v15119_v30 = vpop.eup %9446 }
 0xcfe   : > { %v6516_v2 = vsub.f32 %v14871_v23, %v6440_v11  ;;  %v6517_v4 = vsub.f32 %v14873_v59, %v6440_v11  ;;  %9456 = vpow2.f32 %v6608_v56  ;;  %v6702_v13 = vadd.f32 %v15119_v30, %v15109_v60 }
 0xcff   : > { %9458 = vpow2.f32 %v6610_v38 }
 0xd00   : > { %v6616_v51 = vmul.f32 1.442695, %v6516_v2  ;;  %6694 = vadd.xlane.f32.xlu0 %v6693_v27  ;;  %6700 = vadd.xlane.f32.xlu1 %v6699_v16  ;;  %v6618_v49 = vmul.f32 1.442695, %v6517_v4  ;;  %v15121_v43 = vpop.eup %9448 }
 0xd01   : > { %v6446_v9 = vpop.xlane.xlu1 %6445  ;;  %v15127_v33 = vpop.eup %9450 }
 0xd02   : > { %v6520_v23 = vsub.f32 %v14892_v1, %v6446_v9  ;;  %v6521_v59 = vsub.f32 %v14894_v55, %v6446_v9  ;;  %v6452_v25 = vpop.xlane.xlu0 %6451  ;;  %9460 = vpow2.f32 %v6616_v51  ;;  %v6708_v1 = vadd.f32 %v15127_v33, %v15121_v43 }
 0xd03   : > { %v6524_v45 = vsub.f32 %v14899_v31, %v6452_v25  ;;  %9462 = vpow2.f32 %v6618_v49  ;;  %v6525_v38 = vsub.f32 %v14907_v35, %v6452_v25 }
 0xd04   : > { %v6624_v53 = vmul.f32 1.442695, %v6520_v23  ;;  %6703 = vadd.xlane.f32.xlu1 %v6702_v13  ;;  %v6626_v56 = vmul.f32 1.442695, %v6521_v59  ;;  %v15131_v11 = vpop.eup %9452 }
 0xd05   : > { %v15135_v55 = vpop.eup %9454  ;;  %v6632_v2 = vmul.f32 1.442695, %v6524_v45  ;;  %v6634_v4 = vmul.f32 1.442695, %v6525_v38 }
 0xd06   : > { %9464 = vpow2.f32 %v6624_v53  ;;  %v6714_v16 = vadd.f32 %v15135_v55, %v15131_v11 }
 0xd07   : > { %9466 = vpow2.f32 %v6626_v56 }
 0xd08   : > { %6709 = vadd.xlane.f32.xlu1 %v6708_v1  ;;  %v15137_v27 = vpop.eup %9456  ;;  %9468 = vpow2.f32 %v6632_v2 }
 0xd09   : > { %v15141_v51 = vpop.eup %9458  ;;  %9470 = vpow2.f32 %v6634_v4 }
 0xd0a   : > { %v6458_v31 = vpop.xlane.xlu1 %6457  ;;  %v6720_v25 = vadd.f32 %v15141_v51, %v15137_v27 }
 0xd0b   : > { %v6528_v35 = vsub.f32 %v14928_v12, %v6458_v31  ;;  %v6529_v49 = vsub.f32 %v14933_v17, %v6458_v31 }
 0xd0c   : > { %6715 = vadd.xlane.f32.xlu1 %v6714_v16  ;;  %v15145_v59 = vpop.eup %9460 }
 0xd0d   : > { %v6640_v9 = vmul.f32 1.442695, %v6528_v35  ;;  %v6642_v23 = vmul.f32 1.442695, %v6529_v49  ;;  %v15149_v13 = vpop.eup %9462 }
 0xd0e   : > { %v6726_v17 = vadd.f32 %v15149_v13, %v15145_v59 }
 0xd0f   : > { %9472 = vpow2.f32 %v6640_v9 }
 0xd10   : > { %6721 = vadd.xlane.f32.xlu1 %v6720_v25  ;;  %9474 = vpow2.f32 %v6642_v23  ;;  %v15151_v53 = vpop.eup %9464 }
 0xd11   : > { %v15155_v45 = vpop.eup %9466 }
 0xd12   : > { %v6464_v12 = vpop.xlane.xlu1 %6463  ;;  %v15159_v4 = vpop.eup %9468  ;;  %v6732_v31 = vadd.f32 %v15155_v45, %v15151_v53 }
 0xd13   : > { %v6532_v56 = vsub.f32 %v14952_v3, %v6464_v12  ;;  %v6533_v38 = vsub.f32 %v14957_v40, %v6464_v12  ;;  %16465 = vst [vmem:[#allocation96_spill] sm:$0xff] %v15159_v4  ;;  %v15165_v16 = vpop.eup %9470 }
 0xd14   : > { %6727 = vadd.xlane.f32.xlu1 %v6726_v17  ;;  %v6738_v40 = vadd.f32 %v15165_v16, %v15159_v4 }
 0xd15   : > { %v6648_v1 = vmul.f32 1.442695, %v6532_v56  ;;  %v6650_v2 = vmul.f32 1.442695, %v6533_v38  ;;  %v6502_v56 = vsub.f32 %v14721_v58, %v15049_v15 }
 0xd16   : > { %6926 = vrot.lane.b32.xlu0 %v14528_v39, %s9749_s15 }
 0xd17   : > { %9476 = vpow2.f32 %v6648_v1  ;;  %v6588_v1 = vmul.f32 1.442695, %v6502_v56  ;;  %v16473_v56 = vld [vmem:[#allocation93_spill] sm:$0xff] }
 0xd18   : > { %9478 = vpow2.f32 %v6650_v2  ;;  %6733 = vadd.xlane.f32.xlu1 %v6732_v31  ;;  %v6506_v2 = vsub.f32 %v14733_v5, %v15059_v54 }
 0xd19   : > { %v15167_v35 = vpop.eup %9472 }
 0xd1a   : > { %16466 = vst [vmem:[#allocation100_spill] sm:$0xff] %v15167_v35  ;;  %v6470_v3 = vpop.xlane.xlu1 %6469  ;;  %v15171_v49 = vpop.eup %9474  ;;  %v6596_v58 = vmul.f32 1.442695, %v6506_v2 }
 0xd1b   : > { %16467 = vst [vmem:[#allocation99_spill] sm:$0xff] %v15171_v49  ;;  %v6536_v9 = vsub.f32 %v14976_v44, %v6470_v3  ;;  %v6537_v39 = vsub.f32 %v14981_v50, %v6470_v3  ;;  %v6744_v12 = vadd.f32 %v15171_v49, %v15167_v35  ;;  %v6503_v44 = vsub.f32 %v14723_v36, %v15049_v15 }
 0xd1c   : > { %6739 = vadd.xlane.f32.xlu1 %v6738_v40  ;;  %v6507_v3 = vsub.f32 %v14741_v26, %v15059_v54  ;;  %v5765_v26 = vld [vmem:[%s15605_s11 + $0x1f0] sm:$0xff]  ;;  %v5766_v54 = vld [vmem:[%s15605_s11 + $0x1f8] sm:$0xff] }
 0xd1d   : > { %v6656_v23 = vmul.f32 1.442695, %v6536_v9  ;;  %v6658_v25 = vmul.f32 1.442695, %v6537_v39  ;;  %v6590_v31 = vmul.f32 1.442695, %v6503_v44  ;;  %v6510_v9 = vsub.f32 %v14767_v61, %v15071_v14 }
 0xd1e   : > { %v6598_v15 = vmul.f32 1.442695, %v6507_v3  ;;  %v6511_v39 = vsub.f32 %v14775_v20, %v15071_v14  ;;  %v16472_v20 = vld [vmem:[#allocation68_spill] sm:$0xff]  ;;  %v15215_v44 = vadd.f32 %v16473_v56, %v5766_v54  ;;  %v16477_v54 = vld [vmem:[#allocation78_spill] sm:$0xff] }
 0xd1f   : > { %9480 = vpow2.f32 %v6656_v23  ;;  %v6604_v61 = vmul.f32 1.442695, %v6510_v9  ;;  %v6514_v23 = vsub.f32 %v14803_v47, %v15085_v7  ;;  %v6515_v14 = vsub.f32 %v16472_v20, %v15085_v7  ;;  %v16475_v47 = vld [vmem:[#allocation67_spill] sm:$0xff] }
 0xd20   : > { %9482 = vpow2.f32 %v6658_v25  ;;  %6745 = vadd.xlane.f32.xlu1 %v6744_v12  ;;  %v6606_v25 = vmul.f32 1.442695, %v6511_v39  ;;  %v15212_v12 = vadd.f32 %v14995_v42, %v5765_v26  ;;  %v6519_v3 = vsub.f32 %v16475_v47, %v15099_v63 }
 0xd21   : > { %v15177_v17 = vpop.eup %9476  ;;  %9484 = vpow2.f32 %v6588_v1  ;;  %v16474_v1 = vld [vmem:[#allocation81_spill] sm:$0xff] }
 0xd22   : > { %16468 = vst [vmem:[#allocation28_spill] sm:$0xff] %v15177_v17  ;;  %v15181_v38 = vpop.eup %9478  ;;  %9486 = vpow2.f32 %v6590_v31  ;;  %v6518_v2 = vsub.f32 %v16474_v1, %v15099_v63  ;;  %v6614_v31 = vmul.f32 1.442695, %v6515_v14  ;;  %v6477_v7 = vmax.f32 %v15212_v12, %v15215_v44  ;;  %v16478_v14 = vld [vmem:[#allocation80_spill] sm:$0xff] }
 0xd23   : > { %16469 = vst [vmem:[#allocation33_spill] sm:$0xff] %v15181_v38  ;;  %v6750_v50 = vadd.f32 %v15181_v38, %v15177_v17  ;;  %9488 = vpow2.f32 %v6596_v58  ;;  %v6622_v26 = vmul.f32 1.442695, %v6519_v3 }
 0xd24   : > { %9490 = vpow2.f32 %v6598_v15  ;;  %v6620_v9 = vmul.f32 1.442695, %v6518_v2  ;;  %v16476_v15 = vld [vmem:[#allocation79_spill] sm:$0xff] }
 0xd25   : > { %6751 = vadd.xlane.f32.xlu1 %v6750_v50  ;;  %9492 = vpow2.f32 %v6604_v61  ;;  %v6612_v50 = vmul.f32 1.442695, %v6514_v23  ;;  %v6522_v39 = vsub.f32 %v16476_v15, %v15111_v21  ;;  %v6523_v61 = vsub.f32 %v16477_v54, %v15111_v21  ;;  %v16479_v2 = vld [vmem:[#allocation83_spill] sm:$0xff]  ;;  %v16480_v15 = vld [vmem:[#allocation25_spill] sm:$0xff] }
 0xd26   : > { %9494 = vpow2.f32 %v6606_v25 }
 0xd27   : > { %9496 = vpow2.f32 %v6612_v50  ;;  %v6628_v20 = vmul.f32 1.442695, %v6522_v39  ;;  %v6630_v1 = vmul.f32 1.442695, %v6523_v61 }
 0xd28   : > { %9498 = vpow2.f32 %v6614_v31 }
 0xd29   : > { %v15191_v40 = vpop.eup %9480  ;;  %9500 = vpow2.f32 %v6620_v9 }
 0xd2a   : > { %16470 = vst [vmem:[#allocation98_spill] sm:$0xff] %v15191_v40  ;;  %v15195_v36 = vpop.eup %9482  ;;  %9502 = vpow2.f32 %v6622_v26 }
 0xd2b   : > { %16471 = vst [vmem:[#allocation35_spill] sm:$0xff] %v15195_v36  ;;  %v6756_v5 = vadd.f32 %v15195_v36, %v15191_v40  ;;  %v15221_v58 = vpop.eup %9484  ;;  %9504 = vpow2.f32 %v6628_v20  ;;  %v16482_v40 = vld [vmem:[#allocation91_spill] sm:$0xff]  ;;  %v16484_v36 = vld [vmem:[#allocation94_spill] sm:$0xff] }
 0xd2c   : > { %v15225_v42 = vpop.eup %9486  ;;  %9506 = vpow2.f32 %v6630_v1 }
 0xd2d   : > { %6757 = vadd.xlane.f32.xlu1 %v6756_v5  ;;  %v6455_v5 = vpop.xlane.xlu0 %6454  ;;  %v15231_v63 = vpop.eup %9488  ;;  %v6705_v23 = vadd.f32 %v15225_v42, %v15221_v58 }
 0xd2e   : > { %v15235_v25 = vpop.eup %9490  ;;  %v6526_v56 = vsub.f32 %v16478_v14, %v6455_v5  ;;  %v6527_v31 = vsub.f32 %v16479_v2, %v6455_v5 }
 0xd2f   : > { %v15239_v47 = vpop.eup %9492  ;;  %v6711_v21 = vadd.f32 %v15235_v25, %v15231_v63 }
 0xd30   : > { %v15243_v3 = vpop.eup %9494  ;;  %v6638_v54 = vmul.f32 1.442695, %v6527_v31 }
 0xd31   : > { %v6461_v50 = vpop.xlane.xlu0 %6460  ;;  %v15247_v61 = vpop.eup %9496  ;;  %v6717_v5 = vadd.f32 %v15243_v3, %v15239_v47 }
 0xd32   : > { %v6530_v9 = vsub.f32 %v16480_v15, %v6461_v50  ;;  %v15251_v14 = vpop.eup %9498 }
 0xd33   : > { %v15255_v31 = vpop.eup %9500 }
 0xd34   : > { %v6644_v2 = vmul.f32 1.442695, %v6530_v9  ;;  %v16485_v9 = vld [vmem:[#allocation95_spill] sm:$0xff] }
 0xd35   : > { %6478 = vmax.xlane.f32.xlu0 %v6477_v7  ;;  %v6636_v7 = vmul.f32 1.442695, %v6526_v56  ;;  %v6467_v39 = vpop.xlane.xlu0 %6466 }
 0xd36   : > { %v6534_v20 = vsub.f32 %v16482_v40, %v6467_v39 }
 0xd37   : > { %9508 = vpow2.f32 %v6636_v7 }
 0xd38   : > { %9510 = vpow2.f32 %v6638_v54  ;;  %v6652_v7 = vmul.f32 1.442695, %v6534_v20 }
 0xd39   : > { %6706 = vadd.xlane.f32.xlu0 %v6705_v23  ;;  %v16481_v23 = vld [vmem:[#allocation31_spill] sm:$0xff]  ;;  %v6473_v56 = vpop.xlane.xlu0 %6472  ;;  %9512 = vpow2.f32 %v6644_v2 }
 0xd3a   : > { %v6531_v26 = vsub.f32 %v16481_v23, %v6461_v50  ;;  %v6723_v50 = vadd.f32 %v15251_v14, %v15247_v61  ;;  %v15259_v23 = vpop.eup %9502  ;;  %v6538_v17 = vsub.f32 %v16484_v36, %v6473_v56 }
 0xd3b   : > { %v15263_v54 = vpop.eup %9504 }
 0xd3c   : > { %v6646_v15 = vmul.f32 1.442695, %v6531_v26  ;;  %v15267_v26 = vpop.eup %9506 }
 0xd3d   : > { %6712 = vadd.xlane.f32.xlu0 %v6711_v21  ;;  %v16483_v21 = vld [vmem:[#allocation17_spill] sm:$0xff]  ;;  %v6735_v20 = vadd.f32 %v15267_v26, %v15263_v54 }
 0xd3e   : > { %v6535_v1 = vsub.f32 %v16483_v21, %v6467_v39  ;;  %9514 = vpow2.f32 %v6646_v15  ;;  %v6729_v39 = vadd.f32 %v15259_v23, %v15255_v31  ;;  %v6660_v21 = vmul.f32 1.442695, %v6538_v17 }
 0xd3f   : > { %9516 = vpow2.f32 %v6652_v7 }
 0xd40   : > { %v6654_v40 = vmul.f32 1.442695, %v6535_v1 }
 0xd41   : > { %6718 = vadd.xlane.f32.xlu0 %v6717_v5  ;;  %v6539_v5 = vsub.f32 %v16485_v9, %v6473_v56  ;;  %v15269_v2 = vpop.eup %9508 }
 0xd42   : > { %9518 = vpow2.f32 %v6654_v40  ;;  %16486 = vst [vmem:[#allocation32_spill] sm:$0xff] %v15269_v2  ;;  %v15273_v56 = vpop.eup %9510 }
 0xd43   : > { %v6662_v38 = vmul.f32 1.442695, %v6539_v5  ;;  %v15275_v1 = vpop.eup %9512  ;;  %v6741_v17 = vadd.f32 %v15273_v56, %v15269_v2 }
 0xd44   : > { %16487 = vst [vmem:[#allocation46_spill] sm:$0xff] %v15275_v1 }
 0xd45   : > { %6724 = vadd.xlane.f32.xlu0 %v6723_v50 }
 0xd48   : > { %v15279_v50 = vpop.eup %9514 }
 0xd49   : > { %6730 = vadd.xlane.f32.xlu0 %v6729_v39  ;;  %16488 = vst [vmem:[#allocation66_spill] sm:$0xff] %v15279_v50  ;;  %v15281_v7 = vpop.eup %9516  ;;  %v6747_v40 = vadd.f32 %v15279_v50, %v15275_v1 }
 0xd4a   : > { %v6674_v36 = vpop.xlane.xlu1 %6673  ;;  %16489 = vst [vmem:[#allocation68_spill] sm:$0xff] %v15281_v7 }
 0xd4b   : > { %9520 = vrcp.f32 %v6674_v36 }
 0xd4c   : > { %9522 = vpow2.f32 %v6660_v21  ;;  %v6677_v15 = vpop.xlane.xlu0 %6676  ;;  %v15285_v9 = vpop.eup %9518 }
 0xd4d   : > { %9524 = vrcp.f32 %v6677_v15  ;;  %6736 = vadd.xlane.f32.xlu0 %v6735_v20  ;;  %16490 = vst [vmem:[#allocation93_spill] sm:$0xff] %v15285_v9  ;;  %v6753_v21 = vadd.f32 %v15285_v9, %v15281_v7 }
 0xd4e   : > { %9526 = vpow2.f32 %v6662_v38  ;;  %v6911_v7 = vpop.permute.xlu1 %6910 }
 0xd51   : > { %6742 = vadd.xlane.f32.xlu0 %v6741_v17 }
 0xd52   : > { %v6680_v4 = vpop.xlane.xlu0 %6679 }
 0xd55   : > { %v9521_v5 = vpop.eup %9520  ;;  %6748 = vadd.xlane.f32.xlu0 %v6747_v40 }
 0xd56   : > { %v15287_v39 = vpop.eup %9522  ;;  %v6800_v20 = vmul.f32 %v9521_v5, %v15007_v57  ;;  %v6801_v17 = vmul.f32 %v9521_v5, %v15009_v32  ;;  %v6683_v9 = vpop.xlane.xlu0 %6682 }
 0xd57   : > { %v9525_v38 = vpop.eup %9524  ;;  %9528 = vrcp.f32 %v6683_v9 }
 0xd58   : > { %v15291_v36 = vpop.eup %9526  ;;  %v6802_v15 = vmul.f32 %v9525_v38, %v15011_v48  ;;  %v6803_v35 = vmul.f32 %v9525_v38, %v15015_v46 }
 0xd59   : > { %6754 = vadd.xlane.f32.xlu0 %v6753_v21  ;;  %v6759_v40 = vadd.f32 %v15291_v36, %v15287_v39 }
 0xd5a   : > { %v6864_v1 = vpack.c.bf16 %v6802_v15, %v6800_v20  ;;  %v6865_v49 = vpack.c.bf16 %v6803_v35, %v6801_v17 }
 0xd5c   : > { %6976 = vmatprep.mubr.bf16.mxu1 %v6865_v49 }
 0xd5d   : > { %6760 = vadd.xlane.f32.xlu0 %v6759_v40 }
 0xd61   : > { %v9529_v49 = vpop.eup %9528 }
 0xd62   : > { %v6807_v9 = vmul.f32 %v9529_v49, %v15027_v29 }
 0xd7f   : > { %v6476_v50 = vpop.xlane.xlu1 %6475 }
 0xd80   : > { %v6540_v57 = vsub.f32 %v15054_v52, %v6476_v50  ;;  %v6541_v48 = vsub.f32 %v15057_v19, %v6476_v50 }
 0xd81   : > { %v6686_v2 = vpop.xlane.xlu0 %6685 }
 0xd82   : > { %v6664_v32 = vmul.f32 1.442695, %v6540_v57  ;;  %v6666_v5 = vmul.f32 1.442695, %v6541_v48  ;;  %v16493_v48 = vld [vmem:[#allocation97_spill] sm:$0xff] }
 0xd84   : > { %9530 = vpow2.f32 %v6664_v32  ;;  %v6806_v32 = vmul.f32 %v9529_v49, %v16493_v48 }
 0xd85   : > { %9532 = vpow2.f32 %v6666_v5  ;;  %v6689_v46 = vpop.xlane.xlu0 %6688 }
 0xd86   : > { %9534 = vrcp.f32 %v6680_v4  ;;  %v16492_v4 = vld [vmem:[#allocation92_spill] sm:$0xff] }
 0xd87   : > { %9536 = vrcp.f32 %v6689_v46 }
 0xd88   : > { %9538 = vrcp.f32 %v6686_v2 }
 0xd89   : > { %v6692_v35 = vpop.xlane.xlu0 %6691  ;;  %v6698_v15 = vpop.xlane.xlu1 %6697 }
 0xd8d   : > { %v6695_v38 = vpop.xlane.xlu0 %6694  ;;  %v6701_v5 = vpop.xlane.xlu1 %6700 }
 0xd8e   : > { %v15301_v21 = vpop.eup %9530  ;;  %9540 = vrcp.f32 %v6695_v38 }
 0xd8f   : > { %v15303_v20 = vpop.eup %9532  ;;  %9542 = vrcp.f32 %v6692_v35 }
 0xd90   : > { %16491 = vst [vmem:[#allocation81_spill] sm:$0xff] %v15303_v20  ;;  %v9535_v52 = vpop.eup %9534  ;;  %v6762_v19 = vadd.f32 %v15303_v20, %v15301_v21  ;;  %v16494_v20 = vld [vmem:[#allocation90_spill] sm:$0xff]  ;;  %9544 = vrcp.f32 %v6701_v5 }
 0xd91   : > { %v6927_v50 = vpop.permute.xlu0 %6926  ;;  %v6805_v17 = vmul.f32 %v9535_v52, %v16492_v4  ;;  %v9537_v57 = vpop.eup %9536  ;;  %v6804_v29 = vmul.f32 %v9535_v52, %v16494_v20  ;;  %9546 = vrcp.f32 %v6698_v15 }
 0xd92   : > { %6763 = vadd.xlane.f32.xlu1 %v6762_v19  ;;  %8302 = vmatprep.subr.bf16.mxu1 %v6927_v50  ;;  %v9539_v2 = vpop.eup %9538  ;;  %v6811_v46 = vmul.f32 %v9537_v57, %v15077_v24  ;;  %v6704_v48 = vpop.xlane.xlu1 %6703 }
 0xd93   : > { %8303 = vmatpush3.bf16.msra.mxu1 %v6911_v7  ;;  %v6867_v40 = vpack.c.bf16 %v6807_v9, %v6805_v17  ;;  %v6809_v19 = vmul.f32 %v9539_v2, %v15067_v37  ;;  %v6866_v50 = vpack.c.bf16 %v6806_v32, %v6804_v29  ;;  %v6808_v49 = vmul.f32 %v9539_v2, %v15063_v10 }
 0xd94   : > { %9548 = vrcp.f32 %v6704_v48 }
 0xd95   : > { %v6869_v7 = vpack.c.bf16 %v6811_v46, %v6809_v19 }
 0xd96   : > { %6977 = vmatmul.mubr.bf16.vlgmr.msra.gmra.mrb[0].mxu1 %v6864_v1  ;;  %v6810_v1 = vmul.f32 %v9537_v57, %v15069_v28  ;;  %v6710_v5 = vpop.xlane.xlu1 %6709 }
 0xd97   : > { %6984 = vmatprep.mubr.bf16.mxu1 %v6867_v40  ;;  %9550 = vrcp.f32 %v6710_v5 }
 0xd98   : > { %v9541_v4 = vpop.eup %9540  ;;  %v6868_v9 = vpack.c.bf16 %v6810_v1, %v6808_v49 }
 0xd99   : > { %v9543_v35 = vpop.eup %9542  ;;  %v6815_v38 = vmul.f32 %v9541_v4, %v15081_v0  ;;  %v6814_v17 = vmul.f32 %v9541_v4, %v15079_v62 }
 0xd9a   : > { %v6813_v24 = vmul.f32 %v9543_v35, %v15091_v22  ;;  %v9545_v52 = vpop.eup %9544  ;;  %v6812_v40 = vmul.f32 %v9543_v35, %v15083_v6 }
 0xd9b   : > { %v9547_v37 = vpop.eup %9546  ;;  %v6819_v15 = vmul.f32 %v9545_v52, %v15107_v18  ;;  %v6818_v10 = vmul.f32 %v9545_v52, %v15097_v8 }
 0xd9c   : > { %v6871_v20 = vpack.c.bf16 %v6815_v38, %v6813_v24  ;;  %v6817_v28 = vmul.f32 %v9547_v37, %v15095_v41  ;;  %v6870_v57 = vpack.c.bf16 %v6814_v17, %v6812_v40  ;;  %v6816_v22 = vmul.f32 %v9547_v37, %v15093_v34  ;;  %v6716_v34 = vpop.xlane.xlu1 %6715 }
 0xd9e   : > { %6985 = vmatmul.mubr.bf16.gmra.mrb[4].mxu1 %v6866_v50  ;;  %v6873_v0 = vpack.c.bf16 %v6819_v15, %v6817_v28  ;;  %v6872_v2 = vpack.c.bf16 %v6818_v10, %v6816_v22  ;;  %v9549_v19 = vpop.eup %9548 }
 0xd9f   : > { %6992 = vmatprep.mubr.bf16.mxu1 %v6869_v7  ;;  %v6820_v35 = vmul.f32 %v9549_v19, %v15109_v60  ;;  %v6821_v49 = vmul.f32 %v9549_v19, %v15119_v30 }
 0xda1   : > { %v9551_v50 = vpop.eup %9550 }
 0xda2   : > { %v6825_v17 = vmul.f32 %v9551_v50, %v15127_v33 }
 0xda6   : > { %6993 = vmatmul.mubr.bf16.gmra.mrb[8].mxu1 %v6868_v9 }
 0xda7   : > { %7000 = vmatprep.mubr.bf16.mxu1 %v6871_v20  ;;  %v6722_v20 = vpop.xlane.xlu1 %6721 }
 0xdae   : > { %7001 = vmatmul.mubr.bf16.gmra.mrb[12].mxu1 %v6870_v57  ;;  %v6824_v57 = vmul.f32 %v9551_v50, %v15121_v43 }
 0xdaf   : > { %7008 = vmatprep.mubr.bf16.mxu1 %v6873_v0  ;;  %v6728_v0 = vpop.xlane.xlu1 %6727 }
 0xdb3   : > { %v6734_v5 = vpop.xlane.xlu1 %6733 }
 0xdb6   : > { %7009 = vmatmul.mubr.bf16.gmra.mrb[16].mxu1 %v6872_v2 }
 0xdc2   : > { %v6479_v32 = vpop.xlane.xlu0 %6478 }
 0xdc3   : > { %v6542_v62 = vsub.f32 %v15212_v12, %v6479_v32  ;;  %v6543_v18 = vsub.f32 %v15215_v44, %v6479_v32 }
 0xdc5   : > { %v6668_v6 = vmul.f32 1.442695, %v6542_v62  ;;  %v6670_v41 = vmul.f32 1.442695, %v6543_v18 }
 0xdc6   : > { %v6707_v46 = vpop.xlane.xlu0 %6706 }
 0xdc7   : > { %9552 = vpow2.f32 %v6668_v6 }
 0xdc8   : > { %9554 = vpow2.f32 %v6670_v41 }
 0xdc9   : > { %9556 = vrcp.f32 %v6707_v46 }
 0xdca   : > { %v6713_v8 = vpop.xlane.xlu0 %6712 }
 0xdcb   : > { %9558 = vrcp.f32 %v6713_v8  ;;  %v6740_v8 = vpop.xlane.xlu1 %6739 }
 0xdce   : > { %v6719_v29 = vpop.xlane.xlu0 %6718 }
 0xdcf   : > { %9560 = vrcp.f32 %v6719_v29 }
 0xdd0   : > { %9562 = vrcp.f32 %v6716_v34 }
 0xdd1   : > { %v15325_v7 = vpop.eup %9552 }
 0xdd2   : > { %v15327_v12 = vpop.eup %9554  ;;  %v6725_v38 = vpop.xlane.xlu0 %6724 }
 0xdd3   : > { %v9557_v44 = vpop.eup %9556  ;;  %v6765_v4 = vadd.f32 %v15327_v12, %v15325_v7  ;;  %9564 = vrcp.f32 %v6725_v38 }
 0xdd4   : > { %v6822_v1 = vmul.f32 %v9557_v44, %v15221_v58  ;;  %v6823_v24 = vmul.f32 %v9557_v44, %v15225_v42  ;;  %9566 = vrcp.f32 %v6722_v20 }
 0xdd5   : > { %v9559_v9 = vpop.eup %9558  ;;  %6766 = vadd.xlane.f32.xlu0 %v6765_v4  ;;  %v6746_v4 = vpop.xlane.xlu1 %6745 }
 0xdd6   : > { %v6874_v52 = vpack.c.bf16 %v6822_v1, %v6820_v35  ;;  %v6875_v37 = vpack.c.bf16 %v6823_v24, %v6821_v49  ;;  %v6827_v15 = vmul.f32 %v9559_v9, %v15235_v25  ;;  %v6826_v30 = vmul.f32 %v9559_v9, %v15231_v63  ;;  %v6731_v42 = vpop.xlane.xlu0 %6730 }
 0xdd7   : > { %9568 = vrcp.f32 %v6731_v42 }
 0xdd8   : > { %7016 = vmatprep.mubr.bf16.mxu1 %v6875_v37  ;;  %v6877_v40 = vpack.c.bf16 %v6827_v15, %v6825_v17  ;;  %v6876_v10 = vpack.c.bf16 %v6826_v30, %v6824_v57  ;;  %9570 = vrcp.f32 %v6728_v0  ;;  %v16495_v17 = vld [vmem:[#allocation32_spill] sm:$0xff] }
 0xdd9   : > { %v9561_v60 = vpop.eup %9560  ;;  %7017 = vmatmul.mubr.bf16.gmra.mrb[20].mxu1 %v6874_v52  ;;  %v6752_v9 = vpop.xlane.xlu1 %6751 }
 0xdda   : > { %7024 = vmatprep.mubr.bf16.mxu1 %v6877_v40  ;;  %v9563_v58 = vpop.eup %9562  ;;  %v6831_v28 = vmul.f32 %v9561_v60, %v15243_v3  ;;  %v6830_v48 = vmul.f32 %v9561_v60, %v15239_v47  ;;  %v6737_v32 = vpop.xlane.xlu0 %6736 }
 0xddb   : > { %v6829_v33 = vmul.f32 %v9563_v58, %v15135_v55  ;;  %v6828_v3 = vmul.f32 %v9563_v58, %v15131_v11  ;;  %9572 = vrcp.f32 %v6737_v32  ;;  %v16497_v58 = vld [vmem:[#allocation96_spill] sm:$0xff]  ;;  %v16502_v32 = vld [vmem:[#allocation33_spill] sm:$0xff] }
 0xddc   : > { %9574 = vrcp.f32 %v6734_v5 }
 0xddd   : > { %v6879_v25 = vpack.c.bf16 %v6831_v28, %v6829_v33  ;;  %v9565_v22 = vpop.eup %9564  ;;  %v6878_v62 = vpack.c.bf16 %v6830_v48, %v6828_v3  ;;  %v6758_v30 = vpop.xlane.xlu1 %6757  ;;  %v16499_v33 = vld [vmem:[#allocation46_spill] sm:$0xff] }
 0xdde   : > { %v9567_v2 = vpop.eup %9566  ;;  %v6835_v63 = vmul.f32 %v9565_v22, %v15251_v14  ;;  %v6834_v41 = vmul.f32 %v9565_v22, %v15247_v61  ;;  %v6743_v46 = vpop.xlane.xlu0 %6742 }
 0xddf   : > { %v6833_v43 = vmul.f32 %v9567_v2, %v15141_v51  ;;  %v6832_v14 = vmul.f32 %v9567_v2, %v15137_v27  ;;  %9576 = vrcp.f32 %v6743_v46  ;;  %v16501_v2 = vld [vmem:[#allocation100_spill] sm:$0xff] }
 0xde0   : > { %9578 = vrcp.f32 %v6740_v8 }
 0xde1   : > { %7025 = vmatmul.mubr.bf16.gmra.mrb[24].mxu1 %v6876_v10  ;;  %v6881_v55 = vpack.c.bf16 %v6835_v63, %v6833_v43  ;;  %v9569_v18 = vpop.eup %9568  ;;  %v6880_v34 = vpack.c.bf16 %v6834_v41, %v6832_v14  ;;  %v16504_v41 = vld [vmem:[#allocation28_spill] sm:$0xff] }
 0xde2   : > { %7032 = vmatprep.mubr.bf16.mxu1 %v6879_v25  ;;  %v9571_v6 = vpop.eup %9570  ;;  %v6839_v47 = vmul.f32 %v9569_v18, %v15259_v23  ;;  %v6838_v50 = vmul.f32 %v9569_v18, %v15255_v31  ;;  %v6749_v44 = vpop.xlane.xlu0 %6748  ;;  %v16500_v25 = vld [vmem:[#allocation93_spill] sm:$0xff] }
 0xde3   : > { %v6837_v11 = vmul.f32 %v9571_v6, %v15149_v13  ;;  %v6836_v23 = vmul.f32 %v9571_v6, %v15145_v59  ;;  %9580 = vrcp.f32 %v6749_v44 }
 0xde4   : > { %9582 = vrcp.f32 %v6746_v4 }
 0xde5   : > { %v6883_v51 = vpack.c.bf16 %v6839_v47, %v6837_v11  ;;  %v9573_v29 = vpop.eup %9572  ;;  %v6882_v35 = vpack.c.bf16 %v6838_v50, %v6836_v23  ;;  %v16505_v47 = vld [vmem:[#allocation35_spill] sm:$0xff]  ;;  %v15371_v23 = vstv %s7364_s30  ;;  %s9681_s30 = sshll.u32 %s9750_s16, 4  ;;  %s9682_s30 = int_to_ptr.vmem [resolvable:$false] %s9681_s30 }
 0xde6   : > { %v9575_v19 = vpop.eup %9574  ;;  %v6843_v61 = vmul.f32 %v9573_v29, %v15267_v26  ;;  %v6842_v49 = vmul.f32 %v9573_v29, %v15263_v54  ;;  %v6755_v24 = vpop.xlane.xlu0 %6754  ;;  %v16496_v54 = vld [vmem:[#allocation66_spill] sm:$0xff]  ;;  %s9683_s29 = scalar_lea.vmem %s9682_s30, 8192  ;;  %p9684_p13 = scmp.lt.s32.totalorder %s15544_s18, %s9682_s30 }
 0xde7   : > { %v6841_v27 = vmul.f32 %v9575_v19, %v15155_v45  ;;  %v6840_v26 = vmul.f32 %v9575_v19, %v15151_v53  ;;  %9584 = vrcp.f32 %v6755_v24  ;;  %v16498_v53 = vld [vmem:[#allocation99_spill] sm:$0xff]  ;;  %p9685_p0 = scmp.lt.s32.totalorder %s9683_s29, %s9677_s26 }
 0xde8   : > { %9586 = vrcp.f32 %v6752_v9 }
 0xde9   : > { %7033 = vmatmul.mubr.bf16.gmra.mrb[28].mxu1 %v6878_v62  ;;  %v6885_v13 = vpack.c.bf16 %v6843_v61, %v6841_v27  ;;  %v9577_v1 = vpop.eup %9576  ;;  %v6884_v20 = vpack.c.bf16 %v6842_v49, %v6840_v26  ;;  %p9686_p1 = por %p9685_p0, %p9684_p13 }
 0xdea   : > { %7040 = vmatprep.mubr.bf16.mxu1 %v6881_v55  ;;  %v9579_v38 = vpop.eup %9578  ;;  %v6847_v31 = vmul.f32 %v9577_v1, %v15273_v56  ;;  %v6846_v15 = vmul.f32 %v9577_v1, %v16495_v17  ;;  %v6761_v40 = vpop.xlane.xlu0 %6760  ;;  %v16503_v55 = vld [vmem:[#allocation68_spill] sm:$0xff] }
 0xdeb   : > { %v6845_v59 = vmul.f32 %v9579_v38, %v15165_v16  ;;  %v6844_v56 = vmul.f32 %v9579_v38, %v16497_v58  ;;  %9588 = vrcp.f32 %v6761_v40  ;;  %p9687_p2 = pnand %p9686_p1, %p9680_p12 }
 0xdec   : > { %9590 = vrcp.f32 %v6758_v30 }
 0xded   : > { %v6887_v45 = vpack.c.bf16 %v6847_v31, %v6845_v59  ;;  %v9581_v52 = vpop.eup %9580  ;;  %v6886_v28 = vpack.c.bf16 %v6846_v15, %v6844_v56  ;;  %v16507_v31 = vld [vmem:[#allocation81_spill] sm:$0xff]  ;;  %v16508_v59 = vld [vmem:[#allocation39_spill] sm:$0xff]  ;;  %v16509_v15 = vld [vmem:[#allocation58_spill] sm:$0xff] }
 0xdee   : > { %v9583_v37 = vpop.eup %9582  ;;  %v6851_v60 = vmul.f32 %v9581_v52, %v16496_v54  ;;  %v6850_v10 = vmul.f32 %v9581_v52, %v16499_v33 }
 0xdef   : > { %v6849_v42 = vmul.f32 %v9583_v37, %v16498_v53  ;;  %v6848_v48 = vmul.f32 %v9583_v37, %v16501_v2  ;;  %v16511_v53 = vld [vmem:[#allocation11_spill] sm:$0xff] }
 0xdf1   : > { %7041 = vmatmul.mubr.bf16.gmra.mrb[32].mxu1 %v6880_v34  ;;  %v6889_v16 = vpack.c.bf16 %v6851_v60, %v6849_v42  ;;  %v9585_v57 = vpop.eup %9584  ;;  %v6888_v3 = vpack.c.bf16 %v6850_v10, %v6848_v48  ;;  %v16510_v60 = vld [vmem:[#allocation10_spill] sm:$0xff] }
 0xdf2   : > { %7048 = vmatprep.mubr.bf16.mxu1 %v6883_v51  ;;  %v9587_v0 = vpop.eup %9586  ;;  %v6855_v22 = vmul.f32 %v9585_v57, %v16500_v25  ;;  %v6854_v18 = vmul.f32 %v9585_v57, %v16503_v55  ;;  %v16506_v51 = vld [vmem:[#allocation98_spill] sm:$0xff]  ;;  %v16512_v57 = vld [vmem:[#allocation59_spill] sm:$0xff]  ;;  %v16515_v55 = vld [vmem:[#allocation13_spill] sm:$0xff] }
 0xdf3   : > { %v6853_v63 = vmul.f32 %v9587_v0, %v16502_v32  ;;  %v6852_v46 = vmul.f32 %v9587_v0, %v16504_v41  ;;  %v16513_v25 = vld [vmem:[#allocation55_spill] sm:$0xff]  ;;  %v16514_v32 = vld [vmem:[#allocation12_spill] sm:$0xff] }
 0xdf5   : > { %v6891_v5 = vpack.c.bf16 %v6855_v22, %v6853_v63  ;;  %v9589_v43 = vpop.eup %9588  ;;  %v6890_v8 = vpack.c.bf16 %v6854_v18, %v6852_v46  ;;  %v16516_v46 = vld [vmem:[#allocation56_spill] sm:$0xff] }
 0xdf6   : > { %v9591_v62 = vpop.eup %9590  ;;  %v6859_v6 = vmul.f32 %v9589_v43, %v15291_v36  ;;  %v6858_v34 = vmul.f32 %v9589_v43, %v15287_v39 }
 0xdf7   : > { %v6857_v14 = vmul.f32 %v9591_v62, %v16505_v47  ;;  %v6856_v29 = vmul.f32 %v9591_v62, %v16506_v51 }
 0xdf9   : > { %7049 = vmatmul.mubr.bf16.gmra.mrb[36].mxu1 %v6882_v35  ;;  %v6893_v11 = vpack.c.bf16 %v6859_v6, %v6857_v14  ;;  %v6892_v19 = vpack.c.bf16 %v6858_v34, %v6856_v29 }
 0xdfa   : > { %7056 = vmatprep.mubr.bf16.mxu1 %v6885_v13 }
 0xe01   : > { %7057 = vmatmul.mubr.bf16.gmra.mrb[40].mxu1 %v6884_v20 }
 0xe02   : > { %7064 = vmatprep.mubr.bf16.mxu1 %v6887_v45 }
 0xe09   : > { %7065 = vmatmul.mubr.bf16.gmra.mrb[44].mxu1 %v6886_v28 }
 0xe0a   : > { %7072 = vmatprep.mubr.bf16.mxu1 %v6889_v16 }
 0xe11   : > { %7073 = vmatmul.mubr.bf16.gmra.mrb[48].mxu1 %v6888_v3 }
 0xe12   : > { %7080 = vmatprep.mubr.bf16.mxu1 %v6891_v5 }
 0xe19   : > { %7081 = vmatmul.mubr.bf16.gmra.mrb[52].mxu1 %v6890_v8 }
 0xe1a   : > { %7088 = vmatprep.mubr.bf16.mxu1 %v6893_v11  ;;  %v16517_v11 = vld [vmem:[#allocation64_spill] sm:$0xff] }
 0xe1f   : > { %v6764_v50 = vpop.xlane.xlu1 %6763 }
 0xe20   : > { %9592 = vrcp.f32 %v6764_v50 }
 0xe21   : > { %7089 = vmatmul.mubr.bf16.gmra.mrb[56].mxu1 %v6892_v19  ;;  %v16518_v19 = vld [vmem:[#allocation14_spill] sm:$0xff] }
 0xe2a   : > { %v9593_v4 = vpop.eup %9592 }
 0xe2b   : > { %v6860_v49 = vmul.f32 %v9593_v4, %v15301_v21  ;;  %v6861_v26 = vmul.f32 %v9593_v4, %v16507_v31  ;;  %v16521_v31 = vld [vmem:[#allocation61_spill] sm:$0xff] }
 0xe62   : > { %v6767_v44 = vpop.xlane.xlu0 %6766 }
 0xe63   : > { %9594 = vrcp.f32 %v6767_v44 }
 0xe69   : > { %v8304_v36 = vpop.f32.mrb[0].mxu1 }
 0xe6a   : > { %v8305_v61 = vpop.f32.mrb[1].mxu1 }
 0xe6b   : > { %v8306_v27 = vadd.f32 %v8305_v61, %v8304_v36  ;;  %v8307_v35 = vpop.f32.mrb[2].mxu1 }
 0xe6c   : > { %v8308_v13 = vpop.f32.mrb[3].mxu1 }
 0xe6d   : > { %v9595_v39 = vpop.eup %9594  ;;  %v7106_v1 = vmul.f32 %v8306_v27, %v15371_v23  ;;  %v8309_v38 = vadd.f32 %v8308_v13, %v8307_v35  ;;  %v16519_v27 = vld [vmem:[#allocation15_spill] sm:$0xff] }
 0xe6e   : > { %v6862_v24 = vmul.f32 %v9595_v39, %v15325_v7  ;;  %v6863_v9 = vmul.f32 %v9595_v39, %v15327_v12 }
 0xe6f   : > { %v7138_v20 = vadd.f32 %v7106_v1, %v16508_v59  ;;  %v7107_v45 = vmul.f32 %v8309_v38, %v15371_v23  ;;  %v16520_v1 = vld [vmem:[#allocation65_spill] sm:$0xff] }
 0xe70   : > { %v6894_v52 = vpack.c.bf16 %v6862_v24, %v6860_v49  ;;  %v6895_v37 = vpack.c.bf16 %v6863_v9, %v6861_v26 }
 0xe71   : > { %v7170_v17 = vmul.f32 0.5, %v7138_v20  ;;  %v7139_v40 = vadd.f32 %v7107_v45, %v16509_v15  ;;  %v8310_v54 = vpop.f32.mrb[4].mxu1  ;;  %v16522_v20 = vld [vmem:[#allocation18_spill] sm:$0xff] }
 0xe72   : > { %7096 = vmatprep.mubr.bf16.mxu1 %v6895_v37  ;;  %v8311_v21 = vpop.f32.mrb[5].mxu1 }
 0xe73   : > { %v7202_v7 = vadd.f32 %v7170_v17, %v16510_v60  ;;  %v7171_v58 = vmul.f32 0.5, %v7139_v40  ;;  %v8312_v56 = vadd.f32 %v8311_v21, %v8310_v54  ;;  %7097 = vmatmul.mubr.bf16.gmra.mrb[60].mxu1 %v6894_v52  ;;  %v8313_v12 = vpop.f32.mrb[6].mxu1  ;;  %v16523_v40 = vld [vmem:[#allocation19_spill] sm:$0xff] }
 0xe74   : > { %v8314_v30 = vpop.f32.mrb[7].mxu1 }
 0xe75   : > { %7234 = vst.msk [vmem:[%s15385_s28] sm:$0xff] %vm462_vm0, %v7202_v7  ;;  %v7203_v42 = vadd.f32 %v7171_v58, %v16511_v53  ;;  %v7108_v28 = vmul.f32 %v8312_v56, %v15371_v23  ;;  %v8315_v16 = vadd.f32 %v8314_v30, %v8313_v12  ;;  %v16524_v7 = vld [vmem:[#allocation62_spill] sm:$0xff]  ;;  %v16525_v30 = vld [vmem:[#allocation71_spill] sm:$0xff] }
 0xe77   : > { %7235 = vst.msk [vmem:[%s15385_s28 + $0x8] sm:$0xff] %vm462_vm0, %v7203_v42  ;;  %v7140_v0 = vadd.f32 %v7108_v28, %v16512_v57  ;;  %v7109_v33 = vmul.f32 %v8315_v16, %v15371_v23  ;;  %v16526_v42 = vld [vmem:[#allocation20_spill] sm:$0xff]  ;;  %v16527_v57 = vld [vmem:[#allocation21_spill] sm:$0xff] }
 0xe79   : > { %v7172_v10 = vmul.f32 0.5, %v7140_v0  ;;  %v7141_v22 = vadd.f32 %v7109_v33, %v16513_v25  ;;  %v8316_v2 = vpop.f32.mrb[8].mxu1 }
 0xe7a   : > { %v8317_v48 = vpop.f32.mrb[9].mxu1 }
 0xe7b   : > { %v7204_v63 = vadd.f32 %v7172_v10, %v16514_v32  ;;  %v7173_v3 = vmul.f32 0.5, %v7141_v22  ;;  %v8318_v5 = vadd.f32 %v8317_v48, %v8316_v2  ;;  %v8319_v43 = vpop.f32.mrb[10].mxu1 }
 0xe7c   : > { %v8320_v62 = vpop.f32.mrb[11].mxu1 }
 0xe7d   : > { %7236 = vst.msk [vmem:[%s15385_s28 + $0x10] sm:$0xff] %vm462_vm0, %v7204_v63  ;;  %v7205_v18 = vadd.f32 %v7173_v3, %v16515_v55  ;;  %v7110_v6 = vmul.f32 %v8318_v5, %v15371_v23  ;;  %v8321_v41 = vadd.f32 %v8320_v62, %v8319_v43  ;;  %v16528_v63 = vld [vmem:[#allocation72_spill] sm:$0xff]  ;;  %v16529_v62 = vld [vmem:[#allocation74_spill] sm:$0xff] }
 0xe7f   : > { %7237 = vst.msk [vmem:[%s15385_s28 + $0x18] sm:$0xff] %vm462_vm0, %v7205_v18  ;;  %v7142_v47 = vadd.f32 %v7110_v6, %v16516_v46  ;;  %v7111_v14 = vmul.f32 %v8321_v41, %v15371_v23  ;;  %v16530_v41 = vld [vmem:[#allocation22_spill] sm:$0xff] }
 0xe81   : > { %v7174_v8 = vmul.f32 0.5, %v7142_v47  ;;  %v7143_v34 = vadd.f32 %v7111_v14, %v16517_v11  ;;  %v8322_v51 = vpop.f32.mrb[12].mxu1 }
 0xe82   : > { %v8323_v29 = vpop.f32.mrb[13].mxu1 }
 0xe83   : > { %v7206_v50 = vadd.f32 %v7174_v8, %v16518_v19  ;;  %v7175_v44 = vmul.f32 0.5, %v7143_v34  ;;  %v8324_v36 = vadd.f32 %v8323_v29, %v8322_v51  ;;  %v8325_v61 = vpop.f32.mrb[14].mxu1  ;;  %v16531_v34 = vld [vmem:[#allocation23_spill] sm:$0xff] }
 0xe84   : > { %v8326_v4 = vpop.f32.mrb[15].mxu1 }
 0xe85   : > { %7238 = vst.msk [vmem:[%s15385_s28 + $0x20] sm:$0xff] %vm462_vm0, %v7206_v50  ;;  %v7207_v35 = vadd.f32 %v7175_v44, %v16519_v27  ;;  %v7112_v13 = vmul.f32 %v8324_v36, %v15371_v23  ;;  %v8327_v39 = vadd.f32 %v8326_v4, %v8325_v61  ;;  %v16532_v50 = vld [vmem:[#allocation75_spill] sm:$0xff]  ;;  %v16533_v4 = vld [vmem:[#allocation70_spill] sm:$0xff] }
 0xe87   : > { %7239 = vst.msk [vmem:[%s15385_s28 + $0x28] sm:$0xff] %vm462_vm0, %v7207_v35  ;;  %v7144_v38 = vadd.f32 %v7112_v13, %v16520_v1  ;;  %v7113_v49 = vmul.f32 %v8327_v39, %v15371_v23  ;;  %v16534_v39 = vld [vmem:[#allocation24_spill] sm:$0xff] }
 0xe89   : > { %v7176_v24 = vmul.f32 0.5, %v7144_v38  ;;  %v7145_v26 = vadd.f32 %v7113_v49, %v16521_v31  ;;  %v8328_v9 = vpop.f32.mrb[16].mxu1 }
 0xe8a   : > { %v8329_v59 = vpop.f32.mrb[17].mxu1 }
 0xe8b   : > { %v7208_v45 = vadd.f32 %v7176_v24, %v16522_v20  ;;  %v7177_v52 = vmul.f32 0.5, %v7145_v26  ;;  %v8330_v37 = vadd.f32 %v8329_v59, %v8328_v9  ;;  %v8331_v17 = vpop.f32.mrb[18].mxu1  ;;  %v16535_v26 = vld [vmem:[#allocation26_spill] sm:$0xff] }
 0xe8c   : > { %v8332_v15 = vpop.f32.mrb[19].mxu1 }
 0xe8d   : > { %7240 = vst.msk [vmem:[%s15385_s28 + $0x30] sm:$0xff] %vm462_vm0, %v7208_v45  ;;  %v7209_v54 = vadd.f32 %v7177_v52, %v16523_v40  ;;  %v7114_v21 = vmul.f32 %v8330_v37, %v15371_v23  ;;  %v8333_v60 = vadd.f32 %v8332_v15, %v8331_v17  ;;  %v16536_v45 = vld [vmem:[#allocation89_spill] sm:$0xff]  ;;  %v16537_v15 = vld [vmem:[#allocation16_spill] sm:$0xff] }
 0xe8f   : > { %7241 = vst.msk [vmem:[%s15385_s28 + $0x38] sm:$0xff] %vm462_vm0, %v7209_v54  ;;  %v7146_v58 = vadd.f32 %v7114_v21, %v16524_v7  ;;  %v7115_v56 = vmul.f32 %v8333_v60, %v15371_v23  ;;  %v16538_v60 = vld [vmem:[#allocation27_spill] sm:$0xff] }
 0xe91   : > { %v7178_v12 = vmul.f32 0.5, %v7146_v58  ;;  %v7147_v53 = vadd.f32 %v7115_v56, %v16525_v30 }
 0xe93   : > { %v7210_v28 = vadd.f32 %v7178_v12, %v16526_v42  ;;  %v7179_v16 = vmul.f32 0.5, %v7147_v53  ;;  %v16539_v53 = vld [vmem:[#allocation29_spill] sm:$0xff] }
 0xe95   : > { %7242 = vst.msk [vmem:[%s15385_s28 + $0x40] sm:$0xff] %vm462_vm0, %v7210_v28  ;;  %v7211_v0 = vadd.f32 %v7179_v16, %v16527_v57  ;;  %v16540_v57 = vld [vmem:[#allocation76_spill] sm:$0xff] }
 0xe97   : > { %7243 = vst.msk [vmem:[%s15385_s28 + $0x48] sm:$0xff] %vm462_vm0, %v7211_v0 }
 0xeac   : > { %v8334_v33 = vpop.f32.mrb[20].mxu1 }
 0xead   : > { %v8335_v10 = vpop.f32.mrb[21].mxu1 }
 0xeae   : > { %v8336_v25 = vadd.f32 %v8335_v10, %v8334_v33  ;;  %v8337_v22 = vpop.f32.mrb[22].mxu1 }
 0xeaf   : > { %v8338_v2 = vpop.f32.mrb[23].mxu1 }
 0xeb0   : > { %v7116_v48 = vmul.f32 %v8336_v25, %v15371_v23  ;;  %v8339_v32 = vadd.f32 %v8338_v2, %v8337_v22  ;;  %v16541_v25 = vld [vmem:[#allocation85_spill] sm:$0xff] }
 0xeb2   : > { %v7148_v3 = vadd.f32 %v7116_v48, %v16528_v63  ;;  %v7117_v5 = vmul.f32 %v8339_v32, %v15371_v23  ;;  %v16542_v32 = vld [vmem:[#allocation30_spill] sm:$0xff] }
 0xeb4   : > { %v7180_v43 = vmul.f32 0.5, %v7148_v3  ;;  %v7149_v55 = vadd.f32 %v7117_v5, %v16529_v62  ;;  %v8340_v18 = vpop.f32.mrb[24].mxu1 }
 0xeb5   : > { %v8341_v6 = vpop.f32.mrb[25].mxu1 }
 0xeb6   : > { %v7212_v46 = vadd.f32 %v7180_v43, %v16530_v41  ;;  %v7181_v47 = vmul.f32 0.5, %v7149_v55  ;;  %v8342_v14 = vadd.f32 %v8341_v6, %v8340_v18  ;;  %v8343_v8 = vpop.f32.mrb[26].mxu1  ;;  %v16543_v55 = vld [vmem:[#allocation34_spill] sm:$0xff] }
 0xeb7   : > { %v8344_v11 = vpop.f32.mrb[27].mxu1 }
 0xeb8   : > { %7244 = vst.msk [vmem:[%s15385_s28 + $0x50] sm:$0xff] %vm462_vm0, %v7212_v46  ;;  %v7213_v51 = vadd.f32 %v7181_v47, %v16531_v34  ;;  %v7118_v29 = vmul.f32 %v8342_v14, %v15371_v23  ;;  %v8345_v19 = vadd.f32 %v8344_v11, %v8343_v8  ;;  %v16544_v46 = vld [vmem:[#allocation88_spill] sm:$0xff]  ;;  %v16545_v11 = vld [vmem:[#allocation69_spill] sm:$0xff] }
 0xeba   : > { %7245 = vst.msk [vmem:[%s15385_s28 + $0x58] sm:$0xff] %vm462_vm0, %v7213_v51  ;;  %v7150_v44 = vadd.f32 %v7118_v29, %v16532_v50  ;;  %v7119_v36 = vmul.f32 %v8345_v19, %v15371_v23  ;;  %v16546_v19 = vld [vmem:[#allocation36_spill] sm:$0xff] }
 0xebc   : > { %v7182_v61 = vmul.f32 0.5, %v7150_v44  ;;  %v7151_v27 = vadd.f32 %v7119_v36, %v16533_v4  ;;  %v8346_v35 = vpop.f32.mrb[28].mxu1 }
 0xebd   : > { %v8347_v13 = vpop.f32.mrb[29].mxu1 }
 0xebe   : > { %v7214_v1 = vadd.f32 %v7182_v61, %v16534_v39  ;;  %v7183_v38 = vmul.f32 0.5, %v7151_v27  ;;  %v8348_v49 = vadd.f32 %v8347_v13, %v8346_v35  ;;  %v8349_v24 = vpop.f32.mrb[30].mxu1  ;;  %v16547_v27 = vld [vmem:[#allocation37_spill] sm:$0xff] }
 0xebf   : > { %v8350_v31 = vpop.f32.mrb[31].mxu1 }
 0xec0   : > { %7246 = vst.msk [vmem:[%s15385_s28 + $0x60] sm:$0xff] %vm462_vm0, %v7214_v1  ;;  %v7215_v9 = vadd.f32 %v7183_v38, %v16535_v26  ;;  %v7120_v59 = vmul.f32 %v8348_v49, %v15371_v23  ;;  %v8351_v20 = vadd.f32 %v8350_v31, %v8349_v24  ;;  %v16548_v1 = vld [vmem:[#allocation73_spill] sm:$0xff] }
 0xec1   : > { %v16549_v31 = vld [vmem:[#allocation77_spill] sm:$0xff] }
 0xec2   : > { %7247 = vst.msk [vmem:[%s15385_s28 + $0x68] sm:$0xff] %vm462_vm0, %v7215_v9  ;;  %v7152_v52 = vadd.f32 %v7120_v59, %v16536_v45  ;;  %v7121_v37 = vmul.f32 %v8351_v20, %v15371_v23  ;;  %v16550_v20 = vld [vmem:[#allocation40_spill] sm:$0xff] }
 0xec4   : > { %v7184_v17 = vmul.f32 0.5, %v7152_v52  ;;  %v7153_v40 = vadd.f32 %v7121_v37, %v16537_v15  ;;  %v8352_v54 = vpop.f32.mrb[32].mxu1 }
 0xec5   : > { %v8353_v21 = vpop.f32.mrb[33].mxu1 }
 0xec6   : > { %v7216_v7 = vadd.f32 %v7184_v17, %v16538_v60  ;;  %v7185_v58 = vmul.f32 0.5, %v7153_v40  ;;  %v8354_v56 = vadd.f32 %v8353_v21, %v8352_v54  ;;  %v8355_v12 = vpop.f32.mrb[34].mxu1  ;;  %v16551_v40 = vld [vmem:[#allocation41_spill] sm:$0xff] }
 0xec7   : > { %v8356_v30 = vpop.f32.mrb[35].mxu1 }
 0xec8   : > { %7248 = vst.msk [vmem:[%s15385_s28 + $0x70] sm:$0xff] %vm462_vm0, %v7216_v7  ;;  %v7217_v42 = vadd.f32 %v7185_v58, %v16539_v53  ;;  %v7122_v28 = vmul.f32 %v8354_v56, %v15371_v23  ;;  %v8357_v16 = vadd.f32 %v8356_v30, %v8355_v12  ;;  %v16552_v7 = vld [vmem:[#allocation47_spill] sm:$0xff]  ;;  %v16553_v30 = vld [vmem:[#allocation86_spill] sm:$0xff] }
 0xeca   : > { %7249 = vst.msk [vmem:[%s15385_s28 + $0x78] sm:$0xff] %vm462_vm0, %v7217_v42  ;;  %v7154_v0 = vadd.f32 %v7122_v28, %v16540_v57  ;;  %v7123_v33 = vmul.f32 %v8357_v16, %v15371_v23  ;;  %v16554_v16 = vld [vmem:[#allocation42_spill] sm:$0xff] }
 0xecc   : > { %v7186_v10 = vmul.f32 0.5, %v7154_v0  ;;  %v7155_v22 = vadd.f32 %v7123_v33, %v16541_v25  ;;  %v8358_v2 = vpop.f32.mrb[36].mxu1 }
 0xecd   : > { %v8359_v48 = vpop.f32.mrb[37].mxu1 }
 0xece   : > { %v7218_v63 = vadd.f32 %v7186_v10, %v16542_v32  ;;  %v7187_v3 = vmul.f32 0.5, %v7155_v22  ;;  %v8360_v5 = vadd.f32 %v8359_v48, %v8358_v2  ;;  %v8361_v43 = vpop.f32.mrb[38].mxu1  ;;  %v16555_v22 = vld [vmem:[#allocation43_spill] sm:$0xff] }
 0xecf   : > { %v8362_v62 = vpop.f32.mrb[39].mxu1 }
 0xed0   : > { %7250 = vst.msk [vmem:[%s15385_s28 + $0x80] sm:$0xff] %vm462_vm0, %v7218_v63  ;;  %v7219_v18 = vadd.f32 %v7187_v3, %v16543_v55  ;;  %v7124_v6 = vmul.f32 %v8360_v5, %v15371_v23  ;;  %v8363_v41 = vadd.f32 %v8362_v62, %v8361_v43  ;;  %v16556_v63 = vld [vmem:[#allocation87_spill] sm:$0xff]  ;;  %v16557_v62 = vld [vmem:[#allocation84_spill] sm:$0xff] }
 0xed2   : > { %7251 = vst.msk [vmem:[%s15385_s28 + $0x88] sm:$0xff] %vm462_vm0, %v7219_v18  ;;  %v7156_v47 = vadd.f32 %v7124_v6, %v16544_v46  ;;  %v7125_v14 = vmul.f32 %v8363_v41, %v15371_v23  ;;  %v16558_v41 = vld [vmem:[#allocation44_spill] sm:$0xff] }
 0xed4   : > { %v7188_v8 = vmul.f32 0.5, %v7156_v47  ;;  %v7157_v34 = vadd.f32 %v7125_v14, %v16545_v11  ;;  %v8364_v51 = vpop.f32.mrb[40].mxu1 }
 0xed5   : > { %v8365_v29 = vpop.f32.mrb[41].mxu1 }
 0xed6   : > { %v7220_v50 = vadd.f32 %v7188_v8, %v16546_v19  ;;  %v7189_v44 = vmul.f32 0.5, %v7157_v34  ;;  %v8366_v36 = vadd.f32 %v8365_v29, %v8364_v51  ;;  %v8367_v61 = vpop.f32.mrb[42].mxu1  ;;  %v16559_v34 = vld [vmem:[#allocation45_spill] sm:$0xff] }
 0xed7   : > { %v8368_v4 = vpop.f32.mrb[43].mxu1 }
 0xed8   : > { %7252 = vst.msk [vmem:[%s15385_s28 + $0x90] sm:$0xff] %vm462_vm0, %v7220_v50  ;;  %v7221_v35 = vadd.f32 %v7189_v44, %v16547_v27  ;;  %v7126_v13 = vmul.f32 %v8366_v36, %v15371_v23  ;;  %v8369_v39 = vadd.f32 %v8368_v4, %v8367_v61  ;;  %v16560_v50 = vld [vmem:[#allocation38_spill] sm:$0xff]  ;;  %v16561_v4 = vld [vmem:[#allocation63_spill] sm:$0xff] }
 0xeda   : > { %7253 = vst.msk [vmem:[%s15385_s28 + $0x98] sm:$0xff] %vm462_vm0, %v7221_v35  ;;  %v7158_v38 = vadd.f32 %v7126_v13, %v16548_v1  ;;  %v7127_v49 = vmul.f32 %v8369_v39, %v15371_v23  ;;  %v16562_v39 = vld [vmem:[#allocation48_spill] sm:$0xff] }
 0xedc   : > { %v7190_v24 = vmul.f32 0.5, %v7158_v38  ;;  %v7159_v26 = vadd.f32 %v7127_v49, %v16549_v31  ;;  %v8370_v9 = vpop.f32.mrb[44].mxu1 }
 0xedd   : > { %v8371_v59 = vpop.f32.mrb[45].mxu1 }
 0xede   : > { %v7222_v45 = vadd.f32 %v7190_v24, %v16550_v20  ;;  %v7191_v52 = vmul.f32 0.5, %v7159_v26  ;;  %v8372_v37 = vadd.f32 %v8371_v59, %v8370_v9  ;;  %v8373_v17 = vpop.f32.mrb[46].mxu1  ;;  %v16563_v26 = vld [vmem:[#allocation49_spill] sm:$0xff] }
 0xedf   : > { %v8374_v15 = vpop.f32.mrb[47].mxu1 }
 0xee0   : > { %7254 = vst.msk [vmem:[%s15385_s28 + $0xa0] sm:$0xff] %vm462_vm0, %v7222_v45  ;;  %v7223_v54 = vadd.f32 %v7191_v52, %v16551_v40  ;;  %v7128_v21 = vmul.f32 %v8372_v37, %v15371_v23  ;;  %v8375_v60 = vadd.f32 %v8374_v15, %v8373_v17  ;;  %v16564_v45 = vld [vmem:[#allocation57_spill] sm:$0xff]  ;;  %v16565_v15 = vld [vmem:[#allocation60_spill] sm:$0xff] }
 0xee2   : > { %7255 = vst.msk [vmem:[%s15385_s28 + $0xa8] sm:$0xff] %vm462_vm0, %v7223_v54  ;;  %v7160_v58 = vadd.f32 %v7128_v21, %v16552_v7  ;;  %v7129_v56 = vmul.f32 %v8375_v60, %v15371_v23  ;;  %v16566_v54 = vld [vmem:[#allocation50_spill] sm:$0xff]  ;;  %v16567_v7 = vld [vmem:[#allocation51_spill] sm:$0xff] }
 0xee4   : > { %v7192_v12 = vmul.f32 0.5, %v7160_v58  ;;  %v7161_v53 = vadd.f32 %v7129_v56, %v16553_v30  ;;  %v8376_v42 = vpop.f32.mrb[48].mxu1 }
 0xee5   : > { %v8377_v28 = vpop.f32.mrb[49].mxu1 }
 0xee6   : > { %v7224_v57 = vadd.f32 %v7192_v12, %v16554_v16  ;;  %v7193_v0 = vmul.f32 0.5, %v7161_v53  ;;  %v8378_v33 = vadd.f32 %v8377_v28, %v8376_v42  ;;  %v8379_v10 = vpop.f32.mrb[50].mxu1 }
 0xee7   : > { %v8380_v25 = vpop.f32.mrb[51].mxu1 }
 0xee8   : > { %7256 = vst.msk [vmem:[%s15385_s28 + $0xb0] sm:$0xff] %vm462_vm0, %v7224_v57  ;;  %v7225_v2 = vadd.f32 %v7193_v0, %v16555_v22  ;;  %v7130_v48 = vmul.f32 %v8378_v33, %v15371_v23  ;;  %v8381_v32 = vadd.f32 %v8380_v25, %v8379_v10  ;;  %v16568_v57 = vld [vmem:[#allocation54_spill] sm:$0xff] }
 0xee9   : > { %v16569_v25 = vld [vmem:[#allocation82_spill] sm:$0xff] }
 0xeea   : > { %7257 = vst.msk [vmem:[%s15385_s28 + $0xb8] sm:$0xff] %vm462_vm0, %v7225_v2  ;;  %v7162_v3 = vadd.f32 %v7130_v48, %v16556_v63  ;;  %v7131_v5 = vmul.f32 %v8381_v32, %v15371_v23  ;;  %v16570_v2 = vld [vmem:[#allocation52_spill] sm:$0xff] }
 0xeec   : > { %v7194_v43 = vmul.f32 0.5, %v7162_v3  ;;  %v7163_v55 = vadd.f32 %v7131_v5, %v16557_v62  ;;  %v8382_v18 = vpop.f32.mrb[52].mxu1 }
 0xeed   : > { %v8383_v6 = vpop.f32.mrb[53].mxu1 }
 0xeee   : > { %v7226_v46 = vadd.f32 %v7194_v43, %v16558_v41  ;;  %v7195_v47 = vmul.f32 0.5, %v7163_v55  ;;  %v8384_v14 = vadd.f32 %v8383_v6, %v8382_v18  ;;  %v8385_v8 = vpop.f32.mrb[54].mxu1 }
 0xeef   : > { %v8386_v11 = vpop.f32.mrb[55].mxu1 }
 0xef0   : > { %7258 = vst.msk [vmem:[%s15385_s28 + $0xc0] sm:$0xff] %vm462_vm0, %v7226_v46  ;;  %v7227_v51 = vadd.f32 %v7195_v47, %v16559_v34  ;;  %v7132_v29 = vmul.f32 %v8384_v14, %v15371_v23  ;;  %v8387_v19 = vadd.f32 %v8386_v11, %v8385_v8 }
 0xef2   : > { %7259 = vst.msk [vmem:[%s15385_s28 + $0xc8] sm:$0xff] %vm462_vm0, %v7227_v51  ;;  %v7164_v44 = vadd.f32 %v7132_v29, %v16560_v50  ;;  %v7133_v36 = vmul.f32 %v8387_v19, %v15371_v23 }
 0xef4   : > { %v7196_v61 = vmul.f32 0.5, %v7164_v44  ;;  %v7165_v27 = vadd.f32 %v7133_v36, %v16561_v4  ;;  %v8388_v35 = vpop.f32.mrb[56].mxu1 }
 0xef5   : > { %v8389_v13 = vpop.f32.mrb[57].mxu1 }
 0xef6   : > { %v7228_v1 = vadd.f32 %v7196_v61, %v16562_v39  ;;  %v7197_v38 = vmul.f32 0.5, %v7165_v27  ;;  %v8390_v49 = vadd.f32 %v8389_v13, %v8388_v35  ;;  %v8391_v24 = vpop.f32.mrb[58].mxu1 }
 0xef7   : > { %v8392_v31 = vpop.f32.mrb[59].mxu1 }
 0xef8   : > { %7260 = vst.msk [vmem:[%s15385_s28 + $0xd0] sm:$0xff] %vm462_vm0, %v7228_v1  ;;  %v7229_v9 = vadd.f32 %v7197_v38, %v16563_v26  ;;  %v7134_v59 = vmul.f32 %v8390_v49, %v15371_v23  ;;  %v8393_v20 = vadd.f32 %v8392_v31, %v8391_v24 }
 0xefa   : > { %7261 = vst.msk [vmem:[%s15385_s28 + $0xd8] sm:$0xff] %vm462_vm0, %v7229_v9  ;;  %v7166_v52 = vadd.f32 %v7134_v59, %v16564_v45  ;;  %v7135_v37 = vmul.f32 %v8393_v20, %v15371_v23 }
 0xefc   : > { %v7198_v17 = vmul.f32 0.5, %v7166_v52  ;;  %v7167_v40 = vadd.f32 %v7135_v37, %v16565_v15 }
 0xefe   : > { %v7230_v21 = vadd.f32 %v7198_v17, %v16566_v54  ;;  %v7199_v60 = vmul.f32 0.5, %v7167_v40 }
 0xf00   : > { %7262 = vst.msk [vmem:[%s15385_s28 + $0xe0] sm:$0xff] %vm462_vm0, %v7230_v21  ;;  %v7231_v58 = vadd.f32 %v7199_v60, %v16567_v7 }
 0xf02   : > { %7263 = vst.msk [vmem:[%s15385_s28 + $0xe8] sm:$0xff] %vm462_vm0, %v7231_v58 }
 0xf46   : > { %v8394_v56 = vpop.f32.mrb[60].mxu1 }
 0xf47   : > { %v8395_v12 = vpop.f32.mrb[61].mxu1 }
 0xf48   : > { %v8396_v30 = vadd.f32 %v8395_v12, %v8394_v56  ;;  %v8397_v53 = vpop.f32.mrb[62].mxu1 }
 0xf49   : > { %v8398_v42 = vpop.f32.mrb[63].mxu1 }
 0xf4a   : > { %v7136_v28 = vmul.f32 %v8396_v30, %v15371_v23  ;;  %v8399_v16 = vadd.f32 %v8398_v42, %v8397_v53 }
 0xf4c   : > { %v7168_v0 = vadd.f32 %v7136_v28, %v16568_v57  ;;  %v7137_v33 = vmul.f32 %v8399_v16, %v15371_v23  ;;  %v16571_v23 = vld [vmem:[#allocation53_spill] sm:$0xff] }
 0xf4e   : > { %v7200_v10 = vmul.f32 0.5, %v7168_v0  ;;  %v7169_v22 = vadd.f32 %v7137_v33, %v16569_v25 }
 0xf50   : > { %v7232_v48 = vadd.f32 %v7200_v10, %v16570_v2  ;;  %v7201_v32 = vmul.f32 0.5, %v7169_v22 }
 0xf52   : > { %7264 = vst.msk [vmem:[%s15385_s28 + $0xf0] sm:$0xff] %vm462_vm0, %v7232_v48  ;;  %v7233_v63 = vadd.f32 %v7201_v32, %v16571_v23 }
 0xf54   : > { %7265 = vst.msk [vmem:[%s15385_s28 + $0xf8] sm:$0xff] %vm462_vm0, %v7233_v63 }
 0xf55   : > { %9690 = shalt.err (!%p9687_p2)
}
 0xf56   : > { %s9691_s0 = scalar_lea.hbm %s15542_s20, 4096  ;;  %s9695_s19 = scalar_lea.hbm %s15606_s12, 8192 }
 0xf57   : > { %p9692_p3 = scmp.ne.s32.totalorder %s15542_s20, %s9691_s0  ;;  %p9696_p8 = scmp.lt.u32.totalorder %s15542_s20, %s15606_s12 }
 0xf58   : > { %p9697_p11 = scmp.lt.u32.totalorder %s9695_s19, %s9691_s0  ;;  %p9699_p10 = scmp.lt.u32.totalorder %s9691_s0, %s15542_s20 }
 0xf59   : > { %p9693_p4 = pnand %p9692_p3, %p9856_p5 }
 0xf5a   : > { %p9698_p9 = por %p9697_p11, %p9696_p8 }
 0xf5b   : > { %p9694_p7 = pneg %p9693_p4 }
 0xf5c   : > { %p9700_p12 = por %p9699_p10, %p9698_p9 }
 0xf5e   : > { %p9701_p13 = pnand %p9700_p12, %p9694_p7 }
 0xf60   : > { %9704 = shalt.err (!%p9701_p13)
}
 0xf61   : > { %s9751_s26 = smov 128   ;;  %s9752_s30 = smov 8  }
 0xf62   : > { %8580 = dma.vmem_to_hbm [thread:$0]  (%p9856_p5), %s15544_s18, 4096, %s15542_s20, %s15553_s25, %s9751_s26, %s9751_s26, %s9752_s30  }
 0xf63 PF: > { %p8592_p0 = scmp.ge.s32.totalorder %s9743_s24, 2  ;;  %s7295_s29 = sand.u32 1, %s9731_s21  }
 0xf64   : > { %s7296_s0 = scalar_lea.sflag [#allocation4], %s7295_s29 }
 0xf65   : > { %p8587_p1 = pnand %p8592_p0, %p9860_p6 }
 0xf67   : > { %9726 = dma.done.wait (!%p8587_p1), %s7296_s0, 4096  }
 0xf68   : > { %9728 = vsyncadd (!%p8587_p1), %s7296_s0, 4294963200  ;;  %s16572_s28 = sld [smem:[#allocation9_spill]]  ;;  %p23_p2 = scmp.ge.s32.totalorder %s9843_s27, 4  }
 0xf69   : > { %s16573_s21 = smov %s9735_s22  ;;  %s16574_s22 = smov %s9739_s23 }
 0xf6a   : > { %s16576_s24 = smov %s9843_s27  ;;  %25 = sbr.rel (!%p23_p2) target bundleno = 6 (0x6), region = 109 }
 0xf6e   : > { %s16575_s23 = smov %s16572_s28 }
 0xf71   :  { %7301 = vsyncpa [#allocation4], 1 }
 0xf72   :  { %7303 = vsyncpa [#allocation4 + $0x1], 1 }
 0xf73   :  { %7304 = vsyncpa [#allocation5], 1 }
 0xf74   :  { %7306 = vsyncpa [#allocation5 + $0x1], 1 }

</bundles_post_ra>
